<compile_context>
chip_gen: v7x
topology: tpu7x:2x2x1
jax: 0.10.0
libtpu: 0.0.40
codegen_flags: <defaults>
</compile_context>

<pallas_src>
import functools
import math

import jax
import jax.numpy as jnp
from jax.experimental import pallas as pl
from jax.experimental.pallas import tpu as pltpu

# ----------------------------- configuration --------------------------------
IN_CHANNELS = 4
PATCH = 4
IMG = 16
EMB = 32
DEPTH = 2
N_CLASSES = 16
HEADS = 8                       # MultiHeadAttention default
HEAD_DIM = EMB // HEADS
N_PATCH = (IMG // PATCH) ** 2   # 16
N_TOK = N_PATCH + 1             # 17 (cls token)
N_PAD = 24                      # tokens padded per batch (sublane multiple of 8)
FFN = 4 * EMB                   # 128
K_DIM = IN_CHANNELS * PATCH * PATCH   # 64
N_CLS_PAD = 128                 # lane-dense logits width
EPS = 1e-5
NEG_INF = -1e30


# ------------------------------ math helpers --------------------------------
def _layernorm(x, g, b):
    mu = jnp.mean(x, axis=-1, keepdims=True)
    var = jnp.mean((x - mu) ** 2, axis=-1, keepdims=True)
    return (x - mu) * jax.lax.rsqrt(var + EPS) * g + b


def _erf_kernel(x):
    # Abramowitz & Stegun 7.1.26; divide moved to the EUP via pl.reciprocal.
    a1, a2, a3, a4, a5 = 0.254829592, -0.284496736, 1.421413741, -1.453152027, 1.061405429
    p = 0.3275911
    s = jnp.where(x >= 0.0, 1.0, -1.0)
    ax = jnp.abs(x)
    t = pl.reciprocal(1.0 + p * ax, approx=True)
    poly = ((((a5 * t + a4) * t + a3) * t + a2) * t + a1) * t
    return s * (1.0 - poly * jnp.exp(-ax * ax))


def _gelu_kernel(x):
    return 0.5 * x * (1.0 + _erf_kernel(x * (1.0 / math.sqrt(2.0))))


# ----------------------------- fused ViT kernel ------------------------------
def vit_fused_kernel(pe_ref, ws_ref, fs_ref, o_ref, *,
                     batch, depth, heads, emb, n_tok, n_pad, k_dim):
    f32 = jnp.float32
    bf16 = jnp.bfloat16
    d = emb // heads
    scaling = float(emb) ** 0.5
    T = batch * n_pad

    # Pad-token masks (hoisted; built once).
    col_ids = jax.lax.broadcasted_iota(jnp.int32, (n_pad, n_pad), 1)
    key_bias = jnp.where(col_ids < n_tok, 0.0, NEG_INF).astype(f32)     # (NP, NP)
    row_ids = jax.lax.broadcasted_iota(jnp.int32, (n_pad, 1), 0)
    row_mask = (row_ids < n_tok).astype(f32)                            # (NP, 1)

    # ---- patch embedding: Conv2d(stride=kernel) as one matmul.  Patch rows
    # are already placed into padded token slots by the wrapper; the
    # cls/pos/conv-bias base slab is just added. ----
    patches = pe_ref[0:T, :]                              # (T, K) bf16
    conv_w = pe_ref[T:T + k_dim, 0:emb]                   # (K, E) bf16
    x = jnp.dot(patches, conv_w, preferred_element_type=f32)            # (T, E)
    x = x + fs_ref[depth * 8:depth * 8 + T, 0:emb]        # + (cls|pos|conv_b)

    # ---- transformer encoder (depth statically unrolled) ----
    for l in range(depth):
        r = l * 8
        ln1_g = fs_ref[r + 0:r + 1, 0:emb]
        ln1_b = fs_ref[r + 1:r + 2, 0:emb]
        b_qkv = fs_ref[r + 2:r + 3, 0:3 * emb]
        b_o = fs_ref[r + 3:r + 4, 0:emb]
        ln2_g = fs_ref[r + 4:r + 5, 0:emb]
        ln2_b = fs_ref[r + 5:r + 6, 0:emb]
        b_1 = fs_ref[r + 6:r + 7, :]
        b_2 = fs_ref[r + 7:r + 8, 0:emb]

        w_l = ws_ref[l]                                   # (E, 512) bf16
        w_qkv = w_l[:, 0:3 * emb]                         # lane offsets 128-aligned
        w_1 = w_l[:, 128:256]
        w_2t = w_l[:, 256:384]                            # w2 stored transposed
        w_o = w_l[:, 384:384 + emb]

        # residual 1: LN -> MHA
        h = _layernorm(x, ln1_g, ln1_b)
        qkv = jnp.dot(h.astype(bf16), w_qkv, preferred_element_type=f32) + b_qkv
        qkv3 = qkv.reshape(batch, n_pad, 3 * emb)         # tile-aligned split

        qs, ks, vs = [], [], []
        for hd in range(heads):
            c = hd * d
            qs.append(qkv3[:, :, c:c + d])
            ks.append(qkv3[:, :, emb + c:emb + c + d])
            vs.append(qkv3[:, :, 2 * emb + c:2 * emb + c + d])
        qh = jnp.concatenate(qs, axis=0).astype(bf16)     # (B*H, NP, d), head-major
        kh = jnp.concatenate(ks, axis=0).astype(bf16)
        vh = jnp.concatenate(vs, axis=0).astype(bf16)

        energy = jnp.einsum("bnd,bmd->bnm", qh, kh,
                            preferred_element_type=f32)   # (B*H, NP, NP)
        energy = energy + key_bias[None, :, :]            # mask padded keys
        p = jnp.exp(energy - jnp.max(energy, axis=-1, keepdims=True))
        # softmax denom and the module's /sqrt(emb) quirk folded into one
        # approximate reciprocal (EUP).
        inv = pl.reciprocal(jnp.sum(p, axis=-1, keepdims=True) * scaling,
                            approx=True)
        att = (p * inv).astype(bf16)
        oh = jnp.einsum("bnm,bmd->bnd", att, vh,
                        preferred_element_type=f32)       # (B*H, NP, d)
        attn = jnp.concatenate(
            [oh[hd * batch:(hd + 1) * batch] for hd in range(heads)],
            axis=-1).reshape(T, emb)                      # one lane concat -> (T, E)
        x = x + jnp.dot(attn.astype(bf16), w_o, preferred_element_type=f32) + b_o

        # residual 2: LN -> FFN (exact GELU)
        h2 = _layernorm(x, ln2_g, ln2_b)
        ff = jnp.dot(h2.astype(bf16), w_1, preferred_element_type=f32) + b_1
        ff = _gelu_kernel(ff)
        ff = jax.lax.dot_general(ff.astype(bf16), w_2t, (((1,), (1,)), ((), ())),
                                 preferred_element_type=f32) + b_2
        x = x + ff

    # ---- classification head: masked token mean -> LN -> Linear ----
    x3 = x.reshape(batch, n_pad, emb)
    m = jnp.sum(x3 * row_mask, axis=1) * (1.0 / n_tok)    # exclude pad rows
    hw_r = depth * 8 + T
    h_w = fs_ref[hw_r:hw_r + emb, :].astype(bf16)         # (E, 128), zero-padded
    h_g = fs_ref[hw_r + emb:hw_r + emb + 1, 0:emb]
    h_b = fs_ref[hw_r + emb + 1:hw_r + emb + 2, 0:emb]
    h_bias = fs_ref[hw_r + emb + 2:hw_r + emb + 3, :]
    ln = _layernorm(m, h_g, h_b)
    o_ref[...] = (jnp.dot(ln.astype(bf16), h_w, preferred_element_type=f32)
                  + h_bias).astype(o_ref.dtype)


# --------------------------- wrapper / input packing -------------------------
def _full_spec(shape):
    n = len(shape)
    return pl.BlockSpec(shape, lambda: (0,) * n)


def extract_patches(x, ps):
    # NCHW -> (B, Np, C*ps*ps) with inner (c, i, j) order, matching the
    # Conv2d weight flattening (E, C, ps, ps) -> (E, C*ps*ps).
    B, C, H, W = x.shape
    Hp, Wp = H // ps, W // ps
    x = x.reshape(B, C, Hp, ps, Wp, ps)
    x = x.transpose(0, 2, 4, 1, 3, 5)
    return x.reshape(B, Hp * Wp, C * ps * ps)


def pack_inputs(x, params):
    """One-time layout plumbing in plain JAX: 3 packed slabs."""
    B = x.shape[0]
    T = B * N_PAD

    # --- bf16 patch/conv slab: patches placed into padded token slots ---
    patches = extract_patches(x, PATCH)                               # (B, Np, K)
    pat_rows = jnp.zeros((B, N_PAD, K_DIM), jnp.float32)
    pat_rows = pat_rows.at[:, 1:1 + N_PATCH, :].set(patches)          # row 0 = cls slot
    pat_rows = pat_rows.reshape(T, K_DIM)
    conv_w = params["conv_w"].reshape(EMB, K_DIM).T                   # (K, E)
    conv_rows = jnp.zeros((K_DIM, K_DIM), jnp.float32).at[:, :EMB].set(conv_w)
    pe_slab = jnp.concatenate([pat_rows, conv_rows], axis=0).astype(jnp.bfloat16)

    # --- bf16 per-layer weight slab, 128-aligned lane offsets ---
    blocks = []
    for lp in params["layers"]:
        blk = jnp.zeros((EMB, 512), jnp.float32)
        blk = blk.at[:, 0:3 * EMB].set(
            jnp.concatenate([lp["wq"], lp["wk"], lp["wv"]], axis=1))
        blk = blk.at[:, 128:256].set(lp["w1"])
        blk = blk.at[:, 256:384].set(lp["w2"].T)
        blk = blk.at[:, 384:384 + EMB].set(lp["wo"])
        blocks.append(blk)
    w_slab = jnp.stack(blocks, axis=0).astype(jnp.bfloat16)           # (DEPTH, E, 512)

    # --- f32 slab: per-layer biases/LN rows, token base, head params ---
    rows = []
    for lp in params["layers"]:
        blk = jnp.zeros((8, 128), jnp.float32)
        blk = blk.at[0, :EMB].set(lp["ln1_g"][0])
        blk = blk.at[1, :EMB].set(lp["ln1_b"][0])
        blk = blk.at[2, :3 * EMB].set(
            jnp.concatenate([lp["bq"], lp["bk"], lp["bv"]], axis=1)[0])
        blk = blk.at[3, :EMB].set(lp["bo"][0])
        blk = blk.at[4, :EMB].set(lp["ln2_g"][0])
        blk = blk.at[5, :EMB].set(lp["ln2_b"][0])
        blk = blk.at[6, :FFN].set(lp["b1"][0])
        blk = blk.at[7, :EMB].set(lp["b2"][0])
        rows.append(blk)
    bias_rows = jnp.concatenate(rows, axis=0)                         # (DEPTH*8, 128)

    # token base: row 0 = cls+pos[0]; rows 1..16 = pos[1:] + conv_b; 17..23 = 0
    base = jnp.zeros((N_PAD, EMB), jnp.float32)
    base = base.at[0].set(params["cls_token"][0, 0] + params["positions"][0])
    base = base.at[1:1 + N_PATCH].set(params["positions"][1:] + params["conv_b"][0])
    base_rows = jnp.zeros((T, 128), jnp.float32).at[:, :EMB].set(jnp.tile(base, (B, 1)))

    headw_rows = jnp.zeros((EMB, 128), jnp.float32).at[:, :N_CLASSES].set(params["head_w"])
    tail = jnp.zeros((3, 128), jnp.float32)
    tail = tail.at[0, :EMB].set(params["head_ln_g"][0])
    tail = tail.at[1, :EMB].set(params["head_ln_b"][0])
    tail = tail.at[2, :N_CLASSES].set(params["head_b"][0])

    f_slab = jnp.concatenate([bias_rows, base_rows, headw_rows, tail], axis=0)
    pad = (-f_slab.shape[0]) % 8
    if pad:
        f_slab = jnp.concatenate([f_slab, jnp.zeros((pad, 128), jnp.float32)], axis=0)
    return pe_slab, w_slab, f_slab


def vit_forward(x, params):
    B = x.shape[0]
    pe_slab, w_slab, f_slab = pack_inputs(x, params)

    kern = functools.partial(
        vit_fused_kernel, batch=B, depth=DEPTH, heads=HEADS, emb=EMB,
        n_tok=N_TOK, n_pad=N_PAD, k_dim=K_DIM)

    logits_pad = pl.pallas_call(
        kern,
        out_shape=jax.ShapeDtypeStruct((B, N_CLS_PAD), jnp.float32),
        in_specs=[_full_spec(pe_slab.shape), _full_spec(w_slab.shape),
                  _full_spec(f_slab.shape)],
        out_specs=_full_spec((B, N_CLS_PAD)),
        compiler_params=pltpu.CompilerParams(vmem_limit_bytes=32 * 1024 * 1024),
        # TODO(synk): at batch >= 8 add a grid over batch with
        # dimension_semantics=("parallel",) so v7x's second TensorCore shares
        # the work; at B=2 single-launch latency dominates.
    )(pe_slab, w_slab, f_slab)
    return logits_pad[:, :N_CLASSES]


# ------------------------------ reference (JAX, f32) -------------------------
def _ref_block(x, p):
    h = _layernorm(x, p["ln1_g"], p["ln1_b"])
    q = h @ p["wq"] + p["bq"]
    k = h @ p["wk"] + p["bk"]
    v = h @ p["wv"] + p["bv"]
    B, N, E = x.shape
    q = q.reshape(B, N, HEADS, HEAD_DIM).transpose(0, 2, 1, 3)
    k = k.reshape(B, N, HEADS, HEAD_DIM).transpose(0, 2, 1, 3)
    v = v.reshape(B, N, HEADS, HEAD_DIM).transpose(0, 2, 1, 3)
    energy = jnp.einsum("bhqd,bhkd->bhqk", q, k)
    att = jax.nn.softmax(energy, axis=-1) / (E ** 0.5)
    out = jnp.einsum("bhal,bhlv->bhav", att, v)
    out = out.transpose(0, 2, 1, 3).reshape(B, N, E)
    x1 = x + (out @ p["wo"] + p["bo"])
    h2 = _layernorm(x1, p["ln2_g"], p["ln2_b"])
    ff = jax.nn.gelu(h2 @ p["w1"] + p["b1"], approximate=False) @ p["w2"] + p["b2"]
    return x1 + ff


def vit_reference(x, params):
    B = x.shape[0]
    patches = extract_patches(x, PATCH)
    w2d = params["conv_w"].reshape(EMB, K_DIM).T
    emb = patches @ w2d + params["conv_b"]
    cls = jnp.broadcast_to(params["cls_token"], (B, 1, EMB))
    h = jnp.concatenate([cls, emb], axis=1) + params["positions"]
    for lp in params["layers"]:
        h = _ref_block(h, lp)
    m = h.mean(axis=1)
    ln = _layernorm(m, params["head_ln_g"], params["head_ln_b"])
    return ln @ params["head_w"] + params["head_b"]


# ------------------------------ parameter init --------------------------------
def init_params(key):
    def nxt():
        nonlocal key
        key, sub = jax.random.split(key)
        return sub

    def randn(shape, scale=1.0):
        return (scale * jax.random.normal(nxt(), shape)).astype(jnp.float32)

    params = {
        "conv_w": randn((EMB, IN_CHANNELS, PATCH, PATCH), 0.1),
        "conv_b": randn((1, EMB), 0.02),
        "cls_token": randn((1, 1, EMB), 1.0),
        "positions": randn((N_TOK, EMB), 1.0),
        "head_ln_g": jnp.ones((1, EMB), jnp.float32),
        "head_ln_b": jnp.zeros((1, EMB), jnp.float32),
        "head_w": randn((EMB, N_CLASSES), 0.05),
        "head_b": randn((1, N_CLASSES), 0.02),
        "layers": [],
    }
    for _ in range(DEPTH):
        params["layers"].append({
            "ln1_g": jnp.ones((1, EMB), jnp.float32),
            "ln1_b": jnp.zeros((1, EMB), jnp.float32),
            "wq": randn((EMB, EMB), 0.05), "bq": randn((1, EMB), 0.02),
            "wk": randn((EMB, EMB), 0.05), "bk": randn((1, EMB), 0.02),
            "wv": randn((EMB, EMB), 0.05), "bv": randn((1, EMB), 0.02),
            "wo": randn((EMB, EMB), 0.05), "bo": randn((1, EMB), 0.02),
            "ln2_g": jnp.ones((1, EMB), jnp.float32),
            "ln2_b": jnp.zeros((1, EMB), jnp.float32),
            "w1": randn((EMB, FFN), 0.05), "b1": randn((1, FFN), 0.02),
            "w2": randn((FFN, EMB), 0.05), "b2": randn((1, EMB), 0.02),
        })
    return params


# ---------------------------------- main --------------------------------------
if __name__ == "__main__":
    root = jax.random.PRNGKey(0)
    k_x, k_p = jax.random.split(root)
    x = jax.random.normal(k_x, (2, IN_CHANNELS, IMG, IMG), dtype=jnp.float32)
    params = init_params(k_p)

    out = vit_forward(x, params)
    out = jax.block_until_ready(out)

    ref = vit_reference(x, params)
    assert out.shape == (2, N_CLASSES)
    assert bool(jnp.all(jnp.isfinite(out)))
    # bf16 matmul operands (f32 accumulation) vs. an all-f32 reference.
    assert bool(jnp.allclose(out, ref, atol=1e-2, rtol=1e-2)), (
        f"mismatch: max abs err {float(jnp.max(jnp.abs(out - ref)))}"
    )
    print("KERNEL_OK")
</pallas_src>

<mosaic_0001>
module attributes {stable_mosaic.version = 11 : i64} {
  func.func @vit_fused_kernel(%arg0: memref<112x64xbf16, #tpu.memory_space<vmem>>, %arg1: memref<2x32x512xbf16, #tpu.memory_space<vmem>>, %arg2: memref<104x128xf32, #tpu.memory_space<vmem>>, %arg3: memref<2x128xf32, #tpu.memory_space<vmem>>) attributes {dimension_semantics = [], scalar_prefetch = 0 : i64, scratch_operands = 0 : i64, tpu.core_type = #tpu.core_type<tc>} {
    %0 = tpu.iota {dimensions = array<i32: 1>} : vector<24x24xi32>
    %c17_i32 = arith.constant 17 : i32
    %1 = vector.broadcast %c17_i32 : i32 to vector<24x24xi32>
    %2 = arith.cmpi slt, %0, %1 : vector<24x24xi32>
    %cst = arith.constant 0.000000e+00 : f32
    %cst_0 = arith.constant -1.000000e+30 : f32
    %3 = vector.broadcast %cst : f32 to vector<24x24xf32>
    %4 = vector.broadcast %cst_0 : f32 to vector<24x24xf32>
    %5 = arith.select %2, %3, %4 : vector<24x24xi1>, vector<24x24xf32>
    %6 = tpu.iota {dimensions = array<i32: 0>} : vector<24x1xi32>
    %c17_i32_1 = arith.constant 17 : i32
    %7 = vector.broadcast %c17_i32_1 : i32 to vector<24x1xi32>
    %8 = arith.cmpi slt, %6, %7 : vector<24x1xi32>
    %9 = arith.extui %8 : vector<24x1xi1> to vector<24x1xi32>
    %10 = arith.sitofp %9 : vector<24x1xi32> to vector<24x1xf32>
    %c0 = arith.constant 0 : index
    %c0_2 = arith.constant 0 : index
    %11 = vector.load %arg0[%c0, %c0_2] : memref<112x64xbf16, #tpu.memory_space<vmem>>, vector<48x64xbf16>
    %c48 = arith.constant 48 : index
    %c0_3 = arith.constant 0 : index
    %12 = vector.load %arg0[%c48, %c0_3] : memref<112x64xbf16, #tpu.memory_space<vmem>>, vector<64x32xbf16>
    %cst_4 = arith.constant dense<0.000000e+00> : vector<48x32xf32>
    %13 = tpu.matmul %11, %12, %cst_4 {dimension_numbers = #tpu.dot_dimension_numbers<[1], [0], [0], [1], [0, 0, 1, 1], [], []>} : vector<48x64xbf16>, vector<64x32xbf16>, vector<48x32xf32> -> vector<48x32xf32>
    %c16 = arith.constant 16 : index
    %c0_5 = arith.constant 0 : index
    %14 = vector.load %arg2[%c16, %c0_5] : memref<104x128xf32, #tpu.memory_space<vmem>>, vector<48x32xf32>
    %15 = arith.addf %13, %14 : vector<48x32xf32>
    %c0_6 = arith.constant 0 : index
    %c0_7 = arith.constant 0 : index
    %16 = vector.load %arg2[%c0_6, %c0_7] : memref<104x128xf32, #tpu.memory_space<vmem>>, vector<1x32xf32>
    %c1 = arith.constant 1 : index
    %c0_8 = arith.constant 0 : index
    %17 = vector.load %arg2[%c1, %c0_8] : memref<104x128xf32, #tpu.memory_space<vmem>>, vector<1x32xf32>
    %c2 = arith.constant 2 : index
    %c0_9 = arith.constant 0 : index
    %18 = vector.load %arg2[%c2, %c0_9] : memref<104x128xf32, #tpu.memory_space<vmem>>, vector<1x96xf32>
    %c3 = arith.constant 3 : index
    %c0_10 = arith.constant 0 : index
    %19 = vector.load %arg2[%c3, %c0_10] : memref<104x128xf32, #tpu.memory_space<vmem>>, vector<1x32xf32>
    %c4 = arith.constant 4 : index
    %c0_11 = arith.constant 0 : index
    %20 = vector.load %arg2[%c4, %c0_11] : memref<104x128xf32, #tpu.memory_space<vmem>>, vector<1x32xf32>
    %c5 = arith.constant 5 : index
    %c0_12 = arith.constant 0 : index
    %21 = vector.load %arg2[%c5, %c0_12] : memref<104x128xf32, #tpu.memory_space<vmem>>, vector<1x32xf32>
    %c6 = arith.constant 6 : index
    %c0_13 = arith.constant 0 : index
    %22 = vector.load %arg2[%c6, %c0_13] : memref<104x128xf32, #tpu.memory_space<vmem>>, vector<1x128xf32>
    %c7 = arith.constant 7 : index
    %c0_14 = arith.constant 0 : index
    %23 = vector.load %arg2[%c7, %c0_14] : memref<104x128xf32, #tpu.memory_space<vmem>>, vector<1x32xf32>
    %c0_15 = arith.constant 0 : index
    %c0_16 = arith.constant 0 : index
    %c0_17 = arith.constant 0 : index
    %24 = vector.load %arg1[%c0_15, %c0_16, %c0_17] : memref<2x32x512xbf16, #tpu.memory_space<vmem>>, vector<1x32x512xbf16>
    %25 = vector.shape_cast %24 : vector<1x32x512xbf16> to vector<32x512xbf16>
    %26 = vector.extract_strided_slice %25 {offsets = [0, 0], sizes = [32, 96], strides = [1, 1]} : vector<32x512xbf16> to vector<32x96xbf16>
    %27 = vector.extract_strided_slice %25 {offsets = [0, 128], sizes = [32, 128], strides = [1, 1]} : vector<32x512xbf16> to vector<32x128xbf16>
    %28 = vector.extract_strided_slice %25 {offsets = [0, 256], sizes = [32, 128], strides = [1, 1]} : vector<32x512xbf16> to vector<32x128xbf16>
    %29 = vector.extract_strided_slice %25 {offsets = [0, 384], sizes = [32, 32], strides = [1, 1]} : vector<32x512xbf16> to vector<32x32xbf16>
    %cst_18 = arith.constant dense<0.000000e+00> : vector<48xf32>
    %30 = vector.multi_reduction <add>, %15, %cst_18 [1] : vector<48x32xf32> to vector<48xf32>
    %31 = vector.shape_cast %30 : vector<48xf32> to vector<48x1xf32>
    %cst_19 = arith.constant 3.200000e+01 : f32
    %32 = vector.broadcast %cst_19 : f32 to vector<48x1xf32>
    %33 = arith.divf %31, %32 : vector<48x1xf32>
    %34 = vector.broadcast %33 : vector<48x1xf32> to vector<48x32xf32>
    %35 = arith.subf %15, %34 : vector<48x32xf32>
    %36 = arith.mulf %35, %35 : vector<48x32xf32>
    %cst_20 = arith.constant dense<0.000000e+00> : vector<48xf32>
    %37 = vector.multi_reduction <add>, %36, %cst_20 [1] : vector<48x32xf32> to vector<48xf32>
    %38 = vector.shape_cast %37 : vector<48xf32> to vector<48x1xf32>
    %cst_21 = arith.constant 3.200000e+01 : f32
    %39 = vector.broadcast %cst_21 : f32 to vector<48x1xf32>
    %40 = arith.divf %38, %39 : vector<48x1xf32>
    %41 = vector.broadcast %33 : vector<48x1xf32> to vector<48x32xf32>
    %42 = arith.subf %15, %41 : vector<48x32xf32>
    %cst_22 = arith.constant 9.99999974E-6 : f32
    %43 = vector.broadcast %cst_22 : f32 to vector<48x1xf32>
    %44 = arith.addf %40, %43 : vector<48x1xf32>
    %45 = math.rsqrt %44 : vector<48x1xf32>
    %46 = vector.broadcast %45 : vector<48x1xf32> to vector<48x32xf32>
    %47 = arith.mulf %42, %46 : vector<48x32xf32>
    %48 = vector.broadcast %16 : vector<1x32xf32> to vector<48x32xf32>
    %49 = arith.mulf %47, %48 : vector<48x32xf32>
    %50 = vector.broadcast %17 : vector<1x32xf32> to vector<48x32xf32>
    %51 = arith.addf %49, %50 : vector<48x32xf32>
    %52 = arith.truncf %51 : vector<48x32xf32> to vector<48x32xbf16>
    %cst_23 = arith.constant dense<0.000000e+00> : vector<48x96xf32>
    %53 = tpu.matmul %52, %26, %cst_23 {dimension_numbers = #tpu.dot_dimension_numbers<[1], [0], [0], [1], [0, 0, 1, 1], [], []>} : vector<48x32xbf16>, vector<32x96xbf16>, vector<48x96xf32> -> vector<48x96xf32>
    %54 = vector.broadcast %18 : vector<1x96xf32> to vector<48x96xf32>
    %55 = arith.addf %53, %54 : vector<48x96xf32>
    %56 = vector.shape_cast %55 : vector<48x96xf32> to vector<2x24x96xf32>
    %57 = vector.extract_strided_slice %56 {offsets = [0, 0, 0], sizes = [2, 24, 4], strides = [1, 1, 1]} : vector<2x24x96xf32> to vector<2x24x4xf32>
    %58 = vector.extract_strided_slice %56 {offsets = [0, 0, 32], sizes = [2, 24, 4], strides = [1, 1, 1]} : vector<2x24x96xf32> to vector<2x24x4xf32>
    %59 = vector.extract_strided_slice %56 {offsets = [0, 0, 64], sizes = [2, 24, 4], strides = [1, 1, 1]} : vector<2x24x96xf32> to vector<2x24x4xf32>
    %60 = vector.extract_strided_slice %56 {offsets = [0, 0, 4], sizes = [2, 24, 4], strides = [1, 1, 1]} : vector<2x24x96xf32> to vector<2x24x4xf32>
    %61 = vector.extract_strided_slice %56 {offsets = [0, 0, 36], sizes = [2, 24, 4], strides = [1, 1, 1]} : vector<2x24x96xf32> to vector<2x24x4xf32>
    %62 = vector.extract_strided_slice %56 {offsets = [0, 0, 68], sizes = [2, 24, 4], strides = [1, 1, 1]} : vector<2x24x96xf32> to vector<2x24x4xf32>
    %63 = vector.extract_strided_slice %56 {offsets = [0, 0, 8], sizes = [2, 24, 4], strides = [1, 1, 1]} : vector<2x24x96xf32> to vector<2x24x4xf32>
    %64 = vector.extract_strided_slice %56 {offsets = [0, 0, 40], sizes = [2, 24, 4], strides = [1, 1, 1]} : vector<2x24x96xf32> to vector<2x24x4xf32>
    %65 = vector.extract_strided_slice %56 {offsets = [0, 0, 72], sizes = [2, 24, 4], strides = [1, 1, 1]} : vector<2x24x96xf32> to vector<2x24x4xf32>
    %66 = vector.extract_strided_slice %56 {offsets = [0, 0, 12], sizes = [2, 24, 4], strides = [1, 1, 1]} : vector<2x24x96xf32> to vector<2x24x4xf32>
    %67 = vector.extract_strided_slice %56 {offsets = [0, 0, 44], sizes = [2, 24, 4], strides = [1, 1, 1]} : vector<2x24x96xf32> to vector<2x24x4xf32>
    %68 = vector.extract_strided_slice %56 {offsets = [0, 0, 76], sizes = [2, 24, 4], strides = [1, 1, 1]} : vector<2x24x96xf32> to vector<2x24x4xf32>
    %69 = vector.extract_strided_slice %56 {offsets = [0, 0, 16], sizes = [2, 24, 4], strides = [1, 1, 1]} : vector<2x24x96xf32> to vector<2x24x4xf32>
    %70 = vector.extract_strided_slice %56 {offsets = [0, 0, 48], sizes = [2, 24, 4], strides = [1, 1, 1]} : vector<2x24x96xf32> to vector<2x24x4xf32>
    %71 = vector.extract_strided_slice %56 {offsets = [0, 0, 80], sizes = [2, 24, 4], strides = [1, 1, 1]} : vector<2x24x96xf32> to vector<2x24x4xf32>
    %72 = vector.extract_strided_slice %56 {offsets = [0, 0, 20], sizes = [2, 24, 4], strides = [1, 1, 1]} : vector<2x24x96xf32> to vector<2x24x4xf32>
    %73 = vector.extract_strided_slice %56 {offsets = [0, 0, 52], sizes = [2, 24, 4], strides = [1, 1, 1]} : vector<2x24x96xf32> to vector<2x24x4xf32>
    %74 = vector.extract_strided_slice %56 {offsets = [0, 0, 84], sizes = [2, 24, 4], strides = [1, 1, 1]} : vector<2x24x96xf32> to vector<2x24x4xf32>
    %75 = vector.extract_strided_slice %56 {offsets = [0, 0, 24], sizes = [2, 24, 4], strides = [1, 1, 1]} : vector<2x24x96xf32> to vector<2x24x4xf32>
    %76 = vector.extract_strided_slice %56 {offsets = [0, 0, 56], sizes = [2, 24, 4], strides = [1, 1, 1]} : vector<2x24x96xf32> to vector<2x24x4xf32>
    %77 = vector.extract_strided_slice %56 {offsets = [0, 0, 88], sizes = [2, 24, 4], strides = [1, 1, 1]} : vector<2x24x96xf32> to vector<2x24x4xf32>
    %78 = vector.extract_strided_slice %56 {offsets = [0, 0, 28], sizes = [2, 24, 4], strides = [1, 1, 1]} : vector<2x24x96xf32> to vector<2x24x4xf32>
    %79 = vector.extract_strided_slice %56 {offsets = [0, 0, 60], sizes = [2, 24, 4], strides = [1, 1, 1]} : vector<2x24x96xf32> to vector<2x24x4xf32>
    %80 = vector.extract_strided_slice %56 {offsets = [0, 0, 92], sizes = [2, 24, 4], strides = [1, 1, 1]} : vector<2x24x96xf32> to vector<2x24x4xf32>
    %81 = tpu.concatenate %57, %60, %63, %66, %69, %72, %75, %78 in 0 : vector<2x24x4xf32>, vector<2x24x4xf32>, vector<2x24x4xf32>, vector<2x24x4xf32>, vector<2x24x4xf32>, vector<2x24x4xf32>, vector<2x24x4xf32>, vector<2x24x4xf32> -> vector<16x24x4xf32>
    %82 = arith.truncf %81 : vector<16x24x4xf32> to vector<16x24x4xbf16>
    %83 = tpu.concatenate %58, %61, %64, %67, %70, %73, %76, %79 in 0 : vector<2x24x4xf32>, vector<2x24x4xf32>, vector<2x24x4xf32>, vector<2x24x4xf32>, vector<2x24x4xf32>, vector<2x24x4xf32>, vector<2x24x4xf32>, vector<2x24x4xf32> -> vector<16x24x4xf32>
    %84 = arith.truncf %83 : vector<16x24x4xf32> to vector<16x24x4xbf16>
    %85 = tpu.concatenate %59, %62, %65, %68, %71, %74, %77, %80 in 0 : vector<2x24x4xf32>, vector<2x24x4xf32>, vector<2x24x4xf32>, vector<2x24x4xf32>, vector<2x24x4xf32>, vector<2x24x4xf32>, vector<2x24x4xf32>, vector<2x24x4xf32> -> vector<16x24x4xf32>
    %86 = arith.truncf %85 : vector<16x24x4xf32> to vector<16x24x4xbf16>
    "tpu.trace_start"() <{level = 10 : i32, message = "bnd,bmd->bnm"}> : () -> ()
    %cst_24 = arith.constant dense<0.000000e+00> : vector<16x24x24xf32>
    %87 = tpu.matmul %82, %84, %cst_24 {dimension_numbers = #tpu.dot_dimension_numbers<[2], [2], [1], [1], [0, 0, 0, 1, 1, 1], [0], [0]>} : vector<16x24x4xbf16>, vector<16x24x4xbf16>, vector<16x24x24xf32> -> vector<16x24x24xf32>
    "tpu.trace_stop"() : () -> ()
    %88 = vector.shape_cast %5 : vector<24x24xf32> to vector<1x24x24xf32>
    %89 = vector.broadcast %88 : vector<1x24x24xf32> to vector<16x24x24xf32>
    %90 = arith.addf %87, %89 : vector<16x24x24xf32>
    %cst_25 = arith.constant dense<0xFF800000> : vector<16x24xf32>
    %91 = vector.multi_reduction <maximumf>, %90, %cst_25 [2] : vector<16x24x24xf32> to vector<16x24xf32>
    %92 = vector.shape_cast %91 : vector<16x24xf32> to vector<16x24x1xf32>
    %93 = vector.broadcast %92 : vector<16x24x1xf32> to vector<16x24x24xf32>
    %94 = arith.subf %90, %93 : vector<16x24x24xf32>
    %95 = math.exp %94 : vector<16x24x24xf32>
    %cst_26 = arith.constant dense<0.000000e+00> : vector<16x24xf32>
    %96 = vector.multi_reduction <add>, %95, %cst_26 [2] : vector<16x24x24xf32> to vector<16x24xf32>
    %97 = vector.shape_cast %96 : vector<16x24xf32> to vector<16x24x1xf32>
    %cst_27 = arith.constant 5.65685415 : f32
    %98 = vector.broadcast %cst_27 : f32 to vector<16x24x1xf32>
    %99 = arith.mulf %97, %98 : vector<16x24x1xf32>
    %100 = tpu.reciprocal %99 {approx = true} : vector<16x24x1xf32> -> vector<16x24x1xf32>
    %101 = vector.broadcast %100 : vector<16x24x1xf32> to vector<16x24x24xf32>
    %102 = arith.mulf %95, %101 : vector<16x24x24xf32>
    %103 = arith.truncf %102 : vector<16x24x24xf32> to vector<16x24x24xbf16>
    "tpu.trace_start"() <{level = 10 : i32, message = "bnm,bmd->bnd"}> : () -> ()
    %cst_28 = arith.constant dense<0.000000e+00> : vector<16x24x4xf32>
    %104 = tpu.matmul %103, %86, %cst_28 {dimension_numbers = #tpu.dot_dimension_numbers<[2], [1], [1], [2], [0, 0, 0, 1, 1, 2], [0], [0]>} : vector<16x24x24xbf16>, vector<16x24x4xbf16>, vector<16x24x4xf32> -> vector<16x24x4xf32>
    "tpu.trace_stop"() : () -> ()
    %105 = vector.extract_strided_slice %104 {offsets = [0, 0, 0], sizes = [2, 24, 4], strides = [1, 1, 1]} : vector<16x24x4xf32> to vector<2x24x4xf32>
    %106 = vector.extract_strided_slice %104 {offsets = [2, 0, 0], sizes = [2, 24, 4], strides = [1, 1, 1]} : vector<16x24x4xf32> to vector<2x24x4xf32>
    %107 = vector.extract_strided_slice %104 {offsets = [4, 0, 0], sizes = [2, 24, 4], strides = [1, 1, 1]} : vector<16x24x4xf32> to vector<2x24x4xf32>
    %108 = vector.extract_strided_slice %104 {offsets = [6, 0, 0], sizes = [2, 24, 4], strides = [1, 1, 1]} : vector<16x24x4xf32> to vector<2x24x4xf32>
    %109 = vector.extract_strided_slice %104 {offsets = [8, 0, 0], sizes = [2, 24, 4], strides = [1, 1, 1]} : vector<16x24x4xf32> to vector<2x24x4xf32>
    %110 = vector.extract_strided_slice %104 {offsets = [10, 0, 0], sizes = [2, 24, 4], strides = [1, 1, 1]} : vector<16x24x4xf32> to vector<2x24x4xf32>
    %111 = vector.extract_strided_slice %104 {offsets = [12, 0, 0], sizes = [2, 24, 4], strides = [1, 1, 1]} : vector<16x24x4xf32> to vector<2x24x4xf32>
    %112 = vector.extract_strided_slice %104 {offsets = [14, 0, 0], sizes = [2, 24, 4], strides = [1, 1, 1]} : vector<16x24x4xf32> to vector<2x24x4xf32>
    %113 = tpu.concatenate %105, %106, %107, %108, %109, %110, %111, %112 in 2 : vector<2x24x4xf32>, vector<2x24x4xf32>, vector<2x24x4xf32>, vector<2x24x4xf32>, vector<2x24x4xf32>, vector<2x24x4xf32>, vector<2x24x4xf32>, vector<2x24x4xf32> -> vector<2x24x32xf32>
    %114 = vector.shape_cast %113 : vector<2x24x32xf32> to vector<48x32xf32>
    %115 = arith.truncf %114 : vector<48x32xf32> to vector<48x32xbf16>
    %cst_29 = arith.constant dense<0.000000e+00> : vector<48x32xf32>
    %116 = tpu.matmul %115, %29, %cst_29 {dimension_numbers = #tpu.dot_dimension_numbers<[1], [0], [0], [1], [0, 0, 1, 1], [], []>} : vector<48x32xbf16>, vector<32x32xbf16>, vector<48x32xf32> -> vector<48x32xf32>
    %117 = arith.addf %15, %116 : vector<48x32xf32>
    %118 = vector.broadcast %19 : vector<1x32xf32> to vector<48x32xf32>
    %119 = arith.addf %117, %118 : vector<48x32xf32>
    %cst_30 = arith.constant dense<0.000000e+00> : vector<48xf32>
    %120 = vector.multi_reduction <add>, %119, %cst_30 [1] : vector<48x32xf32> to vector<48xf32>
    %121 = vector.shape_cast %120 : vector<48xf32> to vector<48x1xf32>
    %cst_31 = arith.constant 3.200000e+01 : f32
    %122 = vector.broadcast %cst_31 : f32 to vector<48x1xf32>
    %123 = arith.divf %121, %122 : vector<48x1xf32>
    %124 = vector.broadcast %123 : vector<48x1xf32> to vector<48x32xf32>
    %125 = arith.subf %119, %124 : vector<48x32xf32>
    %126 = arith.mulf %125, %125 : vector<48x32xf32>
    %cst_32 = arith.constant dense<0.000000e+00> : vector<48xf32>
    %127 = vector.multi_reduction <add>, %126, %cst_32 [1] : vector<48x32xf32> to vector<48xf32>
    %128 = vector.shape_cast %127 : vector<48xf32> to vector<48x1xf32>
    %cst_33 = arith.constant 3.200000e+01 : f32
    %129 = vector.broadcast %cst_33 : f32 to vector<48x1xf32>
    %130 = arith.divf %128, %129 : vector<48x1xf32>
    %131 = vector.broadcast %123 : vector<48x1xf32> to vector<48x32xf32>
    %132 = arith.subf %119, %131 : vector<48x32xf32>
    %cst_34 = arith.constant 9.99999974E-6 : f32
    %133 = vector.broadcast %cst_34 : f32 to vector<48x1xf32>
    %134 = arith.addf %130, %133 : vector<48x1xf32>
    %135 = math.rsqrt %134 : vector<48x1xf32>
    %136 = vector.broadcast %135 : vector<48x1xf32> to vector<48x32xf32>
    %137 = arith.mulf %132, %136 : vector<48x32xf32>
    %138 = vector.broadcast %20 : vector<1x32xf32> to vector<48x32xf32>
    %139 = arith.mulf %137, %138 : vector<48x32xf32>
    %140 = vector.broadcast %21 : vector<1x32xf32> to vector<48x32xf32>
    %141 = arith.addf %139, %140 : vector<48x32xf32>
    %142 = arith.truncf %141 : vector<48x32xf32> to vector<48x32xbf16>
    %cst_35 = arith.constant dense<0.000000e+00> : vector<48x128xf32>
    %143 = tpu.matmul %142, %27, %cst_35 {dimension_numbers = #tpu.dot_dimension_numbers<[1], [0], [0], [1], [0, 0, 1, 1], [], []>} : vector<48x32xbf16>, vector<32x128xbf16>, vector<48x128xf32> -> vector<48x128xf32>
    %144 = vector.broadcast %22 : vector<1x128xf32> to vector<48x128xf32>
    %145 = arith.addf %143, %144 : vector<48x128xf32>
    %cst_36 = arith.constant 5.000000e-01 : f32
    %146 = vector.broadcast %cst_36 : f32 to vector<48x128xf32>
    %147 = arith.mulf %146, %145 : vector<48x128xf32>
    %cst_37 = arith.constant 0.707106769 : f32
    %148 = vector.broadcast %cst_37 : f32 to vector<48x128xf32>
    %149 = arith.mulf %145, %148 : vector<48x128xf32>
    %cst_38 = arith.constant 0.000000e+00 : f32
    %150 = vector.broadcast %cst_38 : f32 to vector<48x128xf32>
    %151 = arith.cmpf oge, %149, %150 : vector<48x128xf32>
    %cst_39 = arith.constant 1.000000e+00 : f32
    %cst_40 = arith.constant -1.000000e+00 : f32
    %152 = vector.broadcast %cst_39 : f32 to vector<48x128xf32>
    %153 = vector.broadcast %cst_40 : f32 to vector<48x128xf32>
    %154 = arith.select %151, %152, %153 : vector<48x128xi1>, vector<48x128xf32>
    %155 = math.absf %149 : vector<48x128xf32>
    %cst_41 = arith.constant 0.327591091 : f32
    %156 = vector.broadcast %cst_41 : f32 to vector<48x128xf32>
    %157 = arith.mulf %156, %155 : vector<48x128xf32>
    %cst_42 = arith.constant 1.000000e+00 : f32
    %158 = vector.broadcast %cst_42 : f32 to vector<48x128xf32>
    %159 = arith.addf %158, %157 : vector<48x128xf32>
    %160 = tpu.reciprocal %159 {approx = true} : vector<48x128xf32> -> vector<48x128xf32>
    %cst_43 = arith.constant 1.06140542 : f32
    %161 = vector.broadcast %cst_43 : f32 to vector<48x128xf32>
    %162 = arith.mulf %161, %160 : vector<48x128xf32>
    %cst_44 = arith.constant -1.45315206 : f32
    %163 = vector.broadcast %cst_44 : f32 to vector<48x128xf32>
    %164 = arith.addf %162, %163 : vector<48x128xf32>
    %165 = arith.mulf %164, %160 : vector<48x128xf32>
    %cst_45 = arith.constant 1.42141378 : f32
    %166 = vector.broadcast %cst_45 : f32 to vector<48x128xf32>
    %167 = arith.addf %165, %166 : vector<48x128xf32>
    %168 = arith.mulf %167, %160 : vector<48x128xf32>
    %cst_46 = arith.constant -0.284496725 : f32
    %169 = vector.broadcast %cst_46 : f32 to vector<48x128xf32>
    %170 = arith.addf %168, %169 : vector<48x128xf32>
    %171 = arith.mulf %170, %160 : vector<48x128xf32>
    %cst_47 = arith.constant 0.254829586 : f32
    %172 = vector.broadcast %cst_47 : f32 to vector<48x128xf32>
    %173 = arith.addf %171, %172 : vector<48x128xf32>
    %174 = arith.mulf %173, %160 : vector<48x128xf32>
    %cst_48 = arith.constant 0.000000e+00 : f32
    %175 = vector.broadcast %cst_48 : f32 to vector<48x128xf32>
    %176 = arith.subf %175, %155 : vector<48x128xf32>
    %177 = arith.mulf %176, %155 : vector<48x128xf32>
    %178 = math.exp %177 : vector<48x128xf32>
    %179 = arith.mulf %174, %178 : vector<48x128xf32>
    %cst_49 = arith.constant 1.000000e+00 : f32
    %180 = vector.broadcast %cst_49 : f32 to vector<48x128xf32>
    %181 = arith.subf %180, %179 : vector<48x128xf32>
    %182 = arith.mulf %154, %181 : vector<48x128xf32>
    %cst_50 = arith.constant 1.000000e+00 : f32
    %183 = vector.broadcast %cst_50 : f32 to vector<48x128xf32>
    %184 = arith.addf %183, %182 : vector<48x128xf32>
    %185 = arith.mulf %147, %184 : vector<48x128xf32>
    %186 = arith.truncf %185 : vector<48x128xf32> to vector<48x128xbf16>
    %cst_51 = arith.constant dense<0.000000e+00> : vector<48x32xf32>
    %187 = tpu.matmul %186, %28, %cst_51 {dimension_numbers = #tpu.dot_dimension_numbers<[1], [1], [0], [0], [0, 0, 1, 0], [], []>} : vector<48x128xbf16>, vector<32x128xbf16>, vector<48x32xf32> -> vector<48x32xf32>
    %188 = vector.broadcast %23 : vector<1x32xf32> to vector<48x32xf32>
    %189 = arith.addf %187, %188 : vector<48x32xf32>
    %190 = arith.addf %119, %189 : vector<48x32xf32>
    %c8 = arith.constant 8 : index
    %c0_52 = arith.constant 0 : index
    %191 = vector.load %arg2[%c8, %c0_52] : memref<104x128xf32, #tpu.memory_space<vmem>>, vector<1x32xf32>
    %c9 = arith.constant 9 : index
    %c0_53 = arith.constant 0 : index
    %192 = vector.load %arg2[%c9, %c0_53] : memref<104x128xf32, #tpu.memory_space<vmem>>, vector<1x32xf32>
    %c10 = arith.constant 10 : index
    %c0_54 = arith.constant 0 : index
    %193 = vector.load %arg2[%c10, %c0_54] : memref<104x128xf32, #tpu.memory_space<vmem>>, vector<1x96xf32>
    %c11 = arith.constant 11 : index
    %c0_55 = arith.constant 0 : index
    %194 = vector.load %arg2[%c11, %c0_55] : memref<104x128xf32, #tpu.memory_space<vmem>>, vector<1x32xf32>
    %c12 = arith.constant 12 : index
    %c0_56 = arith.constant 0 : index
    %195 = vector.load %arg2[%c12, %c0_56] : memref<104x128xf32, #tpu.memory_space<vmem>>, vector<1x32xf32>
    %c13 = arith.constant 13 : index
    %c0_57 = arith.constant 0 : index
    %196 = vector.load %arg2[%c13, %c0_57] : memref<104x128xf32, #tpu.memory_space<vmem>>, vector<1x32xf32>
    %c14 = arith.constant 14 : index
    %c0_58 = arith.constant 0 : index
    %197 = vector.load %arg2[%c14, %c0_58] : memref<104x128xf32, #tpu.memory_space<vmem>>, vector<1x128xf32>
    %c15 = arith.constant 15 : index
    %c0_59 = arith.constant 0 : index
    %198 = vector.load %arg2[%c15, %c0_59] : memref<104x128xf32, #tpu.memory_space<vmem>>, vector<1x32xf32>
    %c1_60 = arith.constant 1 : index
    %c0_61 = arith.constant 0 : index
    %c0_62 = arith.constant 0 : index
    %199 = vector.load %arg1[%c1_60, %c0_61, %c0_62] : memref<2x32x512xbf16, #tpu.memory_space<vmem>>, vector<1x32x512xbf16>
    %200 = vector.shape_cast %199 : vector<1x32x512xbf16> to vector<32x512xbf16>
    %201 = vector.extract_strided_slice %200 {offsets = [0, 0], sizes = [32, 96], strides = [1, 1]} : vector<32x512xbf16> to vector<32x96xbf16>
    %202 = vector.extract_strided_slice %200 {offsets = [0, 128], sizes = [32, 128], strides = [1, 1]} : vector<32x512xbf16> to vector<32x128xbf16>
    %203 = vector.extract_strided_slice %200 {offsets = [0, 256], sizes = [32, 128], strides = [1, 1]} : vector<32x512xbf16> to vector<32x128xbf16>
    %204 = vector.extract_strided_slice %200 {offsets = [0, 384], sizes = [32, 32], strides = [1, 1]} : vector<32x512xbf16> to vector<32x32xbf16>
    %cst_63 = arith.constant dense<0.000000e+00> : vector<48xf32>
    %205 = vector.multi_reduction <add>, %190, %cst_63 [1] : vector<48x32xf32> to vector<48xf32>
    %206 = vector.shape_cast %205 : vector<48xf32> to vector<48x1xf32>
    %cst_64 = arith.constant 3.200000e+01 : f32
    %207 = vector.broadcast %cst_64 : f32 to vector<48x1xf32>
    %208 = arith.divf %206, %207 : vector<48x1xf32>
    %209 = vector.broadcast %208 : vector<48x1xf32> to vector<48x32xf32>
    %210 = arith.subf %190, %209 : vector<48x32xf32>
    %211 = arith.mulf %210, %210 : vector<48x32xf32>
    %cst_65 = arith.constant dense<0.000000e+00> : vector<48xf32>
    %212 = vector.multi_reduction <add>, %211, %cst_65 [1] : vector<48x32xf32> to vector<48xf32>
    %213 = vector.shape_cast %212 : vector<48xf32> to vector<48x1xf32>
    %cst_66 = arith.constant 3.200000e+01 : f32
    %214 = vector.broadcast %cst_66 : f32 to vector<48x1xf32>
    %215 = arith.divf %213, %214 : vector<48x1xf32>
    %216 = vector.broadcast %208 : vector<48x1xf32> to vector<48x32xf32>
    %217 = arith.subf %190, %216 : vector<48x32xf32>
    %cst_67 = arith.constant 9.99999974E-6 : f32
    %218 = vector.broadcast %cst_67 : f32 to vector<48x1xf32>
    %219 = arith.addf %215, %218 : vector<48x1xf32>
    %220 = math.rsqrt %219 : vector<48x1xf32>
    %221 = vector.broadcast %220 : vector<48x1xf32> to vector<48x32xf32>
    %222 = arith.mulf %217, %221 : vector<48x32xf32>
    %223 = vector.broadcast %191 : vector<1x32xf32> to vector<48x32xf32>
    %224 = arith.mulf %222, %223 : vector<48x32xf32>
    %225 = vector.broadcast %192 : vector<1x32xf32> to vector<48x32xf32>
    %226 = arith.addf %224, %225 : vector<48x32xf32>
    %227 = arith.truncf %226 : vector<48x32xf32> to vector<48x32xbf16>
    %cst_68 = arith.constant dense<0.000000e+00> : vector<48x96xf32>
    %228 = tpu.matmul %227, %201, %cst_68 {dimension_numbers = #tpu.dot_dimension_numbers<[1], [0], [0], [1], [0, 0, 1, 1], [], []>} : vector<48x32xbf16>, vector<32x96xbf16>, vector<48x96xf32> -> vector<48x96xf32>
    %229 = vector.broadcast %193 : vector<1x96xf32> to vector<48x96xf32>
    %230 = arith.addf %228, %229 : vector<48x96xf32>
    %231 = vector.shape_cast %230 : vector<48x96xf32> to vector<2x24x96xf32>
    %232 = vector.extract_strided_slice %231 {offsets = [0, 0, 0], sizes = [2, 24, 4], strides = [1, 1, 1]} : vector<2x24x96xf32> to vector<2x24x4xf32>
    %233 = vector.extract_strided_slice %231 {offsets = [0, 0, 32], sizes = [2, 24, 4], strides = [1, 1, 1]} : vector<2x24x96xf32> to vector<2x24x4xf32>
    %234 = vector.extract_strided_slice %231 {offsets = [0, 0, 64], sizes = [2, 24, 4], strides = [1, 1, 1]} : vector<2x24x96xf32> to vector<2x24x4xf32>
    %235 = vector.extract_strided_slice %231 {offsets = [0, 0, 4], sizes = [2, 24, 4], strides = [1, 1, 1]} : vector<2x24x96xf32> to vector<2x24x4xf32>
    %236 = vector.extract_strided_slice %231 {offsets = [0, 0, 36], sizes = [2, 24, 4], strides = [1, 1, 1]} : vector<2x24x96xf32> to vector<2x24x4xf32>
    %237 = vector.extract_strided_slice %231 {offsets = [0, 0, 68], sizes = [2, 24, 4], strides = [1, 1, 1]} : vector<2x24x96xf32> to vector<2x24x4xf32>
    %238 = vector.extract_strided_slice %231 {offsets = [0, 0, 8], sizes = [2, 24, 4], strides = [1, 1, 1]} : vector<2x24x96xf32> to vector<2x24x4xf32>
    %239 = vector.extract_strided_slice %231 {offsets = [0, 0, 40], sizes = [2, 24, 4], strides = [1, 1, 1]} : vector<2x24x96xf32> to vector<2x24x4xf32>
    %240 = vector.extract_strided_slice %231 {offsets = [0, 0, 72], sizes = [2, 24, 4], strides = [1, 1, 1]} : vector<2x24x96xf32> to vector<2x24x4xf32>
    %241 = vector.extract_strided_slice %231 {offsets = [0, 0, 12], sizes = [2, 24, 4], strides = [1, 1, 1]} : vector<2x24x96xf32> to vector<2x24x4xf32>
    %242 = vector.extract_strided_slice %231 {offsets = [0, 0, 44], sizes = [2, 24, 4], strides = [1, 1, 1]} : vector<2x24x96xf32> to vector<2x24x4xf32>
    %243 = vector.extract_strided_slice %231 {offsets = [0, 0, 76], sizes = [2, 24, 4], strides = [1, 1, 1]} : vector<2x24x96xf32> to vector<2x24x4xf32>
    %244 = vector.extract_strided_slice %231 {offsets = [0, 0, 16], sizes = [2, 24, 4], strides = [1, 1, 1]} : vector<2x24x96xf32> to vector<2x24x4xf32>
    %245 = vector.extract_strided_slice %231 {offsets = [0, 0, 48], sizes = [2, 24, 4], strides = [1, 1, 1]} : vector<2x24x96xf32> to vector<2x24x4xf32>
    %246 = vector.extract_strided_slice %231 {offsets = [0, 0, 80], sizes = [2, 24, 4], strides = [1, 1, 1]} : vector<2x24x96xf32> to vector<2x24x4xf32>
    %247 = vector.extract_strided_slice %231 {offsets = [0, 0, 20], sizes = [2, 24, 4], strides = [1, 1, 1]} : vector<2x24x96xf32> to vector<2x24x4xf32>
    %248 = vector.extract_strided_slice %231 {offsets = [0, 0, 52], sizes = [2, 24, 4], strides = [1, 1, 1]} : vector<2x24x96xf32> to vector<2x24x4xf32>
    %249 = vector.extract_strided_slice %231 {offsets = [0, 0, 84], sizes = [2, 24, 4], strides = [1, 1, 1]} : vector<2x24x96xf32> to vector<2x24x4xf32>
    %250 = vector.extract_strided_slice %231 {offsets = [0, 0, 24], sizes = [2, 24, 4], strides = [1, 1, 1]} : vector<2x24x96xf32> to vector<2x24x4xf32>
    %251 = vector.extract_strided_slice %231 {offsets = [0, 0, 56], sizes = [2, 24, 4], strides = [1, 1, 1]} : vector<2x24x96xf32> to vector<2x24x4xf32>
    %252 = vector.extract_strided_slice %231 {offsets = [0, 0, 88], sizes = [2, 24, 4], strides = [1, 1, 1]} : vector<2x24x96xf32> to vector<2x24x4xf32>
    %253 = vector.extract_strided_slice %231 {offsets = [0, 0, 28], sizes = [2, 24, 4], strides = [1, 1, 1]} : vector<2x24x96xf32> to vector<2x24x4xf32>
    %254 = vector.extract_strided_slice %231 {offsets = [0, 0, 60], sizes = [2, 24, 4], strides = [1, 1, 1]} : vector<2x24x96xf32> to vector<2x24x4xf32>
    %255 = vector.extract_strided_slice %231 {offsets = [0, 0, 92], sizes = [2, 24, 4], strides = [1, 1, 1]} : vector<2x24x96xf32> to vector<2x24x4xf32>
    %256 = tpu.concatenate %232, %235, %238, %241, %244, %247, %250, %253 in 0 : vector<2x24x4xf32>, vector<2x24x4xf32>, vector<2x24x4xf32>, vector<2x24x4xf32>, vector<2x24x4xf32>, vector<2x24x4xf32>, vector<2x24x4xf32>, vector<2x24x4xf32> -> vector<16x24x4xf32>
    %257 = arith.truncf %256 : vector<16x24x4xf32> to vector<16x24x4xbf16>
    %258 = tpu.concatenate %233, %236, %239, %242, %245, %248, %251, %254 in 0 : vector<2x24x4xf32>, vector<2x24x4xf32>, vector<2x24x4xf32>, vector<2x24x4xf32>, vector<2x24x4xf32>, vector<2x24x4xf32>, vector<2x24x4xf32>, vector<2x24x4xf32> -> vector<16x24x4xf32>
    %259 = arith.truncf %258 : vector<16x24x4xf32> to vector<16x24x4xbf16>
    %260 = tpu.concatenate %234, %237, %240, %243, %246, %249, %252, %255 in 0 : vector<2x24x4xf32>, vector<2x24x4xf32>, vector<2x24x4xf32>, vector<2x24x4xf32>, vector<2x24x4xf32>, vector<2x24x4xf32>, vector<2x24x4xf32>, vector<2x24x4xf32> -> vector<16x24x4xf32>
    %261 = arith.truncf %260 : vector<16x24x4xf32> to vector<16x24x4xbf16>
    "tpu.trace_start"() <{level = 10 : i32, message = "bnd,bmd->bnm"}> : () -> ()
    %cst_69 = arith.constant dense<0.000000e+00> : vector<16x24x24xf32>
    %262 = tpu.matmul %257, %259, %cst_69 {dimension_numbers = #tpu.dot_dimension_numbers<[2], [2], [1], [1], [0, 0, 0, 1, 1, 1], [0], [0]>} : vector<16x24x4xbf16>, vector<16x24x4xbf16>, vector<16x24x24xf32> -> vector<16x24x24xf32>
    "tpu.trace_stop"() : () -> ()
    %263 = vector.shape_cast %5 : vector<24x24xf32> to vector<1x24x24xf32>
    %264 = vector.broadcast %263 : vector<1x24x24xf32> to vector<16x24x24xf32>
    %265 = arith.addf %262, %264 : vector<16x24x24xf32>
    %cst_70 = arith.constant dense<0xFF800000> : vector<16x24xf32>
    %266 = vector.multi_reduction <maximumf>, %265, %cst_70 [2] : vector<16x24x24xf32> to vector<16x24xf32>
    %267 = vector.shape_cast %266 : vector<16x24xf32> to vector<16x24x1xf32>
    %268 = vector.broadcast %267 : vector<16x24x1xf32> to vector<16x24x24xf32>
    %269 = arith.subf %265, %268 : vector<16x24x24xf32>
    %270 = math.exp %269 : vector<16x24x24xf32>
    %cst_71 = arith.constant dense<0.000000e+00> : vector<16x24xf32>
    %271 = vector.multi_reduction <add>, %270, %cst_71 [2] : vector<16x24x24xf32> to vector<16x24xf32>
    %272 = vector.shape_cast %271 : vector<16x24xf32> to vector<16x24x1xf32>
    %cst_72 = arith.constant 5.65685415 : f32
    %273 = vector.broadcast %cst_72 : f32 to vector<16x24x1xf32>
    %274 = arith.mulf %272, %273 : vector<16x24x1xf32>
    %275 = tpu.reciprocal %274 {approx = true} : vector<16x24x1xf32> -> vector<16x24x1xf32>
    %276 = vector.broadcast %275 : vector<16x24x1xf32> to vector<16x24x24xf32>
    %277 = arith.mulf %270, %276 : vector<16x24x24xf32>
    %278 = arith.truncf %277 : vector<16x24x24xf32> to vector<16x24x24xbf16>
    "tpu.trace_start"() <{level = 10 : i32, message = "bnm,bmd->bnd"}> : () -> ()
    %cst_73 = arith.constant dense<0.000000e+00> : vector<16x24x4xf32>
    %279 = tpu.matmul %278, %261, %cst_73 {dimension_numbers = #tpu.dot_dimension_numbers<[2], [1], [1], [2], [0, 0, 0, 1, 1, 2], [0], [0]>} : vector<16x24x24xbf16>, vector<16x24x4xbf16>, vector<16x24x4xf32> -> vector<16x24x4xf32>
    "tpu.trace_stop"() : () -> ()
    %280 = vector.extract_strided_slice %279 {offsets = [0, 0, 0], sizes = [2, 24, 4], strides = [1, 1, 1]} : vector<16x24x4xf32> to vector<2x24x4xf32>
    %281 = vector.extract_strided_slice %279 {offsets = [2, 0, 0], sizes = [2, 24, 4], strides = [1, 1, 1]} : vector<16x24x4xf32> to vector<2x24x4xf32>
    %282 = vector.extract_strided_slice %279 {offsets = [4, 0, 0], sizes = [2, 24, 4], strides = [1, 1, 1]} : vector<16x24x4xf32> to vector<2x24x4xf32>
    %283 = vector.extract_strided_slice %279 {offsets = [6, 0, 0], sizes = [2, 24, 4], strides = [1, 1, 1]} : vector<16x24x4xf32> to vector<2x24x4xf32>
    %284 = vector.extract_strided_slice %279 {offsets = [8, 0, 0], sizes = [2, 24, 4], strides = [1, 1, 1]} : vector<16x24x4xf32> to vector<2x24x4xf32>
    %285 = vector.extract_strided_slice %279 {offsets = [10, 0, 0], sizes = [2, 24, 4], strides = [1, 1, 1]} : vector<16x24x4xf32> to vector<2x24x4xf32>
    %286 = vector.extract_strided_slice %279 {offsets = [12, 0, 0], sizes = [2, 24, 4], strides = [1, 1, 1]} : vector<16x24x4xf32> to vector<2x24x4xf32>
    %287 = vector.extract_strided_slice %279 {offsets = [14, 0, 0], sizes = [2, 24, 4], strides = [1, 1, 1]} : vector<16x24x4xf32> to vector<2x24x4xf32>
    %288 = tpu.concatenate %280, %281, %282, %283, %284, %285, %286, %287 in 2 : vector<2x24x4xf32>, vector<2x24x4xf32>, vector<2x24x4xf32>, vector<2x24x4xf32>, vector<2x24x4xf32>, vector<2x24x4xf32>, vector<2x24x4xf32>, vector<2x24x4xf32> -> vector<2x24x32xf32>
    %289 = vector.shape_cast %288 : vector<2x24x32xf32> to vector<48x32xf32>
    %290 = arith.truncf %289 : vector<48x32xf32> to vector<48x32xbf16>
    %cst_74 = arith.constant dense<0.000000e+00> : vector<48x32xf32>
    %291 = tpu.matmul %290, %204, %cst_74 {dimension_numbers = #tpu.dot_dimension_numbers<[1], [0], [0], [1], [0, 0, 1, 1], [], []>} : vector<48x32xbf16>, vector<32x32xbf16>, vector<48x32xf32> -> vector<48x32xf32>
    %292 = arith.addf %190, %291 : vector<48x32xf32>
    %293 = vector.broadcast %194 : vector<1x32xf32> to vector<48x32xf32>
    %294 = arith.addf %292, %293 : vector<48x32xf32>
    %cst_75 = arith.constant dense<0.000000e+00> : vector<48xf32>
    %295 = vector.multi_reduction <add>, %294, %cst_75 [1] : vector<48x32xf32> to vector<48xf32>
    %296 = vector.shape_cast %295 : vector<48xf32> to vector<48x1xf32>
    %cst_76 = arith.constant 3.200000e+01 : f32
    %297 = vector.broadcast %cst_76 : f32 to vector<48x1xf32>
    %298 = arith.divf %296, %297 : vector<48x1xf32>
    %299 = vector.broadcast %298 : vector<48x1xf32> to vector<48x32xf32>
    %300 = arith.subf %294, %299 : vector<48x32xf32>
    %301 = arith.mulf %300, %300 : vector<48x32xf32>
    %cst_77 = arith.constant dense<0.000000e+00> : vector<48xf32>
    %302 = vector.multi_reduction <add>, %301, %cst_77 [1] : vector<48x32xf32> to vector<48xf32>
    %303 = vector.shape_cast %302 : vector<48xf32> to vector<48x1xf32>
    %cst_78 = arith.constant 3.200000e+01 : f32
    %304 = vector.broadcast %cst_78 : f32 to vector<48x1xf32>
    %305 = arith.divf %303, %304 : vector<48x1xf32>
    %306 = vector.broadcast %298 : vector<48x1xf32> to vector<48x32xf32>
    %307 = arith.subf %294, %306 : vector<48x32xf32>
    %cst_79 = arith.constant 9.99999974E-6 : f32
    %308 = vector.broadcast %cst_79 : f32 to vector<48x1xf32>
    %309 = arith.addf %305, %308 : vector<48x1xf32>
    %310 = math.rsqrt %309 : vector<48x1xf32>
    %311 = vector.broadcast %310 : vector<48x1xf32> to vector<48x32xf32>
    %312 = arith.mulf %307, %311 : vector<48x32xf32>
    %313 = vector.broadcast %195 : vector<1x32xf32> to vector<48x32xf32>
    %314 = arith.mulf %312, %313 : vector<48x32xf32>
    %315 = vector.broadcast %196 : vector<1x32xf32> to vector<48x32xf32>
    %316 = arith.addf %314, %315 : vector<48x32xf32>
    %317 = arith.truncf %316 : vector<48x32xf32> to vector<48x32xbf16>
    %cst_80 = arith.constant dense<0.000000e+00> : vector<48x128xf32>
    %318 = tpu.matmul %317, %202, %cst_80 {dimension_numbers = #tpu.dot_dimension_numbers<[1], [0], [0], [1], [0, 0, 1, 1], [], []>} : vector<48x32xbf16>, vector<32x128xbf16>, vector<48x128xf32> -> vector<48x128xf32>
    %319 = vector.broadcast %197 : vector<1x128xf32> to vector<48x128xf32>
    %320 = arith.addf %318, %319 : vector<48x128xf32>
    %cst_81 = arith.constant 5.000000e-01 : f32
    %321 = vector.broadcast %cst_81 : f32 to vector<48x128xf32>
    %322 = arith.mulf %321, %320 : vector<48x128xf32>
    %cst_82 = arith.constant 0.707106769 : f32
    %323 = vector.broadcast %cst_82 : f32 to vector<48x128xf32>
    %324 = arith.mulf %320, %323 : vector<48x128xf32>
    %cst_83 = arith.constant 0.000000e+00 : f32
    %325 = vector.broadcast %cst_83 : f32 to vector<48x128xf32>
    %326 = arith.cmpf oge, %324, %325 : vector<48x128xf32>
    %cst_84 = arith.constant 1.000000e+00 : f32
    %cst_85 = arith.constant -1.000000e+00 : f32
    %327 = vector.broadcast %cst_84 : f32 to vector<48x128xf32>
    %328 = vector.broadcast %cst_85 : f32 to vector<48x128xf32>
    %329 = arith.select %326, %327, %328 : vector<48x128xi1>, vector<48x128xf32>
    %330 = math.absf %324 : vector<48x128xf32>
    %cst_86 = arith.constant 0.327591091 : f32
    %331 = vector.broadcast %cst_86 : f32 to vector<48x128xf32>
    %332 = arith.mulf %331, %330 : vector<48x128xf32>
    %cst_87 = arith.constant 1.000000e+00 : f32
    %333 = vector.broadcast %cst_87 : f32 to vector<48x128xf32>
    %334 = arith.addf %333, %332 : vector<48x128xf32>
    %335 = tpu.reciprocal %334 {approx = true} : vector<48x128xf32> -> vector<48x128xf32>
    %cst_88 = arith.constant 1.06140542 : f32
    %336 = vector.broadcast %cst_88 : f32 to vector<48x128xf32>
    %337 = arith.mulf %336, %335 : vector<48x128xf32>
    %cst_89 = arith.constant -1.45315206 : f32
    %338 = vector.broadcast %cst_89 : f32 to vector<48x128xf32>
    %339 = arith.addf %337, %338 : vector<48x128xf32>
    %340 = arith.mulf %339, %335 : vector<48x128xf32>
    %cst_90 = arith.constant 1.42141378 : f32
    %341 = vector.broadcast %cst_90 : f32 to vector<48x128xf32>
    %342 = arith.addf %340, %341 : vector<48x128xf32>
    %343 = arith.mulf %342, %335 : vector<48x128xf32>
    %cst_91 = arith.constant -0.284496725 : f32
    %344 = vector.broadcast %cst_91 : f32 to vector<48x128xf32>
    %345 = arith.addf %343, %344 : vector<48x128xf32>
    %346 = arith.mulf %345, %335 : vector<48x128xf32>
    %cst_92 = arith.constant 0.254829586 : f32
    %347 = vector.broadcast %cst_92 : f32 to vector<48x128xf32>
    %348 = arith.addf %346, %347 : vector<48x128xf32>
    %349 = arith.mulf %348, %335 : vector<48x128xf32>
    %cst_93 = arith.constant 0.000000e+00 : f32
    %350 = vector.broadcast %cst_93 : f32 to vector<48x128xf32>
    %351 = arith.subf %350, %330 : vector<48x128xf32>
    %352 = arith.mulf %351, %330 : vector<48x128xf32>
    %353 = math.exp %352 : vector<48x128xf32>
    %354 = arith.mulf %349, %353 : vector<48x128xf32>
    %cst_94 = arith.constant 1.000000e+00 : f32
    %355 = vector.broadcast %cst_94 : f32 to vector<48x128xf32>
    %356 = arith.subf %355, %354 : vector<48x128xf32>
    %357 = arith.mulf %329, %356 : vector<48x128xf32>
    %cst_95 = arith.constant 1.000000e+00 : f32
    %358 = vector.broadcast %cst_95 : f32 to vector<48x128xf32>
    %359 = arith.addf %358, %357 : vector<48x128xf32>
    %360 = arith.mulf %322, %359 : vector<48x128xf32>
    %361 = arith.truncf %360 : vector<48x128xf32> to vector<48x128xbf16>
    %cst_96 = arith.constant dense<0.000000e+00> : vector<48x32xf32>
    %362 = tpu.matmul %361, %203, %cst_96 {dimension_numbers = #tpu.dot_dimension_numbers<[1], [1], [0], [0], [0, 0, 1, 0], [], []>} : vector<48x128xbf16>, vector<32x128xbf16>, vector<48x32xf32> -> vector<48x32xf32>
    %363 = vector.broadcast %198 : vector<1x32xf32> to vector<48x32xf32>
    %364 = arith.addf %362, %363 : vector<48x32xf32>
    %365 = arith.addf %294, %364 : vector<48x32xf32>
    %366 = vector.shape_cast %365 : vector<48x32xf32> to vector<2x24x32xf32>
    %367 = vector.shape_cast %10 : vector<24x1xf32> to vector<1x24x1xf32>
    %368 = vector.broadcast %367 : vector<1x24x1xf32> to vector<2x24x32xf32>
    %369 = arith.mulf %366, %368 : vector<2x24x32xf32>
    %cst_97 = arith.constant dense<0.000000e+00> : vector<2x32xf32>
    %370 = vector.multi_reduction <add>, %369, %cst_97 [1] : vector<2x24x32xf32> to vector<2x32xf32>
    %cst_98 = arith.constant 0.0588235296 : f32
    %371 = vector.broadcast %cst_98 : f32 to vector<2x32xf32>
    %372 = arith.mulf %370, %371 : vector<2x32xf32>
    %c64 = arith.constant 64 : index
    %c0_99 = arith.constant 0 : index
    %373 = vector.load %arg2[%c64, %c0_99] : memref<104x128xf32, #tpu.memory_space<vmem>>, vector<32x128xf32>
    %374 = arith.truncf %373 : vector<32x128xf32> to vector<32x128xbf16>
    %c96 = arith.constant 96 : index
    %c0_100 = arith.constant 0 : index
    %375 = vector.load %arg2[%c96, %c0_100] : memref<104x128xf32, #tpu.memory_space<vmem>>, vector<1x32xf32>
    %c97 = arith.constant 97 : index
    %c0_101 = arith.constant 0 : index
    %376 = vector.load %arg2[%c97, %c0_101] : memref<104x128xf32, #tpu.memory_space<vmem>>, vector<1x32xf32>
    %c98 = arith.constant 98 : index
    %c0_102 = arith.constant 0 : index
    %377 = vector.load %arg2[%c98, %c0_102] : memref<104x128xf32, #tpu.memory_space<vmem>>, vector<1x128xf32>
    %cst_103 = arith.constant dense<0.000000e+00> : vector<2xf32>
    %378 = vector.multi_reduction <add>, %372, %cst_103 [1] : vector<2x32xf32> to vector<2xf32>
    %379 = vector.shape_cast %378 : vector<2xf32> to vector<2x1xf32>
    %cst_104 = arith.constant 3.200000e+01 : f32
    %380 = vector.broadcast %cst_104 : f32 to vector<2x1xf32>
    %381 = arith.divf %379, %380 : vector<2x1xf32>
    %382 = vector.broadcast %381 : vector<2x1xf32> to vector<2x32xf32>
    %383 = arith.subf %372, %382 : vector<2x32xf32>
    %384 = arith.mulf %383, %383 : vector<2x32xf32>
    %cst_105 = arith.constant dense<0.000000e+00> : vector<2xf32>
    %385 = vector.multi_reduction <add>, %384, %cst_105 [1] : vector<2x32xf32> to vector<2xf32>
    %386 = vector.shape_cast %385 : vector<2xf32> to vector<2x1xf32>
    %cst_106 = arith.constant 3.200000e+01 : f32
    %387 = vector.broadcast %cst_106 : f32 to vector<2x1xf32>
    %388 = arith.divf %386, %387 : vector<2x1xf32>
    %389 = vector.broadcast %381 : vector<2x1xf32> to vector<2x32xf32>
    %390 = arith.subf %372, %389 : vector<2x32xf32>
    %cst_107 = arith.constant 9.99999974E-6 : f32
    %391 = vector.broadcast %cst_107 : f32 to vector<2x1xf32>
    %392 = arith.addf %388, %391 : vector<2x1xf32>
    %393 = math.rsqrt %392 : vector<2x1xf32>
    %394 = vector.broadcast %393 : vector<2x1xf32> to vector<2x32xf32>
    %395 = arith.mulf %390, %394 : vector<2x32xf32>
    %396 = vector.broadcast %375 : vector<1x32xf32> to vector<2x32xf32>
    %397 = arith.mulf %395, %396 : vector<2x32xf32>
    %398 = vector.broadcast %376 : vector<1x32xf32> to vector<2x32xf32>
    %399 = arith.addf %397, %398 : vector<2x32xf32>
    %400 = arith.truncf %399 : vector<2x32xf32> to vector<2x32xbf16>
    %cst_108 = arith.constant dense<0.000000e+00> : vector<2x128xf32>
    %401 = tpu.matmul %400, %374, %cst_108 {dimension_numbers = #tpu.dot_dimension_numbers<[1], [0], [0], [1], [0, 0, 1, 1], [], []>} : vector<2x32xbf16>, vector<32x128xbf16>, vector<2x128xf32> -> vector<2x128xf32>
    %402 = vector.broadcast %377 : vector<1x128xf32> to vector<2x128xf32>
    %403 = arith.addf %401, %402 : vector<2x128xf32>
    %c0_109 = arith.constant 0 : index
    %c0_110 = arith.constant 0 : index
    %404 = vector.load %arg3[%c0_109, %c0_110] : memref<2x128xf32, #tpu.memory_space<vmem>>, vector<2x128xf32>
    tpu.vector_store %arg3[%c0_109, %c0_110], %403 {strides = array<i32>} : memref<2x128xf32, #tpu.memory_space<vmem>>, vector<2x128xf32>,
    return
  }
}

</mosaic_0001>

<bundles_post_ra>
// kernel: tpu_custom_call.1
= control target key start
LH: loop header
LB: loop body
LE: loop exit
PB: predicated region body
PF: predicated region fallthrough
CT: control target
= control target key end

     0   :  { %8 = vsyncpa [#allocation3], 0  ;;  %s12989_s0 = inlined_call_operand.vmem [shape: bf16[112,64], index: 0, kind: input, shape index: {}]   ;;  %s12990_s1 = inlined_call_operand.hbm [shape: bf16[2,32,512], index: 1, kind: input, shape index: {}]   ;;  %s12991_s2 = inlined_call_operand.hbm [shape: f32[104,128], index: 2, kind: input, shape index: {}]   ;;  %s12992_s3 = inlined_call_operand.hbm [shape: f32[2,128], index: 3, kind: output, shape index: {}]  }
   0x1   :  { %9 = vsyncpa [#allocation6], 0 }
   0x2   :  { %10 = vsyncpa [#allocation4], 0  ;;  %s10128_s12 = smov [#allocation2]   ;;  %s10056_s16 = scalar_lea.hbm %s12990_s1, 2048 }
   0x3   :  { %s18_s13 = sshll.u32 %s10128_s12, 4  ;;  %p10057_p0 = scmp.ne.s32.totalorder %s12990_s1, %s10056_s16  ;;  %s19_s13 = int_to_ptr.vmem [resolvable:$true] %s18_s13 }
   0x4   :  { %p10060_p1 = scmp.lt.u32.totalorder %s10056_s16, %s12990_s1 }
   0x6   :  { %p10062_p2 = pnand %p10060_p1, %p10057_p0 }
   0x8   :  { %10065 = shalt.err (!%p10062_p2)
}
   0x9   :  { %s10066_s21 = scalar_lea.vmem %s19_s13, 2048  ;;  %p10071_p4 = scmp.lt.s32.totalorder %s19_s13, %s19_s13 }
   0xa   :  { %p10067_p3 = scmp.ne.s32.totalorder %s19_s13, %s10066_s21  ;;  %p10072_p5 = scmp.lt.s32.totalorder %s10066_s21, %s10066_s21 }
   0xc   :  { %p10073_p6 = por %p10072_p5, %p10071_p4 }
   0xe   :  { %p10074_p7 = pnand %p10073_p6, %p10067_p3 }
  0x10   :  { %10077 = shalt.err (!%p10074_p7)
}
  0x11   :  { %s10129_s22 = smov 256   ;;  %s10130_s23 = smov 16  }
  0x12   :  { %24 = dma.hbm_to_vmem [thread:$0]  %s12990_s1, 2048, %s19_s13, [#allocation3], %s10129_s22, %s10129_s22, %s10130_s23  }
  0x13   :  { %s10131_s26 = smov [#allocation5]   ;;  %s10078_s30 = scalar_lea.hbm %s12991_s2, 1664 }
  0x14   :  { %s30_s27 = sshll.u32 %s10131_s26, 4  ;;  %p10079_p8 = scmp.ne.s32.totalorder %s12991_s2, %s10078_s30  ;;  %s31_s27 = int_to_ptr.vmem [resolvable:$true] %s30_s27 }
  0x15   :  { %p10082_p9 = scmp.lt.u32.totalorder %s10078_s30, %s12991_s2 }
  0x17   :  { %p10084_p10 = pnand %p10082_p9, %p10079_p8 }
  0x19   :  { %10087 = shalt.err (!%p10084_p10)
}
  0x1a   :  { %s10088_s8 = scalar_lea.vmem %s31_s27, 1664  ;;  %p10093_p12 = scmp.lt.s32.totalorder %s31_s27, %s31_s27 }
  0x1b   :  { %p10089_p11 = scmp.ne.s32.totalorder %s31_s27, %s10088_s8  ;;  %p10094_p13 = scmp.lt.s32.totalorder %s10088_s8, %s10088_s8 }
  0x1d   :  { %p10095_p0 = por %p10094_p13, %p10093_p12 }
  0x1f   :  { %p10096_p1 = pnand %p10095_p0, %p10089_p11 }
  0x21   :  { %10099 = shalt.err (!%p10096_p1)
}
  0x22   :  { %s10132_s1 = smov 128   ;;  %s10133_s9 = smov 8  }
  0x23   :  { %36 = dma.hbm_to_vmem [thread:$0]  %s12991_s2, 1664, %s31_s27, [#allocation6], %s10132_s1, %s10132_s1, %s10133_s9  }
  0x24   :  { %10122 = dma.done.wait [#allocation3], 2048  }
  0x25   :  { %10123 = vsyncadd [#allocation3], 4294965248 }
  0x26   :  { %10124 = dma.done.wait [#allocation6], 1664  }
  0x27   :  { %10125 = vsyncadd [#allocation6], 4294965632  ;;  %v12994_v0 = vmov 0.0   ;;  %vm10135_vm0 = vmmov 0   ;;  %v9543_v1 = vld [vmem:[%s12989_s0 + $0x18] sm:$0xff]   ;;  %v9544_v2 = vld [vmem:[%s12989_s0 + $0x20] sm:$0xff]  }
  0x28   :  { %8334 = vmatprep.subr.bf16.mxu0 %v12994_v0  ;;  %8342 = vmatprep.mubr.msk.bf16.mxu0 %vm10135_vm0, %v12994_v0  ;;  %v9545_v3 = vld [vmem:[%s12989_s0 + $0x28] sm:$0xff]   ;;  %v9546_v4 = vld [vmem:[%s12989_s0 + $0x30] sm:$0xff]   ;;  %v9547_v5 = vld [vmem:[%s12989_s0] sm:$0xff]   ;;  %vm120_vm1 = vcmask 523264   ;;  %vm203_vm2 = vcmask 261120   ;;  %vm558_vm3 = vcmask 31744  }
  0x29   :  { %8354 = vmatprep.subr.bf16.mxu1 %v12994_v0  ;;  %8358 = vmatprep.mubr.msk.bf16.mxu1 %vm10135_vm0, %v12994_v0  ;;  %v9548_v6 = vld [vmem:[%s12989_s0 + $0x8] sm:$0xff]   ;;  %v9549_v7 = vld [vmem:[%s12989_s0 + $0x10] sm:$0xff]   ;;  %v77_v17 = vld [vmem:[#allocation5 + $0x20] sm:$0xff]  ;;  %s10136_s0 = smov 124   ;;  %s10137_s26 = smov 120   ;;  %vm1609_vm5 = vcmask 195584  }
  0x2a   :  { %8335 = vmatpush3.bf16.msra.mxu0 %v9543_v1  ;;  %v75_v8 = vld [vmem:[#allocation5 + $0x10] sm:$0xff]  ;;  %v76_v10 = vld [vmem:[#allocation5 + $0x18] sm:$0xff]  ;;  %v78_v20 = vld [vmem:[#allocation5 + $0x28] sm:$0xff]  ;;  %s10138_s27 = smov 116   ;;  %s10139_s28 = smov 112   ;;  %vm2229_vm6 = vcmask 1043456  }
  0x2b   :  { %8336 = vmatprep.subr.bf16.mxu0 %v12994_v0  ;;  %v79_v27 = vld [vmem:[#allocation5 + $0x30] sm:$0xff]  ;;  %v80_v30 = vld [vmem:[#allocation5 + $0x38] sm:$0xff]  ;;  %s10140_s29 = smov 96   ;;  %s10141_s30 = smov 108   ;;  %vm3385_vm7 = vcmask 64512   ;;  %vm3392_vm8 = vcmask 97280  }
  0x2c   :  { %s10142_s4 = smov 104   ;;  %s10143_s5 = smov 100   ;;  %vm3399_vm9 = vcmask 130048   ;;  %vm3406_vm10 = vcmask 162816   ;;  %vm3419_vm11 = vcmask 228352  }
  0x2d   :  { %s10144_s6 = smov 64   ;;  %s10146_s7 = smov 4  }
  0x2e   :  { %8337 = vmatpush3.bf16.msra.mxu0 %v9544_v2  ;;  %s10147_s8 = smov 12   ;;  %s10148_s1 = smov 20  }
  0x2f   :  { %8338 = vmatprep.subr.bf16.mxu0 %v12994_v0  ;;  %s10149_s10 = smov 24   ;;  %s10150_s11 = smov 28  }
  0x32   :  { %8339 = vmatpush3.bf16.msra.mxu0 %v9545_v3 }
  0x33   :  { %8340 = vmatprep.subr.bf16.mxu0 %v12994_v0 }
  0x36   :  { %8341 = vmatpush3.bf16.msra.mxu0 %v9546_v4 }
  0x39   :  { %8343 = vmatmul.mubr.msk.bf16.vlgmr.msra.gmra.mrb[0].mxu0 %vm120_vm1, %v9547_v5  ;;  %v9550_v5 = vld [vmem:[#allocation2] ss:$16 sps:$4 sm:$0xff]  }
  0x3a   :  { %8346 = vmatprep.mubr.msk.bf16.mxu0 %vm10135_vm0, %v12994_v0  ;;  %8355 = vmatpush3.bf16.msra.mxu1 %v9550_v5 }
  0x3b   :  { %8356 = vmatprep.subr.bf16.mxu1 %v12994_v0 }
  0x41   :  { %8347 = vmatmul.mubr.msk.bf16.gmra.mrb[4].mxu0 %vm120_vm1, %v9548_v6  ;;  %v9553_v6 = vld [vmem:[#allocation2 + $0x20] ss:$16 sps:$4 sm:$0xff]  }
  0x42   :  { %8350 = vmatprep.mubr.msk.bf16.mxu0 %vm10135_vm0, %v12994_v0  ;;  %8357 = vmatpush3.bf16.msra.mxu1 %v9553_v6 }
  0x49   :  { %8351 = vmatmul.mubr.msk.bf16.gmra.mrb[8].mxu0 %vm120_vm1, %v9549_v7 }
 0x10c   :  { %v164_v9 = vpop.f32.mrb[0].mxu0 }
 0x10d   :  { %v10233_v11 = vadd.f32 %v164_v9, %v75_v8  ;;  %v8344_v12 = vpop.f32.mrb[1].mxu0 }
 0x10e   :  { %v167_v13 = vpop.f32.mrb[2].mxu0 }
 0x10f   :  { %13069 = vst [vmem:[#allocation11_spill] sm:$0xff] %v10233_v11  ;;  %v10235_v14 = vadd.f32 %v167_v13, %v76_v10  ;;  %v8345_v15 = vpop.f32.mrb[3].mxu0  ;;  %v204_v16 = vsel %vm203_vm2, %v10233_v11, 0.0 }
 0x110   :  { %205 = vadd.xlane.f32.xlu0 %v204_v16 }
 0x111   :  { %13070 = vst [vmem:[#allocation12_spill] sm:$0xff] %v10235_v14  ;;  %v207_v18 = vsel %vm203_vm2, %v10235_v14, 0.0 }
 0x114   :  { %208 = vadd.xlane.f32.xlu0 %v207_v18  ;;  %v172_v19 = vpop.f32.mrb[4].mxu0 }
 0x115   :  { %v10241_v21 = vadd.f32 %v172_v19, %v77_v17  ;;  %v8348_v22 = vpop.f32.mrb[5].mxu0 }
 0x116   :  { %v175_v23 = vpop.f32.mrb[6].mxu0 }
 0x117   :  { %13071 = vst [vmem:[#allocation13_spill] sm:$0xff] %v10241_v21  ;;  %v10243_v24 = vadd.f32 %v175_v23, %v78_v20  ;;  %v8349_v25 = vpop.f32.mrb[7].mxu0  ;;  %v210_v26 = vsel %vm203_vm2, %v10241_v21, 0.0 }
 0x118   :  { %211 = vadd.xlane.f32.xlu1 %v210_v26 }
 0x119   :  { %13072 = vst [vmem:[#allocation14_spill] sm:$0xff] %v10243_v24  ;;  %v213_v28 = vsel %vm203_vm2, %v10243_v24, 0.0 }
 0x11c   :  { %214 = vadd.xlane.f32.xlu1 %v213_v28  ;;  %v180_v29 = vpop.f32.mrb[8].mxu0 }
 0x11d   :  { %v10249_v31 = vadd.f32 %v180_v29, %v79_v27  ;;  %v8352_v32 = vpop.f32.mrb[9].mxu0  ;;  %v7846_v27 = vld [vmem:[#allocation5] ss:$0 sm:$0xff] }
 0x11e   :  { %v183_v33 = vpop.f32.mrb[10].mxu0 }
 0x11f   :  { %13073 = vst [vmem:[#allocation15_spill] sm:$0xff] %v10249_v31  ;;  %v10251_v34 = vadd.f32 %v183_v33, %v80_v30  ;;  %v8353_v35 = vpop.f32.mrb[11].mxu0  ;;  %v216_v36 = vsel %vm203_vm2, %v10249_v31, 0.0 }
 0x120   :  { %217 = vadd.xlane.f32.xlu0 %v216_v36 }
 0x121   :  { %13074 = vst [vmem:[#allocation16_spill] sm:$0xff] %v10251_v34  ;;  %v219_v37 = vsel %vm203_vm2, %v10251_v34, 0.0 }
 0x122   :  { %220 = vadd.xlane.f32.xlu1 %v219_v37  ;;  %v7847_v37 = vld [vmem:[#allocation5 + $0x1] ss:$0 sm:$0xff] }
 0x19d   :  { %v206_v38 = vpop.xlane.xlu0 %205 }
 0x19e   :  { %v223_v39 = vmul.f32 0.03125, %v206_v38 }
 0x1a0   :  { %v229_v40 = vsub.f32 %v10233_v11, %v223_v39 }
 0x1a1   :  { %v209_v41 = vpop.xlane.xlu0 %208 }
 0x1a2   :  { %v224_v42 = vmul.f32 0.03125, %v209_v41  ;;  %v235_v43 = vmul.f32 %v229_v40, %v229_v40 }
 0x1a4   :  { %v230_v44 = vsub.f32 %v10235_v14, %v224_v42  ;;  %v241_v45 = vsel %vm203_vm2, %v235_v43, 0.0 }
 0x1a5   :  { %v212_v46 = vpop.xlane.xlu1 %211  ;;  %242 = vadd.xlane.f32.xlu0 %v241_v45 }
 0x1a6   :  { %v225_v47 = vmul.f32 0.03125, %v212_v46  ;;  %v236_v48 = vmul.f32 %v230_v44, %v230_v44 }
 0x1a8   :  { %v10261_v49 = vsub.f32 %v10241_v21, %v225_v47  ;;  %v244_v50 = vsel %vm203_vm2, %v236_v48, 0.0 }
 0x1a9   :  { %v215_v51 = vpop.xlane.xlu1 %214  ;;  %245 = vadd.xlane.f32.xlu1 %v244_v50 }
 0x1aa   :  { %v226_v52 = vmul.f32 0.03125, %v215_v51  ;;  %v237_v53 = vmul.f32 %v10261_v49, %v10261_v49 }
 0x1ac   :  { %v232_v54 = vsub.f32 %v10243_v24, %v226_v52  ;;  %v247_v55 = vsel %vm203_vm2, %v237_v53, 0.0 }
 0x1ad   :  { %248 = vadd.xlane.f32.xlu0 %v247_v55  ;;  %v218_v56 = vpop.xlane.xlu0 %217 }
 0x1ae   :  { %v227_v57 = vmul.f32 0.03125, %v218_v56  ;;  %v238_v58 = vmul.f32 %v232_v54, %v232_v54 }
 0x1af   :  { %v221_v59 = vpop.xlane.xlu1 %220 }
 0x1b0   :  { %v233_v60 = vsub.f32 %v10249_v31, %v227_v57  ;;  %v228_v61 = vmul.f32 0.03125, %v221_v59  ;;  %v250_v62 = vsel %vm203_vm2, %v238_v58, 0.0 }
 0x1b1   :  { %251 = vadd.xlane.f32.xlu1 %v250_v62 }
 0x1b2   :  { %v234_v63 = vsub.f32 %v10251_v34, %v228_v61  ;;  %v239_v1 = vmul.f32 %v233_v60, %v233_v60  ;;  %v7848_v61 = vld [vmem:[#allocation5 + $0x2] ss:$0 sm:$0xff] }
 0x1b4   :  { %v253_v2 = vsel %vm203_vm2, %v239_v1, 0.0  ;;  %v240_v3 = vmul.f32 %v234_v63, %v234_v63 }
 0x1b5   :  { %254 = vadd.xlane.f32.xlu0 %v253_v2 }
 0x1b6   :  { %v256_v4 = vsel %vm203_vm2, %v240_v3, 0.0 }
 0x1b7   :  { %257 = vadd.xlane.f32.xlu1 %v256_v4 }
 0x232   :  { %v243_v7 = vpop.xlane.xlu0 %242 }
 0x233   :  { %v259_v8 = vmul.f32 0.03125, %v243_v7 }
 0x235   :  { %v265_v9 = vadd.f32 1e-05, %v259_v8 }
 0x236   :  { %v246_v10 = vpop.xlane.xlu1 %245 }
 0x237   :  { %9574 = vrsqrt.f32 %v265_v9  ;;  %v260_v12 = vmul.f32 0.03125, %v246_v10 }
 0x239   :  { %v266_v13 = vadd.f32 1e-05, %v260_v12 }
 0x23a   :  { %v249_v15 = vpop.xlane.xlu0 %248 }
 0x23b   :  { %9576 = vrsqrt.f32 %v266_v13  ;;  %v261_v16 = vmul.f32 0.03125, %v249_v15 }
 0x23d   :  { %v267_v17 = vadd.f32 1e-05, %v261_v16 }
 0x23e   :  { %v252_v18 = vpop.xlane.xlu1 %251 }
 0x23f   :  { %9578 = vrsqrt.f32 %v267_v17  ;;  %v262_v19 = vmul.f32 0.03125, %v252_v18 }
 0x241   :  { %v9575_v20 = vpop.eup %9574  ;;  %v268_v22 = vadd.f32 1e-05, %v262_v19 }
 0x242   :  { %v255_v23 = vpop.xlane.xlu0 %254  ;;  %v277_v25 = vmul.f32 %v9575_v20, %v229_v40 }
 0x243   :  { %9580 = vrsqrt.f32 %v268_v22  ;;  %v263_v26 = vmul.f32 0.03125, %v255_v23 }
 0x244   :  { %v258_v28 = vpop.xlane.xlu1 %257  ;;  %v287_v35 = vmul.f32 %v7846_v27, %v277_v25 }
 0x245   :  { %v9577_v29 = vpop.eup %9576  ;;  %v269_v30 = vadd.f32 1e-05, %v263_v26  ;;  %v264_v32 = vmul.f32 0.03125, %v258_v28 }
 0x246   :  { %v278_v33 = vmul.f32 %v9577_v29, %v230_v44  ;;  %v297_v41 = vadd.f32 %v7847_v37, %v287_v35 }
 0x247   :  { %9582 = vrsqrt.f32 %v269_v30  ;;  %v270_v36 = vadd.f32 1e-05, %v264_v32 }
 0x248   :  { %v288_v38 = vmul.f32 %v7846_v27, %v278_v33 }
 0x249   :  { %v9579_v39 = vpop.eup %9578  ;;  %9584 = vrsqrt.f32 %v270_v36 }
 0x24a   :  { %v298_v42 = vadd.f32 %v7847_v37, %v288_v38  ;;  %v279_v43 = vmul.f32 %v9579_v39, %v10261_v49 }
 0x24c   :  { %v303_v40 = vpack.c.bf16 %v298_v42, %v297_v41  ;;  %v289_v47 = vmul.f32 %v7846_v27, %v279_v43 }
 0x24d   :  { %v9581_v45 = vpop.eup %9580 }
 0x24e   :  { %8359 = vmatmul.mubr.msk.bf16.vlgmr.msra.gmra.mrb[0].mxu1 %vm203_vm2, %v303_v40  ;;  %v280_v46 = vmul.f32 %v9581_v45, %v232_v54  ;;  %v299_v50 = vadd.f32 %v7847_v37, %v289_v47 }
 0x24f   :  { %8362 = vmatprep.mubr.msk.bf16.mxu1 %vm10135_vm0, %v12994_v0 }
 0x250   :  { %v290_v44 = vmul.f32 %v7846_v27, %v280_v46 }
 0x251   :  { %v9583_v48 = vpop.eup %9582 }
 0x252   :  { %v300_v51 = vadd.f32 %v7847_v37, %v290_v44  ;;  %v281_v52 = vmul.f32 %v9583_v48, %v233_v60 }
 0x253   :  { %v9585_v53 = vpop.eup %9584 }
 0x254   :  { %v304_v55 = vpack.c.bf16 %v300_v51, %v299_v50  ;;  %v282_v56 = vmul.f32 %v9585_v53, %v234_v63  ;;  %v291_v49 = vmul.f32 %v7846_v27, %v281_v52 }
 0x256   :  { %8363 = vmatmul.mubr.msk.bf16.gmra.mrb[4].mxu1 %vm203_vm2, %v304_v55  ;;  %v292_v57 = vmul.f32 %v7846_v27, %v282_v56  ;;  %v301_v58 = vadd.f32 %v7847_v37, %v291_v49 }
 0x257   :  { %8366 = vmatprep.mubr.msk.bf16.mxu1 %vm10135_vm0, %v12994_v0 }
 0x258   :  { %v302_v54 = vadd.f32 %v7847_v37, %v292_v57 }
 0x25a   :  { %v305_v59 = vpack.c.bf16 %v302_v54, %v301_v58 }
 0x25e   :  { %8367 = vmatmul.mubr.msk.bf16.gmra.mrb[8].mxu1 %vm203_vm2, %v305_v59 }
 0x321   :  { %v365_v62 = vpop.f32.mrb[0].mxu1 }
 0x322   :  { %v8360_v1 = vpop.f32.mrb[1].mxu1  ;;  %v366_v60 = vadd.f32 %v7848_v61, %v365_v62 }
 0x323   :  { %v368_v2 = vpop.f32.mrb[2].mxu1 }
 0x324   :  { %v369_v3 = vadd.f32 %v7848_v61, %v368_v2  ;;  %v8361_v4 = vpop.f32.mrb[3].mxu1 }
 0x326   :  { %v10282_v63 = vpack.i.bf16 %v369_v3, %v366_v60  ;;  %v10284_v5 = vpack.c.bf16 %v369_v3, %v366_v60 }
 0x328   :  { %9124 = vrot.lane.b32.xlu0 %v10282_v63, %s10136_s0  ;;  %8374 = vmatprep.mubr.msk.bf16.mxu1 %vm558_vm3, %v10284_v5 }
 0x329   :  { %v373_v6 = vpop.f32.mrb[4].mxu1 }
 0x32a   :  { %v8364_v7 = vpop.f32.mrb[5].mxu1  ;;  %v374_v9 = vadd.f32 %v7848_v61, %v373_v6 }
 0x32b   :  { %v376_v8 = vpop.f32.mrb[6].mxu1 }
 0x32c   :  { %v377_v10 = vadd.f32 %v7848_v61, %v376_v8  ;;  %v8365_v12 = vpop.f32.mrb[7].mxu1  ;;  %v10326_v26 = vpack.c.bf16 %v374_v9, %v374_v9 }
 0x32e   :  { %v10290_v13 = vpack.i.bf16 %v377_v10, %v374_v9 }
 0x330   :  { %9144 = vrot.lane.b32.xlu0 %v10290_v13, %s10137_s26  ;;  %9129 = vrot.lane.b32.xlu1 %v10290_v13, %s10136_s0 }
 0x331   :  { %v381_v15 = vpop.f32.mrb[8].mxu1 }
 0x332   :  { %v382_v16 = vadd.f32 %v7848_v61, %v381_v15  ;;  %v8368_v17 = vpop.f32.mrb[9].mxu1 }
 0x333   :  { %v384_v18 = vpop.f32.mrb[10].mxu1 }
 0x334   :  { %v385_v19 = vadd.f32 %v7848_v61, %v384_v18  ;;  %9154 = vrot.lane.b32.xlu0 %v10282_v63, %s10138_s27  ;;  %v8369_v20 = vpop.f32.mrb[11].mxu1  ;;  %v10298_v22 = vpack.c.bf16 %v382_v16, %v377_v10 }
 0x336   :  { %8382 = vmatprep.mubr.msk.bf16.mxu0 %vm558_vm3, %v10298_v22  ;;  %v10302_v23 = vpack.i.bf16 %v385_v19, %v382_v16  ;;  %v10320_v25 = vpack.c.bf16 %v385_v19, %v385_v19 }
 0x338   :  { %9164 = vrot.lane.b32.xlu0 %v10302_v23, %s10138_s27  ;;  %9134 = vrot.lane.b32.xlu1 %v10302_v23, %s10136_s0 }
 0x33c   :  { %9169 = vrot.lane.b32.xlu0 %v10282_v63, %s10139_s28  ;;  %9139 = vrot.lane.b32.xlu1 %v10282_v63, %s10137_s26 }
 0x340   :  { %621 = vrot.lane.b32.xlu0 %v10298_v22, %s10140_s29  ;;  %9149 = vrot.lane.b32.xlu1 %v10302_v23, %s10137_s26 }
 0x344   :  { %9179 = vrot.lane.b32.xlu0 %v10302_v23, %s10139_s28  ;;  %9159 = vrot.lane.b32.xlu1 %v10290_v13, %s10138_s27 }
 0x348   :  { %554 = vrot.lane.b32.xlu1 %v10284_v5, %s10140_s29  ;;  %623 = vrot.lane.b32.xlu0 %v10320_v25, %s10140_s29 }
 0x34c   :  { %556 = vrot.lane.b32.xlu1 %v10326_v26, %s10140_s29 }
 0x350   :  { %9174 = vrot.lane.b32.xlu1 %v10290_v13, %s10139_s28 }
 0x39a   :  { %v9125_v27 = vpop.permute.xlu0 %9124 }
 0x39b   :  { %v9127_v28 = vunpack.i.h.bf16 %v9125_v27  ;;  %v9126_v29 = vunpack.i.l.bf16 %v9125_v27 }
 0x39d   :  { %v10332_v30 = vpack.c.bf16 %v9127_v28, %v9126_v29 }
 0x39f   :  { %687 = vrot.lane.b32.xlu1 %v10332_v30, %s10140_s29 }
 0x3a2   :  { %v9145_v32 = vpop.permute.xlu0 %9144  ;;  %v9130_v33 = vpop.permute.xlu1 %9129 }
 0x3a3   :  { %v9131_v35 = vunpack.i.l.bf16 %v9130_v33  ;;  %9184 = vrot.lane.b32.xlu1 %v10282_v63, %s10141_s30  ;;  %v9132_v41 = vunpack.i.h.bf16 %v9130_v33  ;;  %v9146_v55 = vunpack.i.l.bf16 %v9145_v32  ;;  %v9147_v54 = vunpack.i.h.bf16 %v9145_v32 }
 0x3a5   :  { %v10338_v36 = vpack.c.bf16 %v9131_v35, %v9131_v35  ;;  %v10368_v61 = vpack.c.bf16 %v9146_v55, %v9146_v55 }
 0x3a6   :  { %v9155_v37 = vpop.permute.xlu0 %9154 }
 0x3a7   :  { %689 = vrot.lane.b32.xlu0 %v10338_v36, %s10140_s29  ;;  %v9157_v60 = vunpack.i.h.bf16 %v9155_v37  ;;  %v9156_v3 = vunpack.i.l.bf16 %v9155_v37 }
 0x3a9   :  { %v10385_v7 = vpack.c.bf16 %v9157_v60, %v9156_v3 }
 0x3aa   :  { %v10342_v38 = vpop.permute.xlu0 %9164  ;;  %v9135_v39 = vpop.permute.xlu1 %9134 }
 0x3ab   :  { %v9136_v42 = vunpack.i.l.bf16 %v9135_v39  ;;  %9189 = vrot.lane.b32.xlu0 %v10290_v13, %s10141_s30  ;;  %v9137_v44 = vunpack.i.h.bf16 %v9135_v39  ;;  %v9166_v16 = vunpack.i.l.bf16 %v10342_v38 }
 0x3ad   :  { %v10346_v43 = vpack.c.bf16 %v9136_v42, %v9132_v41  ;;  %v10360_v53 = vpack.c.bf16 %v9137_v44, %v9137_v44 }
 0x3ae   :  { %v10348_v40 = vpop.permute.xlu0 %9169  ;;  %v9140_v45 = vpop.permute.xlu1 %9139 }
 0x3af   :  { %v9142_v46 = vunpack.i.h.bf16 %v9140_v45  ;;  %v9141_v47 = vunpack.i.l.bf16 %v9140_v45  ;;  %753 = vrot.lane.b32.xlu1 %v10346_v43, %s10140_s29  ;;  %v9172_v18 = vunpack.i.h.bf16 %v10348_v40  ;;  %v9171_v19 = vunpack.i.l.bf16 %v10348_v40 }
 0x3b1   :  { %v10352_v48 = vpack.c.bf16 %v9142_v46, %v9141_v47  ;;  %v10418_v28 = vpack.c.bf16 %v9172_v18, %v9171_v19 }
 0x3b2   :  { %v622_v50 = vpop.permute.xlu0 %621  ;;  %v9150_v51 = vpop.permute.xlu1 %9149 }
 0x3b3   :  { %9004 = vmatprep.subr.msk.bf16.mxu0 %vm558_vm3, %v622_v50  ;;  %9194 = vrot.lane.b32.xlu1 %v10302_v23, %s10141_s30  ;;  %v632_v52 = vsel %vm558_vm3, %v622_v50, 0  ;;  %v9151_v56 = vunpack.i.l.bf16 %v9150_v51  ;;  %v9152_v6 = vunpack.i.h.bf16 %v9150_v51 }
 0x3b4   :  { %819 = vrot.lane.b32.xlu0 %v10352_v48, %s10140_s29  ;;  %8379 = vmatpush3.bf16.xpose.msra.mxu0 %v632_v52 }
 0x3b5   :  { %v10370_v62 = vpack.c.bf16 %v9151_v56, %v9147_v54  ;;  %v10387_v9 = vpack.c.bf16 %v9152_v6, %v9152_v6 }
 0x3b6   :  { %v10362_v49 = vpop.permute.xlu0 %9179  ;;  %v9160_v57 = vpop.permute.xlu1 %9159 }
 0x3b7   :  { %755 = vrot.lane.b32.xlu1 %v10360_v53, %s10140_s29  ;;  %v9161_v8 = vunpack.i.l.bf16 %v9160_v57  ;;  %v9162_v12 = vunpack.i.h.bf16 %v9160_v57  ;;  %v9182_v35 = vunpack.i.h.bf16 %v10362_v49 }
 0x3b8   :  { %9199 = vrot.lane.b32.xlu0 %v10282_v63, %s10142_s4 }
 0x3b9   :  { %v10398_v15 = vpack.c.bf16 %v9161_v8, %v9161_v8  ;;  %v10405_v17 = vpack.c.bf16 %v9166_v16, %v9162_v12 }
 0x3ba   :  { %v624_v58 = vpop.permute.xlu0 %623  ;;  %v555_v59 = vpop.permute.xlu1 %554 }
 0x3bb   :  { %9002 = vmatprep.subr.msk.bf16.mxu1 %vm558_vm3, %v555_v59  ;;  %9005 = vmatprep.subr.msk.bf16.mxu0 %vm558_vm3, %v624_v58  ;;  %v566_v1 = vsel %vm558_vm3, %v555_v59, 0  ;;  %v635_v2 = vsel %vm558_vm3, %v624_v58, 0 }
 0x3bc   :  { %821 = vrot.lane.b32.xlu1 %v10368_v61, %s10140_s29  ;;  %885 = vrot.lane.b32.xlu0 %v10370_v62, %s10140_s29 }
 0x3bd   :  { %8371 = vmatpush3.bf16.xpose.msra.mxu1 %v566_v1  ;;  %8381 = vmatpush3.bf16.xpose.msra.mxu0 %v635_v2 }
 0x3be   :  { %v557_v4 = vpop.permute.xlu1 %556 }
 0x3bf   :  { %9003 = vmatprep.subr.msk.bf16.mxu1 %vm558_vm3, %v557_v4  ;;  %v569_v10 = vsel %vm558_vm3, %v557_v4, 0 }
 0x3c0   :  { %9204 = vrot.lane.b32.xlu1 %v10290_v13, %s10142_s4  ;;  %9209 = vrot.lane.b32.xlu0 %v10302_v23, %s10142_s4 }
 0x3c2   :  { %v9175_v20 = vpop.permute.xlu1 %9174 }
 0x3c3   :  { %v9176_v27 = vunpack.i.l.bf16 %v9175_v20  ;;  %v9177_v29 = vunpack.i.h.bf16 %v9175_v20 }
 0x3c4   :  { %8383 = vmatmul.mubr.msk.bf16.vlgmr.msra.gmra.mrb[12].mxu0 %vm558_vm3, %v10320_v25  ;;  %951 = vrot.lane.b32.xlu1 %v10385_v7, %s10140_s29 }
 0x3c5   :  { %887 = vrot.lane.b32.xlu0 %v10387_v9, %s10140_s29  ;;  %8373 = vmatpush3.bf16.xpose.msra.mxu1 %v569_v10  ;;  %v10426_v33 = vpack.c.bf16 %v9176_v27, %v9176_v27 }
 0x3c6   :  { %8398 = vmatprep.mubr.msk.bf16.mxu0 %vm558_vm3, %v10346_v43 }
 0x3c8   :  { %9214 = vrot.lane.b32.xlu1 %v10282_v63, %s10143_s5  ;;  %v9167_v63 = vunpack.i.h.bf16 %v10342_v38 }
 0x3c9   :  { %953 = vrot.lane.b32.xlu0 %v10398_v15, %s10140_s29 }
 0x3ca   :  { %v10424_v32 = vpack.c.bf16 %v9167_v63, %v9167_v63 }
 0x3cc   :  { %8375 = vmatmul.mubr.msk.bf16.vlgmr.msra.gmra.mrb[12].mxu1 %vm558_vm3, %v10326_v26  ;;  %1017 = vrot.lane.b32.xlu1 %v10405_v17, %s10140_s29 }
 0x3cd   :  { %9219 = vrot.lane.b32.xlu0 %v10290_v13, %s10143_s5  ;;  %8390 = vmatprep.mubr.msk.bf16.mxu1 %vm558_vm3, %v10332_v30  ;;  %v9181_v13 = vunpack.i.l.bf16 %v10362_v49 }
 0x3cf   :  { %v10434_v37 = vpack.c.bf16 %v9181_v13, %v9177_v29 }
 0x3d0   :  { %9224 = vrot.lane.b32.xlu1 %v10302_v23, %s10143_s5  ;;  %v10438_v23 = vpack.c.bf16 %v9182_v35, %v9182_v35 }
 0x3d1   :  { %1083 = vrot.lane.b32.xlu0 %v10418_v28, %s10140_s29 }
 0x3d4   :  { %1019 = vrot.lane.b32.xlu1 %v10424_v32, %s10140_s29 }
 0x3d5   :  { %1085 = vrot.lane.b32.xlu0 %v10426_v33, %s10140_s29 }
 0x3d8   :  { %1149 = vrot.lane.b32.xlu1 %v10434_v37, %s10140_s29 }
 0x3dc   :  { %1151 = vrot.lane.b32.xlu1 %v10438_v23, %s10140_s29 }
 0x411   :  { %v688_v38 = vpop.permute.xlu1 %687 }
 0x412   :  { %9006 = vmatprep.subr.msk.bf16.mxu1 %vm558_vm3, %v688_v38  ;;  %v698_v39 = vsel %vm558_vm3, %v688_v38, 0 }
 0x413   :  { %8387 = vmatpush3.bf16.xpose.msra.mxu1 %v698_v39 }
 0x415   :  { %v9185_v41 = vpop.permute.xlu1 %9184 }
 0x416   :  { %v9187_v42 = vunpack.i.h.bf16 %v9185_v41  ;;  %v9186_v40 = vunpack.i.l.bf16 %v9185_v41 }
 0x418   :  { %v10444_v45 = vpack.c.bf16 %v9187_v42, %v9186_v40 }
 0x419   :  { %v690_v46 = vpop.permute.xlu0 %689 }
 0x41a   :  { %1215 = vrot.lane.b32.xlu0 %v10444_v45, %s10140_s29  ;;  %9007 = vmatprep.subr.msk.bf16.mxu1 %vm558_vm3, %v690_v46  ;;  %v701_v47 = vsel %vm558_vm3, %v690_v46, 0 }
 0x41b   :  { %8389 = vmatpush3.bf16.xpose.msra.mxu1 %v701_v47 }
 0x41d   :  { %v9190_v44 = vpop.permute.xlu0 %9189 }
 0x41e   :  { %v9191_v50 = vunpack.i.l.bf16 %v9190_v44  ;;  %v9192_v49 = vunpack.i.h.bf16 %v9190_v44 }
 0x420   :  { %v10450_v51 = vpack.c.bf16 %v9191_v50, %v9191_v50 }
 0x421   :  { %v754_v52 = vpop.permute.xlu1 %753 }
 0x422   :  { %8391 = vmatmul.mubr.msk.bf16.vlgmr.msra.gmra.mrb[16].mxu1 %vm558_vm3, %v10338_v36  ;;  %9008 = vmatprep.subr.msk.bf16.mxu0 %vm558_vm3, %v754_v52  ;;  %v764_v55 = vsel %vm558_vm3, %v754_v52, 0 }
 0x423   :  { %1217 = vrot.lane.b32.xlu0 %v10450_v51, %s10140_s29  ;;  %8395 = vmatpush3.bf16.xpose.msra.mxu0 %v764_v55 }
 0x424   :  { %8406 = vmatprep.mubr.msk.bf16.mxu1 %vm558_vm3, %v10352_v48 }
 0x425   :  { %v9195_v56 = vpop.permute.xlu1 %9194 }
 0x426   :  { %v9196_v57 = vunpack.i.l.bf16 %v9195_v56  ;;  %v820_v54 = vpop.permute.xlu0 %819  ;;  %v9197_v59 = vunpack.i.h.bf16 %v9195_v56 }
 0x427   :  { %9010 = vmatprep.subr.msk.bf16.mxu1 %vm558_vm3, %v820_v54  ;;  %v830_v58 = vsel %vm558_vm3, %v820_v54, 0 }
 0x428   :  { %8403 = vmatpush3.bf16.xpose.msra.mxu1 %v830_v58  ;;  %v10462_v1 = vpack.c.bf16 %v9196_v57, %v9192_v49  ;;  %v10468_v8 = vpack.c.bf16 %v9197_v59, %v9197_v59 }
 0x429   :  { %v756_v2 = vpop.permute.xlu1 %755 }
 0x42a   :  { %v9200_v60 = vpop.permute.xlu0 %9199  ;;  %9009 = vmatprep.subr.msk.bf16.mxu0 %vm558_vm3, %v756_v2  ;;  %1281 = vrot.lane.b32.xlu1 %v10462_v1, %s10140_s29  ;;  %v767_v3 = vsel %vm558_vm3, %v756_v2, 0 }
 0x42b   :  { %v9202_v4 = vunpack.i.h.bf16 %v9200_v60  ;;  %v9201_v6 = vunpack.i.l.bf16 %v9200_v60  ;;  %8397 = vmatpush3.bf16.xpose.msra.mxu0 %v767_v3 }
 0x42d   :  { %v10470_v10 = vpack.c.bf16 %v9202_v4, %v9201_v6 }
 0x42e   :  { %v822_v12 = vpop.permute.xlu1 %821  ;;  %v886_v16 = vpop.permute.xlu0 %885  ;;  %1283 = vrot.lane.b32.xlu1 %v10468_v8, %s10140_s29 }
 0x42f   :  { %9011 = vmatprep.subr.msk.bf16.mxu1 %vm558_vm3, %v822_v12  ;;  %9012 = vmatprep.subr.msk.bf16.mxu0 %vm558_vm3, %v886_v16  ;;  %v833_v18 = vsel %vm558_vm3, %v822_v12, 0  ;;  %v896_v63 = vsel %vm558_vm3, %v886_v16, 0 }
 0x430   :  { %1347 = vrot.lane.b32.xlu0 %v10470_v10, %s10140_s29  ;;  %8405 = vmatpush3.bf16.xpose.msra.mxu1 %v833_v18 }
 0x432   :  { %v9205_v19 = vpop.permute.xlu1 %9204  ;;  %v9210_v20 = vpop.permute.xlu0 %9209  ;;  %8399 = vmatmul.mubr.msk.bf16.vlgmr.msra.gmra.mrb[16].mxu0 %vm558_vm3, %v10360_v53 }
 0x433   :  { %v9207_v27 = vunpack.i.h.bf16 %v9205_v19  ;;  %v9206_v29 = vunpack.i.l.bf16 %v9205_v19  ;;  %v9211_v13 = vunpack.i.l.bf16 %v9210_v20  ;;  %8411 = vmatpush3.bf16.xpose.msra.mxu0 %v896_v63  ;;  %8414 = vmatprep.mubr.msk.bf16.mxu0 %vm558_vm3, %v10370_v62  ;;  %v9212_v39 = vunpack.i.h.bf16 %v9210_v20 }
 0x435   :  { %v10484_v35 = vpack.c.bf16 %v9211_v13, %v9207_v27  ;;  %v10486_v38 = vpack.c.bf16 %v9206_v29, %v9206_v29  ;;  %v10499_v47 = vpack.c.bf16 %v9212_v39, %v9212_v39 }
 0x436   :  { %v952_v41 = vpop.permute.xlu1 %951 }
 0x437   :  { %v888_v42 = vpop.permute.xlu0 %887  ;;  %8407 = vmatmul.mubr.msk.bf16.vlgmr.msra.gmra.mrb[20].mxu1 %vm558_vm3, %v10368_v61  ;;  %9014 = vmatprep.subr.msk.bf16.mxu1 %vm558_vm3, %v952_v41  ;;  %v962_v40 = vsel %vm558_vm3, %v952_v41, 0  ;;  %13075 = vst [vmem:[#allocation17_spill] sm:$0xff] %v10499_v47 }
 0x438   :  { %9013 = vmatprep.subr.msk.bf16.mxu0 %vm558_vm3, %v888_v42  ;;  %1413 = vrot.lane.b32.xlu1 %v10484_v35, %s10140_s29  ;;  %v899_v44 = vsel %vm558_vm3, %v888_v42, 0 }
 0x439   :  { %1349 = vrot.lane.b32.xlu0 %v10486_v38, %s10140_s29  ;;  %8419 = vmatpush3.bf16.xpose.msra.mxu1 %v962_v40 }
 0x43a   :  { %8422 = vmatprep.mubr.msk.bf16.mxu1 %vm558_vm3, %v10385_v7  ;;  %v9215_v46 = vpop.permute.xlu1 %9214 }
 0x43b   :  { %v9217_v50 = vunpack.i.h.bf16 %v9215_v46  ;;  %v9216_v52 = vunpack.i.l.bf16 %v9215_v46  ;;  %v954_v55 = vpop.permute.xlu0 %953  ;;  %8413 = vmatpush3.bf16.xpose.msra.mxu0 %v899_v44 }
 0x43c   :  { %9015 = vmatprep.subr.msk.bf16.mxu1 %vm558_vm3, %v954_v55  ;;  %1415 = vrot.lane.b32.xlu1 %v10499_v47, %s10140_s29  ;;  %v965_v58 = vsel %vm558_vm3, %v954_v55, 0 }
 0x43d   :  { %v10505_v56 = vpack.c.bf16 %v9217_v50, %v9216_v52 }
 0x43e   :  { %v1018_v49 = vpop.permute.xlu1 %1017 }
 0x43f   :  { %v9220_v57 = vpop.permute.xlu0 %9219  ;;  %9016 = vmatprep.subr.msk.bf16.mxu0 %vm558_vm3, %v1018_v49  ;;  %1479 = vrot.lane.b32.xlu0 %v10505_v56, %s10140_s29  ;;  %v1028_v60 = vsel %vm558_vm3, %v1018_v49, 0 }
 0x440   :  { %v9221_v54 = vunpack.i.l.bf16 %v9220_v57  ;;  %v9222_v3 = vunpack.i.h.bf16 %v9220_v57 }
 0x441   :  { %8421 = vmatpush3.bf16.xpose.msra.mxu1 %v965_v58 }
 0x442   :  { %v9225_v59 = vpop.permute.xlu1 %9224  ;;  %8415 = vmatmul.mubr.msk.bf16.vlgmr.msra.gmra.mrb[20].mxu0 %vm558_vm3, %v10387_v9  ;;  %v10513_v2 = vpack.c.bf16 %v9221_v54, %v9221_v54 }
 0x443   :  { %v9227_v4 = vunpack.i.h.bf16 %v9225_v59  ;;  %v9226_v6 = vunpack.i.l.bf16 %v9225_v59  ;;  %v1084_v12 = vpop.permute.xlu0 %1083  ;;  %8427 = vmatpush3.bf16.xpose.msra.mxu0 %v1028_v60  ;;  %8430 = vmatprep.mubr.msk.bf16.mxu0 %vm558_vm3, %v10405_v17 }
 0x444   :  { %9018 = vmatprep.subr.msk.bf16.mxu1 %vm558_vm3, %v1084_v12  ;;  %1481 = vrot.lane.b32.xlu0 %v10513_v2, %s10140_s29  ;;  %v1094_v20 = vsel %vm558_vm3, %v1084_v12, 0 }
 0x445   :  { %v10521_v16 = vpack.c.bf16 %v9226_v6, %v9222_v3  ;;  %v10523_v18 = vpack.c.bf16 %v9227_v4, %v9227_v4 }
 0x446   :  { %v1020_v19 = vpop.permute.xlu1 %1019 }
 0x447   :  { %13076 = vst [vmem:[#allocation18_spill] sm:$0xff] %v10521_v16  ;;  %13077 = vst [vmem:[#allocation19_spill] sm:$0xff] %v10523_v18  ;;  %9017 = vmatprep.subr.msk.bf16.mxu0 %vm558_vm3, %v1020_v19  ;;  %1545 = vrot.lane.b32.xlu1 %v10521_v16, %s10140_s29  ;;  %v1086_v63 = vpop.permute.xlu0 %1085  ;;  %v1031_v27 = vsel %vm558_vm3, %v1020_v19, 0 }
 0x448   :  { %8423 = vmatmul.mubr.msk.bf16.vlgmr.msra.gmra.mrb[24].mxu1 %vm558_vm3, %v10398_v15  ;;  %1547 = vrot.lane.b32.xlu0 %v10523_v18, %s10140_s29  ;;  %v1097_v13 = vsel %vm558_vm3, %v1086_v63, 0 }
 0x449   :  { %8435 = vmatpush3.bf16.xpose.msra.mxu1 %v1094_v20  ;;  %8438 = vmatprep.mubr.msk.bf16.mxu1 %vm558_vm3, %v10418_v28 }
 0x44a   :  { %9019 = vmatprep.subr.msk.bf16.mxu1 %vm558_vm3, %v1086_v63  ;;  %v1150_v29 = vpop.permute.xlu1 %1149 }
 0x44b   :  { %2220 = vrot.lane.b32.xlu1 %v10326_v26, %s10144_s6  ;;  %8429 = vmatpush3.bf16.xpose.msra.mxu0 %v1031_v27  ;;  %v1160_v26 = vsel %vm558_vm3, %v1150_v29, 0 }
 0x44c   :  { %2218 = vrot.lane.b32.xlu0 %v10284_v5, %s10144_s6  ;;  %9020 = vmatprep.subr.msk.bf16.mxu0 %vm558_vm3, %v1150_v29 }
 0x44e   :  { %v1152_v5 = vpop.permute.xlu1 %1151 }
 0x44f   :  { %2281 = vrot.lane.b32.xlu1 %v10298_v22, %s10144_s6  ;;  %v1163_v22 = vsel %vm558_vm3, %v1152_v5, 0 }
 0x450   :  { %2343 = vrot.lane.b32.xlu0 %v10332_v30, %s10144_s6 }
 0x451   :  { %8437 = vmatpush3.bf16.xpose.msra.mxu1 %v1097_v13 }
 0x452   :  { %8431 = vmatmul.mubr.msk.bf16.vlgmr.msra.gmra.mrb[24].mxu0 %vm558_vm3, %v10424_v32 }
 0x453   :  { %2467 = vrot.lane.b32.xlu1 %v10352_v48, %s10144_s6  ;;  %8443 = vmatpush3.bf16.xpose.msra.mxu0 %v1160_v26 }
 0x454   :  { %2345 = vrot.lane.b32.xlu0 %v10338_v36, %s10144_s6  ;;  %8446 = vmatprep.mubr.msk.bf16.mxu0 %vm558_vm3, %v10434_v37 }
 0x455   :  { %9021 = vmatprep.subr.msk.bf16.mxu0 %vm558_vm3, %v1152_v5 }
 0x457   :  { %2469 = vrot.lane.b32.xlu1 %v10368_v61, %s10144_s6 }
 0x458   :  { %8439 = vmatmul.mubr.msk.bf16.vlgmr.msra.gmra.mrb[28].mxu1 %vm558_vm3, %v10426_v33  ;;  %2283 = vrot.lane.b32.xlu0 %v10320_v25, %s10144_s6 }
 0x459   :  { %8454 = vmatprep.mubr.msk.bf16.mxu1 %vm558_vm3, %v10444_v45 }
 0x45b   :  { %2529 = vrot.lane.b32.xlu1 %v10370_v62, %s10144_s6  ;;  %8445 = vmatpush3.bf16.xpose.msra.mxu0 %v1163_v22 }
 0x45c   :  { %2405 = vrot.lane.b32.xlu0 %v10346_v43, %s10144_s6  ;;  %v12993_v43 = vlaneseq }
 0x45e   :  { %v45_v62 = vand.u32 127, %v12993_v43 }
 0x45f   :  { %2715 = vrot.lane.b32.xlu1 %v10418_v28, %s10144_s6 }
 0x460   :  { %2591 = vrot.lane.b32.xlu0 %v10385_v7, %s10144_s6  ;;  %vm46_vm4 = vcmp.lt.s32.totalorder %v45_v62, 17 }
 0x462   :  { %8447 = vmatmul.mubr.msk.bf16.vlgmr.msra.gmra.mrb[28].mxu0 %vm558_vm3, %v10438_v23 }
 0x463   :  { %2717 = vrot.lane.b32.xlu1 %v10426_v33, %s10144_s6  ;;  %8462 = vmatprep.mubr.msk.bf16.mxu0 %vm558_vm3, %v10462_v1 }
 0x464   :  { %2593 = vrot.lane.b32.xlu0 %v10398_v15, %s10144_s6 }
 0x467   :  { %2841 = vrot.lane.b32.xlu1 %v10450_v51, %s10144_s6 }
 0x468   :  { %2653 = vrot.lane.b32.xlu0 %v10405_v17, %s10144_s6 }
 0x46b   :  { %2965 = vrot.lane.b32.xlu1 %v10486_v38, %s10144_s6 }
 0x46c   :  { %2839 = vrot.lane.b32.xlu0 %v10444_v45, %s10144_s6 }
 0x46f   :  { %3087 = vrot.lane.b32.xlu1 %v10505_v56, %s10144_s6 }
 0x470   :  { %2777 = vrot.lane.b32.xlu0 %v10434_v37, %s10144_s6 }
 0x473   :  { %3089 = vrot.lane.b32.xlu1 %v10513_v2, %s10144_s6 }
 0x474   :  { %2963 = vrot.lane.b32.xlu0 %v10470_v10, %s10144_s6 }
 0x478   :  { %2901 = vrot.lane.b32.xlu0 %v10462_v1, %s10144_s6 }
 0x47c   :  { %3025 = vrot.lane.b32.xlu0 %v10484_v35, %s10144_s6 }
 0x480   :  { %2407 = vrot.lane.b32.xlu0 %v10360_v53, %s10144_s6 }
 0x484   :  { %2531 = vrot.lane.b32.xlu0 %v10387_v9, %s10144_s6 }
 0x488   :  { %2655 = vrot.lane.b32.xlu0 %v10424_v32, %s10144_s6  ;;  %v10145_v32 = vmov -1e+30  }
 0x489   :  { %v10623_v33 = vsel %vm46_vm4, 0.0, %v10145_v32 }
 0x48a   :  { %13078 = vst [vmem:[#allocation20_spill] sm:$0xff] %v10623_v33 }
 0x48c   :  { %2779 = vrot.lane.b32.xlu0 %v10438_v23, %s10144_s6  ;;  %v1216_v25 = vpop.permute.xlu0 %1215 }
 0x48d   :  { %9022 = vmatprep.subr.msk.bf16.mxu1 %vm558_vm3, %v1216_v25  ;;  %v1226_v30 = vsel %vm558_vm3, %v1216_v25, 0 }
 0x48e   :  { %8451 = vmatpush3.bf16.xpose.msra.mxu1 %v1226_v30 }
 0x490   :  { %2903 = vrot.lane.b32.xlu0 %v10468_v8, %s10144_s6 }
 0x495   :  { %v1218_v36 = vpop.permute.xlu0 %1217 }
 0x496   :  { %9023 = vmatprep.subr.msk.bf16.mxu1 %vm558_vm3, %v1218_v36  ;;  %v1229_v48 = vsel %vm558_vm3, %v1218_v36, 0 }
 0x497   :  { %v8384_v53 = vpop.f32.mrb[12].mxu0  ;;  %8453 = vmatpush3.bf16.xpose.msra.mxu1 %v1229_v48 }
 0x498   :  { %v671_v61 = vpop.f32.mrb[13].mxu0 }
 0x499   :  { %v8385_v7 = vpop.f32.mrb[14].mxu0  ;;  %v10638_v46 = vadd.f32 %v671_v61, %v10623_v33 }
 0x49a   :  { %v674_v9 = vpop.f32.mrb[15].mxu0 }
 0x49b   :  { %v1619_v49 = vsel %vm1609_vm5, %v10638_v46, -inf  ;;  %v10662_v4 = vadd.f32 %v674_v9, %v10623_v33 }
 0x49c   :  { %v1282_v15 = vpop.permute.xlu1 %1281 }
 0x49d   :  { %9024 = vmatprep.subr.msk.bf16.mxu0 %vm558_vm3, %v1282_v15  ;;  %v1292_v17 = vsel %vm558_vm3, %v1282_v15, 0  ;;  %v1622_v19 = vsel %vm1609_vm5, %v10662_v4, -inf }
 0x49e   :  { %8455 = vmatmul.mubr.msk.bf16.vlgmr.msra.gmra.mrb[32].mxu1 %vm558_vm3, %v10450_v51  ;;  %8459 = vmatpush3.bf16.xpose.msra.mxu0 %v1292_v17  ;;  %v10630_v51 = vadd.f32 %v8384_v53, %v10623_v33 }
 0x49f   :  { %v8376_v28 = vpop.f32.mrb[12].mxu1  ;;  %8470 = vmatprep.mubr.msk.bf16.mxu1 %vm558_vm3, %v10470_v10 }
 0x4a0   :  { %v605_v37 = vpop.f32.mrb[13].mxu1  ;;  %v1284_v23 = vpop.permute.xlu1 %1283  ;;  %v1625_v44 = vsel %vm1609_vm5, %v10630_v51, -inf  ;;  %v10643_v50 = vadd.f32 %v8376_v28, %v10623_v33 }
 0x4a1   :  { %v10626_v45 = vadd.f32 %v605_v37, %v10623_v33  ;;  %v8377_v1 = vpop.f32.mrb[14].mxu1  ;;  %9025 = vmatprep.subr.msk.bf16.mxu0 %vm558_vm3, %v1284_v23  ;;  %v1295_v40 = vsel %vm558_vm3, %v1284_v23, 0 }
 0x4a2   :  { %v1348_v39 = vpop.permute.xlu0 %1347  ;;  %v608_v41 = vpop.f32.mrb[15].mxu1  ;;  %v1616_v60 = vsel %vm1609_vm5, %v10643_v50, -inf }
 0x4a3   :  { %9026 = vmatprep.subr.msk.bf16.mxu1 %vm558_vm3, %v1348_v39  ;;  %v1358_v10 = vsel %vm558_vm3, %v1348_v39, 0  ;;  %v1610_v42 = vsel %vm1609_vm5, %v10626_v45, -inf  ;;  %v10654_v58 = vadd.f32 %v608_v41, %v10623_v33 }
 0x4a4   :  { %8467 = vmatpush3.bf16.xpose.msra.mxu1 %v1358_v10  ;;  %1611 = vmax.xlane.f32.xlu1 %v1610_v42 }
 0x4a6   :  { %8461 = vmatpush3.bf16.xpose.msra.mxu0 %v1295_v40 }
 0x4a8   :  { %1626 = vmax.xlane.f32.xlu1 %v1625_v44 }
 0x4aa   :  { %v1414_v52 = vpop.permute.xlu1 %1413 }
 0x4ab   :  { %v1350_v55 = vpop.permute.xlu0 %1349  ;;  %9028 = vmatprep.subr.msk.bf16.mxu0 %vm558_vm3, %v1414_v52  ;;  %v1424_v54 = vsel %vm558_vm3, %v1414_v52, 0 }
 0x4ac   :  { %9027 = vmatprep.subr.msk.bf16.mxu1 %vm558_vm3, %v1350_v55  ;;  %v1361_v57 = vsel %vm558_vm3, %v1350_v55, 0  ;;  %1620 = vmax.xlane.f32.xlu1 %v1619_v49 }
 0x4ad   :  { %8469 = vmatpush3.bf16.xpose.msra.mxu1 %v1361_v57  ;;  %8463 = vmatmul.mubr.msk.bf16.vlgmr.msra.gmra.mrb[32].mxu0 %vm558_vm3, %v10468_v8  ;;  %v1613_v8 = vsel %vm1609_vm5, %v10654_v58, -inf }
 0x4ae   :  { %v1416_v59 = vpop.permute.xlu1 %1415  ;;  %8475 = vmatpush3.bf16.xpose.msra.mxu0 %v1424_v54  ;;  %8478 = vmatprep.mubr.msk.bf16.mxu0 %vm558_vm3, %v10484_v35 }
 0x4af   :  { %1617 = vmax.xlane.f32.xlu0 %v1616_v60  ;;  %9029 = vmatprep.subr.msk.bf16.mxu0 %vm558_vm3, %v1416_v59  ;;  %v1427_v35 = vsel %vm558_vm3, %v1416_v59, 0 }
 0x4b1   :  { %v1480_v3 = vpop.permute.xlu0 %1479 }
 0x4b2   :  { %9030 = vmatprep.subr.msk.bf16.mxu1 %vm558_vm3, %v1480_v3  ;;  %v1490_v6 = vsel %vm558_vm3, %v1480_v3, 0 }
 0x4b3   :  { %1614 = vmax.xlane.f32.xlu0 %v1613_v8 }
 0x4b4   :  { %8471 = vmatmul.mubr.msk.bf16.vlgmr.msra.gmra.mrb[36].mxu1 %vm558_vm3, %v10486_v38 }
 0x4b5   :  { %8483 = vmatpush3.bf16.xpose.msra.mxu1 %v1490_v6  ;;  %8486 = vmatprep.mubr.msk.bf16.mxu1 %vm558_vm3, %v10505_v56 }
 0x4b6   :  { %v1482_v12 = vpop.permute.xlu0 %1481  ;;  %8477 = vmatpush3.bf16.xpose.msra.mxu0 %v1427_v35 }
 0x4b7   :  { %9031 = vmatprep.subr.msk.bf16.mxu1 %vm558_vm3, %v1482_v12  ;;  %1623 = vmax.xlane.f32.xlu0 %v1622_v19  ;;  %v1493_v38 = vsel %vm558_vm3, %v1482_v12, 0 }
 0x4b9   :  { %v1546_v20 = vpop.permute.xlu1 %1545 }
 0x4ba   :  { %v1548_v63 = vpop.permute.xlu0 %1547  ;;  %9032 = vmatprep.subr.msk.bf16.mxu0 %vm558_vm3, %v1546_v20  ;;  %v1556_v56 = vsel %vm558_vm3, %v1546_v20, 0 }
 0x4bb   :  { %v1559_v26 = vsel %vm558_vm3, %v1548_v63, 0 }
 0x4bd   :  { %8485 = vmatpush3.bf16.xpose.msra.mxu1 %v1493_v38  ;;  %8479 = vmatmul.mubr.msk.bf16.vlgmr.msra.gmra.mrb[36].mxu0 %vm558_vm3, %v10499_v47  ;;  %v2221_v29 = vpop.permute.xlu1 %2220 }
 0x4be   :  { %v2219_v27 = vpop.permute.xlu0 %2218  ;;  %8491 = vmatpush3.bf16.xpose.msra.mxu0 %v1556_v56  ;;  %8494 = vmatprep.mubr.msk.bf16.mxu0 %vm558_vm3, %v10521_v16  ;;  %v2231_v25 = vsel %vm2229_vm6, %v2221_v29, 0 }
 0x4bf   :  { %8498 = vmatprep.subr.bf16.mxu1 %v2219_v27  ;;  %9033 = vmatprep.subr.msk.bf16.mxu0 %vm558_vm3, %v1548_v63 }
 0x4c1   :  { %v2282_v5 = vpop.permute.xlu1 %2281 }
 0x4c2   :  { %v10684_v13 = vpop.permute.xlu0 %2343 }
 0x4c4   :  { %8487 = vmatmul.mubr.msk.bf16.vlgmr.msra.gmra.mrb[40].mxu1 %vm558_vm3, %v10513_v2 }
 0x4c5   :  { %8499 = vmatpush3.bf16.msra.mxu1 %v2219_v27  ;;  %v10724_v41 = vpop.permute.xlu1 %2467 }
 0x4c6   :  { %9034 = vmatprep.subr.msk.bf16.mxu1 %vm2229_vm6, %v2221_v29  ;;  %v10690_v22 = vpop.permute.xlu0 %2345  ;;  %8493 = vmatpush3.bf16.xpose.msra.mxu0 %v1559_v26 }
 0x4c7   :  { %8506 = vmatprep.subr.bf16.mxu0 %v2282_v5 }
 0x4c9   :  { %8501 = vmatpush3.bf16.msra.mxu1 %v2231_v25  ;;  %v10736_v54 = vpop.permute.xlu1 %2469 }
 0x4ca   :  { %8514 = vmatprep.subr.bf16.mxu1 %v10684_v13  ;;  %v2284_v30 = vpop.permute.xlu0 %2283  ;;  %13084 = vst [vmem:[#allocation26_spill] sm:$0xff] %v10736_v54 }
 0x4cb   :  { %v2293_v2 = vsel %vm2229_vm6, %v2284_v30, 0 }
 0x4cd   :  { %8495 = vmatmul.mubr.msk.bf16.vlgmr.msra.gmra.mrb[40].mxu0 %vm558_vm3, %v10523_v18  ;;  %v10753_v38 = vpop.permute.xlu1 %2529 }
 0x4ce   :  { %8507 = vmatpush3.bf16.msra.mxu0 %v2282_v5  ;;  %v10698_v36 = vpop.permute.xlu0 %2405 }
 0x4cf   :  { %9035 = vmatprep.subr.msk.bf16.mxu0 %vm2229_vm6, %v2284_v30 }
 0x4d1   :  { %v10766_v30 = vpop.permute.xlu1 %2715 }
 0x4d2   :  { %8509 = vmatpush3.bf16.msra.mxu0 %v2293_v2  ;;  %v10701_v48 = vpop.permute.xlu0 %2591  ;;  %13087 = vst [vmem:[#allocation29_spill] sm:$0xff] %v10766_v30 }
 0x4d3   :  { %8522 = vmatprep.subr.bf16.mxu0 %v10698_v36  ;;  %13079 = vst [vmem:[#allocation21_spill] sm:$0xff] %v10701_v48 }
 0x4d6   :  { %v10703_v53 = vpop.permute.xlu0 %2593 }
 0x4d7   :  { %13080 = vst [vmem:[#allocation22_spill] sm:$0xff] %v10703_v53 }
 0x4da   :  { %v10716_v37 = vpop.permute.xlu0 %2653 }
 0x4db   :  { %13081 = vst [vmem:[#allocation23_spill] sm:$0xff] %v10716_v37 }
 0x4de   :  { %v10722_v39 = vpop.permute.xlu0 %2839 }
 0x4df   :  { %13082 = vst [vmem:[#allocation24_spill] sm:$0xff] %v10722_v39 }
 0x4e2   :  { %v10729_v44 = vpop.permute.xlu0 %2777 }
 0x4e3   :  { %13083 = vst [vmem:[#allocation25_spill] sm:$0xff] %v10729_v44 }
 0x4e6   :  { %v10743_v35 = vpop.permute.xlu0 %2963 }
 0x4e7   :  { %13085 = vst [vmem:[#allocation27_spill] sm:$0xff] %v10743_v35 }
 0x4ea   :  { %v10762_v26 = vpop.permute.xlu0 %2901 }
 0x4eb   :  { %13086 = vst [vmem:[#allocation28_spill] sm:$0xff] %v10762_v26 }
 0x4f5   :  { %v8392_v61 = vpop.f32.mrb[16].mxu1 }
 0x4f6   :  { %v10706_v62 = vadd.f32 %v8392_v61, %v10623_v33  ;;  %v737_v7 = vpop.f32.mrb[17].mxu1 }
 0x4f7   :  { %v8393_v9 = vpop.f32.mrb[18].mxu1  ;;  %v10709_v15 = vadd.f32 %v737_v7, %v10623_v33 }
 0x4f8   :  { %v740_v17 = vpop.f32.mrb[19].mxu1  ;;  %v1634_v28 = vsel %vm1609_vm5, %v10706_v62, -inf }
 0x4f9   :  { %v10714_v32 = vadd.f32 %v740_v17, %v10623_v33  ;;  %1635 = vmax.xlane.f32.xlu0 %v1634_v28  ;;  %v1628_v1 = vsel %vm1609_vm5, %v10709_v15, -inf }
 0x4fb   :  { %v1631_v23 = vsel %vm1609_vm5, %v10714_v32, -inf }
 0x4fc   :  { %1632 = vmax.xlane.f32.xlu1 %v1631_v23  ;;  %v10776_v23 = vpop.permute.xlu0 %3025 }
 0x4fd   :  { %1629 = vmax.xlane.f32.xlu0 %v1628_v1  ;;  %13088 = vst [vmem:[#allocation30_spill] sm:$0xff] %v10776_v23 }
 0x505   :  { %v8400_v10 = vpop.f32.mrb[16].mxu0 }
 0x506   :  { %v10727_v42 = vadd.f32 %v8400_v10, %v10623_v33  ;;  %v803_v40 = vpop.f32.mrb[17].mxu0  ;;  %v10778_v10 = vpop.permute.xlu1 %2717 }
 0x507   :  { %v8401_v52 = vpop.f32.mrb[18].mxu0  ;;  %v10732_v55 = vadd.f32 %v803_v40, %v10623_v33  ;;  %13089 = vst [vmem:[#allocation31_spill] sm:$0xff] %v10778_v10 }
 0x508   :  { %v806_v49 = vpop.f32.mrb[19].mxu0  ;;  %v1643_v57 = vsel %vm1609_vm5, %v10727_v42, -inf }
 0x509   :  { %1644 = vmax.xlane.f32.xlu1 %v1643_v57  ;;  %v1637_v6 = vsel %vm1609_vm5, %v10732_v55, -inf  ;;  %v10758_v27 = vadd.f32 %v806_v49, %v10623_v33 }
 0x50a   :  { %v8408_v59 = vpop.f32.mrb[20].mxu1 }
 0x50b   :  { %v10739_v60 = vadd.f32 %v8408_v59, %v10623_v33  ;;  %v869_v3 = vpop.f32.mrb[21].mxu1  ;;  %v1640_v25 = vsel %vm1609_vm5, %v10758_v27, -inf }
 0x50c   :  { %v8409_v8 = vpop.f32.mrb[22].mxu1  ;;  %v10746_v12 = vadd.f32 %v869_v3, %v10623_v33 }
 0x50d   :  { %v872_v19 = vpop.f32.mrb[23].mxu1  ;;  %v1652_v20 = vsel %vm1609_vm5, %v10739_v60, -inf  ;;  %1638 = vmax.xlane.f32.xlu1 %v1637_v6  ;;  %v10790_v6 = vpop.permute.xlu0 %2407 }
 0x50e   :  { %v10751_v63 = vadd.f32 %v872_v19, %v10623_v33  ;;  %1653 = vmax.xlane.f32.xlu0 %v1652_v20  ;;  %v1646_v29 = vsel %vm1609_vm5, %v10746_v12, -inf }
 0x510   :  { %v1649_v56 = vsel %vm1609_vm5, %v10751_v63, -inf }
 0x511   :  { %1650 = vmax.xlane.f32.xlu1 %v1649_v56  ;;  %v10797_v56 = vpop.permute.xlu1 %2841 }
 0x512   :  { %1647 = vmax.xlane.f32.xlu0 %v1646_v29  ;;  %13090 = vst [vmem:[#allocation32_spill] sm:$0xff] %v10797_v56 }
 0x515   :  { %v8416_v5 = vpop.f32.mrb[20].mxu0 }
 0x516   :  { %v10769_v2 = vadd.f32 %v8416_v5, %v10623_v33  ;;  %1641 = vmax.xlane.f32.xlu0 %v1640_v25  ;;  %v935_v61 = vpop.f32.mrb[21].mxu0  ;;  %v10804_v25 = vpop.permute.xlu0 %2531 }
 0x517   :  { %v8417_v7 = vpop.f32.mrb[22].mxu0  ;;  %v10772_v9 = vadd.f32 %v935_v61, %v10623_v33  ;;  %13091 = vst [vmem:[#allocation33_spill] sm:$0xff] %v10804_v25 }
 0x518   :  { %v938_v17 = vpop.f32.mrb[23].mxu0  ;;  %v1661_v28 = vsel %vm1609_vm5, %v10769_v2, -inf }
 0x519   :  { %1662 = vmax.xlane.f32.xlu1 %v1661_v28  ;;  %v1655_v49 = vsel %vm1609_vm5, %v10772_v9, -inf  ;;  %v10800_v29 = vadd.f32 %v938_v17, %v10623_v33 }
 0x51b   :  { %v8424_v1 = vpop.f32.mrb[24].mxu1  ;;  %v1658_v7 = vsel %vm1609_vm5, %v10800_v29, -inf }
 0x51c   :  { %v10781_v40 = vadd.f32 %v8424_v1, %v10623_v33  ;;  %v1001_v52 = vpop.f32.mrb[25].mxu1 }
 0x51d   :  { %v8425_v57 = vpop.f32.mrb[26].mxu1  ;;  %1656 = vmax.xlane.f32.xlu1 %v1655_v49  ;;  %v10786_v59 = vadd.f32 %v1001_v52, %v10623_v33  ;;  %v10808_v52 = vpop.permute.xlu1 %2965 }
 0x51e   :  { %v1004_v3 = vpop.f32.mrb[27].mxu1  ;;  %v1670_v8 = vsel %vm1609_vm5, %v10781_v40, -inf  ;;  %13092 = vst [vmem:[#allocation34_spill] sm:$0xff] %v10808_v52  ;;  %v10810_v57 = vpop.permute.xlu0 %2655 }
 0x51f   :  { %v10793_v19 = vadd.f32 %v1004_v3, %v10623_v33  ;;  %1671 = vmax.xlane.f32.xlu0 %v1670_v8  ;;  %v1664_v5 = vsel %vm1609_vm5, %v10786_v59, -inf  ;;  %13093 = vst [vmem:[#allocation35_spill] sm:$0xff] %v10810_v57 }
 0x521   :  { %v1667_v20 = vsel %vm1609_vm5, %v10793_v19, -inf  ;;  %v10812_v43 = vpop.permute.xlu1 %3087 }
 0x522   :  { %1668 = vmax.xlane.f32.xlu1 %v1667_v20  ;;  %13094 = vst [vmem:[#allocation36_spill] sm:$0xff] %v10812_v43 }
 0x523   :  { %1665 = vmax.xlane.f32.xlu0 %v1664_v5  ;;  %v10814_v5 = vpop.permute.xlu0 %2779 }
 0x524   :  { %13095 = vst [vmem:[#allocation37_spill] sm:$0xff] %v10814_v5 }
 0x525   :  { %v8432_v61 = vpop.f32.mrb[24].mxu0  ;;  %v10816_v0 = vpop.permute.xlu1 %3089 }
 0x526   :  { %v1067_v28 = vpop.f32.mrb[25].mxu0  ;;  %13096 = vst [vmem:[#allocation38_spill] sm:$0xff] %v10816_v0 }
 0x527   :  { %1659 = vmax.xlane.f32.xlu0 %v1658_v7  ;;  %v8433_v1 = vpop.f32.mrb[26].mxu0  ;;  %v10822_v7 = vpop.permute.xlu0 %2903 }
 0x528   :  { %v1070_v49 = vpop.f32.mrb[27].mxu0  ;;  %13097 = vst [vmem:[#allocation39_spill] sm:$0xff] %v10822_v7 }
 0x52b   :  { %v8440_v17 = vpop.f32.mrb[28].mxu1 }
 0x52c   :  { %v1133_v3 = vpop.f32.mrb[29].mxu1 }
 0x52d   :  { %v8441_v8 = vpop.f32.mrb[30].mxu1 }
 0x52e   :  { %v1136_v20 = vpop.f32.mrb[31].mxu1 }
 0x531   :  { %v1612_v24 = vpop.xlane.xlu1 %1611 }
 0x532   :  { %v1754_v14 = vsub.f32 %v10626_v45, %v1612_v24 }
 0x534   :  { %v1802_v43 = vmul.f32 1.442695, %v1754_v14 }
 0x535   :  { %v10818_v34 = vpop.f32.mrb[28].mxu0  ;;  %v1627_v56 = vpop.xlane.xlu1 %1626 }
 0x536   :  { %v10820_v31 = vpop.f32.mrb[29].mxu0 }
 0x537   :  { %v8449_v1 = vpop.f32.mrb[30].mxu0 }
 0x538   :  { %v10824_v21 = vpop.f32.mrb[31].mxu0  ;;  %v1759_v1 = vsub.f32 %v10630_v51, %v1627_v56  ;;  %v10844_v51 = vadd.f32 %v8440_v17, %v10623_v33 }
 0x539   :  { %v1621_v45 = vpop.xlane.xlu1 %1620 }
 0x53c   :  { %v1618_v8 = vpop.xlane.xlu0 %1617 }
 0x53d   :  { %v1756_v11 = vsub.f32 %v10643_v50, %v1618_v8  ;;  %v1812_v50 = vmul.f32 1.442695, %v1759_v1  ;;  %v10864_v8 = vadd.f32 %v1136_v20, %v10623_v33 }
 0x53f   :  { %v1806_v23 = vmul.f32 1.442695, %v1756_v11 }
 0x540   :  { %v1615_v52 = vpop.xlane.xlu0 %1614 }
 0x541   :  { %9586 = vpow2.f32 %v1806_v23  ;;  %v1755_v0 = vsub.f32 %v10654_v58, %v1615_v52  ;;  %v1688_v52 = vsel %vm1609_vm5, %v10844_v51, -inf }
 0x542   :  { %9588 = vpow2.f32 %v1802_v43 }
 0x543   :  { %v1804_v35 = vmul.f32 1.442695, %v1755_v0  ;;  %v1757_v0 = vsub.f32 %v10638_v46, %v1621_v45  ;;  %v10851_v46 = vadd.f32 %v1067_v28, %v10623_v33 }
 0x544   :  { %v1624_v7 = vpop.xlane.xlu0 %1623 }
 0x545   :  { %9590 = vpow2.f32 %v1804_v35  ;;  %v1758_v24 = vsub.f32 %v10662_v4, %v1624_v7  ;;  %v10841_v35 = vadd.f32 %v8432_v61, %v10623_v33  ;;  %v1808_v56 = vmul.f32 1.442695, %v1757_v0 }
 0x546   :  { %9592 = vpow2.f32 %v1812_v50  ;;  %v10854_v61 = vadd.f32 %v1133_v3, %v10623_v33  ;;  %v10861_v7 = vadd.f32 %v1070_v49, %v10623_v33  ;;  %v1673_v3 = vsel %vm1609_vm5, %v10851_v46, -inf }
 0x547   :  { %v1810_v43 = vmul.f32 1.442695, %v1758_v24  ;;  %v1679_v17 = vsel %vm1609_vm5, %v10841_v35, -inf  ;;  %v1685_v49 = vsel %vm1609_vm5, %v10864_v8, -inf  ;;  %v10886_v0 = vadd.f32 %v10818_v34, %v10623_v33 }
 0x548   :  { %v1682_v28 = vsel %vm1609_vm5, %v10854_v61, -inf  ;;  %v1676_v24 = vsel %vm1609_vm5, %v10861_v7, -inf }
 0x549   :  { %9594 = vpow2.f32 %v1810_v43 }
 0x54a   :  { %9596 = vpow2.f32 %v1808_v56 }
 0x54b   :  { %v10830_v26 = vpop.eup %9586 }
 0x54c   :  { %v1904_v14 = vsel %vm1609_vm5, %v10830_v26, 0.0  ;;  %v10835_v11 = vpop.eup %9588 }
 0x54d   :  { %1905 = vadd.xlane.f32.xlu1 %v1904_v14  ;;  %v1898_v23 = vsel %vm1609_vm5, %v10835_v11, 0.0 }
 0x54f   :  { %v10837_v58 = vpop.eup %9590 }
 0x550   :  { %v1901_v4 = vsel %vm1609_vm5, %v10837_v58, 0.0  ;;  %v10870_v1 = vpop.eup %9592 }
 0x551   :  { %1902 = vadd.xlane.f32.xlu0 %v1901_v4  ;;  %1899 = vadd.xlane.f32.xlu1 %v1898_v23  ;;  %v1913_v14 = vsel %vm1609_vm5, %v10870_v1, 0.0  ;;  %v10892_v4 = vadd.f32 %v10820_v31, %v10623_v33  ;;  %v1697_v23 = vsel %vm1609_vm5, %v10886_v0, -inf }
 0x553   :  { %v10876_v45 = vpop.eup %9594  ;;  %v1691_v56 = vsel %vm1609_vm5, %v10892_v4, -inf }
 0x554   :  { %v1910_v20 = vsel %vm1609_vm5, %v10876_v45, 0.0  ;;  %v10882_v50 = vpop.eup %9596 }
 0x555   :  { %1689 = vmax.xlane.f32.xlu0 %v1688_v52  ;;  %1680 = vmax.xlane.f32.xlu1 %v1679_v17  ;;  %v1907_v43 = vsel %vm1609_vm5, %v10882_v50, 0.0 }
 0x559   :  { %1683 = vmax.xlane.f32.xlu0 %v1682_v28  ;;  %1674 = vmax.xlane.f32.xlu1 %v1673_v3 }
 0x55d   :  { %1677 = vmax.xlane.f32.xlu0 %v1676_v24  ;;  %1686 = vmax.xlane.f32.xlu1 %v1685_v49 }
 0x561   :  { %1911 = vadd.xlane.f32.xlu0 %v1910_v20  ;;  %1914 = vadd.xlane.f32.xlu1 %v1913_v14  ;;  %v10913_v14 = vadd.f32 %v10824_v21, %v10623_v33 }
 0x565   :  { %1908 = vadd.xlane.f32.xlu1 %v1907_v43 }
 0x569   :  { %1698 = vmax.xlane.f32.xlu1 %v1697_v23  ;;  %v1694_v23 = vsel %vm1609_vm5, %v10913_v14, -inf }
 0x56d   :  { %1692 = vmax.xlane.f32.xlu1 %v1691_v56 }
 0x571   :  { %v8456_v52 = vpop.f32.mrb[32].mxu1 }
 0x572   :  { %v10899_v34 = vadd.f32 %v8456_v52, %v10623_v33  ;;  %v1265_v17 = vpop.f32.mrb[33].mxu1 }
 0x573   :  { %v8457_v28 = vpop.f32.mrb[34].mxu1  ;;  %v10902_v3 = vadd.f32 %v1265_v17, %v10623_v33 }
 0x574   :  { %v1268_v24 = vpop.f32.mrb[35].mxu1  ;;  %v1706_v31 = vsel %vm1609_vm5, %v10899_v34, -inf }
 0x575   :  { %v10907_v49 = vadd.f32 %v1268_v24, %v10623_v33  ;;  %1707 = vmax.xlane.f32.xlu0 %v1706_v31  ;;  %v1700_v43 = vsel %vm1609_vm5, %v10902_v3, -inf }
 0x577   :  { %v1703_v20 = vsel %vm1609_vm5, %v10907_v49, -inf }
 0x578   :  { %1704 = vmax.xlane.f32.xlu1 %v1703_v20 }
 0x579   :  { %1701 = vmax.xlane.f32.xlu0 %v1700_v43 }
 0x57d   :  { %1695 = vmax.xlane.f32.xlu0 %v1694_v23 }
 0x580   :  { %v8464_v56 = vpop.f32.mrb[32].mxu0 }
 0x581   :  { %v10920_v52 = vadd.f32 %v8464_v56, %v10623_v33  ;;  %v1331_v17 = vpop.f32.mrb[33].mxu0 }
 0x582   :  { %v8465_v28 = vpop.f32.mrb[34].mxu0  ;;  %v10923_v24 = vadd.f32 %v1331_v17, %v10623_v33 }
 0x583   :  { %v1334_v21 = vpop.f32.mrb[35].mxu0  ;;  %v1715_v31 = vsel %vm1609_vm5, %v10920_v52, -inf }
 0x584   :  { %1716 = vmax.xlane.f32.xlu1 %v1715_v31  ;;  %v1709_v43 = vsel %vm1609_vm5, %v10923_v24, -inf }
 0x587   :  { %v8472_v20 = vpop.f32.mrb[36].mxu1 }
 0x588   :  { %v10930_v23 = vadd.f32 %v8472_v20, %v10623_v33  ;;  %v1397_v5 = vpop.f32.mrb[37].mxu1  ;;  %1710 = vmax.xlane.f32.xlu1 %v1709_v43  ;;  %v10943_v20 = vadd.f32 %v1334_v21, %v10623_v33 }
 0x589   :  { %v8473_v56 = vpop.f32.mrb[38].mxu1  ;;  %v10933_v28 = vadd.f32 %v1397_v5, %v10623_v33 }
 0x58a   :  { %v1400_v17 = vpop.f32.mrb[39].mxu1  ;;  %v1724_v18 = vsel %vm1609_vm5, %v10930_v23, -inf  ;;  %v1636_v56 = vpop.xlane.xlu0 %1635 }
 0x58b   :  { %v10938_v39 = vadd.f32 %v1400_v17, %v10623_v33  ;;  %1725 = vmax.xlane.f32.xlu0 %v1724_v18  ;;  %v1718_v43 = vsel %vm1609_vm5, %v10933_v28, -inf  ;;  %v1633_v17 = vpop.xlane.xlu1 %1632  ;;  %v1712_v18 = vsel %vm1609_vm5, %v10943_v20, -inf  ;;  %v1762_v47 = vsub.f32 %v10706_v62, %v1636_v56 }
 0x58d   :  { %v1721_v31 = vsel %vm1609_vm5, %v10938_v39, -inf }
 0x58e   :  { %1722 = vmax.xlane.f32.xlu1 %v1721_v31 }
 0x58f   :  { %1719 = vmax.xlane.f32.xlu0 %v1718_v43  ;;  %v1761_v43 = vsub.f32 %v10714_v32, %v1633_v17 }
 0x590   :  { %v8480_v5 = vpop.f32.mrb[36].mxu0 }
 0x591   :  { %v10948_v44 = vadd.f32 %v8480_v5, %v10623_v33  ;;  %v1463_v10 = vpop.f32.mrb[37].mxu0  ;;  %v1630_v5 = vpop.xlane.xlu0 %1629 }
 0x592   :  { %v8481_v57 = vpop.f32.mrb[38].mxu0  ;;  %v10953_v21 = vadd.f32 %v1463_v10, %v10623_v33 }
 0x593   :  { %1713 = vmax.xlane.f32.xlu0 %v1712_v18  ;;  %v1466_v37 = vpop.f32.mrb[39].mxu0  ;;  %v1733_v31 = vsel %vm1609_vm5, %v10948_v44, -inf  ;;  %v1816_v18 = vmul.f32 1.442695, %v1761_v43 }
 0x594   :  { %13098 = vst [vmem:[#allocation40_spill] sm:$0xff] %v10953_v21  ;;  %1734 = vmax.xlane.f32.xlu1 %v1733_v31  ;;  %v1727_v53 = vsel %vm1609_vm5, %v10953_v21, -inf  ;;  %v1760_v21 = vsub.f32 %v10709_v15, %v1630_v5  ;;  %v10978_v56 = vadd.f32 %v1466_v37, %v10623_v33 }
 0x595   :  { %9598 = vpow2.f32 %v1816_v18 }
 0x596   :  { %v1645_v30 = vpop.xlane.xlu1 %1644  ;;  %v1814_v5 = vmul.f32 1.442695, %v1760_v21 }
 0x597   :  { %v8488_v25 = vpop.f32.mrb[40].mxu1  ;;  %v1765_v48 = vsub.f32 %v10727_v42, %v1645_v30 }
 0x598   :  { %v10962_v57 = vadd.f32 %v8488_v25, %v10623_v33  ;;  %v1529_v10 = vpop.f32.mrb[41].mxu1  ;;  %1728 = vmax.xlane.f32.xlu1 %v1727_v53  ;;  %v1818_v53 = vmul.f32 1.442695, %v1762_v47 }
 0x599   :  { %v8489_v16 = vpop.f32.mrb[42].mxu1  ;;  %v10966_v31 = vadd.f32 %v1529_v10, %v10623_v33 }
 0x59a   :  { %v1532_v32 = vpop.f32.mrb[43].mxu1  ;;  %v1742_v17 = vsel %vm1609_vm5, %v10962_v57, -inf  ;;  %v1639_v54 = vpop.xlane.xlu1 %1638  ;;  %v1824_v16 = vmul.f32 1.442695, %v1765_v48  ;;  %9600 = vpow2.f32 %v1818_v53 }
 0x59b   :  { %v10972_v62 = vadd.f32 %v1532_v32, %v10623_v33  ;;  %1743 = vmax.xlane.f32.xlu0 %v1742_v17  ;;  %v1654_v25 = vpop.xlane.xlu0 %1653  ;;  %v1763_v42 = vsub.f32 %v10732_v55, %v1639_v54  ;;  %v1736_v43 = vsel %vm1609_vm5, %v10966_v31, -inf  ;;  %v1730_v32 = vsel %vm1609_vm5, %v10978_v56, -inf }
 0x59c   :  { %v1768_v47 = vsub.f32 %v10739_v60, %v1654_v25  ;;  %9602 = vpow2.f32 %v1824_v16 }
 0x59d   :  { %v1739_v30 = vsel %vm1609_vm5, %v10972_v62, -inf  ;;  %v1820_v55 = vmul.f32 1.442695, %v1763_v42  ;;  %9604 = vpow2.f32 %v1814_v5 }
 0x59e   :  { %1740 = vmax.xlane.f32.xlu1 %v1739_v30  ;;  %v1651_v15 = vpop.xlane.xlu1 %1650  ;;  %v1830_v30 = vmul.f32 1.442695, %v1768_v47 }
 0x59f   :  { %1737 = vmax.xlane.f32.xlu0 %v1736_v43  ;;  %v1648_v10 = vpop.xlane.xlu0 %1647  ;;  %v1767_v54 = vsub.f32 %v10751_v63, %v1651_v15  ;;  %9606 = vpow2.f32 %v1820_v55  ;;  %v11000_v5 = vpop.eup %9598 }
 0x5a0   :  { %v8496_v48 = vpop.f32.mrb[40].mxu0  ;;  %v1766_v53 = vsub.f32 %v10746_v12, %v1648_v10  ;;  %9608 = vpow2.f32 %v1830_v30 }
 0x5a1   :  { %v10985_v18 = vadd.f32 %v8496_v48, %v10623_v33  ;;  %v1595_v37 = vpop.f32.mrb[41].mxu0  ;;  %v1828_v25 = vmul.f32 1.442695, %v1767_v54 }
 0x5a2   :  { %v8497_v17 = vpop.f32.mrb[42].mxu0  ;;  %v10996_v42 = vadd.f32 %v1595_v37, %v10623_v33  ;;  %v1826_v10 = vmul.f32 1.442695, %v1766_v53 }
 0x5a3   :  { %1731 = vmax.xlane.f32.xlu0 %v1730_v32  ;;  %v1598_v21 = vpop.f32.mrb[43].mxu0  ;;  %v1751_v63 = vsel %vm1609_vm5, %v10985_v18, -inf  ;;  %v1642_v16 = vpop.xlane.xlu0 %1641  ;;  %9610 = vpow2.f32 %v1828_v25  ;;  %v1919_v32 = vsel %vm1609_vm5, %v11000_v5, 0.0 }
 0x5a4   :  { %v10991_v60 = vadd.f32 %v1598_v21, %v10623_v33  ;;  %13099 = vst [vmem:[#allocation41_spill] sm:$0xff] %v10996_v42  ;;  %v1764_v47 = vsub.f32 %v10758_v27, %v1642_v16  ;;  %v11004_v55 = vpop.eup %9600  ;;  %v1745_v54 = vsel %vm1609_vm5, %v10996_v42, -inf  ;;  %9612 = vpow2.f32 %v1826_v10 }
 0x5a5   :  { %v1922_v25 = vsel %vm1609_vm5, %v11004_v55, 0.0 }
 0x5a6   :  { %v1663_v43 = vpop.xlane.xlu1 %1662  ;;  %v1748_v15 = vsel %vm1609_vm5, %v10991_v60, -inf  ;;  %v11010_v17 = vpop.eup %9602  ;;  %v1822_v21 = vmul.f32 1.442695, %v1764_v47 }
 0x5a7   :  { %1752 = vmax.xlane.f32.xlu0 %v1751_v63  ;;  %v1771_v12 = vsub.f32 %v10769_v2, %v1663_v43  ;;  %1749 = vmax.xlane.f32.xlu1 %v1748_v15  ;;  %v11013_v30 = vpop.eup %9604  ;;  %v1931_v16 = vsel %vm1609_vm5, %v11010_v17, 0.0 }
 0x5a8   :  { %v1916_v47 = vsel %vm1609_vm5, %v11013_v30, 0.0 }
 0x5a9   :  { %v1836_v48 = vmul.f32 1.442695, %v1771_v12  ;;  %v11020_v43 = vpop.eup %9606 }
 0x5aa   :  { %v1657_v37 = vpop.xlane.xlu1 %1656  ;;  %v11023_v10 = vpop.eup %9608 }
 0x5ab   :  { %1746 = vmax.xlane.f32.xlu0 %v1745_v54  ;;  %v1769_v2 = vsub.f32 %v10772_v9, %v1657_v37  ;;  %1920 = vadd.xlane.f32.xlu1 %v1919_v32  ;;  %9614 = vpow2.f32 %v1836_v48  ;;  %v1925_v48 = vsel %vm1609_vm5, %v11020_v43, 0.0 }
 0x5ac   :  { %v1672_v27 = vpop.xlane.xlu0 %1671  ;;  %9616 = vpow2.f32 %v1822_v21 }
 0x5ad   :  { %v1774_v53 = vsub.f32 %v10781_v40, %v1672_v27  ;;  %v1832_v63 = vmul.f32 1.442695, %v1769_v2  ;;  %v11029_v54 = vpop.eup %9610  ;;  %v1940_v27 = vsel %vm1609_vm5, %v11023_v10, 0.0 }
 0x5ae   :  { %v11033_v21 = vpop.eup %9612 }
 0x5af   :  { %1923 = vadd.xlane.f32.xlu0 %v1922_v25  ;;  %1932 = vadd.xlane.f32.xlu1 %v1931_v16  ;;  %v1842_v9 = vmul.f32 1.442695, %v1774_v53  ;;  %9618 = vpow2.f32 %v1832_v63  ;;  %v1669_v40 = vpop.xlane.xlu1 %1668  ;;  %v1937_v53 = vsel %vm1609_vm5, %v11029_v54, 0.0 }
 0x5b0   :  { %v1666_v15 = vpop.xlane.xlu0 %1665  ;;  %v1773_v2 = vsub.f32 %v10793_v19, %v1669_v40  ;;  %v1934_v19 = vsel %vm1609_vm5, %v11033_v21, 0.0 }
 0x5b1   :  { %v1772_v12 = vsub.f32 %v10786_v59, %v1666_v15  ;;  %9620 = vpow2.f32 %v1842_v9 }
 0x5b2   :  { %v1840_v16 = vmul.f32 1.442695, %v1773_v2 }
 0x5b3   :  { %v1838_v37 = vmul.f32 1.442695, %v1772_v12  ;;  %1917 = vadd.xlane.f32.xlu0 %v1916_v47  ;;  %1926 = vadd.xlane.f32.xlu1 %v1925_v48 }
 0x5b4   :  { %v1660_v32 = vpop.xlane.xlu0 %1659 }
 0x5b5   :  { %9622 = vpow2.f32 %v1838_v37  ;;  %v1770_v59 = vsub.f32 %v10800_v29, %v1660_v32  ;;  %v11039_v63 = vpop.eup %9614 }
 0x5b6   :  { %v11041_v9 = vpop.eup %9616  ;;  %v1949_v29 = vsel %vm1609_vm5, %v11039_v63, 0.0 }
 0x5b7   :  { %v1834_v25 = vmul.f32 1.442695, %v1770_v59  ;;  %1941 = vadd.xlane.f32.xlu0 %v1940_v27  ;;  %1938 = vadd.xlane.f32.xlu1 %v1937_v53  ;;  %v1928_v40 = vsel %vm1609_vm5, %v11041_v9, 0.0 }
 0x5b9   :  { %9624 = vpow2.f32 %v1834_v25  ;;  %v11047_v15 = vpop.eup %9618 }
 0x5ba   :  { %9626 = vpow2.f32 %v1840_v16  ;;  %v1943_v47 = vsel %vm1609_vm5, %v11047_v15, 0.0 }
 0x5bb   :  { %1935 = vadd.xlane.f32.xlu0 %v1934_v19  ;;  %1950 = vadd.xlane.f32.xlu1 %v1949_v29  ;;  %v11049_v12 = vpop.eup %9620 }
 0x5bc   :  { %13100 = vst [vmem:[#allocation42_spill] sm:$0xff] %v11049_v12  ;;  %v1958_v32 = vsel %vm1609_vm5, %v11049_v12, 0.0 }
 0x5bf   :  { %v11055_v48 = vpop.eup %9622  ;;  %1929 = vadd.xlane.f32.xlu0 %v1928_v40  ;;  %1944 = vadd.xlane.f32.xlu1 %v1943_v47 }
 0x5c0   :  { %13101 = vst [vmem:[#allocation43_spill] sm:$0xff] %v11055_v48  ;;  %v1952_v37 = vsel %vm1609_vm5, %v11055_v48, 0.0 }
 0x5c3   :  { %v11061_v2 = vpop.eup %9624  ;;  %1953 = vadd.xlane.f32.xlu0 %v1952_v37  ;;  %1959 = vadd.xlane.f32.xlu1 %v1958_v32 }
 0x5c4   :  { %13102 = vst [vmem:[#allocation44_spill] sm:$0xff] %v11061_v2  ;;  %v1946_v59 = vsel %vm1609_vm5, %v11061_v2, 0.0  ;;  %v11065_v27 = vpop.eup %9626 }
 0x5c5   :  { %13103 = vst [vmem:[#allocation45_spill] sm:$0xff] %v11065_v27  ;;  %v1955_v53 = vsel %vm1609_vm5, %v11065_v27, 0.0 }
 0x5c7   :  { %1947 = vadd.xlane.f32.xlu1 %v1946_v59 }
 0x5cb   :  { %1956 = vadd.xlane.f32.xlu1 %v1955_v53 }
 0x5da   :  { %v1906_v25 = vpop.xlane.xlu1 %1905 }
 0x5db   :  { %v2044_v16 = vmul.f32 5.656854, %v1906_v25 }
 0x5dd   :  { %9628 = vrcp.f32 %v2044_v16 }
 0x5de   :  { %v1903_v19 = vpop.xlane.xlu0 %1902  ;;  %v1900_v29 = vpop.xlane.xlu1 %1899 }
 0x5df   :  { %v2043_v40 = vmul.f32 5.656854, %v1903_v19  ;;  %v2042_v47 = vmul.f32 5.656854, %v1900_v29 }
 0x5e1   :  { %9630 = vrcp.f32 %v2043_v40 }
 0x5e2   :  { %9632 = vrcp.f32 %v2042_v47  ;;  %v1690_v37 = vpop.xlane.xlu0 %1689  ;;  %v1681_v32 = vpop.xlane.xlu1 %1680 }
 0x5e3   :  { %v1777_v33 = vsub.f32 %v10841_v35, %v1681_v32  ;;  %v1780_v59 = vsub.f32 %v10844_v51, %v1690_v37 }
 0x5e5   :  { %v1848_v48 = vmul.f32 1.442695, %v1777_v33  ;;  %v1854_v29 = vmul.f32 1.442695, %v1780_v59 }
 0x5e6   :  { %v1684_v12 = vpop.xlane.xlu0 %1683  ;;  %v1675_v42 = vpop.xlane.xlu1 %1674 }
 0x5e7   :  { %v1778_v53 = vsub.f32 %v10854_v61, %v1684_v12  ;;  %v1775_v25 = vsub.f32 %v10851_v46, %v1675_v42  ;;  %9634 = vpow2.f32 %v1848_v48  ;;  %v9629_v27 = vpop.eup %9628 }
 0x5e8   :  { %v2140_v61 = vmul.f32 %v9629_v27, %v10830_v26 }
 0x5e9   :  { %v1850_v16 = vmul.f32 1.442695, %v1778_v53  ;;  %v1844_v19 = vmul.f32 1.442695, %v1775_v25 }
 0x5ea   :  { %v1678_v40 = vpop.xlane.xlu0 %1677  ;;  %v1687_v47 = vpop.xlane.xlu1 %1686 }
 0x5eb   :  { %v9631_v2 = vpop.eup %9630  ;;  %9636 = vpow2.f32 %v1850_v16  ;;  %v1776_v35 = vsub.f32 %v10861_v7, %v1678_v40  ;;  %v1779_v33 = vsub.f32 %v10864_v8, %v1687_v47  ;;  %v2187_v7 = vpack.c.bf16 %v2140_v61, %v2140_v61 }
 0x5ec   :  { %v9633_v51 = vpop.eup %9632  ;;  %9638 = vpow2.f32 %v1844_v19  ;;  %v2139_v37 = vmul.f32 %v9631_v2, %v10837_v58  ;;  %v2355_v16 = vsel %vm2229_vm6, %v10690_v22, 0 }
 0x5ed   :  { %v1846_v46 = vmul.f32 1.442695, %v1776_v35  ;;  %v1852_v42 = vmul.f32 1.442695, %v1779_v33  ;;  %v2138_v12 = vmul.f32 %v9633_v51, %v10835_v11  ;;  %9640 = vpow2.f32 %v1854_v29 }
 0x5ee   :  { %v1912_v48 = vpop.xlane.xlu0 %1911  ;;  %v1915_v32 = vpop.xlane.xlu1 %1914 }
 0x5ef   :  { %9642 = vpow2.f32 %v1846_v46  ;;  %v2046_v59 = vmul.f32 5.656854, %v1912_v48  ;;  %v2047_v53 = vmul.f32 5.656854, %v1915_v32  ;;  %v2186_v25 = vpack.c.bf16 %v2139_v37, %v2138_v12 }
 0x5f0   :  { %9644 = vpow2.f32 %v1852_v42 }
 0x5f1   :  { %8502 = vmatprep.mubr.msk.bf16.mxu1 %vm1609_vm5, %v2186_v25  ;;  %v11079_v8 = vpop.eup %9634  ;;  %9646 = vrcp.f32 %v2047_v53 }
 0x5f2   :  { %8503 = vmatmul.mubr.msk.bf16.vlgmr.msra.gmra.mrb[44].mxu1 %vm1609_vm5, %v2187_v7  ;;  %v1909_v26 = vpop.xlane.xlu1 %1908  ;;  %9648 = vrcp.f32 %v2046_v59  ;;  %v1967_v58 = vsel %vm1609_vm5, %v11079_v8, 0.0 }
 0x5f3   :  { %8515 = vmatpush3.bf16.msra.mxu1 %v10684_v13  ;;  %v2045_v11 = vmul.f32 5.656854, %v1909_v26  ;;  %1968 = vadd.xlane.f32.xlu1 %v1967_v58 }
 0x5f4   :  { %9036 = vmatprep.subr.msk.bf16.mxu1 %vm2229_vm6, %v10690_v22 }
 0x5f5   :  { %v11087_v2 = vpop.eup %9636  ;;  %9650 = vrcp.f32 %v2045_v11 }
 0x5f6   :  { %v11089_v27 = vpop.eup %9638  ;;  %v1699_v19 = vpop.xlane.xlu1 %1698  ;;  %v1970_v13 = vsel %vm1609_vm5, %v11087_v2, 0.0 }
 0x5f7   :  { %8517 = vmatpush3.bf16.msra.mxu1 %v2355_v16  ;;  %v1783_v29 = vsub.f32 %v10886_v0, %v1699_v19  ;;  %1971 = vadd.xlane.f32.xlu0 %v1970_v13  ;;  %v1961_v40 = vsel %vm1609_vm5, %v11089_v27, 0.0  ;;  %v11098_v47 = vpop.eup %9640 }
 0x5f8   :  { %8530 = vmatprep.subr.bf16.mxu1 %v10724_v41  ;;  %1962 = vadd.xlane.f32.xlu1 %v1961_v40  ;;  %v1976_v61 = vsel %vm1609_vm5, %v11098_v47, 0.0 }
 0x5f9   :  { %v11101_v35 = vpop.eup %9642  ;;  %v1860_v33 = vmul.f32 1.442695, %v1783_v29 }
 0x5fa   :  { %v1693_v22 = vpop.xlane.xlu1 %1692  ;;  %v1964_v51 = vsel %vm1609_vm5, %v11101_v35, 0.0  ;;  %v11105_v37 = vpop.eup %9644 }
 0x5fb   :  { %9652 = vpow2.f32 %v1860_v33  ;;  %v1781_v0 = vsub.f32 %v10892_v4, %v1693_v22  ;;  %1965 = vadd.xlane.f32.xlu0 %v1964_v51  ;;  %v9647_v46 = vpop.eup %9646  ;;  %v1973_v32 = vsel %vm1609_vm5, %v11105_v37, 0.0 }
 0x5fc   :  { %1977 = vadd.xlane.f32.xlu1 %v1976_v61  ;;  %v9649_v42 = vpop.eup %9648  ;;  %v2143_v59 = vmul.f32 %v9647_v46, %v10870_v1 }
 0x5fd   :  { %v1856_v12 = vmul.f32 1.442695, %v1781_v0  ;;  %v2142_v4 = vmul.f32 %v9649_v42, %v10876_v45 }
 0x5fe   :  { %v2189_v11 = vpack.c.bf16 %v2143_v59, %v2143_v59 }
 0x5ff   :  { %v9651_v48 = vpop.eup %9650  ;;  %9654 = vpow2.f32 %v1856_v12 }
 0x600   :  { %1974 = vadd.xlane.f32.xlu1 %v1973_v32  ;;  %v2141_v53 = vmul.f32 %v9651_v48, %v10882_v50 }
 0x602   :  { %v1708_v25 = vpop.xlane.xlu0 %1707  ;;  %v2188_v7 = vpack.c.bf16 %v2142_v4, %v2141_v53 }
 0x603   :  { %v1786_v26 = vsub.f32 %v10899_v34, %v1708_v25 }
 0x604   :  { %8510 = vmatprep.mubr.msk.bf16.mxu0 %vm1609_vm5, %v2188_v7 }
 0x605   :  { %v11117_v58 = vpop.eup %9652  ;;  %v1866_v16 = vmul.f32 1.442695, %v1786_v26  ;;  %8511 = vmatmul.mubr.msk.bf16.vlgmr.msra.gmra.mrb[44].mxu0 %vm1609_vm5, %v2189_v11  ;;  %v1705_v1 = vpop.xlane.xlu1 %1704 }
 0x606   :  { %8523 = vmatpush3.bf16.msra.mxu0 %v10698_v36  ;;  %v1702_v19 = vpop.xlane.xlu0 %1701  ;;  %v1985_v50 = vsel %vm1609_vm5, %v11117_v58, 0.0  ;;  %v1785_v13 = vsub.f32 %v10907_v49, %v1705_v1  ;;  %v2417_v36 = vsel %vm2229_vm6, %v10790_v6, 0 }
 0x607   :  { %9656 = vpow2.f32 %v1866_v16  ;;  %9037 = vmatprep.subr.msk.bf16.mxu0 %vm2229_vm6, %v10790_v6  ;;  %v1784_v45 = vsub.f32 %v10902_v3, %v1702_v19  ;;  %1986 = vadd.xlane.f32.xlu1 %v1985_v50 }
 0x608   :  { %v1864_v3 = vmul.f32 1.442695, %v1785_v13 }
 0x609   :  { %v11126_v34 = vpop.eup %9654  ;;  %v1862_v29 = vmul.f32 1.442695, %v1784_v45 }
 0x60a   :  { %8525 = vmatpush3.bf16.msra.mxu0 %v2417_v36  ;;  %v1696_v40 = vpop.xlane.xlu0 %1695  ;;  %v1979_v33 = vsel %vm1609_vm5, %v11126_v34, 0.0 }
 0x60b   :  { %9658 = vpow2.f32 %v1862_v29  ;;  %8538 = vmatprep.subr.bf16.mxu0 %v10753_v38  ;;  %v1782_v22 = vsub.f32 %v10913_v14, %v1696_v40  ;;  %1980 = vadd.xlane.f32.xlu0 %v1979_v33 }
 0x60d   :  { %v1858_v51 = vmul.f32 1.442695, %v1782_v22 }
 0x60f   :  { %9660 = vpow2.f32 %v1858_v51  ;;  %v13104_v51 = vld [vmem:[#allocation40_spill] sm:$0xff] }
 0x610   :  { %9662 = vpow2.f32 %v1864_v3 }
 0x611   :  { %v11135_v0 = vpop.eup %9656  ;;  %v1717_v49 = vpop.xlane.xlu1 %1716 }
 0x612   :  { %v1789_v6 = vsub.f32 %v10920_v52, %v1717_v49  ;;  %v1994_v61 = vsel %vm1609_vm5, %v11135_v0, 0.0 }
 0x613   :  { %1995 = vadd.xlane.f32.xlu1 %v1994_v61 }
 0x614   :  { %v1872_v46 = vmul.f32 1.442695, %v1789_v6 }
 0x615   :  { %v11140_v42 = vpop.eup %9658  ;;  %v1711_v12 = vpop.xlane.xlu1 %1710 }
 0x616   :  { %9664 = vpow2.f32 %v1872_v46  ;;  %v1787_v14 = vsub.f32 %v10923_v24, %v1711_v12  ;;  %v1988_v48 = vsel %vm1609_vm5, %v11140_v42, 0.0 }
 0x617   :  { %1989 = vadd.xlane.f32.xlu1 %v1988_v48 }
 0x618   :  { %v1726_v32 = vpop.xlane.xlu0 %1725  ;;  %v1868_v59 = vmul.f32 1.442695, %v1787_v14 }
 0x619   :  { %v11145_v53 = vpop.eup %9660  ;;  %v1792_v52 = vsub.f32 %v10930_v23, %v1726_v32 }
 0x61a   :  { %9666 = vpow2.f32 %v1868_v59  ;;  %v1982_v4 = vsel %vm1609_vm5, %v11145_v53, 0.0  ;;  %v11150_v25 = vpop.eup %9662 }
 0x61b   :  { %v1878_v7 = vmul.f32 1.442695, %v1792_v52  ;;  %v1723_v26 = vpop.xlane.xlu1 %1722  ;;  %1983 = vadd.xlane.f32.xlu0 %v1982_v4  ;;  %v1991_v19 = vsel %vm1609_vm5, %v11150_v25, 0.0 }
 0x61c   :  { %v1720_v24 = vpop.xlane.xlu0 %1719  ;;  %v1791_v11 = vsub.f32 %v10938_v39, %v1723_v26 }
 0x61d   :  { %9668 = vpow2.f32 %v1878_v7  ;;  %v1790_v16 = vsub.f32 %v10933_v28, %v1720_v24 }
 0x61e   :  { %v1876_v1 = vmul.f32 1.442695, %v1791_v11 }
 0x61f   :  { %v1874_v23 = vmul.f32 1.442695, %v1790_v16  ;;  %1992 = vadd.xlane.f32.xlu0 %v1991_v19 }
 0x620   :  { %v11156_v50 = vpop.eup %9664  ;;  %9670 = vpow2.f32 %v1876_v1  ;;  %v1714_v45 = vpop.xlane.xlu0 %1713 }
 0x621   :  { %9672 = vpow2.f32 %v1874_v23  ;;  %v1788_v13 = vsub.f32 %v10943_v20, %v1714_v45  ;;  %v1735_v29 = vpop.xlane.xlu1 %1734  ;;  %v2003_v39 = vsel %vm1609_vm5, %v11156_v50, 0.0 }
 0x622   :  { %v1795_v36 = vsub.f32 %v10948_v44, %v1735_v29  ;;  %2004 = vadd.xlane.f32.xlu1 %v2003_v39 }
 0x623   :  { %v1870_v28 = vmul.f32 1.442695, %v1788_v13 }
 0x624   :  { %v11162_v40 = vpop.eup %9666  ;;  %v1884_v33 = vmul.f32 1.442695, %v1795_v36 }
 0x625   :  { %9674 = vpow2.f32 %v1870_v28  ;;  %v1729_v22 = vpop.xlane.xlu1 %1728  ;;  %v1997_v3 = vsel %vm1609_vm5, %v11162_v40, 0.0 }
 0x626   :  { %9676 = vpow2.f32 %v1884_v33  ;;  %v1793_v49 = vsub.f32 %v13104_v51, %v1729_v22  ;;  %1998 = vadd.xlane.f32.xlu1 %v1997_v3 }
 0x627   :  { %v11167_v20 = vpop.eup %9668 }
 0x628   :  { %v1744_v6 = vpop.xlane.xlu0 %1743  ;;  %v1880_v61 = vmul.f32 1.442695, %v1793_v49  ;;  %v2012_v46 = vsel %vm1609_vm5, %v11167_v20, 0.0 }
 0x629   :  { %v1798_v44 = vsub.f32 %v10962_v57, %v1744_v6 }
 0x62a   :  { %v11172_v12 = vpop.eup %9670  ;;  %9678 = vpow2.f32 %v1880_v61  ;;  %2013 = vadd.xlane.f32.xlu1 %v2012_v46 }
 0x62b   :  { %v11174_v14 = vpop.eup %9672  ;;  %v1890_v48 = vmul.f32 1.442695, %v1798_v44  ;;  %v1741_v59 = vpop.xlane.xlu1 %1740  ;;  %v2009_v57 = vsel %vm1609_vm5, %v11172_v12, 0.0 }
 0x62c   :  { %v1738_v32 = vpop.xlane.xlu0 %1737  ;;  %v2006_v52 = vsel %vm1609_vm5, %v11174_v14, 0.0  ;;  %v1797_v24 = vsub.f32 %v10972_v62, %v1741_v59 }
 0x62d   :  { %9680 = vpow2.f32 %v1890_v48  ;;  %v1796_v4 = vsub.f32 %v10966_v31, %v1738_v32  ;;  %2007 = vadd.xlane.f32.xlu0 %v2006_v52 }
 0x62e   :  { %2010 = vadd.xlane.f32.xlu1 %v2009_v57  ;;  %v1888_v23 = vmul.f32 1.442695, %v1797_v24 }
 0x62f   :  { %v11181_v7 = vpop.eup %9674  ;;  %v1886_v26 = vmul.f32 1.442695, %v1796_v4 }
 0x630   :  { %v11184_v11 = vpop.eup %9676  ;;  %v1732_v16 = vpop.xlane.xlu0 %1731  ;;  %v2000_v1 = vsel %vm1609_vm5, %v11181_v7, 0.0 }
 0x631   :  { %9682 = vpow2.f32 %v1886_v26  ;;  %v1794_v19 = vsub.f32 %v10978_v56, %v1732_v16  ;;  %2001 = vadd.xlane.f32.xlu0 %v2000_v1  ;;  %v2021_v31 = vsel %vm1609_vm5, %v11184_v11, 0.0 }
 0x632   :  { %2022 = vadd.xlane.f32.xlu1 %v2021_v31 }
 0x633   :  { %v1882_v45 = vmul.f32 1.442695, %v1794_v19 }
 0x634   :  { %v11191_v13 = vpop.eup %9678  ;;  %v1753_v29 = vpop.xlane.xlu0 %1752 }
 0x635   :  { %v1750_v62 = vpop.xlane.xlu1 %1749  ;;  %9684 = vpow2.f32 %v1882_v45  ;;  %v1801_v39 = vsub.f32 %v10985_v18, %v1753_v29  ;;  %v2015_v28 = vsel %vm1609_vm5, %v11191_v13, 0.0 }
 0x636   :  { %v1800_v36 = vsub.f32 %v10991_v60, %v1750_v62  ;;  %2016 = vadd.xlane.f32.xlu0 %v2015_v28  ;;  %9686 = vpow2.f32 %v1888_v23 }
 0x637   :  { %v11197_v56 = vpop.eup %9680  ;;  %v1896_v33 = vmul.f32 1.442695, %v1801_v39 }
 0x638   :  { %v1894_v22 = vmul.f32 1.442695, %v1800_v36  ;;  %v11199_v3 = vpop.xlane.xlu0 %1746  ;;  %v2030_v51 = vsel %vm1609_vm5, %v11197_v56, 0.0 }
 0x639   :  { %v1921_v49 = vpop.xlane.xlu1 %1920  ;;  %9688 = vpow2.f32 %v1896_v33  ;;  %2031 = vadd.xlane.f32.xlu1 %v2030_v51 }
 0x63a   :  { %9690 = vpow2.f32 %v1894_v22  ;;  %v2049_v44 = vmul.f32 5.656854, %v1921_v49 }
 0x63b   :  { %v11203_v18 = vpop.eup %9682 }
 0x63c   :  { %v1924_v60 = vpop.xlane.xlu0 %1923  ;;  %v2024_v6 = vsel %vm1609_vm5, %v11203_v18, 0.0 }
 0x63d   :  { %v1933_v61 = vpop.xlane.xlu1 %1932  ;;  %v2050_v46 = vmul.f32 5.656854, %v1924_v60  ;;  %2025 = vadd.xlane.f32.xlu1 %v2024_v6 }
 0x63e   :  { %v2053_v62 = vmul.f32 5.656854, %v1933_v61 }
 0x63f   :  { %v11207_v48 = vpop.eup %9684  ;;  %9692 = vrcp.f32 %v2050_v46 }
 0x640   :  { %v1918_v32 = vpop.xlane.xlu0 %1917  ;;  %v2018_v59 = vsel %vm1609_vm5, %v11207_v48, 0.0  ;;  %v11211_v4 = vpop.eup %9686  ;;  %9694 = vrcp.f32 %v2049_v44 }
 0x641   :  { %v1927_v52 = vpop.xlane.xlu1 %1926  ;;  %v2048_v57 = vmul.f32 5.656854, %v1918_v32  ;;  %2019 = vadd.xlane.f32.xlu0 %v2018_v59  ;;  %v2027_v19 = vsel %vm1609_vm5, %v11211_v4, 0.0 }
 0x642   :  { %v2051_v28 = vmul.f32 5.656854, %v1927_v52 }
 0x643   :  { %v11213_v26 = vpop.eup %9688  ;;  %9696 = vrcp.f32 %v2048_v57 }
 0x644   :  { %v11215_v24 = vpop.eup %9690  ;;  %v1942_v16 = vpop.xlane.xlu0 %1941  ;;  %v2039_v1 = vsel %vm1609_vm5, %v11213_v26, 0.0 }
 0x645   :  { %v1939_v31 = vpop.xlane.xlu1 %1938  ;;  %v2056_v23 = vmul.f32 5.656854, %v1942_v16  ;;  %2040 = vadd.xlane.f32.xlu1 %v2039_v1  ;;  %2028 = vadd.xlane.f32.xlu0 %v2027_v19  ;;  %v2036_v29 = vsel %vm1609_vm5, %v11215_v24, 0.0 }
 0x646   :  { %v2055_v45 = vmul.f32 5.656854, %v1939_v31 }
 0x647   :  { %9698 = vrcp.f32 %v2056_v23 }
 0x648   :  { %9700 = vrcp.f32 %v2055_v45  ;;  %v1936_v39 = vpop.xlane.xlu0 %1935 }
 0x649   :  { %v1951_v36 = vpop.xlane.xlu1 %1950  ;;  %v2054_v33 = vmul.f32 5.656854, %v1936_v39  ;;  %2037 = vadd.xlane.f32.xlu1 %v2036_v29  ;;  %v9693_v22 = vpop.eup %9692 }
 0x64a   :  { %v9695_v51 = vpop.eup %9694  ;;  %v2146_v46 = vmul.f32 %v9693_v22, %v11004_v55  ;;  %v2059_v59 = vmul.f32 5.656854, %v1951_v36 }
 0x64b   :  { %9702 = vrcp.f32 %v2054_v33  ;;  %v2145_v61 = vmul.f32 %v9695_v51, %v11000_v5 }
 0x64c   :  { %9704 = vrcp.f32 %v2053_v62  ;;  %v1930_v49 = vpop.xlane.xlu0 %1929  ;;  %v2191_v19 = vpack.c.bf16 %v2146_v46, %v2146_v46  ;;  %v13105_v62 = vld [vmem:[#allocation26_spill] sm:$0xff] }
 0x64d   :  { %v1945_v60 = vpop.xlane.xlu1 %1944  ;;  %v9697_v6 = vpop.eup %9696  ;;  %9706 = vrcp.f32 %v2051_v28  ;;  %v2052_v44 = vmul.f32 5.656854, %v1930_v49  ;;  %v13107_v46 = vld [vmem:[#allocation18_spill] sm:$0xff] }
 0x64e   :  { %v2144_v32 = vmul.f32 %v9697_v6, %v11013_v30  ;;  %v2057_v1 = vmul.f32 5.656854, %v1945_v60  ;;  %v13106_v60 = vld [vmem:[#allocation21_spill] sm:$0xff] }
 0x64f   :  { %9708 = vrcp.f32 %v2052_v44 }
 0x650   :  { %v2190_v52 = vpack.c.bf16 %v2145_v61, %v2144_v32  ;;  %v1954_v23 = vpop.xlane.xlu0 %1953  ;;  %9710 = vrcp.f32 %v2059_v59  ;;  %v13108_v61 = vld [vmem:[#allocation17_spill] sm:$0xff] }
 0x651   :  { %v1960_v57 = vpop.xlane.xlu1 %1959  ;;  %v9699_v16 = vpop.eup %9698  ;;  %9712 = vrcp.f32 %v2057_v1  ;;  %v2060_v29 = vmul.f32 5.656854, %v1954_v23  ;;  %v13110_v1 = vld [vmem:[#allocation33_spill] sm:$0xff] }
 0x652   :  { %v9701_v31 = vpop.eup %9700  ;;  %8518 = vmatprep.mubr.msk.bf16.mxu1 %vm1609_vm5, %v2190_v52  ;;  %v2062_v55 = vmul.f32 5.656854, %v1960_v57  ;;  %v2152_v36 = vmul.f32 %v9699_v16, %v11023_v10  ;;  %v13109_v52 = vld [vmem:[#allocation22_spill] sm:$0xff] }
 0x653   :  { %8519 = vmatmul.mubr.msk.bf16.vlgmr.msra.gmra.mrb[48].mxu1 %vm1609_vm5, %v2191_v19  ;;  %v2151_v5 = vmul.f32 %v9701_v31, %v11029_v54  ;;  %v13111_v19 = vld [vmem:[#allocation29_spill] sm:$0xff] }
 0x654   :  { %8531 = vmatpush3.bf16.msra.mxu1 %v10724_v41  ;;  %v2479_v41 = vsel %vm2229_vm6, %v13105_v62, 0  ;;  %v2195_v6 = vpack.c.bf16 %v2152_v36, %v2152_v36 }
 0x655   :  { %v1948_v30 = vpop.xlane.xlu1 %1947  ;;  %v9703_v45 = vpop.eup %9702  ;;  %9038 = vmatprep.subr.msk.bf16.mxu1 %vm2229_vm6, %v13105_v62 }
 0x656   :  { %v2058_v39 = vmul.f32 5.656854, %v1948_v30  ;;  %v9705_v28 = vpop.eup %9704  ;;  %v2150_v33 = vmul.f32 %v9703_v45, %v11033_v21  ;;  %v13112_v30 = vld [vmem:[#allocation44_spill] sm:$0xff] }
 0x657   :  { %v9707_v22 = vpop.eup %9706  ;;  %v2149_v10 = vmul.f32 %v9705_v28, %v11010_v17  ;;  %v13114_v28 = vld [vmem:[#allocation23_spill] sm:$0xff] }
 0x658   :  { %9714 = vrcp.f32 %v2058_v39  ;;  %8533 = vmatpush3.bf16.msra.mxu1 %v2479_v41  ;;  %v2194_v54 = vpack.c.bf16 %v2151_v5, %v2150_v33  ;;  %v2147_v21 = vmul.f32 %v9707_v22, %v11020_v43  ;;  %v2603_v43 = vsel %vm2229_vm6, %v13109_v52, 0  ;;  %v13115_v22 = vld [vmem:[#allocation42_spill] sm:$0xff] }
 0x659   :  { %9716 = vrcp.f32 %v2062_v55  ;;  %v1957_v51 = vpop.xlane.xlu1 %1956  ;;  %v9709_v49 = vpop.eup %9708  ;;  %8546 = vmatprep.subr.bf16.mxu1 %v13106_v60  ;;  %v2193_v17 = vpack.c.bf16 %v2149_v10, %v2149_v10  ;;  %v13119_v10 = vld [vmem:[#allocation31_spill] sm:$0xff] }
 0x65a   :  { %9718 = vrcp.f32 %v2060_v29  ;;  %v2061_v44 = vmul.f32 5.656854, %v1957_v51  ;;  %3149 = vrot.lane.b32.xlu1 %v13107_v46, %s10144_s6  ;;  %8534 = vmatprep.mubr.msk.bf16.mxu1 %vm1609_vm5, %v2194_v54  ;;  %v2148_v32 = vmul.f32 %v9709_v49, %v11041_v9  ;;  %v9711_v57 = vpop.eup %9710  ;;  %v2541_v29 = vsel %vm2229_vm6, %v13110_v1, 0  ;;  %v13117_v54 = vld [vmem:[#allocation45_spill] sm:$0xff] }
 0x65b   :  { %3027 = vrot.lane.b32.xlu0 %v13108_v61, %s10144_s6  ;;  %8535 = vmatmul.mubr.msk.bf16.vlgmr.msra.gmra.mrb[52].mxu1 %vm1609_vm5, %v2195_v6  ;;  %v9713_v16 = vpop.eup %9712  ;;  %v2155_v31 = vmul.f32 %v9711_v57, %v11039_v63  ;;  %v13120_v46 = vld [vmem:[#allocation25_spill] sm:$0xff] }
 0x65c   :  { %9720 = vrcp.f32 %v2061_v44  ;;  %8547 = vmatpush3.bf16.msra.mxu1 %v13106_v60  ;;  %v2192_v59 = vpack.c.bf16 %v2148_v32, %v2147_v21  ;;  %v2153_v55 = vmul.f32 %v9713_v16, %v11047_v15  ;;  %v13116_v15 = vld [vmem:[#allocation43_spill] sm:$0xff]  ;;  %v2727_v21 = vsel %vm2229_vm6, %v13119_v10, 0  ;;  %v13121_v32 = vld [vmem:[#allocation24_spill] sm:$0xff] }
 0x65d   :  { %9040 = vmatprep.subr.msk.bf16.mxu1 %vm2229_vm6, %v13109_v52  ;;  %v2197_v33 = vpack.c.bf16 %v2155_v31, %v2155_v31  ;;  %v13118_v60 = vld [vmem:[#allocation35_spill] sm:$0xff] }
 0x65e   :  { %8526 = vmatprep.mubr.msk.bf16.mxu0 %vm1609_vm5, %v2192_v59  ;;  %v2665_v44 = vsel %vm2229_vm6, %v13118_v60, 0 }
 0x65f   :  { %8527 = vmatmul.mubr.msk.bf16.vlgmr.msra.gmra.mrb[48].mxu0 %vm1609_vm5, %v2193_v17 }
 0x660   :  { %8539 = vmatpush3.bf16.msra.mxu0 %v10753_v38  ;;  %8549 = vmatpush3.bf16.msra.mxu1 %v2603_v43  ;;  %v13113_v38 = vld [vmem:[#allocation41_spill] sm:$0xff] }
 0x661   :  { %9039 = vmatprep.subr.msk.bf16.mxu0 %vm2229_vm6, %v13110_v1  ;;  %8562 = vmatprep.subr.bf16.mxu1 %v13111_v19  ;;  %v1799_v62 = vsub.f32 %v13113_v38, %v11199_v3 }
 0x662   :  { %v9715_v9 = vpop.eup %9714 }
 0x663   :  { %v9717_v23 = vpop.eup %9716  ;;  %v2154_v5 = vmul.f32 %v9715_v9, %v13112_v30  ;;  %v1892_v49 = vmul.f32 1.442695, %v1799_v62 }
 0x664   :  { %v9719_v45 = vpop.eup %9718  ;;  %8541 = vmatpush3.bf16.msra.mxu0 %v2541_v29  ;;  %v2158_v63 = vmul.f32 %v9717_v23, %v13115_v22 }
 0x665   :  { %v2196_v39 = vpack.c.bf16 %v2154_v5, %v2153_v55  ;;  %8554 = vmatprep.subr.bf16.mxu0 %v13114_v28  ;;  %v2156_v41 = vmul.f32 %v9719_v45, %v13116_v15  ;;  %9722 = vpow2.f32 %v1892_v49  ;;  %v13122_v5 = vld [vmem:[#allocation19_spill] sm:$0xff] }
 0x666   :  { %v9721_v36 = vpop.eup %9720  ;;  %v2199_v6 = vpack.c.bf16 %v2158_v63, %v2158_v63 }
 0x667   :  { %8542 = vmatprep.mubr.msk.bf16.mxu0 %vm1609_vm5, %v2196_v39  ;;  %v2157_v51 = vmul.f32 %v9721_v36, %v13117_v54 }
 0x668   :  { %8543 = vmatmul.mubr.msk.bf16.vlgmr.msra.gmra.mrb[52].mxu0 %vm1609_vm5, %v2197_v33 }
 0x669   :  { %8555 = vmatpush3.bf16.msra.mxu0 %v13114_v28  ;;  %v2198_v3 = vpack.c.bf16 %v2157_v51, %v2156_v41 }
 0x66a   :  { %9041 = vmatprep.subr.msk.bf16.mxu0 %vm2229_vm6, %v13118_v60  ;;  %v13125_v60 = vld [vmem:[#allocation32_spill] sm:$0xff] }
 0x66b   :  { %8550 = vmatprep.mubr.msk.bf16.mxu1 %vm1609_vm5, %v2198_v3 }
 0x66c   :  { %8551 = vmatmul.mubr.msk.bf16.vlgmr.msra.gmra.mrb[56].mxu1 %vm1609_vm5, %v2199_v6 }
 0x66d   :  { %8557 = vmatpush3.bf16.msra.mxu0 %v2665_v44  ;;  %8563 = vmatpush3.bf16.msra.mxu1 %v13111_v19  ;;  %v2851_v44 = vsel %vm2229_vm6, %v13125_v60, 0 }
 0x66e   :  { %9042 = vmatprep.subr.msk.bf16.mxu1 %vm2229_vm6, %v13119_v10  ;;  %8570 = vmatprep.subr.bf16.mxu0 %v13120_v46 }
 0x66f   :  { %v11284_v61 = vpop.eup %9722 }
 0x670   :  { %v2033_v59 = vsel %vm1609_vm5, %v11284_v61, 0.0 }
 0x671   :  { %8565 = vmatpush3.bf16.msra.mxu1 %v2727_v21 }
 0x672   :  { %8578 = vmatprep.subr.bf16.mxu1 %v13121_v32 }
 0x67a   :  { %2034 = vadd.xlane.f32.xlu0 %v2033_v59 }
 0x680   :  { %v1969_v52 = vpop.xlane.xlu1 %1968 }
 0x681   :  { %v2065_v17 = vmul.f32 5.656854, %v1969_v52 }
 0x683   :  { %9724 = vrcp.f32 %v2065_v17 }
 0x684   :  { %v1972_v57 = vpop.xlane.xlu0 %1971 }
 0x685   :  { %v1963_v16 = vpop.xlane.xlu1 %1962  ;;  %v2066_v31 = vmul.f32 5.656854, %v1972_v57 }
 0x686   :  { %v2063_v43 = vmul.f32 5.656854, %v1963_v16 }
 0x688   :  { %v1966_v9 = vpop.xlane.xlu0 %1965  ;;  %9726 = vrcp.f32 %v2063_v43 }
 0x689   :  { %v2064_v1 = vmul.f32 5.656854, %v1966_v9  ;;  %v1978_v19 = vpop.xlane.xlu1 %1977 }
 0x68a   :  { %v2068_v23 = vmul.f32 5.656854, %v1978_v19 }
 0x68b   :  { %9728 = vrcp.f32 %v2064_v1 }
 0x68c   :  { %9730 = vrcp.f32 %v2068_v23 }
 0x68d   :  { %v1975_v55 = vpop.xlane.xlu1 %1974  ;;  %9732 = vrcp.f32 %v2066_v31  ;;  %v9725_v45 = vpop.eup %9724 }
 0x68e   :  { %v2067_v30 = vmul.f32 5.656854, %v1975_v55  ;;  %v2161_v62 = vmul.f32 %v9725_v45, %v11079_v8 }
 0x690   :  { %9734 = vrcp.f32 %v2067_v30  ;;  %3151 = vrot.lane.b32.xlu0 %v13122_v5, %s10144_s6  ;;  %v2201_v63 = vpack.c.bf16 %v2161_v62, %v2161_v62 }
 0x692   :  { %v9727_v29 = vpop.eup %9726 }
 0x693   :  { %v2159_v39 = vmul.f32 %v9727_v29, %v11089_v27  ;;  %v13123_v27 = vld [vmem:[#allocation37_spill] sm:$0xff] }
 0x694   :  { %v1987_v8 = vpop.xlane.xlu1 %1986  ;;  %v2789_v3 = vsel %vm2229_vm6, %v13123_v27, 0 }
 0x695   :  { %v9729_v38 = vpop.eup %9728  ;;  %v2071_v6 = vmul.f32 5.656854, %v1987_v8 }
 0x696   :  { %v2160_v36 = vmul.f32 %v9729_v38, %v11101_v35  ;;  %v9731_v28 = vpop.eup %9730 }
 0x697   :  { %v9733_v33 = vpop.eup %9732  ;;  %v2164_v41 = vmul.f32 %v9731_v28, %v11098_v47  ;;  %9736 = vrcp.f32 %v2071_v6 }
 0x698   :  { %v2200_v22 = vpack.c.bf16 %v2160_v36, %v2159_v39  ;;  %v2162_v54 = vmul.f32 %v9733_v33, %v11087_v2  ;;  %v13124_v2 = vld [vmem:[#allocation28_spill] sm:$0xff] }
 0x699   :  { %v2203_v49 = vpack.c.bf16 %v2164_v41, %v2164_v41 }
 0x69a   :  { %v9735_v15 = vpop.eup %9734  ;;  %8558 = vmatprep.mubr.msk.bf16.mxu0 %vm1609_vm5, %v2200_v22 }
 0x69b   :  { %8559 = vmatmul.mubr.msk.bf16.vlgmr.msra.gmra.mrb[56].mxu0 %vm1609_vm5, %v2201_v63  ;;  %v2163_v51 = vmul.f32 %v9735_v15, %v11105_v37  ;;  %v1981_v37 = vpop.xlane.xlu0 %1980 }
 0x69c   :  { %8571 = vmatpush3.bf16.msra.mxu0 %v13120_v46  ;;  %v2069_v10 = vmul.f32 5.656854, %v1981_v37  ;;  %v13126_v46 = vld [vmem:[#allocation27_spill] sm:$0xff]  ;;  %v13130_v37 = vld [vmem:[#allocation36_spill] sm:$0xff] }
 0x69d   :  { %9043 = vmatprep.subr.msk.bf16.mxu0 %vm2229_vm6, %v13123_v27  ;;  %v2202_v35 = vpack.c.bf16 %v2163_v51, %v2162_v54 }
 0x69e   :  { %9738 = vrcp.f32 %v2069_v10 }
 0x69f   :  { %8566 = vmatprep.mubr.msk.bf16.mxu1 %vm1609_vm5, %v2202_v35  ;;  %v13128_v35 = vld [vmem:[#allocation34_spill] sm:$0xff] }
 0x6a0   :  { %8567 = vmatmul.mubr.msk.bf16.vlgmr.msra.gmra.mrb[60].mxu1 %vm1609_vm5, %v2203_v49  ;;  %8573 = vmatpush3.bf16.msra.mxu0 %v2789_v3  ;;  %v1996_v47 = vpop.xlane.xlu1 %1995  ;;  %v13129_v49 = vld [vmem:[#allocation30_spill] sm:$0xff]  ;;  %v2975_v3 = vsel %vm2229_vm6, %v13128_v35, 0 }
 0x6a1   :  { %8579 = vmatpush3.bf16.msra.mxu1 %v13121_v32  ;;  %8586 = vmatprep.subr.bf16.mxu0 %v13124_v2  ;;  %v2074_v59 = vmul.f32 5.656854, %v1996_v47  ;;  %v9737_v9 = vpop.eup %9736 }
 0x6a2   :  { %9044 = vmatprep.subr.msk.bf16.mxu1 %vm2229_vm6, %v13125_v60  ;;  %v2167_v23 = vmul.f32 %v9737_v9, %v11117_v58 }
 0x6a4   :  { %v1990_v21 = vpop.xlane.xlu1 %1989  ;;  %v2205_v28 = vpack.c.bf16 %v2167_v23, %v2167_v23 }
 0x6a5   :  { %8581 = vmatpush3.bf16.msra.mxu1 %v2851_v44  ;;  %v2072_v32 = vmul.f32 5.656854, %v1990_v21 }
 0x6a6   :  { %8594 = vmatprep.subr.bf16.mxu1 %v13126_v46 }
 0x6a8   :  { %v1984_v52 = vpop.xlane.xlu0 %1983  ;;  %v9739_v1 = vpop.eup %9738 }
 0x6a9   :  { %v2070_v17 = vmul.f32 5.656854, %v1984_v52  ;;  %v2165_v30 = vmul.f32 %v9739_v1, %v11126_v34 }
 0x6ab   :  { %9740 = vrcp.f32 %v2070_v17 }
 0x6ac   :  { %9742 = vrcp.f32 %v2074_v59  ;;  %v1993_v57 = vpop.xlane.xlu0 %1992 }
 0x6ad   :  { %9744 = vrcp.f32 %v2072_v32  ;;  %v2073_v16 = vmul.f32 5.656854, %v1993_v57 }
 0x6af   :  { %9746 = vrcp.f32 %v2073_v16  ;;  %v2005_v43 = vpop.xlane.xlu1 %2004 }
 0x6b0   :  { %v2077_v38 = vmul.f32 5.656854, %v2005_v43 }
 0x6b3   :  { %v1999_v19 = vpop.xlane.xlu1 %1998 }
 0x6b4   :  { %v2075_v15 = vmul.f32 5.656854, %v1999_v19 }
 0x6b5   :  { %v9741_v31 = vpop.eup %9740 }
 0x6b6   :  { %v9743_v55 = vpop.eup %9742  ;;  %v2166_v5 = vmul.f32 %v9741_v31, %v11145_v53 }
 0x6b7   :  { %v9745_v45 = vpop.eup %9744  ;;  %v2014_v29 = vpop.xlane.xlu1 %2013  ;;  %v2170_v33 = vmul.f32 %v9743_v55, %v11135_v0  ;;  %v13127_v0 = vld [vmem:[#allocation39_spill] sm:$0xff] }
 0x6b8   :  { %v2080_v62 = vmul.f32 5.656854, %v2014_v29  ;;  %v2204_v39 = vpack.c.bf16 %v2166_v5, %v2165_v30  ;;  %v2168_v63 = vmul.f32 %v9745_v45, %v11140_v42 }
 0x6b9   :  { %v9747_v36 = vpop.eup %9746  ;;  %v2207_v51 = vpack.c.bf16 %v2170_v33, %v2170_v33 }
 0x6ba   :  { %v2008_v22 = vpop.xlane.xlu0 %2007  ;;  %8574 = vmatprep.mubr.msk.bf16.mxu0 %vm1609_vm5, %v2204_v39  ;;  %v2169_v58 = vmul.f32 %v9747_v36, %v11150_v25  ;;  %9748 = vrcp.f32 %v2080_v62  ;;  %v2913_v25 = vsel %vm2229_vm6, %v13127_v0, 0  ;;  %v13132_v36 = vmov 0.0  }
 0x6bb   :  { %v2078_v34 = vmul.f32 5.656854, %v2008_v22  ;;  %8575 = vmatmul.mubr.msk.bf16.vlgmr.msra.gmra.mrb[60].mxu0 %vm1609_vm5, %v2205_v28  ;;  %v2011_v53 = vpop.xlane.xlu1 %2010  ;;  %9750 = vrcp.f32 %v2077_v38 }
 0x6bc   :  { %8587 = vmatpush3.bf16.msra.mxu0 %v13124_v2  ;;  %v2079_v41 = vmul.f32 5.656854, %v2011_v53  ;;  %v2206_v54 = vpack.c.bf16 %v2169_v58, %v2168_v63 }
 0x6bd   :  { %9752 = vrcp.f32 %v2078_v34  ;;  %9045 = vmatprep.subr.msk.bf16.mxu0 %vm2229_vm6, %v13127_v0 }
 0x6be   :  { %v2002_v8 = vpop.xlane.xlu0 %2001  ;;  %9754 = vrcp.f32 %v2079_v41  ;;  %8582 = vmatprep.mubr.msk.bf16.mxu1 %vm1609_vm5, %v2206_v54 }
 0x6bf   :  { %9756 = vrcp.f32 %v2075_v15  ;;  %v2076_v42 = vmul.f32 5.656854, %v2002_v8  ;;  %8583 = vmatmul.mubr.msk.bf16.vlgmr.msra.gmra.mrb[64].mxu1 %vm1609_vm5, %v2207_v51  ;;  %v2023_v27 = vpop.xlane.xlu1 %2022 }
 0x6c0   :  { %8589 = vmatpush3.bf16.msra.mxu0 %v2913_v25  ;;  %8595 = vmatpush3.bf16.msra.mxu1 %v13126_v46  ;;  %v2083_v43 = vmul.f32 5.656854, %v2023_v27 }
 0x6c1   :  { %9758 = vrcp.f32 %v2076_v42  ;;  %9046 = vmatprep.subr.msk.bf16.mxu1 %vm2229_vm6, %v13128_v35  ;;  %8602 = vmatprep.subr.bf16.mxu0 %v13129_v49 }
 0x6c2   :  { %9760 = vrcp.f32 %v2083_v43 }
 0x6c3   :  { %v2017_v59 = vpop.xlane.xlu0 %2016 }
 0x6c4   :  { %8597 = vmatpush3.bf16.msra.mxu1 %v2975_v3  ;;  %v9749_v47 = vpop.eup %9748  ;;  %v2081_v1 = vmul.f32 5.656854, %v2017_v59 }
 0x6c5   :  { %v11333_v2 = vpop.f32.mrb[44].mxu1  ;;  %8610 = vmatprep.subr.bf16.mxu1 %v13130_v37  ;;  %v9751_v60 = vpop.eup %9750  ;;  %v2176_v32 = vmul.f32 %v9749_v47, %v11167_v20 }
 0x6c6   :  { %v11336_v6 = vpop.f32.mrb[45].mxu1  ;;  %v2032_v44 = vpop.xlane.xlu1 %2031  ;;  %v2173_v31 = vmul.f32 %v9751_v60, %v11156_v50  ;;  %9762 = vrcp.f32 %v2081_v1  ;;  %v13131_v50 = vld [vmem:[#allocation38_spill] sm:$0xff] }
 0x6c7   :  { %v9753_v10 = vpop.eup %9752  ;;  %v8505_v46 = vpop.f32.mrb[46].mxu1  ;;  %v2211_v5 = vpack.c.bf16 %v2176_v32, %v2176_v32  ;;  %v2086_v20 = vmul.f32 5.656854, %v2032_v44  ;;  %v3099_v62 = vsel %vm2229_vm6, %v13131_v50, 0  ;;  %v9555_v1 = vld [vmem:[#allocation2 + $0x24] ss:$16 sps:$4 sm:$0xff]  }
 0x6c8   :  { %v9755_v21 = vpop.eup %9754  ;;  %v11338_v52 = vpop.f32.mrb[47].mxu1  ;;  %v2174_v57 = vmul.f32 %v9753_v10, %v11174_v14  ;;  %v2209_v38 = vpack.c.bf16 %v2173_v31, %v2173_v31 }
 0x6c9   :  { %v9757_v17 = vpop.eup %9756  ;;  %v2175_v16 = vmul.f32 %v9755_v21, %v11172_v12 }
 0x6ca   :  { %v2026_v23 = vpop.xlane.xlu1 %2025  ;;  %v2171_v55 = vmul.f32 %v9757_v17, %v11162_v40 }
 0x6cb   :  { %v9759_v9 = vpop.eup %9758  ;;  %v2210_v19 = vpack.c.bf16 %v2175_v16, %v2174_v57  ;;  %v2084_v12 = vmul.f32 5.656854, %v2026_v23  ;;  %v9552_v16 = vld [vmem:[#allocation2 + $0x4] ss:$16 sps:$4 sm:$0xff]  }
 0x6cc   :  { %v2172_v30 = vmul.f32 %v9759_v9, %v11181_v7  ;;  %v9761_v63 = vpop.eup %9760 }
 0x6cd   :  { %8598 = vmatprep.mubr.msk.bf16.mxu1 %vm1609_vm5, %v2210_v19  ;;  %v2179_v51 = vmul.f32 %v9761_v63, %v11184_v11 }
 0x6ce   :  { %v2020_v45 = vpop.xlane.xlu0 %2019  ;;  %v2208_v14 = vpack.c.bf16 %v2172_v30, %v2171_v55  ;;  %8599 = vmatmul.mubr.msk.bf16.vlgmr.msra.gmra.mrb[68].mxu1 %vm1609_vm5, %v2211_v5 }
 0x6cf   :  { %v2082_v29 = vmul.f32 5.656854, %v2020_v45  ;;  %8611 = vmatpush3.bf16.msra.mxu1 %v13130_v37  ;;  %v2213_v3 = vpack.c.bf16 %v2179_v51, %v2179_v51 }
 0x6d0   :  { %8590 = vmatprep.mubr.msk.bf16.mxu0 %vm1609_vm5, %v2208_v14  ;;  %9048 = vmatprep.subr.msk.bf16.mxu1 %vm2229_vm6, %v13131_v50  ;;  %v9763_v15 = vpop.eup %9762 }
 0x6d1   :  { %9764 = vrcp.f32 %v2082_v29  ;;  %8591 = vmatmul.mubr.msk.bf16.vlgmr.msra.gmra.mrb[64].mxu0 %vm1609_vm5, %v2209_v38  ;;  %v2177_v42 = vmul.f32 %v9763_v15, %v11191_v13 }
 0x6d2   :  { %9766 = vrcp.f32 %v2086_v20  ;;  %8603 = vmatpush3.bf16.msra.mxu0 %v13129_v49  ;;  %v2029_v40 = vpop.xlane.xlu0 %2028  ;;  %v2041_v7 = vpop.xlane.xlu1 %2040 }
 0x6d3   :  { %9768 = vrcp.f32 %v2084_v12  ;;  %v2085_v39 = vmul.f32 5.656854, %v2029_v40  ;;  %8613 = vmatpush3.bf16.msra.mxu1 %v3099_v62  ;;  %v2089_v13 = vmul.f32 5.656854, %v2041_v7 }
 0x6d4   :  { %8626 = vmatprep.subr.bf16.mxu1 %v13132_v36 }
 0x6d5   :  { %9770 = vrcp.f32 %v2085_v39 }
 0x6d6   :  { %v3028_v28 = vpop.permute.xlu0 %3027  ;;  %v2038_v33 = vpop.xlane.xlu1 %2037  ;;  %9772 = vrcp.f32 %v2089_v13 }
 0x6d7   :  { %9047 = vmatprep.subr.msk.bf16.mxu0 %vm2229_vm6, %v3028_v28  ;;  %v3037_v22 = vsel %vm2229_vm6, %v3028_v28, 0 }
 0x6d8   :  { %8605 = vmatpush3.bf16.msra.mxu0 %v3037_v22  ;;  %v11359_v58 = vpop.f32.mrb[44].mxu0 }
 0x6d9   :  { %v11361_v34 = vpop.f32.mrb[45].mxu0 }
 0x6da   :  { %v3150_v53 = vpop.permute.xlu1 %3149  ;;  %v8513_v41 = vpop.f32.mrb[46].mxu0 }
 0x6db   :  { %v9765_v54 = vpop.eup %9764  ;;  %8618 = vmatprep.subr.bf16.mxu0 %v3150_v53  ;;  %v11363_v0 = vpop.f32.mrb[47].mxu0 }
 0x6dc   :  { %v9767_v8 = vpop.eup %9766  ;;  %v2178_v25 = vmul.f32 %v9765_v54, %v11207_v48 }
 0x6dd   :  { %v9769_v27 = vpop.eup %9768  ;;  %v2182_v47 = vmul.f32 %v9767_v8, %v11197_v56  ;;  %v2088_v56 = vmul.f32 5.656854, %v2038_v33 }
 0x6de   :  { %v2212_v35 = vpack.c.bf16 %v2178_v25, %v2177_v42  ;;  %v2180_v37 = vmul.f32 %v9769_v27, %v11203_v18 }
 0x6df   :  { %v9771_v49 = vpop.eup %9770  ;;  %v2215_v44 = vpack.c.bf16 %v2182_v47, %v2182_v47  ;;  %9774 = vrcp.f32 %v2088_v56 }
 0x6e0   :  { %8606 = vmatprep.mubr.msk.bf16.mxu0 %vm1609_vm5, %v2212_v35  ;;  %v2181_v60 = vmul.f32 %v9771_v49, %v11211_v4  ;;  %v9773_v46 = vpop.eup %9772 }
 0x6e1   :  { %8607 = vmatmul.mubr.msk.bf16.vlgmr.msra.gmra.mrb[68].mxu0 %vm1609_vm5, %v2213_v3  ;;  %v2185_v32 = vmul.f32 %v9773_v46, %v11213_v26 }
 0x6e2   :  { %8619 = vmatpush3.bf16.msra.mxu0 %v3150_v53  ;;  %v2214_v11 = vpack.c.bf16 %v2181_v60, %v2180_v37 }
 0x6e3   :  { %v2217_v9 = vpack.c.bf16 %v2185_v32, %v2185_v32 }
 0x6e4   :  { %8614 = vmatprep.mubr.msk.bf16.mxu1 %vm1609_vm5, %v2214_v11 }
 0x6e5   :  { %8615 = vmatmul.mubr.msk.bf16.vlgmr.msra.gmra.mrb[72].mxu1 %vm1609_vm5, %v2215_v44 }
 0x6e6   :  { %8630 = vmatprep.mubr.msk.bf16.mxu1 %vm10135_vm0, %v13132_v36 }
 0x6e9   :  { %v9775_v21 = vpop.eup %9774 }
 0x6ea   :  { %v2184_v57 = vmul.f32 %v9775_v21, %v11215_v24 }
 0x707   :  { %v2035_v48 = vpop.xlane.xlu0 %2034 }
 0x708   :  { %v2087_v18 = vmul.f32 5.656854, %v2035_v48 }
 0x70a   :  { %9776 = vrcp.f32 %v2087_v18 }
 0x70b   :  { %v3152_v4 = vpop.permute.xlu0 %3151 }
 0x70c   :  { %9049 = vmatprep.subr.msk.bf16.mxu0 %vm2229_vm6, %v3152_v4  ;;  %v3161_v10 = vsel %vm2229_vm6, %v3152_v4, 0 }
 0x70d   :  { %8621 = vmatpush3.bf16.msra.mxu0 %v3161_v10 }
 0x70e   :  { %8642 = vmatprep.subr.bf16.mxu0 %v13132_v36 }
 0x714   :  { %v9777_v59 = vpop.eup %9776 }
 0x715   :  { %v2183_v17 = vmul.f32 %v9777_v59, %v11284_v61 }
 0x717   :  { %v2216_v43 = vpack.c.bf16 %v2184_v57, %v2183_v17 }
 0x719   :  { %8622 = vmatprep.mubr.msk.bf16.mxu0 %vm1609_vm5, %v2216_v43 }
 0x71a   :  { %8623 = vmatmul.mubr.msk.bf16.vlgmr.msra.gmra.mrb[72].mxu0 %vm1609_vm5, %v2217_v9 }
 0x71b   :  { %8643 = vmatpush3.bf16.msra.mxu0 %v9552_v16  ;;  %8646 = vmatprep.mubr.msk.bf16.mxu0 %vm10135_vm0, %v13132_v36 }
 0x71c   :  { %8644 = vmatprep.subr.bf16.mxu0 %v13132_v36 }
 0x71f   :  { %8645 = vmatpush3.bf16.msra.mxu0 %v9555_v1 }
 0x720   :  { %8674 = vmatprep.subr.bf16.mxu0 %v13132_v36 }
 0x726   :  { %v8520_v26 = vpop.f32.mrb[48].mxu1 }
 0x727   :  { %v2391_v61 = vpop.f32.mrb[49].mxu1 }
 0x728   :  { %v8521_v24 = vpop.f32.mrb[50].mxu1 }
 0x729   :  { %v2394_v19 = vpop.f32.mrb[51].mxu1 }
 0x72a   :  { %v9228_v31 = vpack.i.bf16 %v2394_v19, %v2391_v61  ;;  %v9556_v19 = vld [vmem:[#allocation2 + $0xc] ss:$16 sps:$4 sm:$0xff]  }
 0x72b   :  { %8627 = vmatpush3.bf16.msra.mxu1 %v9556_v19 }
 0x72c   :  { %9229 = vrot.lane.b32.xlu1 %v9228_v31, %s10146_s7  ;;  %8628 = vmatprep.subr.bf16.mxu1 %v13132_v36  ;;  %v9558_v31 = vld [vmem:[#allocation2 + $0x2c] ss:$16 sps:$4 sm:$0xff]  }
 0x72e   :  { %v8536_v23 = vpop.f32.mrb[52].mxu1 }
 0x72f   :  { %v2515_v55 = vpop.f32.mrb[53].mxu1  ;;  %8629 = vmatpush3.bf16.msra.mxu1 %v9558_v31 }
 0x730   :  { %v8537_v30 = vpop.f32.mrb[54].mxu1  ;;  %8658 = vmatprep.subr.bf16.mxu1 %v13132_v36 }
 0x731   :  { %v2518_v5 = vpop.f32.mrb[55].mxu1 }
 0x732   :  { %v9238_v20 = vpack.i.bf16 %v2518_v5, %v2515_v55  ;;  %v11390_v45 = vpop.f32.mrb[48].mxu0 }
 0x733   :  { %v2453_v14 = vpop.f32.mrb[49].mxu0 }
 0x734   :  { %v9233_v12 = vpack.i.bf16 %v2453_v14, %v8520_v26  ;;  %v8529_v29 = vpop.f32.mrb[50].mxu0 }
 0x735   :  { %v11392_v38 = vpop.f32.mrb[51].mxu0 }
 0x736   :  { %v9293_v50 = vpack.i.bf16 %v11390_v45, %v11392_v38  ;;  %9234 = vrot.lane.b32.xlu0 %v9233_v12, %s10146_s7 }
 0x73a   :  { %9239 = vrot.lane.b32.xlu0 %v9238_v20, %s10133_s9 }
 0x73b   :  { %v8544_v40 = vpop.f32.mrb[52].mxu0 }
 0x73c   :  { %v2577_v7 = vpop.f32.mrb[53].mxu0 }
 0x73d   :  { %v9243_v62 = vpack.i.bf16 %v2577_v7, %v8536_v23  ;;  %v8545_v39 = vpop.f32.mrb[54].mxu0 }
 0x73e   :  { %v2580_v28 = vpop.f32.mrb[55].mxu0 }
 0x73f   :  { %v9298_v33 = vpack.i.bf16 %v8544_v40, %v2580_v28  ;;  %9244 = vrot.lane.b32.xlu1 %v9243_v62, %s10133_s9  ;;  %v8552_v22 = vpop.f32.mrb[56].mxu1 }
 0x740   :  { %v2639_v63 = vpop.f32.mrb[57].mxu1 }
 0x741   :  { %v8553_v15 = vpop.f32.mrb[58].mxu1 }
 0x742   :  { %v2642_v53 = vpop.f32.mrb[59].mxu1 }
 0x743   :  { %v9248_v41 = vpack.i.bf16 %v2642_v53, %v2639_v63 }
 0x745   :  { %9249 = vrot.lane.b32.xlu1 %v9248_v41, %s10147_s8 }
 0x76e   :  { %v11400_v54 = vpop.f32.mrb[56].mxu0 }
 0x76f   :  { %v2701_v51 = vpop.f32.mrb[57].mxu0 }
 0x770   :  { %v9253_v8 = vpack.i.bf16 %v2701_v51, %v8552_v22  ;;  %v8561_v42 = vpop.f32.mrb[58].mxu0 }
 0x771   :  { %v2704_v25 = vpop.f32.mrb[59].mxu0 }
 0x772   :  { %v9303_v27 = vpack.i.bf16 %v11400_v54, %v2704_v25  ;;  %9254 = vrot.lane.b32.xlu0 %v9253_v8, %s10147_s8 }
 0x773   :  { %v8568_v35 = vpop.f32.mrb[60].mxu1 }
 0x774   :  { %v2763_v49 = vpop.f32.mrb[61].mxu1 }
 0x775   :  { %v8569_v3 = vpop.f32.mrb[62].mxu1 }
 0x776   :  { %v2766_v47 = vpop.f32.mrb[63].mxu1 }
 0x777   :  { %v9258_v37 = vpack.i.bf16 %v2766_v47, %v2763_v49 }
 0x779   :  { %9259 = vrot.lane.b32.xlu0 %v9258_v37, %s10130_s23 }
 0x78e   :  { %v8576_v60 = vpop.f32.mrb[60].mxu0 }
 0x78f   :  { %v2825_v11 = vpop.f32.mrb[61].mxu0 }
 0x790   :  { %v9263_v44 = vpack.i.bf16 %v2825_v11, %v8568_v35  ;;  %v8577_v13 = vpop.f32.mrb[62].mxu0 }
 0x791   :  { %v2828_v56 = vpop.f32.mrb[63].mxu0 }
 0x792   :  { %v9313_v48 = vpack.i.bf16 %v8576_v60, %v2828_v56  ;;  %9264 = vrot.lane.b32.xlu1 %v9263_v44, %s10130_s23  ;;  %v8584_v18 = vpop.f32.mrb[64].mxu1 }
 0x793   :  { %v2887_v4 = vpop.f32.mrb[65].mxu1 }
 0x794   :  { %v8585_v10 = vpop.f32.mrb[66].mxu1 }
 0x795   :  { %v2890_v46 = vpop.f32.mrb[67].mxu1 }
 0x796   :  { %v9268_v21 = vpack.i.bf16 %v2890_v46, %v2887_v4 }
 0x798   :  { %9269 = vrot.lane.b32.xlu1 %v9268_v21, %s10148_s1 }
 0x79e   :  { %v9230_v38 = vpop.permute.xlu1 %9229 }
 0x79f   :  { %v9231_v35 = vunpack.i.l.bf16 %v9230_v38 }
 0x7a1   :  { %v8600_v59 = vpop.f32.mrb[68].mxu1 }
 0x7a2   :  { %v3011_v32 = vpop.f32.mrb[69].mxu1 }
 0x7a3   :  { %v8601_v17 = vpop.f32.mrb[70].mxu1 }
 0x7a4   :  { %v8592_v57 = vpop.f32.mrb[64].mxu0  ;;  %v3014_v16 = vpop.f32.mrb[71].mxu1 }
 0x7a5   :  { %v2949_v43 = vpop.f32.mrb[65].mxu0  ;;  %v9278_v9 = vpack.i.bf16 %v3014_v16, %v3011_v32 }
 0x7a6   :  { %v9273_v1 = vpack.i.bf16 %v2949_v43, %v8584_v18  ;;  %v8593_v26 = vpop.f32.mrb[66].mxu0 }
 0x7a7   :  { %v2952_v61 = vpop.f32.mrb[67].mxu0 }
 0x7a8   :  { %v9318_v24 = vpack.i.bf16 %v8592_v57, %v2952_v61  ;;  %9274 = vrot.lane.b32.xlu0 %v9273_v1, %s10148_s1  ;;  %v9235_v45 = vpop.permute.xlu0 %9234 }
 0x7ac   :  { %9279 = vrot.lane.b32.xlu0 %v9278_v9, %s10149_s10 }
 0x7b0   :  { %9299 = vrot.lane.b32.xlu0 %v9298_v33, %s10133_s9 }
 0x7b1   :  { %v11424_v53 = vpop.permute.xlu1 %9244 }
 0x7b4   :  { %v8608_v23 = vpop.f32.mrb[68].mxu0 }
 0x7b5   :  { %v3073_v55 = vpop.f32.mrb[69].mxu0 }
 0x7b6   :  { %v9283_v30 = vpack.i.bf16 %v3073_v55, %v8600_v59  ;;  %v8609_v5 = vpop.f32.mrb[70].mxu0  ;;  %v9237_v55 = vunpack.i.h.bf16 %v9235_v45 }
 0x7b7   :  { %v3076_v20 = vpop.f32.mrb[71].mxu0  ;;  %v9250_v54 = vpop.permute.xlu1 %9249  ;;  %v9247_v5 = vunpack.i.h.bf16 %v11424_v53 }
 0x7b8   :  { %v9323_v14 = vpack.i.bf16 %v8608_v23, %v3076_v20  ;;  %9284 = vrot.lane.b32.xlu1 %v9283_v30, %s10149_s10  ;;  %v8616_v12 = vpop.f32.mrb[72].mxu1  ;;  %v9252_v47 = vunpack.i.h.bf16 %v9250_v54  ;;  %v9251_v37 = vunpack.i.l.bf16 %v9250_v54  ;;  %v9236_v30 = vunpack.i.l.bf16 %v9235_v45 }
 0x7b9   :  { %v3135_v29 = vpop.f32.mrb[73].mxu1  ;;  %v9246_v20 = vunpack.i.l.bf16 %v11424_v53 }
 0x7ba   :  { %v8617_v40 = vpop.f32.mrb[74].mxu1 }
 0x7bb   :  { %v3138_v7 = vpop.f32.mrb[75].mxu1 }
 0x7bc   :  { %v9288_v62 = vpack.i.bf16 %v3138_v7, %v3135_v29  ;;  %v3382_v7 = vsel %vm558_vm3, %v11361_v34, %v9237_v55 }
 0x7be   :  { %9289 = vrot.lane.b32.xlu1 %v9288_v62, %s10150_s11  ;;  %v3381_v62 = vsel %vm558_vm3, %v11333_v2, %v9236_v30 }
 0x7c2   :  { %9294 = vrot.lane.b32.xlu1 %v9293_v50, %s10146_s7  ;;  %v9240_v50 = vpop.permute.xlu0 %9239 }
 0x7c3   :  { %v9242_v49 = vunpack.i.h.bf16 %v9240_v50  ;;  %v9241_v3 = vunpack.i.l.bf16 %v9240_v50 }
 0x7c6   :  { %9304 = vrot.lane.b32.xlu1 %v9303_v27, %s10147_s8  ;;  %v9232_v27 = vunpack.i.h.bf16 %v9230_v38 }
 0x7c8   :  { %v3380_v56 = vsel %vm558_vm3, %v11338_v52, %v9232_v27 }
 0x7c9   :  { %v3387_v46 = vsel %vm3385_vm7, %v3380_v56, %v9242_v49 }
 0x7ca   :  { %9319 = vrot.lane.b32.xlu1 %v9318_v24, %s10148_s1  ;;  %v3394_v17 = vsel %vm3392_vm8, %v3387_v46, %v9252_v47 }
 0x7e4   :  { %v11426_v41 = vpop.permute.xlu0 %9254 }
 0x7eb   :  { %v9260_v51 = vpop.permute.xlu0 %9259 }
 0x7ec   :  { %v9262_v11 = vunpack.i.h.bf16 %v9260_v51  ;;  %v9261_v44 = vunpack.i.l.bf16 %v9260_v51 }
 0x7ed   :  { %v8624_v39 = vpop.f32.mrb[72].mxu0 }
 0x7ee   :  { %v3197_v28 = vpop.f32.mrb[73].mxu0  ;;  %v3401_v16 = vsel %vm3399_vm9, %v3394_v17, %v9262_v11 }
 0x7ef   :  { %v9308_v33 = vpack.i.bf16 %v3197_v28, %v8616_v12  ;;  %v8625_v22 = vpop.f32.mrb[74].mxu0  ;;  %v9256_v12 = vunpack.i.l.bf16 %v11426_v41 }
 0x7f0   :  { %v3200_v63 = vpop.f32.mrb[75].mxu0  ;;  %v3389_v22 = vsel %vm3385_vm7, %v3382_v7, %v9247_v5  ;;  %v7923_v5 = vld [vmem:[#allocation5 + $0x3] ss:$0 sm:$0xff] }
 0x7f1   :  { %v9328_v15 = vpack.i.bf16 %v8624_v39, %v3200_v63  ;;  %9309 = vrot.lane.b32.xlu0 %v9308_v33, %s10150_s11  ;;  %v3388_v63 = vsel %vm3385_vm7, %v3381_v62, %v9246_v20  ;;  %v13134_v62 = vld [vmem:[#allocation12_spill] sm:$0xff] }
 0x7f2   :  { %v3395_v50 = vsel %vm3392_vm8, %v3388_v63, %v9256_v12 }
 0x7f3   :  { %9329 = vrot.lane.b32.xlu1 %v9328_v15, %s10150_s11 }
 0x7f5   :  { %9314 = vrot.lane.b32.xlu0 %v9313_v48, %s10130_s23  ;;  %v3379_v48 = vsel %vm558_vm3, %v11336_v6, %v9231_v35 }
 0x7f6   :  { %v3386_v10 = vsel %vm3385_vm7, %v3379_v48, %v9241_v3 }
 0x7f7   :  { %v3393_v32 = vsel %vm3392_vm8, %v3386_v10, %v9251_v37 }
 0x7f8   :  { %v3400_v57 = vsel %vm3399_vm9, %v3393_v32, %v9261_v44 }
 0x7f9   :  { %9324 = vrot.lane.b32.xlu0 %v9323_v14, %s10149_s10  ;;  %v9257_v14 = vunpack.i.h.bf16 %v11426_v41 }
 0x7fb   :  { %v3396_v53 = vsel %vm3392_vm8, %v3389_v22, %v9257_v14  ;;  %v13133_v14 = vld [vmem:[#allocation11_spill] sm:$0xff] }
 0x804   :  { %v11428_v8 = vpop.permute.xlu1 %9264 }
 0x805   :  { %v9267_v29 = vunpack.i.h.bf16 %v11428_v8  ;;  %v9266_v40 = vunpack.i.l.bf16 %v11428_v8 }
 0x807   :  { %v3402_v2 = vsel %vm3399_vm9, %v3395_v50, %v9266_v40  ;;  %v3403_v54 = vsel %vm3399_vm9, %v3396_v53, %v9267_v29 }
 0x80a   :  { %v9270_v25 = vpop.permute.xlu1 %9269 }
 0x80b   :  { %v9272_v18 = vunpack.i.h.bf16 %v9270_v25  ;;  %v9271_v4 = vunpack.i.l.bf16 %v9270_v25 }
 0x80d   :  { %v3407_v6 = vsel %vm3406_vm10, %v3400_v57, %v9271_v4  ;;  %v3408_v43 = vsel %vm3406_vm10, %v3401_v16, %v9272_v18 }
 0x81a   :  { %v11430_v42 = vpop.permute.xlu0 %9274 }
 0x81b   :  { %v9277_v39 = vunpack.i.h.bf16 %v11430_v42  ;;  %v9276_v28 = vunpack.i.l.bf16 %v11430_v42 }
 0x81d   :  { %v3409_v51 = vsel %vm3406_vm10, %v3402_v2, %v9276_v28  ;;  %v3410_v8 = vsel %vm3406_vm10, %v3403_v54, %v9277_v39 }
 0x81e   :  { %v9280_v60 = vpop.permute.xlu0 %9279 }
 0x81f   :  { %v9282_v21 = vunpack.i.h.bf16 %v9280_v60  ;;  %v9281_v59 = vunpack.i.l.bf16 %v9280_v60 }
 0x821   :  { %v3413_v26 = vsel %vm1609_vm5, %v3407_v6, %v9281_v59  ;;  %v3414_v61 = vsel %vm1609_vm5, %v3408_v43, %v9282_v21 }
 0x822   :  { %v9300_v33 = vpop.permute.xlu0 %9299 }
 0x823   :  { %v9302_v11 = vunpack.i.h.bf16 %v9300_v33  ;;  %v9301_v44 = vunpack.i.l.bf16 %v9300_v33 }
 0x82a   :  { %v9285_v13 = vpop.permute.xlu1 %9284 }
 0x82b   :  { %v9287_v15 = vunpack.i.h.bf16 %v9285_v13  ;;  %v9286_v45 = vunpack.i.l.bf16 %v9285_v13 }
 0x82d   :  { %v3415_v25 = vsel %vm1609_vm5, %v3409_v51, %v9286_v45  ;;  %v3416_v27 = vsel %vm1609_vm5, %v3410_v8, %v9287_v15  ;;  %v13135_v45 = vld [vmem:[#allocation13_spill] sm:$0xff] }
 0x830   :  { %v9290_v52 = vpop.permute.xlu1 %9289 }
 0x831   :  { %v9292_v9 = vunpack.i.h.bf16 %v9290_v52  ;;  %v9291_v1 = vunpack.i.l.bf16 %v9290_v52 }
 0x833   :  { %v3420_v24 = vsel %vm3419_vm11, %v3413_v26, %v9291_v1  ;;  %v3421_v19 = vsel %vm3419_vm11, %v3414_v61, %v9292_v9 }
 0x834   :  { %v3426_v31 = vpack.c.bf16 %v3421_v19, %v3420_v24  ;;  %v9295_v23 = vpop.permute.xlu1 %9294 }
 0x835   :  { %v9297_v34 = vunpack.i.h.bf16 %v9295_v23  ;;  %v9296_v41 = vunpack.i.l.bf16 %v9295_v23 }
 0x836   :  { %8631 = vmatmul.mubr.msk.bf16.vlgmr.msra.gmra.mrb[76].mxu1 %vm203_vm2, %v3426_v31 }
 0x837   :  { %8634 = vmatprep.mubr.msk.bf16.mxu1 %vm10135_vm0, %v13132_v36  ;;  %v3384_v3 = vsel %vm558_vm3, %v11359_v58, %v9297_v34  ;;  %v3383_v47 = vsel %vm558_vm3, %v11363_v0, %v9296_v41  ;;  %v13136_v41 = vld [vmem:[#allocation14_spill] sm:$0xff] }
 0x838   :  { %v9305_v38 = vpop.permute.xlu1 %9304  ;;  %v3390_v10 = vsel %vm3385_vm7, %v3383_v47, %v9301_v44  ;;  %v3391_v46 = vsel %vm3385_vm7, %v3384_v3, %v9302_v11 }
 0x839   :  { %v9307_v37 = vunpack.i.h.bf16 %v9305_v38  ;;  %v9306_v60 = vunpack.i.l.bf16 %v9305_v38 }
 0x83b   :  { %v3397_v59 = vsel %vm3392_vm8, %v3390_v10, %v9306_v60  ;;  %v3398_v0 = vsel %vm3392_vm8, %v3391_v46, %v9307_v37  ;;  %v13138_v37 = vld [vmem:[#allocation16_spill] sm:$0xff] }
 0x83c   :  { %v9320_v13 = vpop.permute.xlu1 %9319 }
 0x83d   :  { %v9322_v16 = vunpack.i.h.bf16 %v9320_v13  ;;  %v9321_v52 = vunpack.i.l.bf16 %v9320_v13 }
 0x863   :  { %v9310_v42 = vpop.permute.xlu0 %9309 }
 0x864   :  { %v9312_v35 = vunpack.i.h.bf16 %v9310_v42  ;;  %v9311_v49 = vunpack.i.l.bf16 %v9310_v42 }
 0x865   :  { %v9330_v32 = vpop.permute.xlu1 %9329 }
 0x866   :  { %v3422_v56 = vsel %vm3419_vm11, %v3415_v25, %v9311_v49  ;;  %v3423_v48 = vsel %vm3419_vm11, %v3416_v27, %v9312_v35  ;;  %v9332_v1 = vunpack.i.h.bf16 %v9330_v32  ;;  %v9331_v26 = vunpack.i.l.bf16 %v9330_v32  ;;  %v13137_v27 = vld [vmem:[#allocation15_spill] sm:$0xff] }
 0x867   :  { %v9315_v18 = vpop.permute.xlu0 %9314  ;;  %v3427_v4 = vpack.c.bf16 %v3423_v48, %v3422_v56 }
 0x868   :  { %v9317_v21 = vunpack.i.h.bf16 %v9315_v18  ;;  %v9316_v58 = vunpack.i.l.bf16 %v9315_v18 }
 0x869   :  { %8635 = vmatmul.mubr.msk.bf16.gmra.mrb[80].mxu1 %vm203_vm2, %v3427_v4 }
 0x86a   :  { %v3404_v17 = vsel %vm3399_vm9, %v3397_v59, %v9316_v58  ;;  %v3405_v57 = vsel %vm3399_vm9, %v3398_v0, %v9317_v21  ;;  %8638 = vmatprep.mubr.msk.bf16.mxu1 %vm10135_vm0, %v13132_v36 }
 0x86b   :  { %v9325_v6 = vpop.permute.xlu0 %9324  ;;  %v3411_v61 = vsel %vm3406_vm10, %v3404_v17, %v9321_v52  ;;  %v3412_v24 = vsel %vm3406_vm10, %v3405_v57, %v9322_v16 }
 0x86c   :  { %v9327_v43 = vunpack.i.h.bf16 %v9325_v6  ;;  %v9326_v9 = vunpack.i.l.bf16 %v9325_v6 }
 0x86e   :  { %v3417_v19 = vsel %vm1609_vm5, %v3411_v61, %v9326_v9  ;;  %v3418_v31 = vsel %vm1609_vm5, %v3412_v24, %v9327_v43 }
 0x86f   :  { %v3424_v23 = vsel %vm3419_vm11, %v3417_v19, %v9331_v26  ;;  %v3425_v55 = vsel %vm3419_vm11, %v3418_v31, %v9332_v1 }
 0x870   :  { %v3428_v30 = vpack.c.bf16 %v3425_v55, %v3424_v23 }
 0x872   :  { %8639 = vmatmul.mubr.msk.bf16.gmra.mrb[84].mxu1 %vm203_vm2, %v3428_v30 }
 0x873   :  { %8662 = vmatprep.mubr.msk.bf16.mxu1 %vm10135_vm0, %v13132_v36 }
 0x909   :  { %v3484_v20 = vpop.f32.mrb[76].mxu1 }
 0x90a   :  { %v3507_v12 = vadd.f32 %v3484_v20, %v13133_v14  ;;  %v8632_v29 = vpop.f32.mrb[77].mxu1 }
 0x90b   :  { %v3487_v40 = vpop.f32.mrb[78].mxu1 }
 0x90c   :  { %v11498_v7 = vadd.f32 %v7923_v5, %v3507_v12  ;;  %v3508_v39 = vadd.f32 %v3487_v40, %v13134_v62  ;;  %v8633_v28 = vpop.f32.mrb[79].mxu1 }
 0x90e   :  { %v11501_v33 = vadd.f32 %v7923_v5, %v3508_v39  ;;  %v3523_v22 = vsel %vm203_vm2, %v11498_v7, 0.0 }
 0x90f   :  { %3524 = vadd.xlane.f32.xlu0 %v3523_v22 }
 0x910   :  { %v3526_v63 = vsel %vm203_vm2, %v11501_v33, 0.0 }
 0x911   :  { %3527 = vadd.xlane.f32.xlu1 %v3526_v63 }
 0x93c   :  { %v3492_v15 = vpop.f32.mrb[80].mxu1 }
 0x93d   :  { %v3509_v38 = vadd.f32 %v3492_v15, %v13135_v45  ;;  %v8636_v50 = vpop.f32.mrb[81].mxu1  ;;  %v7924_v15 = vld [vmem:[#allocation5 + $0x4] ss:$0 sm:$0xff] }
 0x93e   :  { %v3495_v53 = vpop.f32.mrb[82].mxu1 }
 0x93f   :  { %v11508_v34 = vadd.f32 %v7923_v5, %v3509_v38  ;;  %v3510_v2 = vadd.f32 %v3495_v53, %v13136_v41  ;;  %v8637_v54 = vpop.f32.mrb[83].mxu1  ;;  %v7925_v41 = vld [vmem:[#allocation5 + $0x5] ss:$0 sm:$0xff] }
 0x941   :  { %v11511_v51 = vadd.f32 %v7923_v5, %v3510_v2  ;;  %v3529_v8 = vsel %vm203_vm2, %v11508_v34, 0.0 }
 0x942   :  { %3530 = vadd.xlane.f32.xlu0 %v3529_v8 }
 0x943   :  { %v3532_v25 = vsel %vm203_vm2, %v11511_v51, 0.0 }
 0x945   :  { %v3500_v42 = vpop.f32.mrb[84].mxu1 }
 0x946   :  { %v3511_v35 = vadd.f32 %v3500_v42, %v13137_v27  ;;  %3533 = vadd.xlane.f32.xlu0 %v3532_v25  ;;  %v8640_v49 = vpop.f32.mrb[85].mxu1 }
 0x947   :  { %v3503_v3 = vpop.f32.mrb[86].mxu1 }
 0x948   :  { %v11518_v47 = vadd.f32 %v7923_v5, %v3511_v35  ;;  %v3512_v60 = vadd.f32 %v3503_v3, %v13138_v37  ;;  %v8641_v11 = vpop.f32.mrb[87].mxu1 }
 0x94a   :  { %v11521_v44 = vadd.f32 %v7923_v5, %v3512_v60  ;;  %v3535_v13 = vsel %vm203_vm2, %v11518_v47, 0.0 }
 0x94b   :  { %3536 = vadd.xlane.f32.xlu0 %v3535_v13 }
 0x94c   :  { %v3538_v56 = vsel %vm203_vm2, %v11521_v44, 0.0 }
 0x94d   :  { %3539 = vadd.xlane.f32.xlu1 %v3538_v56 }
 0x99c   :  { %v3525_v48 = vpop.xlane.xlu0 %3524 }
 0x99d   :  { %v3541_v18 = vmul.f32 0.03125, %v3525_v48 }
 0x99e   :  { %v3528_v4 = vpop.xlane.xlu1 %3527 }
 0x99f   :  { %v3547_v10 = vsub.f32 %v11498_v7, %v3541_v18  ;;  %v3542_v46 = vmul.f32 0.03125, %v3528_v4 }
 0x9a1   :  { %v3548_v21 = vsub.f32 %v11501_v33, %v3542_v46  ;;  %v3553_v58 = vmul.f32 %v3547_v10, %v3547_v10 }
 0x9a3   :  { %v3559_v59 = vsel %vm203_vm2, %v3553_v58, 0.0  ;;  %v3554_v0 = vmul.f32 %v3548_v21, %v3548_v21 }
 0x9a4   :  { %3560 = vadd.xlane.f32.xlu0 %v3559_v59 }
 0x9a5   :  { %v3562_v32 = vsel %vm203_vm2, %v3554_v0, 0.0 }
 0x9a6   :  { %3563 = vadd.xlane.f32.xlu1 %v3562_v32 }
 0x9cf   :  { %v3531_v17 = vpop.xlane.xlu0 %3530 }
 0x9d0   :  { %v3543_v57 = vmul.f32 0.03125, %v3531_v17 }
 0x9d2   :  { %v3549_v16 = vsub.f32 %v11508_v34, %v3543_v57 }
 0x9d3   :  { %v3534_v52 = vpop.xlane.xlu0 %3533 }
 0x9d4   :  { %v3544_v6 = vmul.f32 0.03125, %v3534_v52  ;;  %v3555_v43 = vmul.f32 %v3549_v16, %v3549_v16 }
 0x9d6   :  { %v3550_v9 = vsub.f32 %v11511_v51, %v3544_v6  ;;  %v3565_v1 = vsel %vm203_vm2, %v3555_v43, 0.0 }
 0x9d7   :  { %3566 = vadd.xlane.f32.xlu0 %v3565_v1 }
 0x9d8   :  { %v3537_v26 = vpop.xlane.xlu0 %3536  ;;  %v3556_v61 = vmul.f32 %v3550_v9, %v3550_v9 }
 0x9d9   :  { %v3545_v24 = vmul.f32 0.03125, %v3537_v26 }
 0x9da   :  { %v3540_v19 = vpop.xlane.xlu1 %3539  ;;  %v3568_v31 = vsel %vm203_vm2, %v3556_v61, 0.0 }
 0x9db   :  { %v3551_v23 = vsub.f32 %v11518_v47, %v3545_v24  ;;  %v3546_v55 = vmul.f32 0.03125, %v3540_v19  ;;  %3569 = vadd.xlane.f32.xlu1 %v3568_v31  ;;  %v9561_v19 = vld [vmem:[#allocation2 + $0x28] ss:$16 sps:$4 sm:$0xff]   ;;  %v11549_v31 = vld [vmem:[#allocation5 + $0x6] ss:$0 sm:$0xff] }
 0x9dd   :  { %v3552_v30 = vsub.f32 %v11521_v44, %v3546_v55  ;;  %v3557_v5 = vmul.f32 %v3551_v23, %v3551_v23 }
 0x9df   :  { %v3571_v20 = vsel %vm203_vm2, %v3557_v5, 0.0  ;;  %v3558_v14 = vmul.f32 %v3552_v30, %v3552_v30 }
 0x9e0   :  { %3572 = vadd.xlane.f32.xlu0 %v3571_v20 }
 0x9e1   :  { %v3574_v12 = vsel %vm203_vm2, %v3558_v14, 0.0 }
 0x9e2   :  { %3575 = vadd.xlane.f32.xlu1 %v3574_v12 }
 0xa31   :  { %v3561_v29 = vpop.xlane.xlu0 %3560 }
 0xa32   :  { %v3577_v40 = vmul.f32 0.03125, %v3561_v29 }
 0xa33   :  { %v3564_v62 = vpop.xlane.xlu1 %3563 }
 0xa34   :  { %v3583_v39 = vadd.f32 1e-05, %v3577_v40  ;;  %v3578_v28 = vmul.f32 0.03125, %v3564_v62 }
 0xa36   :  { %9778 = vrsqrt.f32 %v3583_v39  ;;  %v3584_v22 = vadd.f32 1e-05, %v3578_v28 }
 0xa38   :  { %9780 = vrsqrt.f32 %v3584_v22 }
 0xa40   :  { %v9779_v63 = vpop.eup %9778 }
 0xa41   :  { %v3595_v45 = vmul.f32 %v9779_v63, %v3547_v10 }
 0xa42   :  { %v9781_v38 = vpop.eup %9780 }
 0xa43   :  { %v3605_v50 = vmul.f32 %v7924_v15, %v3595_v45  ;;  %v3596_v53 = vmul.f32 %v9781_v38, %v3548_v21 }
 0xa45   :  { %v3606_v2 = vmul.f32 %v7924_v15, %v3596_v53  ;;  %v3615_v54 = vadd.f32 %v7925_v41, %v3605_v50 }
 0xa47   :  { %v3616_v8 = vadd.f32 %v7925_v41, %v3606_v2 }
 0xa49   :  { %v3621_v42 = vpack.c.bf16 %v3616_v8, %v3615_v54 }
 0xa4b   :  { %8647 = vmatmul.mubr.msk.bf16.vlgmr.msra.gmra.mrb[76].mxu0 %vm203_vm2, %v3621_v42 }
 0xa4c   :  { %8650 = vmatprep.mubr.msk.bf16.mxu0 %vm10135_vm0, %v13132_v36 }
 0xa64   :  { %v3567_v25 = vpop.xlane.xlu0 %3566 }
 0xa65   :  { %v3579_v27 = vmul.f32 0.03125, %v3567_v25 }
 0xa67   :  { %v3585_v35 = vadd.f32 1e-05, %v3579_v27 }
 0xa68   :  { %v3570_v49 = vpop.xlane.xlu1 %3569 }
 0xa69   :  { %9782 = vrsqrt.f32 %v3585_v35  ;;  %v3580_v3 = vmul.f32 0.03125, %v3570_v49 }
 0xa6b   :  { %v3586_v37 = vadd.f32 1e-05, %v3580_v3 }
 0xa6d   :  { %9784 = vrsqrt.f32 %v3586_v37  ;;  %v3573_v60 = vpop.xlane.xlu0 %3572 }
 0xa6e   :  { %v3581_v11 = vmul.f32 0.03125, %v3573_v60 }
 0xa6f   :  { %v3576_v13 = vpop.xlane.xlu1 %3575 }
 0xa70   :  { %v3587_v56 = vadd.f32 1e-05, %v3581_v11  ;;  %v3582_v48 = vmul.f32 0.03125, %v3576_v13 }
 0xa72   :  { %9786 = vrsqrt.f32 %v3587_v56  ;;  %v3588_v18 = vadd.f32 1e-05, %v3582_v48 }
 0xa73   :  { %v9783_v4 = vpop.eup %9782 }
 0xa74   :  { %9788 = vrsqrt.f32 %v3588_v18  ;;  %v3597_v10 = vmul.f32 %v9783_v4, %v3549_v16 }
 0xa76   :  { %v3607_v58 = vmul.f32 %v7924_v15, %v3597_v10 }
 0xa77   :  { %v9785_v46 = vpop.eup %9784 }
 0xa78   :  { %v3598_v21 = vmul.f32 %v9785_v46, %v3550_v9  ;;  %v3617_v32 = vadd.f32 %v7925_v41, %v3607_v58  ;;  %v9560_v9 = vld [vmem:[#allocation2 + $0x8] ss:$16 sps:$4 sm:$0xff]  }
 0xa79   :  { %8659 = vmatpush3.bf16.xpose.msra.mxu1 %v9560_v9 }
 0xa7a   :  { %v3608_v59 = vmul.f32 %v7924_v15, %v3598_v21  ;;  %8660 = vmatprep.subr.bf16.mxu1 %v13132_v36 }
 0xa7c   :  { %v9787_v0 = vpop.eup %9786  ;;  %v3618_v17 = vadd.f32 %v7925_v41, %v3608_v59 }
 0xa7d   :  { %v3599_v57 = vmul.f32 %v9787_v0, %v3551_v23 }
 0xa7e   :  { %v9789_v52 = vpop.eup %9788  ;;  %v3622_v6 = vpack.c.bf16 %v3618_v17, %v3617_v32  ;;  %v13032_v17 = vmov -1.0  }
 0xa7f   :  { %v3600_v43 = vmul.f32 %v9789_v52, %v3552_v30  ;;  %v3609_v1 = vmul.f32 %v7924_v15, %v3599_v57 }
 0xa80   :  { %8651 = vmatmul.mubr.msk.bf16.gmra.mrb[80].mxu0 %vm203_vm2, %v3622_v6 }
 0xa81   :  { %8654 = vmatprep.mubr.msk.bf16.mxu0 %vm10135_vm0, %v13132_v36  ;;  %v3610_v26 = vmul.f32 %v7924_v15, %v3600_v43  ;;  %v3619_v61 = vadd.f32 %v7925_v41, %v3609_v1  ;;  %8661 = vmatpush3.bf16.xpose.msra.mxu1 %v9561_v19 }
 0xa83   :  { %v3620_v16 = vadd.f32 %v7925_v41, %v3610_v26 }
 0xa85   :  { %v3623_v24 = vpack.c.bf16 %v3620_v16, %v3619_v61 }
 0xa88   :  { %8655 = vmatmul.mubr.msk.bf16.gmra.mrb[84].mxu0 %vm203_vm2, %v3623_v24 }
 0xa89   :  { %8678 = vmatprep.mubr.msk.bf16.mxu0 %vm10135_vm0, %v13132_v36 }
 0xb1e   :  { %v3679_v23 = vpop.f32.mrb[76].mxu0 }
 0xb1f   :  { %v3680_v55 = vadd.f32 %v11549_v31, %v3679_v23  ;;  %v8648_v30 = vpop.f32.mrb[77].mxu0 }
 0xb20   :  { %v3682_v5 = vpop.f32.mrb[78].mxu0 }
 0xb21   :  { %v3708_v20 = vmul.f32 0.70710677, %v3680_v55  ;;  %v3683_v14 = vadd.f32 %v11549_v31, %v3682_v5  ;;  %v8649_v12 = vpop.f32.mrb[79].mxu0  ;;  %v3702_v16 = vmul.f32 0.5, %v3680_v55 }
 0xb23   :  { %v3726_v29 = vand.u32 2147483647, %v3708_v20  ;;  %v3709_v40 = vmul.f32 0.70710677, %v3683_v14  ;;  %vm3714_vm12 = vcmp.ge.f32.partialorder %v3708_v20, 0.0  ;;  %v3703_v24 = vmul.f32 0.5, %v3683_v14 }
 0xb24   :  { %v3720_v57 = vsel %vm3714_vm12, 1.0, %v13032_v17 }
 0xb25   :  { %v3732_v62 = vmul.f32 0.3275911, %v3726_v29  ;;  %v3727_v39 = vand.u32 2147483647, %v3709_v40  ;;  %v3804_v15 = vsub.f32 0.0, %v3726_v29  ;;  %vm3715_vm13 = vcmp.ge.f32.partialorder %v3709_v40, 0.0 }
 0xb26   :  { %v3721_v1 = vsel %vm3715_vm13, 1.0, %v13032_v17 }
 0xb27   :  { %v3738_v28 = vadd.f32 1.0, %v3732_v62  ;;  %v3733_v22 = vmul.f32 0.3275911, %v3727_v39  ;;  %v3805_v45 = vsub.f32 0.0, %v3727_v39  ;;  %v3810_v50 = vmul.f32 %v3804_v15, %v3726_v29 }
 0xb29   :  { %9790 = vrcp.f32 %v3738_v28  ;;  %v3739_v63 = vadd.f32 1.0, %v3733_v22  ;;  %v3811_v54 = vmul.f32 %v3805_v45, %v3727_v39  ;;  %v3816_v8 = vmul.f32 1.442695, %v3810_v50 }
 0xb2b   :  { %9792 = vrcp.f32 %v3739_v63  ;;  %v3818_v49 = vmul.f32 1.442695, %v3811_v54 }
 0xb2c   :  { %9794 = vpow2.f32 %v3816_v8 }
 0xb2d   :  { %9796 = vpow2.f32 %v3818_v49 }
 0xb33   :  { %v9791_v38 = vpop.eup %9790 }
 0xb34   :  { %v3750_v53 = vmul.f32 1.0614054, %v9791_v38 }
 0xb35   :  { %v9793_v41 = vpop.eup %9792 }
 0xb36   :  { %v3756_v2 = vadd.f32 -1.4531521, %v3750_v53  ;;  %v3751_v42 = vmul.f32 1.0614054, %v9793_v41  ;;  %v9795_v46 = vpop.eup %9794 }
 0xb37   :  { %v9797_v0 = vpop.eup %9796 }
 0xb38   :  { %v3762_v25 = vmul.f32 %v9791_v38, %v3756_v2  ;;  %v3757_v27 = vadd.f32 -1.4531521, %v3751_v42 }
 0xb3a   :  { %v3768_v35 = vadd.f32 1.4214138, %v3762_v25  ;;  %v3763_v3 = vmul.f32 %v9793_v41, %v3757_v27 }
 0xb3c   :  { %v3774_v37 = vmul.f32 %v9791_v38, %v3768_v35  ;;  %v3769_v60 = vadd.f32 1.4214138, %v3763_v3 }
 0xb3e   :  { %v3780_v11 = vadd.f32 -0.28449672, %v3774_v37  ;;  %v3775_v13 = vmul.f32 %v9793_v41, %v3769_v60 }
 0xb40   :  { %v3786_v56 = vmul.f32 %v9791_v38, %v3780_v11  ;;  %v3781_v48 = vadd.f32 -0.28449672, %v3775_v13 }
 0xb42   :  { %v3792_v18 = vadd.f32 0.2548296, %v3786_v56  ;;  %v3787_v4 = vmul.f32 %v9793_v41, %v3781_v48 }
 0xb44   :  { %v3798_v10 = vmul.f32 %v9791_v38, %v3792_v18  ;;  %v3793_v21 = vadd.f32 0.2548296, %v3787_v4 }
 0xb46   :  { %v3828_v58 = vmul.f32 %v9795_v46, %v3798_v10  ;;  %v3799_v59 = vmul.f32 %v9793_v41, %v3793_v21 }
 0xb48   :  { %v3834_v32 = vsub.f32 1.0, %v3828_v58  ;;  %v3829_v52 = vmul.f32 %v9797_v0, %v3799_v59 }
 0xb4a   :  { %v3840_v6 = vmul.f32 %v3834_v32, %v3720_v57  ;;  %v3835_v43 = vsub.f32 1.0, %v3829_v52 }
 0xb4c   :  { %v3846_v26 = vadd.f32 1.0, %v3840_v6  ;;  %v3841_v61 = vmul.f32 %v3835_v43, %v3721_v1 }
 0xb4e   :  { %v3847_v9 = vadd.f32 1.0, %v3841_v61  ;;  %v3852_v19 = vmul.f32 %v3846_v26, %v3702_v16 }
 0xb50   :  { %v3853_v23 = vmul.f32 %v3847_v9, %v3703_v24 }
 0xb52   :  { %v3858_v30 = vpack.c.bf16 %v3853_v23, %v3852_v19 }
 0xb53   :  { %v3687_v5 = vpop.f32.mrb[80].mxu0 }
 0xb54   :  { %v11556_v20 = vadd.f32 %v11549_v31, %v3687_v5  ;;  %v8652_v12 = vpop.f32.mrb[81].mxu0  ;;  %8663 = vmatmul.mubr.bf16.vlgmr.msra.gmra.mrb[88].mxu1 %v3858_v30 }
 0xb55   :  { %v3690_v29 = vpop.f32.mrb[82].mxu0  ;;  %8666 = vmatprep.mubr.msk.bf16.mxu1 %vm10135_vm0, %v13132_v36 }
 0xb56   :  { %v11559_v40 = vmul.f32 0.70710677, %v11556_v20  ;;  %v11562_v62 = vadd.f32 %v11549_v31, %v3690_v29  ;;  %v8653_v39 = vpop.f32.mrb[83].mxu0 }
 0xb58   :  { %v3728_v55 = vand.u32 2147483647, %v11559_v40  ;;  %v11568_v14 = vmul.f32 0.70710677, %v11562_v62  ;;  %vm3716_vm14 = vcmp.ge.f32.partialorder %v11559_v40, 0.0 }
 0xb5a   :  { %v3734_v28 = vmul.f32 0.3275911, %v3728_v55  ;;  %v3729_v22 = vand.u32 2147483647, %v11568_v14  ;;  %v3806_v35 = vsub.f32 0.0, %v3728_v55  ;;  %vm3717_vm15 = vcmp.ge.f32.partialorder %v11568_v14, 0.0 }
 0xb5b   :  { %v3695_v63 = vpop.f32.mrb[84].mxu0  ;;  %v3723_v40 = vsel %vm3717_vm15, 1.0, %v13032_v17 }
 0xb5c   :  { %v3740_v15 = vadd.f32 1.0, %v3734_v28  ;;  %v3735_v45 = vmul.f32 0.3275911, %v3729_v22  ;;  %v8656_v38 = vpop.f32.mrb[85].mxu0  ;;  %v11572_v50 = vadd.f32 %v11549_v31, %v3695_v63  ;;  %v3807_v60 = vsub.f32 0.0, %v3729_v22 }
 0xb5d   :  { %v3698_v53 = vpop.f32.mrb[86].mxu0  ;;  %v3812_v13 = vmul.f32 %v3806_v35, %v3728_v55 }
 0xb5e   :  { %9798 = vrcp.f32 %v3740_v15  ;;  %v3741_v41 = vadd.f32 1.0, %v3735_v45  ;;  %v8657_v2 = vpop.f32.mrb[87].mxu0  ;;  %v11575_v54 = vmul.f32 0.70710677, %v11572_v50  ;;  %v11578_v8 = vadd.f32 %v11549_v31, %v3698_v53 }
 0xb5f   :  { %v3813_v4 = vmul.f32 %v3807_v60, %v3729_v22  ;;  %v3820_v10 = vmul.f32 1.442695, %v3812_v13  ;;  %v3722_v13 = vsel %vm3716_vm14, 1.0, %v13032_v17 }
 0xb60   :  { %9800 = vrcp.f32 %v3741_v41  ;;  %v3730_v42 = vand.u32 2147483647, %v11575_v54  ;;  %v11582_v25 = vmul.f32 0.70710677, %v11578_v8  ;;  %vm3718_vm1 = vcmp.ge.f32.partialorder %v11575_v54, 0.0 }
 0xb61   :  { %v3822_v32 = vmul.f32 1.442695, %v3813_v4  ;;  %v3706_v54 = vmul.f32 0.5, %v11572_v50 }
 0xb62   :  { %v3736_v27 = vmul.f32 0.3275911, %v3730_v42  ;;  %v3731_v49 = vand.u32 2147483647, %v11582_v25  ;;  %v3808_v58 = vsub.f32 0.0, %v3730_v42  ;;  %vm3719_vm4 = vcmp.ge.f32.partialorder %v11582_v25, 0.0 }
 0xb64   :  { %v3742_v3 = vadd.f32 1.0, %v3736_v27  ;;  %v3737_v37 = vmul.f32 0.3275911, %v3731_v49  ;;  %v3809_v52 = vsub.f32 0.0, %v3731_v49  ;;  %v3814_v1 = vmul.f32 %v3808_v58, %v3730_v42 }
 0xb66   :  { %9802 = vrcp.f32 %v3742_v3  ;;  %v3743_v56 = vadd.f32 1.0, %v3737_v37  ;;  %v3815_v23 = vmul.f32 %v3809_v52, %v3731_v49  ;;  %v3824_v5 = vmul.f32 1.442695, %v3814_v1 }
 0xb68   :  { %v9799_v11 = vpop.eup %9798  ;;  %9804 = vrcp.f32 %v3743_v56  ;;  %v3826_v15 = vmul.f32 1.442695, %v3815_v23 }
 0xb69   :  { %v3752_v48 = vmul.f32 1.0614054, %v9799_v11  ;;  %9806 = vpow2.f32 %v3820_v10 }
 0xb6a   :  { %v9801_v31 = vpop.eup %9800  ;;  %9808 = vpow2.f32 %v3822_v32 }
 0xb6b   :  { %v3758_v18 = vadd.f32 -1.4531521, %v3752_v48  ;;  %v3753_v46 = vmul.f32 1.0614054, %v9801_v31  ;;  %9810 = vpow2.f32 %v3824_v5 }
 0xb6c   :  { %9812 = vpow2.f32 %v3826_v15 }
 0xb6d   :  { %v3764_v21 = vmul.f32 %v9799_v11, %v3758_v18  ;;  %v3759_v59 = vadd.f32 -1.4531521, %v3753_v46 }
 0xb6f   :  { %v3770_v0 = vadd.f32 1.4214138, %v3764_v21  ;;  %v3765_v57 = vmul.f32 %v9801_v31, %v3759_v59 }
 0xb70   :  { %v9803_v6 = vpop.eup %9802 }
 0xb71   :  { %v3776_v43 = vmul.f32 %v9799_v11, %v3770_v0  ;;  %v3771_v26 = vadd.f32 1.4214138, %v3765_v57  ;;  %v3754_v61 = vmul.f32 1.0614054, %v9803_v6  ;;  %v3704_v0 = vmul.f32 0.5, %v11556_v20 }
 0xb72   :  { %v9805_v24 = vpop.eup %9804  ;;  %v3705_v57 = vmul.f32 0.5, %v11562_v62 }
 0xb73   :  { %v3782_v16 = vadd.f32 -0.28449672, %v3776_v43  ;;  %v3777_v9 = vmul.f32 %v9801_v31, %v3771_v26  ;;  %v3760_v19 = vadd.f32 -1.4531521, %v3754_v61  ;;  %v3755_v12 = vmul.f32 1.0614054, %v9805_v24  ;;  %v9807_v53 = vpop.eup %9806 }
 0xb74   :  { %v9809_v3 = vpop.eup %9808 }
 0xb75   :  { %v3788_v30 = vmul.f32 %v9799_v11, %v3782_v16  ;;  %v3783_v29 = vadd.f32 -0.28449672, %v3777_v9  ;;  %v3766_v39 = vmul.f32 %v9803_v6, %v3760_v19  ;;  %v3761_v28 = vadd.f32 -1.4531521, %v3755_v12  ;;  %v9811_v59 = vpop.eup %9810 }
 0xb76   :  { %v9813_v1 = vpop.eup %9812  ;;  %v3724_v9 = vsel %vm3718_vm1, 1.0, %v13032_v17 }
 0xb77   :  { %v3794_v55 = vadd.f32 0.2548296, %v3788_v30  ;;  %v3789_v22 = vmul.f32 %v9801_v31, %v3783_v29  ;;  %v3772_v63 = vadd.f32 1.4214138, %v3766_v39  ;;  %v3767_v38 = vmul.f32 %v9805_v24, %v3761_v28 }
 0xb78   :  { %v3725_v30 = vsel %vm3719_vm4, 1.0, %v13032_v17 }
 0xb79   :  { %v3800_v45 = vmul.f32 %v9799_v11, %v3794_v55  ;;  %v3795_v41 = vadd.f32 0.2548296, %v3789_v22  ;;  %v3778_v2 = vmul.f32 %v9803_v6, %v3772_v63  ;;  %v3773_v27 = vadd.f32 1.4214138, %v3767_v38  ;;  %v7932_v55 = vld [vmem:[#allocation5 + $0x7] ss:$0 sm:$0xff] }
 0xb7b   :  { %v3830_v42 = vmul.f32 %v9807_v53, %v3800_v45  ;;  %v3801_v35 = vmul.f32 %v9801_v31, %v3795_v41  ;;  %v3784_v49 = vadd.f32 -0.28449672, %v3778_v2  ;;  %v3779_v60 = vmul.f32 %v9805_v24, %v3773_v27 }
 0xb7d   :  { %v3836_v37 = vsub.f32 1.0, %v3830_v42  ;;  %v3831_v11 = vmul.f32 %v9809_v3, %v3801_v35  ;;  %v3790_v56 = vmul.f32 %v9803_v6, %v3784_v49  ;;  %v3785_v18 = vadd.f32 -0.28449672, %v3779_v60 }
 0xb7f   :  { %v3842_v48 = vmul.f32 %v3836_v37, %v3722_v13  ;;  %v3837_v4 = vsub.f32 1.0, %v3831_v11  ;;  %v3796_v10 = vadd.f32 0.2548296, %v3790_v56  ;;  %v3791_v46 = vmul.f32 %v9805_v24, %v3785_v18 }
 0xb81   :  { %v3848_v21 = vadd.f32 1.0, %v3842_v48  ;;  %v3843_v31 = vmul.f32 %v3837_v4, %v3723_v40  ;;  %v3802_v58 = vmul.f32 %v9803_v6, %v3796_v10  ;;  %v3797_v32 = vadd.f32 0.2548296, %v3791_v46 }
 0xb83   :  { %v3849_v52 = vadd.f32 1.0, %v3843_v31  ;;  %v3832_v14 = vmul.f32 %v9811_v59, %v3802_v58  ;;  %v3803_v43 = vmul.f32 %v9805_v24, %v3797_v32  ;;  %v3854_v26 = vmul.f32 %v3848_v21, %v3704_v0 }
 0xb84   :  { %v3707_v24 = vmul.f32 0.5, %v11578_v8 }
 0xb85   :  { %v3855_v61 = vmul.f32 %v3849_v52, %v3705_v57  ;;  %v3838_v16 = vsub.f32 1.0, %v3832_v14  ;;  %v3833_v6 = vmul.f32 %v9813_v1, %v3803_v43  ;;  %v9562_v52 = vld [vmem:[#allocation2 + $0x40] ss:$16 sps:$4 sm:$0xff]  }
 0xb86   :  { %8675 = vmatpush3.bf16.msra.mxu0 %v9562_v52  ;;  %v9564_v14 = vld [vmem:[#allocation2 + $0x60] ss:$16 sps:$4 sm:$0xff]  }
 0xb87   :  { %v3844_v19 = vmul.f32 %v3838_v16, %v3724_v9  ;;  %v3859_v23 = vpack.c.bf16 %v3855_v61, %v3854_v26  ;;  %v3839_v20 = vsub.f32 1.0, %v3833_v6  ;;  %8676 = vmatprep.subr.bf16.mxu0 %v13132_v36 }
 0xb89   :  { %8667 = vmatmul.mubr.bf16.gmra.mrb[92].mxu1 %v3859_v23  ;;  %v3850_v62 = vadd.f32 1.0, %v3844_v19  ;;  %v3845_v5 = vmul.f32 %v3839_v20, %v3725_v30 }
 0xb8a   :  { %8670 = vmatprep.mubr.msk.bf16.mxu1 %vm10135_vm0, %v13132_v36  ;;  %8677 = vmatpush3.bf16.msra.mxu0 %v9564_v14 }
 0xb8b   :  { %v3851_v12 = vadd.f32 1.0, %v3845_v5  ;;  %v3856_v29 = vmul.f32 %v3850_v62, %v3706_v54 }
 0xb8d   :  { %v3857_v39 = vmul.f32 %v3851_v12, %v3707_v24 }
 0xb8f   :  { %v3860_v25 = vpack.c.bf16 %v3857_v39, %v3856_v29 }
 0xb91   :  { %8671 = vmatmul.mubr.bf16.gmra.mrb[96].mxu1 %v3860_v25 }
 0xc27   :  { %v3907_v28 = vpop.f32.mrb[88].mxu1 }
 0xc28   :  { %v3908_v22 = vadd.f32 %v7932_v55, %v3907_v28  ;;  %v8664_v63 = vpop.f32.mrb[89].mxu1 }
 0xc29   :  { %v3910_v15 = vpop.f32.mrb[90].mxu1 }
 0xc2a   :  { %v11600_v45 = vadd.f32 %v3908_v22, %v11498_v7  ;;  %v3911_v38 = vadd.f32 %v7932_v55, %v3910_v15  ;;  %v8665_v53 = vpop.f32.mrb[91].mxu1 }
 0xc2c   :  { %13139 = vst [vmem:[#allocation40_spill] sm:$0xff] %v11600_v45  ;;  %v11603_v41 = vadd.f32 %v3911_v38, %v11501_v33  ;;  %v3953_v50 = vsel %vm203_vm2, %v11600_v45, 0.0 }
 0xc2d   :  { %3954 = vadd.xlane.f32.xlu0 %v3953_v50 }
 0xc2e   :  { %13140 = vst [vmem:[#allocation26_spill] sm:$0xff] %v11603_v41  ;;  %v3956_v8 = vsel %vm203_vm2, %v11603_v41, 0.0 }
 0xc2f   :  { %3957 = vadd.xlane.f32.xlu1 %v3956_v8  ;;  %v7935_v8 = vld [vmem:[#allocation5 + $0x8] ss:$0 sm:$0xff] }
 0xc5c   :  { %v3915_v2 = vpop.f32.mrb[92].mxu1 }
 0xc5d   :  { %v3916_v42 = vadd.f32 %v7932_v55, %v3915_v2  ;;  %v8668_v27 = vpop.f32.mrb[93].mxu1 }
 0xc5e   :  { %v3918_v35 = vpop.f32.mrb[94].mxu1 }
 0xc5f   :  { %v11610_v7 = vadd.f32 %v3916_v42, %v11508_v34  ;;  %v3919_v49 = vadd.f32 %v7932_v55, %v3918_v35  ;;  %v8669_v3 = vpop.f32.mrb[95].mxu1 }
 0xc61   :  { %13141 = vst [vmem:[#allocation21_spill] sm:$0xff] %v11610_v7  ;;  %v11613_v33 = vadd.f32 %v3919_v49, %v11511_v51  ;;  %v3959_v37 = vsel %vm203_vm2, %v11610_v7, 0.0  ;;  %v7936_v49 = vld [vmem:[#allocation5 + $0x9] ss:$0 sm:$0xff] }
 0xc62   :  { %3960 = vadd.xlane.f32.xlu0 %v3959_v37 }
 0xc63   :  { %13142 = vst [vmem:[#allocation18_spill] sm:$0xff] %v11613_v33  ;;  %v3962_v60 = vsel %vm203_vm2, %v11613_v33, 0.0 }
 0xc64   :  { %3963 = vadd.xlane.f32.xlu1 %v3962_v60  ;;  %v3923_v13 = vpop.f32.mrb[96].mxu1 }
 0xc65   :  { %v3924_v11 = vadd.f32 %v7932_v55, %v3923_v13  ;;  %v8672_v56 = vpop.f32.mrb[97].mxu1 }
 0xc66   :  { %v3926_v48 = vpop.f32.mrb[98].mxu1 }
 0xc67   :  { %v11620_v34 = vadd.f32 %v3924_v11, %v11518_v47  ;;  %v3927_v18 = vadd.f32 %v7932_v55, %v3926_v48  ;;  %v8673_v4 = vpop.f32.mrb[99].mxu1 }
 0xc69   :  { %13143 = vst [vmem:[#allocation17_spill] sm:$0xff] %v11620_v34  ;;  %v11623_v51 = vadd.f32 %v3927_v18, %v11521_v44  ;;  %v3965_v10 = vsel %vm203_vm2, %v11620_v34, 0.0 }
 0xc6a   :  { %3966 = vadd.xlane.f32.xlu0 %v3965_v10 }
 0xc6b   :  { %13144 = vst [vmem:[#allocation22_spill] sm:$0xff] %v11623_v51  ;;  %v3968_v40 = vsel %vm203_vm2, %v11623_v51, 0.0 }
 0xc6c   :  { %3969 = vadd.xlane.f32.xlu1 %v3968_v40 }
 0xcba   :  { %v3955_v46 = vpop.xlane.xlu0 %3954 }
 0xcbb   :  { %v3971_v21 = vmul.f32 0.03125, %v3955_v46 }
 0xcbc   :  { %v3958_v31 = vpop.xlane.xlu1 %3957 }
 0xcbd   :  { %v3977_v58 = vsub.f32 %v11600_v45, %v3971_v21  ;;  %v3972_v47 = vmul.f32 0.03125, %v3958_v31 }
 0xcbf   :  { %v3978_v59 = vsub.f32 %v11603_v41, %v3972_v47  ;;  %v3983_v0 = vmul.f32 %v3977_v58, %v3977_v58 }
 0xcc1   :  { %v3989_v44 = vsel %vm203_vm2, %v3983_v0, 0.0  ;;  %v3984_v32 = vmul.f32 %v3978_v59, %v3978_v59 }
 0xcc2   :  { %3990 = vadd.xlane.f32.xlu0 %v3989_v44 }
 0xcc3   :  { %v3992_v57 = vsel %vm203_vm2, %v3984_v32, 0.0 }
 0xcc4   :  { %3993 = vadd.xlane.f32.xlu1 %v3992_v57 }
 0xcef   :  { %v3961_v43 = vpop.xlane.xlu0 %3960 }
 0xcf0   :  { %v3973_v1 = vmul.f32 0.03125, %v3961_v43 }
 0xcf1   :  { %v3964_v26 = vpop.xlane.xlu1 %3963 }
 0xcf2   :  { %v3979_v61 = vsub.f32 %v11610_v7, %v3973_v1  ;;  %v3974_v16 = vmul.f32 0.03125, %v3964_v26 }
 0xcf4   :  { %v3980_v9 = vsub.f32 %v11613_v33, %v3974_v16  ;;  %v3985_v6 = vmul.f32 %v3979_v61, %v3979_v61 }
 0xcf6   :  { %v3995_v19 = vsel %vm203_vm2, %v3985_v6, 0.0  ;;  %v3986_v23 = vmul.f32 %v3980_v9, %v3980_v9 }
 0xcf7   :  { %3996 = vadd.xlane.f32.xlu0 %v3995_v19  ;;  %v3967_v20 = vpop.xlane.xlu0 %3966 }
 0xcf8   :  { %v3998_v30 = vsel %vm203_vm2, %v3986_v23, 0.0  ;;  %v3975_v62 = vmul.f32 0.03125, %v3967_v20 }
 0xcf9   :  { %3999 = vadd.xlane.f32.xlu1 %v3998_v30  ;;  %v3970_v5 = vpop.xlane.xlu1 %3969 }
 0xcfa   :  { %v3981_v54 = vsub.f32 %v11620_v34, %v3975_v62  ;;  %v3976_v24 = vmul.f32 0.03125, %v3970_v5 }
 0xcfc   :  { %v3982_v12 = vsub.f32 %v11623_v51, %v3976_v24  ;;  %v3987_v29 = vmul.f32 %v3981_v54, %v3981_v54 }
 0xcfe   :  { %v4001_v39 = vsel %vm203_vm2, %v3987_v29, 0.0  ;;  %v3988_v25 = vmul.f32 %v3982_v12, %v3982_v12 }
 0xcff   :  { %4002 = vadd.xlane.f32.xlu0 %v4001_v39 }
 0xd00   :  { %v4004_v55 = vsel %vm203_vm2, %v3988_v25, 0.0 }
 0xd01   :  { %4005 = vadd.xlane.f32.xlu1 %v4004_v55 }
 0xd4f   :  { %v3991_v28 = vpop.xlane.xlu0 %3990 }
 0xd50   :  { %v4007_v22 = vmul.f32 0.03125, %v3991_v28 }
 0xd51   :  { %v3994_v63 = vpop.xlane.xlu1 %3993 }
 0xd52   :  { %v4013_v15 = vadd.f32 1e-05, %v4007_v22  ;;  %v4008_v38 = vmul.f32 0.03125, %v3994_v63 }
 0xd54   :  { %9814 = vrsqrt.f32 %v4013_v15  ;;  %v4014_v53 = vadd.f32 1e-05, %v4008_v38 }
 0xd56   :  { %9816 = vrsqrt.f32 %v4014_v53 }
 0xd5e   :  { %v9815_v50 = vpop.eup %9814 }
 0xd5f   :  { %v4025_v2 = vmul.f32 %v9815_v50, %v3977_v58 }
 0xd60   :  { %v9817_v42 = vpop.eup %9816 }
 0xd61   :  { %v4035_v27 = vmul.f32 %v7935_v8, %v4025_v2  ;;  %v4026_v35 = vmul.f32 %v9817_v42, %v3978_v59 }
 0xd63   :  { %v4036_v3 = vmul.f32 %v7935_v8, %v4026_v35  ;;  %v4045_v37 = vadd.f32 %v7936_v49, %v4035_v27 }
 0xd65   :  { %v4046_v60 = vadd.f32 %v7936_v49, %v4036_v3 }
 0xd67   :  { %v4051_v13 = vpack.c.bf16 %v4046_v60, %v4045_v37 }
 0xd69   :  { %8679 = vmatmul.mubr.msk.bf16.vlgmr.msra.gmra.mrb[88].mxu0 %vm203_vm2, %v4051_v13 }
 0xd6a   :  { %8682 = vmatprep.mubr.msk.bf16.mxu0 %vm10135_vm0, %v13132_v36 }
 0xd84   :  { %v3997_v11 = vpop.xlane.xlu0 %3996 }
 0xd85   :  { %v4009_v56 = vmul.f32 0.03125, %v3997_v11 }
 0xd86   :  { %v4000_v48 = vpop.xlane.xlu1 %3999 }
 0xd87   :  { %v4015_v18 = vadd.f32 1e-05, %v4009_v56  ;;  %v4010_v4 = vmul.f32 0.03125, %v4000_v48 }
 0xd89   :  { %9818 = vrsqrt.f32 %v4015_v18  ;;  %v4016_v10 = vadd.f32 1e-05, %v4010_v4 }
 0xd8b   :  { %9820 = vrsqrt.f32 %v4016_v10 }
 0xd8c   :  { %v4003_v40 = vpop.xlane.xlu0 %4002 }
 0xd8d   :  { %v4011_v46 = vmul.f32 0.03125, %v4003_v40 }
 0xd8e   :  { %v4006_v21 = vpop.xlane.xlu1 %4005 }
 0xd8f   :  { %v4017_v31 = vadd.f32 1e-05, %v4011_v46  ;;  %v4012_v58 = vmul.f32 0.03125, %v4006_v21 }
 0xd91   :  { %9822 = vrsqrt.f32 %v4017_v31  ;;  %v4018_v47 = vadd.f32 1e-05, %v4012_v58 }
 0xd93   :  { %v9819_v59 = vpop.eup %9818  ;;  %9824 = vrsqrt.f32 %v4018_v47 }
 0xd94   :  { %v4027_v0 = vmul.f32 %v9819_v59, %v3979_v61 }
 0xd95   :  { %v9821_v44 = vpop.eup %9820 }
 0xd96   :  { %v4028_v32 = vmul.f32 %v9821_v44, %v3980_v9  ;;  %v4037_v57 = vmul.f32 %v7935_v8, %v4027_v0  ;;  %v7937_v9 = vld [vmem:[#allocation5 + $0xa] ss:$0 sm:$0xff] }
 0xd98   :  { %v4038_v52 = vmul.f32 %v7935_v8, %v4028_v32  ;;  %v4047_v14 = vadd.f32 %v7936_v49, %v4037_v57 }
 0xd9a   :  { %v4048_v43 = vadd.f32 %v7936_v49, %v4038_v52 }
 0xd9b   :  { %v9823_v1 = vpop.eup %9822 }
 0xd9c   :  { %v4052_v26 = vpack.c.bf16 %v4048_v43, %v4047_v14  ;;  %v4029_v16 = vmul.f32 %v9823_v1, %v3981_v54 }
 0xd9d   :  { %v9825_v6 = vpop.eup %9824 }
 0xd9e   :  { %8683 = vmatmul.mubr.msk.bf16.gmra.mrb[92].mxu0 %vm203_vm2, %v4052_v26  ;;  %v4030_v19 = vmul.f32 %v9825_v6, %v3982_v12  ;;  %v4039_v23 = vmul.f32 %v7935_v8, %v4029_v16 }
 0xd9f   :  { %8686 = vmatprep.mubr.msk.bf16.mxu0 %vm10135_vm0, %v13132_v36 }
 0xda0   :  { %v4040_v20 = vmul.f32 %v7935_v8, %v4030_v19  ;;  %v4049_v30 = vadd.f32 %v7936_v49, %v4039_v23 }
 0xda2   :  { %v4050_v61 = vadd.f32 %v7936_v49, %v4040_v20 }
 0xda4   :  { %v4053_v62 = vpack.c.bf16 %v4050_v61, %v4049_v30 }
 0xda6   :  { %8687 = vmatmul.mubr.msk.bf16.gmra.mrb[96].mxu0 %vm203_vm2, %v4053_v62 }
 0xe3c   :  { %v4113_v5 = vpop.f32.mrb[88].mxu0 }
 0xe3d   :  { %v8680_v24 = vpop.f32.mrb[89].mxu0  ;;  %v4114_v39 = vadd.f32 %v7937_v9, %v4113_v5 }
 0xe3e   :  { %v4116_v29 = vpop.f32.mrb[90].mxu0 }
 0xe3f   :  { %v4117_v54 = vadd.f32 %v7937_v9, %v4116_v29  ;;  %v8681_v25 = vpop.f32.mrb[91].mxu0 }
 0xe41   :  { %v11649_v55 = vpack.i.bf16 %v4117_v54, %v4114_v39  ;;  %v11651_v28 = vpack.c.bf16 %v4117_v54, %v4114_v39 }
 0xe43   :  { %9334 = vrot.lane.b32.xlu0 %v11649_v55, %s10136_s0  ;;  %8694 = vmatprep.mubr.msk.bf16.mxu1 %vm558_vm3, %v11651_v28 }
 0xe71   :  { %v4121_v12 = vpop.f32.mrb[92].mxu0 }
 0xe72   :  { %v8684_v22 = vpop.f32.mrb[93].mxu0  ;;  %v4122_v15 = vadd.f32 %v7937_v9, %v4121_v12 }
 0xe73   :  { %v4124_v63 = vpop.f32.mrb[94].mxu0 }
 0xe74   :  { %v4125_v38 = vadd.f32 %v7937_v9, %v4124_v63  ;;  %v8685_v53 = vpop.f32.mrb[95].mxu0  ;;  %v11693_v13 = vpack.c.bf16 %v4122_v15, %v4122_v15 }
 0xe76   :  { %v11657_v50 = vpack.i.bf16 %v4125_v38, %v4122_v15 }
 0xe78   :  { %9354 = vrot.lane.b32.xlu0 %v11657_v50, %s10137_s26  ;;  %9339 = vrot.lane.b32.xlu1 %v11657_v50, %s10136_s0 }
 0xe79   :  { %v4129_v8 = vpop.f32.mrb[96].mxu0 }
 0xe7a   :  { %v4130_v2 = vadd.f32 %v7937_v9, %v4129_v8  ;;  %v8688_v42 = vpop.f32.mrb[97].mxu0 }
 0xe7b   :  { %v4132_v27 = vpop.f32.mrb[98].mxu0 }
 0xe7c   :  { %9364 = vrot.lane.b32.xlu0 %v11649_v55, %s10138_s27  ;;  %v4133_v35 = vadd.f32 %v7937_v9, %v4132_v27  ;;  %v8689_v49 = vpop.f32.mrb[99].mxu0  ;;  %v11665_v3 = vpack.c.bf16 %v4130_v2, %v4125_v38 }
 0xe7e   :  { %8702 = vmatprep.mubr.msk.bf16.mxu0 %vm558_vm3, %v11665_v3  ;;  %v11669_v37 = vpack.i.bf16 %v4133_v35, %v4130_v2  ;;  %v11687_v60 = vpack.c.bf16 %v4133_v35, %v4133_v35 }
 0xe80   :  { %9374 = vrot.lane.b32.xlu0 %v11669_v37, %s10138_s27  ;;  %9344 = vrot.lane.b32.xlu1 %v11669_v37, %s10136_s0 }
 0xe84   :  { %9379 = vrot.lane.b32.xlu0 %v11649_v55, %s10139_s28  ;;  %9349 = vrot.lane.b32.xlu1 %v11649_v55, %s10137_s26 }
 0xe88   :  { %4368 = vrot.lane.b32.xlu0 %v11665_v3, %s10140_s29  ;;  %9359 = vrot.lane.b32.xlu1 %v11669_v37, %s10137_s26 }
 0xe8c   :  { %9389 = vrot.lane.b32.xlu0 %v11669_v37, %s10139_s28  ;;  %9369 = vrot.lane.b32.xlu1 %v11657_v50, %s10138_s27 }
 0xe90   :  { %4302 = vrot.lane.b32.xlu1 %v11651_v28, %s10140_s29  ;;  %4370 = vrot.lane.b32.xlu0 %v11687_v60, %s10140_s29 }
 0xe94   :  { %4304 = vrot.lane.b32.xlu1 %v11693_v13, %s10140_s29 }
 0xe98   :  { %9384 = vrot.lane.b32.xlu1 %v11657_v50, %s10139_s28 }
 0xeb5   :  { %v9335_v11 = vpop.permute.xlu0 %9334 }
 0xeb6   :  { %v9337_v56 = vunpack.i.h.bf16 %v9335_v11  ;;  %v9336_v48 = vunpack.i.l.bf16 %v9335_v11 }
 0xeb8   :  { %v11699_v18 = vpack.c.bf16 %v9337_v56, %v9336_v48 }
 0xeba   :  { %4434 = vrot.lane.b32.xlu1 %v11699_v18, %s10140_s29 }
 0xebe   :  { %9394 = vrot.lane.b32.xlu1 %v11649_v55, %s10141_s30 }
 0xeea   :  { %v9355_v4 = vpop.permute.xlu0 %9354  ;;  %v9340_v10 = vpop.permute.xlu1 %9339 }
 0xeeb   :  { %v9341_v40 = vunpack.i.l.bf16 %v9340_v10  ;;  %v9342_v47 = vunpack.i.h.bf16 %v9340_v10  ;;  %v9356_v19 = vunpack.i.l.bf16 %v9355_v4  ;;  %v9357_v61 = vunpack.i.h.bf16 %v9355_v4 }
 0xeed   :  { %v11705_v46 = vpack.c.bf16 %v9341_v40, %v9341_v40  ;;  %v11733_v62 = vpack.c.bf16 %v9356_v19, %v9356_v19 }
 0xeee   :  { %v9365_v21 = vpop.permute.xlu0 %9364 }
 0xeef   :  { %4436 = vrot.lane.b32.xlu0 %v11705_v46, %s10140_s29  ;;  %v9367_v54 = vunpack.i.h.bf16 %v9365_v21  ;;  %v9366_v25 = vunpack.i.l.bf16 %v9365_v21 }
 0xef1   :  { %v11750_v63 = vpack.c.bf16 %v9367_v54, %v9366_v25 }
 0xef2   :  { %v11709_v31 = vpop.permute.xlu0 %9374  ;;  %v9345_v58 = vpop.permute.xlu1 %9344 }
 0xef3   :  { %9399 = vrot.lane.b32.xlu0 %v11657_v50, %s10141_s30  ;;  %v9346_v59 = vunpack.i.l.bf16 %v9345_v58  ;;  %v9347_v14 = vunpack.i.h.bf16 %v9345_v58  ;;  %v9376_v42 = vunpack.i.l.bf16 %v11709_v31 }
 0xef5   :  { %v11713_v0 = vpack.c.bf16 %v9346_v59, %v9342_v47  ;;  %v11727_v6 = vpack.c.bf16 %v9347_v14, %v9347_v14 }
 0xef6   :  { %v11715_v44 = vpop.permute.xlu0 %9379  ;;  %v9350_v32 = vpop.permute.xlu1 %9349 }
 0xef7   :  { %v9352_v57 = vunpack.i.h.bf16 %v9350_v32  ;;  %v9351_v52 = vunpack.i.l.bf16 %v9350_v32  ;;  %4500 = vrot.lane.b32.xlu1 %v11713_v0, %s10140_s29  ;;  %v9382_v35 = vunpack.i.h.bf16 %v11715_v44  ;;  %v9381_v49 = vunpack.i.l.bf16 %v11715_v44 }
 0xef9   :  { %v11719_v43 = vpack.c.bf16 %v9352_v57, %v9351_v52  ;;  %v11783_v56 = vpack.c.bf16 %v9382_v35, %v9381_v49 }
 0xefa   :  { %v4369_v1 = vpop.permute.xlu0 %4368  ;;  %v9360_v26 = vpop.permute.xlu1 %9359 }
 0xefb   :  { %9052 = vmatprep.subr.msk.bf16.mxu0 %vm558_vm3, %v4369_v1  ;;  %9404 = vrot.lane.b32.xlu1 %v11669_v37, %s10141_s30  ;;  %v4379_v16 = vsel %vm558_vm3, %v4369_v1, 0  ;;  %v9361_v23 = vunpack.i.l.bf16 %v9360_v26  ;;  %v9362_v22 = vunpack.i.h.bf16 %v9360_v26 }
 0xefc   :  { %4566 = vrot.lane.b32.xlu0 %v11719_v43, %s10140_s29  ;;  %8699 = vmatpush3.bf16.xpose.msra.mxu0 %v4379_v16 }
 0xefd   :  { %v11735_v9 = vpack.c.bf16 %v9361_v23, %v9357_v61  ;;  %v11752_v15 = vpack.c.bf16 %v9362_v22, %v9362_v22 }
 0xefe   :  { %v9390_v20 = vpop.permute.xlu0 %9389  ;;  %v9370_v30 = vpop.permute.xlu1 %9369 }
 0xeff   :  { %4502 = vrot.lane.b32.xlu1 %v11727_v6, %s10140_s29  ;;  %v9371_v38 = vunpack.i.l.bf16 %v9370_v30  ;;  %v9372_v8 = vunpack.i.h.bf16 %v9370_v30  ;;  %v9392_v21 = vunpack.i.h.bf16 %v9390_v20 }
 0xf00   :  { %9409 = vrot.lane.b32.xlu0 %v11649_v55, %s10142_s4 }
 0xf01   :  { %v11763_v2 = vpack.c.bf16 %v9371_v38, %v9371_v38  ;;  %v11770_v27 = vpack.c.bf16 %v9376_v42, %v9372_v8 }
 0xf02   :  { %v4371_v5 = vpop.permute.xlu0 %4370  ;;  %v4303_v24 = vpop.permute.xlu1 %4302 }
 0xf03   :  { %9050 = vmatprep.subr.msk.bf16.mxu1 %vm558_vm3, %v4303_v24  ;;  %9053 = vmatprep.subr.msk.bf16.mxu0 %vm558_vm3, %v4371_v5  ;;  %v4313_v29 = vsel %vm558_vm3, %v4303_v24, 0  ;;  %v4382_v39 = vsel %vm558_vm3, %v4371_v5, 0 }
 0xf04   :  { %4568 = vrot.lane.b32.xlu1 %v11733_v62, %s10140_s29  ;;  %4632 = vrot.lane.b32.xlu0 %v11735_v9, %s10140_s29 }
 0xf05   :  { %8691 = vmatpush3.bf16.xpose.msra.mxu1 %v4313_v29  ;;  %8701 = vmatpush3.bf16.xpose.msra.mxu0 %v4382_v39 }
 0xf06   :  { %v4305_v12 = vpop.permute.xlu1 %4304 }
 0xf07   :  { %9051 = vmatprep.subr.msk.bf16.mxu1 %vm558_vm3, %v4305_v12  ;;  %v4316_v53 = vsel %vm558_vm3, %v4305_v12, 0 }
 0xf08   :  { %9414 = vrot.lane.b32.xlu1 %v11657_v50, %s10142_s4  ;;  %9419 = vrot.lane.b32.xlu0 %v11669_v37, %s10142_s4 }
 0xf0a   :  { %v9385_v11 = vpop.permute.xlu1 %9384 }
 0xf0b   :  { %v9386_v48 = vunpack.i.l.bf16 %v9385_v11  ;;  %v9387_v10 = vunpack.i.h.bf16 %v9385_v11 }
 0xf0c   :  { %8703 = vmatmul.mubr.msk.bf16.vlgmr.msra.gmra.mrb[100].mxu0 %vm558_vm3, %v11687_v60  ;;  %4698 = vrot.lane.b32.xlu1 %v11750_v63, %s10140_s29 }
 0xf0d   :  { %4634 = vrot.lane.b32.xlu0 %v11752_v15, %s10140_s29  ;;  %8693 = vmatpush3.bf16.xpose.msra.mxu1 %v4316_v53  ;;  %v11791_v40 = vpack.c.bf16 %v9386_v48, %v9386_v48 }
 0xf0e   :  { %8718 = vmatprep.mubr.msk.bf16.mxu0 %vm558_vm3, %v11713_v0 }
 0xf10   :  { %9424 = vrot.lane.b32.xlu1 %v11649_v55, %s10143_s5  ;;  %v9377_v55 = vunpack.i.h.bf16 %v11709_v31 }
 0xf11   :  { %4700 = vrot.lane.b32.xlu0 %v11763_v2, %s10140_s29 }
 0xf12   :  { %v11789_v4 = vpack.c.bf16 %v9377_v55, %v9377_v55 }
 0xf14   :  { %8695 = vmatmul.mubr.msk.bf16.vlgmr.msra.gmra.mrb[100].mxu1 %vm558_vm3, %v11693_v13  ;;  %4764 = vrot.lane.b32.xlu1 %v11770_v27, %s10140_s29 }
 0xf15   :  { %9429 = vrot.lane.b32.xlu0 %v11657_v50, %s10143_s5  ;;  %8710 = vmatprep.mubr.msk.bf16.mxu1 %vm558_vm3, %v11699_v18  ;;  %v9391_v50 = vunpack.i.l.bf16 %v9390_v20 }
 0xf17   :  { %v11797_v31 = vpack.c.bf16 %v9391_v50, %v9387_v10 }
 0xf18   :  { %9434 = vrot.lane.b32.xlu1 %v11669_v37, %s10143_s5  ;;  %v11801_v37 = vpack.c.bf16 %v9392_v21, %v9392_v21 }
 0xf19   :  { %4830 = vrot.lane.b32.xlu0 %v11783_v56, %s10140_s29 }
 0xf1c   :  { %4766 = vrot.lane.b32.xlu1 %v11789_v4, %s10140_s29 }
 0xf1d   :  { %4832 = vrot.lane.b32.xlu0 %v11791_v40, %s10140_s29 }
 0xf20   :  { %4896 = vrot.lane.b32.xlu1 %v11797_v31, %s10140_s29 }
 0xf24   :  { %4898 = vrot.lane.b32.xlu1 %v11801_v37, %s10140_s29 }
 0xf2c   :  { %v4435_v58 = vpop.permute.xlu1 %4434 }
 0xf2d   :  { %9054 = vmatprep.subr.msk.bf16.mxu1 %vm558_vm3, %v4435_v58  ;;  %v4445_v47 = vsel %vm558_vm3, %v4435_v58, 0 }
 0xf2e   :  { %8707 = vmatpush3.bf16.xpose.msra.mxu1 %v4445_v47 }
 0xf30   :  { %v9395_v59 = vpop.permute.xlu1 %9394 }
 0xf31   :  { %v9397_v44 = vunpack.i.h.bf16 %v9395_v59  ;;  %v9396_v32 = vunpack.i.l.bf16 %v9395_v59 }
 0xf33   :  { %v11807_v57 = vpack.c.bf16 %v9397_v44, %v9396_v32 }
 0xf35   :  { %4962 = vrot.lane.b32.xlu0 %v11807_v57, %s10140_s29 }
 0xf61   :  { %v4437_v52 = vpop.permute.xlu0 %4436 }
 0xf62   :  { %9055 = vmatprep.subr.msk.bf16.mxu1 %vm558_vm3, %v4437_v52  ;;  %v4448_v14 = vsel %vm558_vm3, %v4437_v52, 0 }
 0xf63   :  { %8709 = vmatpush3.bf16.xpose.msra.mxu1 %v4448_v14 }
 0xf65   :  { %v9400_v1 = vpop.permute.xlu0 %9399 }
 0xf66   :  { %v9401_v26 = vunpack.i.l.bf16 %v9400_v1  ;;  %v9402_v30 = vunpack.i.h.bf16 %v9400_v1 }
 0xf68   :  { %v11813_v16 = vpack.c.bf16 %v9401_v26, %v9401_v26 }
 0xf69   :  { %v4501_v19 = vpop.permute.xlu1 %4500 }
 0xf6a   :  { %8711 = vmatmul.mubr.msk.bf16.vlgmr.msra.gmra.mrb[104].mxu1 %vm558_vm3, %v11705_v46  ;;  %4964 = vrot.lane.b32.xlu0 %v11813_v16, %s10140_s29  ;;  %v4511_v23 = vsel %vm558_vm3, %v4501_v19, 0 }
 0xf6b   :  { %9056 = vmatprep.subr.msk.bf16.mxu0 %vm558_vm3, %v4501_v19  ;;  %8726 = vmatprep.mubr.msk.bf16.mxu1 %vm558_vm3, %v11719_v43 }
 0xf6c   :  { %8715 = vmatpush3.bf16.xpose.msra.mxu0 %v4511_v23 }
 0xf6d   :  { %v9405_v20 = vpop.permute.xlu1 %9404 }
 0xf6e   :  { %v9406_v61 = vunpack.i.l.bf16 %v9405_v20  ;;  %v4567_v5 = vpop.permute.xlu0 %4566  ;;  %v9407_v29 = vunpack.i.h.bf16 %v9405_v20 }
 0xf6f   :  { %9058 = vmatprep.subr.msk.bf16.mxu1 %vm558_vm3, %v4567_v5  ;;  %v4577_v24 = vsel %vm558_vm3, %v4567_v5, 0 }
 0xf70   :  { %v11825_v39 = vpack.c.bf16 %v9406_v61, %v9402_v30  ;;  %8723 = vmatpush3.bf16.xpose.msra.mxu1 %v4577_v24  ;;  %v11831_v53 = vpack.c.bf16 %v9407_v29, %v9407_v29 }
 0xf71   :  { %v4503_v54 = vpop.permute.xlu1 %4502 }
 0xf72   :  { %v9410_v25 = vpop.permute.xlu0 %9409  ;;  %9057 = vmatprep.subr.msk.bf16.mxu0 %vm558_vm3, %v4503_v54  ;;  %5028 = vrot.lane.b32.xlu1 %v11825_v39, %s10140_s29  ;;  %v4514_v12 = vsel %vm558_vm3, %v4503_v54, 0 }
 0xf73   :  { %v9412_v22 = vunpack.i.h.bf16 %v9410_v25  ;;  %v9411_v38 = vunpack.i.l.bf16 %v9410_v25 }
 0xf74   :  { %8717 = vmatpush3.bf16.xpose.msra.mxu0 %v4514_v12 }
 0xf75   :  { %v11833_v8 = vpack.c.bf16 %v9412_v22, %v9411_v38 }
 0xf76   :  { %v4569_v42 = vpop.permute.xlu1 %4568  ;;  %v4633_v35 = vpop.permute.xlu0 %4632  ;;  %5030 = vrot.lane.b32.xlu1 %v11831_v53, %s10140_s29 }
 0xf77   :  { %9059 = vmatprep.subr.msk.bf16.mxu1 %vm558_vm3, %v4569_v42  ;;  %9060 = vmatprep.subr.msk.bf16.mxu0 %vm558_vm3, %v4633_v35  ;;  %v4580_v49 = vsel %vm558_vm3, %v4569_v42, 0  ;;  %v4643_v48 = vsel %vm558_vm3, %v4633_v35, 0 }
 0xf78   :  { %5094 = vrot.lane.b32.xlu0 %v11833_v8, %s10140_s29  ;;  %8725 = vmatpush3.bf16.xpose.msra.mxu1 %v4580_v49 }
 0xf7a   :  { %v9415_v11 = vpop.permute.xlu1 %9414  ;;  %v9420_v55 = vpop.permute.xlu0 %9419 }
 0xf7b   :  { %8719 = vmatmul.mubr.msk.bf16.vlgmr.msra.gmra.mrb[104].mxu0 %vm558_vm3, %v11727_v6  ;;  %v9417_v10 = vunpack.i.h.bf16 %v9415_v11  ;;  %v9416_v50 = vunpack.i.l.bf16 %v9415_v11  ;;  %v9421_v21 = vunpack.i.l.bf16 %v9420_v55  ;;  %v9422_v59 = vunpack.i.h.bf16 %v9420_v55 }
 0xf7c   :  { %8731 = vmatpush3.bf16.xpose.msra.mxu0 %v4643_v48  ;;  %8734 = vmatprep.mubr.msk.bf16.mxu0 %vm558_vm3, %v11735_v9 }
 0xf7d   :  { %v11847_v58 = vpack.c.bf16 %v9416_v50, %v9416_v50  ;;  %v11849_v47 = vpack.c.bf16 %v9421_v21, %v9417_v10  ;;  %v11860_v14 = vpack.c.bf16 %v9422_v59, %v9422_v59 }
 0xf7e   :  { %v4699_v44 = vpop.permute.xlu1 %4698 }
 0xf7f   :  { %v4635_v32 = vpop.permute.xlu0 %4634  ;;  %8727 = vmatmul.mubr.msk.bf16.vlgmr.msra.gmra.mrb[108].mxu1 %vm558_vm3, %v11733_v62  ;;  %9062 = vmatprep.subr.msk.bf16.mxu1 %vm558_vm3, %v4699_v44  ;;  %v4709_v52 = vsel %vm558_vm3, %v4699_v44, 0  ;;  %13145 = vst [vmem:[#allocation33_spill] sm:$0xff] %v11860_v14 }
 0xf80   :  { %9061 = vmatprep.subr.msk.bf16.mxu0 %vm558_vm3, %v4635_v32  ;;  %5160 = vrot.lane.b32.xlu1 %v11849_v47, %s10140_s29  ;;  %v4646_v26 = vsel %vm558_vm3, %v4635_v32, 0 }
 0xf81   :  { %5096 = vrot.lane.b32.xlu0 %v11847_v58, %s10140_s29  ;;  %8739 = vmatpush3.bf16.xpose.msra.mxu1 %v4709_v52 }
 0xf82   :  { %8742 = vmatprep.mubr.msk.bf16.mxu1 %vm558_vm3, %v11750_v63  ;;  %v9425_v1 = vpop.permute.xlu1 %9424 }
 0xf83   :  { %v9427_v19 = vunpack.i.h.bf16 %v9425_v1  ;;  %v9426_v23 = vunpack.i.l.bf16 %v9425_v1  ;;  %v4701_v20 = vpop.permute.xlu0 %4700 }
 0xf84   :  { %8733 = vmatpush3.bf16.xpose.msra.mxu0 %v4646_v26  ;;  %9063 = vmatprep.subr.msk.bf16.mxu1 %vm558_vm3, %v4701_v20  ;;  %v4712_v29 = vsel %vm558_vm3, %v4701_v20, 0 }
 0xf85   :  { %5162 = vrot.lane.b32.xlu1 %v11860_v14, %s10140_s29  ;;  %v11868_v30 = vpack.c.bf16 %v9427_v19, %v9426_v23 }
 0xf86   :  { %v4765_v61 = vpop.permute.xlu1 %4764 }
 0xf87   :  { %v9430_v5 = vpop.permute.xlu0 %9429  ;;  %9064 = vmatprep.subr.msk.bf16.mxu0 %vm558_vm3, %v4765_v61  ;;  %5226 = vrot.lane.b32.xlu0 %v11868_v30, %s10140_s29  ;;  %v4775_v12 = vsel %vm558_vm3, %v4765_v61, 0 }
 0xf88   :  { %v9431_v24 = vunpack.i.l.bf16 %v9430_v5  ;;  %v9432_v22 = vunpack.i.h.bf16 %v9430_v5 }
 0xf89   :  { %8741 = vmatpush3.bf16.xpose.msra.mxu1 %v4712_v29 }
 0xf8a   :  { %v11874_v54 = vpack.c.bf16 %v9431_v24, %v9431_v24  ;;  %v9435_v25 = vpop.permute.xlu1 %9434 }
 0xf8b   :  { %8735 = vmatmul.mubr.msk.bf16.vlgmr.msra.gmra.mrb[108].mxu0 %vm558_vm3, %v11752_v15  ;;  %v9437_v38 = vunpack.i.h.bf16 %v9435_v25  ;;  %v9436_v42 = vunpack.i.l.bf16 %v9435_v25  ;;  %v4831_v35 = vpop.permute.xlu0 %4830 }
 0xf8c   :  { %8747 = vmatpush3.bf16.xpose.msra.mxu0 %v4775_v12  ;;  %8750 = vmatprep.mubr.msk.bf16.mxu0 %vm558_vm3, %v11770_v27  ;;  %v4841_v48 = vsel %vm558_vm3, %v4831_v35, 0 }
 0xf8d   :  { %9066 = vmatprep.subr.msk.bf16.mxu1 %vm558_vm3, %v4831_v35  ;;  %5228 = vrot.lane.b32.xlu0 %v11874_v54, %s10140_s29  ;;  %v11884_v49 = vpack.c.bf16 %v9437_v38, %v9437_v38  ;;  %v11886_v11 = vpack.c.bf16 %v9436_v42, %v9432_v22 }
 0xf8e   :  { %v4767_v55 = vpop.permute.xlu1 %4766 }
 0xf8f   :  { %13146 = vst [vmem:[#allocation29_spill] sm:$0xff] %v11884_v49  ;;  %13147 = vst [vmem:[#allocation44_spill] sm:$0xff] %v11886_v11  ;;  %9065 = vmatprep.subr.msk.bf16.mxu0 %vm558_vm3, %v4767_v55  ;;  %5292 = vrot.lane.b32.xlu1 %v11886_v11, %s10140_s29  ;;  %v4833_v10 = vpop.permute.xlu0 %4832  ;;  %v4778_v50 = vsel %vm558_vm3, %v4767_v55, 0 }
 0xf90   :  { %8743 = vmatmul.mubr.msk.bf16.vlgmr.msra.gmra.mrb[112].mxu1 %vm558_vm3, %v11763_v2  ;;  %v4844_v59 = vsel %vm558_vm3, %v4833_v10, 0 }
 0xf91   :  { %5294 = vrot.lane.b32.xlu0 %v11884_v49, %s10140_s29  ;;  %8755 = vmatpush3.bf16.xpose.msra.mxu1 %v4841_v48 }
 0xf92   :  { %8758 = vmatprep.mubr.msk.bf16.mxu1 %vm558_vm3, %v11783_v56  ;;  %9067 = vmatprep.subr.msk.bf16.mxu1 %vm558_vm3, %v4833_v10  ;;  %v4897_v21 = vpop.permute.xlu1 %4896 }
 0xf93   :  { %5966 = vrot.lane.b32.xlu1 %v11693_v13, %s10144_s6  ;;  %v4907_v13 = vsel %vm558_vm3, %v4897_v21, 0 }
 0xf94   :  { %8749 = vmatpush3.bf16.xpose.msra.mxu0 %v4778_v50 }
 0xf95   :  { %5964 = vrot.lane.b32.xlu0 %v11651_v28, %s10144_s6  ;;  %9068 = vmatprep.subr.msk.bf16.mxu0 %vm558_vm3, %v4897_v21 }
 0xf96   :  { %v4899_v28 = vpop.permute.xlu1 %4898 }
 0xf97   :  { %6026 = vrot.lane.b32.xlu1 %v11665_v3, %s10144_s6  ;;  %v4910_v3 = vsel %vm558_vm3, %v4899_v28, 0 }
 0xf99   :  { %6088 = vrot.lane.b32.xlu0 %v11699_v18, %s10144_s6  ;;  %8757 = vmatpush3.bf16.xpose.msra.mxu1 %v4844_v59 }
 0xf9b   :  { %8751 = vmatmul.mubr.msk.bf16.vlgmr.msra.gmra.mrb[112].mxu0 %vm558_vm3, %v11789_v4  ;;  %6212 = vrot.lane.b32.xlu1 %v11719_v43, %s10144_s6 }
 0xf9c   :  { %8763 = vmatpush3.bf16.xpose.msra.mxu0 %v4907_v13  ;;  %8766 = vmatprep.mubr.msk.bf16.mxu0 %vm558_vm3, %v11797_v31 }
 0xf9d   :  { %6090 = vrot.lane.b32.xlu0 %v11705_v46, %s10144_s6  ;;  %9069 = vmatprep.subr.msk.bf16.mxu0 %vm558_vm3, %v4899_v28 }
 0xf9f   :  { %6214 = vrot.lane.b32.xlu1 %v11733_v62, %s10144_s6 }
 0xfa0   :  { %8759 = vmatmul.mubr.msk.bf16.vlgmr.msra.gmra.mrb[116].mxu1 %vm558_vm3, %v11791_v40 }
 0xfa1   :  { %6028 = vrot.lane.b32.xlu0 %v11687_v60, %s10144_s6  ;;  %8774 = vmatprep.mubr.msk.bf16.mxu1 %vm558_vm3, %v11807_v57 }
 0xfa3   :  { %6274 = vrot.lane.b32.xlu1 %v11735_v9, %s10144_s6 }
 0xfa4   :  { %8765 = vmatpush3.bf16.xpose.msra.mxu0 %v4910_v3 }
 0xfa5   :  { %6150 = vrot.lane.b32.xlu0 %v11713_v0, %s10144_s6 }
 0xfa7   :  { %v4963_v18 = vpop.permute.xlu0 %4962  ;;  %6460 = vrot.lane.b32.xlu1 %v11783_v56, %s10144_s6 }
 0xfa8   :  { %9070 = vmatprep.subr.msk.bf16.mxu1 %vm558_vm3, %v4963_v18  ;;  %v4973_v60 = vsel %vm558_vm3, %v4963_v18, 0 }
 0xfa9   :  { %6336 = vrot.lane.b32.xlu0 %v11750_v63, %s10144_s6  ;;  %8771 = vmatpush3.bf16.xpose.msra.mxu1 %v4973_v60 }
 0xfab   :  { %8767 = vmatmul.mubr.msk.bf16.vlgmr.msra.gmra.mrb[116].mxu0 %vm558_vm3, %v11801_v37  ;;  %6462 = vrot.lane.b32.xlu1 %v11791_v40, %s10144_s6 }
 0xfac   :  { %8782 = vmatprep.mubr.msk.bf16.mxu0 %vm558_vm3, %v11825_v39 }
 0xfad   :  { %6338 = vrot.lane.b32.xlu0 %v11763_v2, %s10144_s6 }
 0xfaf   :  { %6586 = vrot.lane.b32.xlu1 %v11813_v16, %s10144_s6 }
 0xfb1   :  { %6398 = vrot.lane.b32.xlu0 %v11770_v27, %s10144_s6 }
 0xfb3   :  { %6710 = vrot.lane.b32.xlu1 %v11847_v58, %s10144_s6 }
 0xfb5   :  { %6584 = vrot.lane.b32.xlu0 %v11807_v57, %s10144_s6 }
 0xfb7   :  { %6832 = vrot.lane.b32.xlu1 %v11868_v30, %s10144_s6 }
 0xfb9   :  { %6522 = vrot.lane.b32.xlu0 %v11797_v31, %s10144_s6 }
 0xfbb   :  { %6834 = vrot.lane.b32.xlu1 %v11874_v54, %s10144_s6 }
 0xfbd   :  { %6708 = vrot.lane.b32.xlu0 %v11833_v8, %s10144_s6 }
 0xfc1   :  { %6646 = vrot.lane.b32.xlu0 %v11825_v39, %s10144_s6 }
 0xfc5   :  { %6770 = vrot.lane.b32.xlu0 %v11849_v47, %s10144_s6 }
 0xfc9   :  { %6152 = vrot.lane.b32.xlu0 %v11727_v6, %s10144_s6 }
 0xfcd   :  { %6276 = vrot.lane.b32.xlu0 %v11752_v15, %s10144_s6 }
 0xfd1   :  { %6400 = vrot.lane.b32.xlu0 %v11789_v4, %s10144_s6  ;;  %v13148_v4 = vld [vmem:[#allocation20_spill] sm:$0xff] }
 0xfd5   :  { %6524 = vrot.lane.b32.xlu0 %v11801_v37, %s10144_s6 }
 0xfd9   :  { %6648 = vrot.lane.b32.xlu0 %v11831_v53, %s10144_s6 }
 0xfdc   :  { %v4965_v46 = vpop.permute.xlu0 %4964 }
 0xfdd   :  { %9071 = vmatprep.subr.msk.bf16.mxu1 %vm558_vm3, %v4965_v46  ;;  %v4976_v0 = vsel %vm558_vm3, %v4965_v46, 0 }
 0xfde   :  { %8773 = vmatpush3.bf16.xpose.msra.mxu1 %v4976_v0 }
 0xfdf   :  { %v8704_v43 = vpop.f32.mrb[100].mxu0 }
 0xfe0   :  { %v4418_v6 = vpop.f32.mrb[101].mxu0 }
 0xfe1   :  { %v8705_v62 = vpop.f32.mrb[102].mxu0  ;;  %v11998_v32 = vadd.f32 %v4418_v6, %v13148_v4 }
 0xfe2   :  { %v4421_v9 = vpop.f32.mrb[103].mxu0 }
 0xfe3   :  { %v5365_v23 = vsel %vm1609_vm5, %v11998_v32, -inf  ;;  %v12022_v12 = vadd.f32 %v4421_v9, %v13148_v4 }
 0xfe4   :  { %v5029_v63 = vpop.permute.xlu1 %5028 }
 0xfe5   :  { %8775 = vmatmul.mubr.msk.bf16.vlgmr.msra.gmra.mrb[120].mxu1 %vm558_vm3, %v11813_v16  ;;  %9072 = vmatprep.subr.msk.bf16.mxu0 %vm558_vm3, %v5029_v63  ;;  %v5039_v15 = vsel %vm558_vm3, %v5029_v63, 0  ;;  %v11990_v16 = vadd.f32 %v8704_v43, %v13148_v4  ;;  %v5368_v42 = vsel %vm1609_vm5, %v12022_v12, -inf }
 0xfe6   :  { %8790 = vmatprep.mubr.msk.bf16.mxu1 %vm558_vm3, %v11833_v8  ;;  %8779 = vmatpush3.bf16.xpose.msra.mxu0 %v5039_v15 }
 0xfe7   :  { %v8696_v2 = vpop.f32.mrb[100].mxu1  ;;  %v5371_v52 = vsel %vm1609_vm5, %v11990_v16, -inf }
 0xfe8   :  { %v4352_v27 = vpop.f32.mrb[101].mxu1  ;;  %v5031_v56 = vpop.permute.xlu1 %5030  ;;  %v12003_v1 = vadd.f32 %v8696_v2, %v13148_v4 }
 0xfe9   :  { %v11986_v40 = vadd.f32 %v4352_v27, %v13148_v4  ;;  %v8697_v31 = vpop.f32.mrb[102].mxu1  ;;  %9073 = vmatprep.subr.msk.bf16.mxu0 %vm558_vm3, %v5031_v56  ;;  %v5042_v44 = vsel %vm558_vm3, %v5031_v56, 0 }
 0xfea   :  { %v5095_v37 = vpop.permute.xlu0 %5094  ;;  %v4355_v57 = vpop.f32.mrb[103].mxu1  ;;  %v5362_v29 = vsel %vm1609_vm5, %v12003_v1, -inf }
 0xfeb   :  { %9074 = vmatprep.subr.msk.bf16.mxu1 %vm558_vm3, %v5095_v37  ;;  %v5105_v39 = vsel %vm558_vm3, %v5095_v37, 0  ;;  %v5356_v8 = vsel %vm1609_vm5, %v11986_v40, -inf  ;;  %v12014_v5 = vadd.f32 %v4355_v57, %v13148_v4 }
 0xfec   :  { %8787 = vmatpush3.bf16.xpose.msra.mxu1 %v5105_v39  ;;  %5357 = vmax.xlane.f32.xlu1 %v5356_v8 }
 0xfee   :  { %8781 = vmatpush3.bf16.xpose.msra.mxu0 %v5042_v44 }
 0xff0   :  { %5372 = vmax.xlane.f32.xlu1 %v5371_v52 }
 0xff2   :  { %v5161_v26 = vpop.permute.xlu1 %5160 }
 0xff3   :  { %v5097_v19 = vpop.permute.xlu0 %5096  ;;  %9076 = vmatprep.subr.msk.bf16.mxu0 %vm558_vm3, %v5161_v26  ;;  %v5171_v61 = vsel %vm558_vm3, %v5161_v26, 0 }
 0xff4   :  { %9075 = vmatprep.subr.msk.bf16.mxu1 %vm558_vm3, %v5097_v19  ;;  %v5108_v20 = vsel %vm558_vm3, %v5097_v19, 0  ;;  %5366 = vmax.xlane.f32.xlu1 %v5365_v23 }
 0xff5   :  { %8789 = vmatpush3.bf16.xpose.msra.mxu1 %v5108_v20  ;;  %8783 = vmatmul.mubr.msk.bf16.vlgmr.msra.gmra.mrb[120].mxu0 %vm558_vm3, %v11831_v53  ;;  %v5359_v53 = vsel %vm1609_vm5, %v12014_v5, -inf }
 0xff6   :  { %8795 = vmatpush3.bf16.xpose.msra.mxu0 %v5171_v61  ;;  %8798 = vmatprep.mubr.msk.bf16.mxu0 %vm558_vm3, %v11849_v47 }
 0xff7   :  { %v5163_v24 = vpop.permute.xlu1 %5162 }
 0xff8   :  { %5363 = vmax.xlane.f32.xlu0 %v5362_v29  ;;  %9077 = vmatprep.subr.msk.bf16.mxu0 %vm558_vm3, %v5163_v24  ;;  %v5174_v47 = vsel %vm558_vm3, %v5163_v24, 0 }
 0xff9   :  { %v5227_v25 = vpop.permute.xlu0 %5226 }
 0xffa   :  { %9078 = vmatprep.subr.msk.bf16.mxu1 %vm558_vm3, %v5227_v25  ;;  %v5237_v22 = vsel %vm558_vm3, %v5227_v25, 0 }
 0xffc   :  { %5360 = vmax.xlane.f32.xlu0 %v5359_v53  ;;  %8791 = vmatmul.mubr.msk.bf16.vlgmr.msra.gmra.mrb[124].mxu1 %vm558_vm3, %v11847_v58 }
 0xffd   :  { %8803 = vmatpush3.bf16.xpose.msra.mxu1 %v5237_v22  ;;  %8806 = vmatprep.mubr.msk.bf16.mxu1 %vm558_vm3, %v11868_v30 }
 0xffe   :  { %8797 = vmatpush3.bf16.xpose.msra.mxu0 %v5174_v47 }
 0xfff   :  { %v5229_v38 = vpop.permute.xlu0 %5228 }
0x1000   :  { %9079 = vmatprep.subr.msk.bf16.mxu1 %vm558_vm3, %v5229_v38  ;;  %5369 = vmax.xlane.f32.xlu0 %v5368_v42  ;;  %v5240_v58 = vsel %vm558_vm3, %v5229_v38, 0 }
0x1001   :  { %v5293_v35 = vpop.permute.xlu1 %5292 }
0x1002   :  { %9080 = vmatprep.subr.msk.bf16.mxu0 %vm558_vm3, %v5293_v35  ;;  %v5303_v30 = vsel %vm558_vm3, %v5293_v35, 0 }
0x1003   :  { %v5295_v55 = vpop.permute.xlu0 %5294 }
0x1004   :  { %v5306_v21 = vsel %vm558_vm3, %v5295_v55, 0 }
0x1005   :  { %8805 = vmatpush3.bf16.xpose.msra.mxu1 %v5240_v58  ;;  %8799 = vmatmul.mubr.msk.bf16.vlgmr.msra.gmra.mrb[124].mxu0 %vm558_vm3, %v11860_v14  ;;  %v5967_v10 = vpop.permute.xlu1 %5966 }
0x1006   :  { %8811 = vmatpush3.bf16.xpose.msra.mxu0 %v5303_v30  ;;  %8814 = vmatprep.mubr.msk.bf16.mxu0 %vm558_vm3, %v11886_v11  ;;  %v5976_v28 = vsel %vm2229_vm6, %v5967_v10, 0 }
0x1007   :  { %v5965_v48 = vpop.permute.xlu0 %5964  ;;  %9081 = vmatprep.subr.msk.bf16.mxu0 %vm558_vm3, %v5295_v55 }
0x1008   :  { %8818 = vmatprep.subr.bf16.mxu1 %v5965_v48 }
0x1009   :  { %v6027_v59 = vpop.permute.xlu1 %6026 }
0x100b   :  { %v12044_v50 = vpop.permute.xlu0 %6088 }
0x100c   :  { %8807 = vmatmul.mubr.msk.bf16.vlgmr.msra.gmra.mrb[128].mxu1 %vm558_vm3, %v11874_v54 }
0x100d   :  { %8819 = vmatpush3.bf16.msra.mxu1 %v5965_v48  ;;  %v12084_v57 = vpop.permute.xlu1 %6212 }
0x100e   :  { %9082 = vmatprep.subr.msk.bf16.mxu1 %vm2229_vm6, %v5967_v10  ;;  %8813 = vmatpush3.bf16.xpose.msra.mxu0 %v5306_v21 }
0x100f   :  { %v12050_v13 = vpop.permute.xlu0 %6090  ;;  %8826 = vmatprep.subr.bf16.mxu0 %v6027_v59 }
0x1011   :  { %8821 = vmatpush3.bf16.msra.mxu1 %v5976_v28  ;;  %v12096_v61 = vpop.permute.xlu1 %6214 }
0x1012   :  { %8834 = vmatprep.subr.bf16.mxu1 %v12044_v50  ;;  %13154 = vst [vmem:[#allocation35_spill] sm:$0xff] %v12096_v61 }
0x1013   :  { %v6029_v3 = vpop.permute.xlu0 %6028 }
0x1014   :  { %v6038_v54 = vsel %vm2229_vm6, %v6029_v3, 0 }
0x1015   :  { %8815 = vmatmul.mubr.msk.bf16.vlgmr.msra.gmra.mrb[128].mxu0 %vm558_vm3, %v11884_v49  ;;  %v12113_v58 = vpop.permute.xlu1 %6274 }
0x1016   :  { %8827 = vmatpush3.bf16.msra.mxu0 %v6027_v59 }
0x1017   :  { %9083 = vmatprep.subr.msk.bf16.mxu0 %vm2229_vm6, %v6029_v3  ;;  %v12058_v18 = vpop.permute.xlu0 %6150 }
0x1019   :  { %v12126_v3 = vpop.permute.xlu1 %6460 }
0x101a   :  { %8829 = vmatpush3.bf16.msra.mxu0 %v6038_v54  ;;  %13157 = vst [vmem:[#allocation24_spill] sm:$0xff] %v12126_v3 }
0x101b   :  { %8842 = vmatprep.subr.bf16.mxu0 %v12058_v18  ;;  %v12061_v60 = vpop.permute.xlu0 %6336 }
0x101c   :  { %13149 = vst [vmem:[#allocation41_spill] sm:$0xff] %v12061_v60 }
0x101f   :  { %v12063_v0 = vpop.permute.xlu0 %6338 }
0x1020   :  { %13150 = vst [vmem:[#allocation23_spill] sm:$0xff] %v12063_v0 }
0x1023   :  { %v12078_v56 = vpop.permute.xlu0 %6398 }
0x1024   :  { %13151 = vst [vmem:[#allocation42_spill] sm:$0xff] %v12078_v56 }
0x1027   :  { %v12082_v37 = vpop.permute.xlu0 %6584 }
0x1028   :  { %13152 = vst [vmem:[#allocation43_spill] sm:$0xff] %v12082_v37 }
0x102b   :  { %v12089_v52 = vpop.permute.xlu0 %6522 }
0x102c   :  { %13153 = vst [vmem:[#allocation45_spill] sm:$0xff] %v12089_v52 }
0x102f   :  { %v12103_v47 = vpop.permute.xlu0 %6708 }
0x1030   :  { %13155 = vst [vmem:[#allocation31_spill] sm:$0xff] %v12103_v47 }
0x1033   :  { %v12122_v21 = vpop.permute.xlu0 %6646 }
0x1034   :  { %13156 = vst [vmem:[#allocation25_spill] sm:$0xff] %v12122_v21 }
0x103d   :  { %v8712_v46 = vpop.f32.mrb[104].mxu1 }
0x103e   :  { %v12066_v43 = vadd.f32 %v8712_v46, %v13148_v4  ;;  %v4484_v6 = vpop.f32.mrb[105].mxu1 }
0x103f   :  { %v8713_v62 = vpop.f32.mrb[106].mxu1  ;;  %v12069_v9 = vadd.f32 %v4484_v6, %v13148_v4 }
0x1040   :  { %v4487_v63 = vpop.f32.mrb[107].mxu1  ;;  %v5380_v15 = vsel %vm1609_vm5, %v12066_v43, -inf }
0x1041   :  { %v12074_v2 = vadd.f32 %v4487_v63, %v13148_v4  ;;  %5381 = vmax.xlane.f32.xlu0 %v5380_v15  ;;  %v5374_v31 = vsel %vm1609_vm5, %v12069_v9, -inf }
0x1043   :  { %v5377_v27 = vsel %vm1609_vm5, %v12074_v2, -inf }
0x1044   :  { %5378 = vmax.xlane.f32.xlu1 %v5377_v27  ;;  %v12136_v27 = vpop.permute.xlu0 %6770 }
0x1045   :  { %5375 = vmax.xlane.f32.xlu0 %v5374_v31  ;;  %13158 = vst [vmem:[#allocation19_spill] sm:$0xff] %v12136_v27 }
0x104e   :  { %v8720_v39 = vpop.f32.mrb[104].mxu0 }
0x104f   :  { %v12087_v8 = vadd.f32 %v8720_v39, %v13148_v4  ;;  %v4550_v44 = vpop.f32.mrb[105].mxu0  ;;  %v12138_v39 = vpop.permute.xlu1 %6462 }
0x1050   :  { %v8721_v26 = vpop.f32.mrb[106].mxu0  ;;  %v12092_v19 = vadd.f32 %v4550_v44, %v13148_v4  ;;  %13159 = vst [vmem:[#allocation37_spill] sm:$0xff] %v12138_v39 }
0x1051   :  { %v4553_v23 = vpop.f32.mrb[107].mxu0  ;;  %v5389_v20 = vsel %vm1609_vm5, %v12087_v8, -inf }
0x1052   :  { %5390 = vmax.xlane.f32.xlu1 %v5389_v20  ;;  %v8728_v24 = vpop.f32.mrb[108].mxu1  ;;  %v5383_v22 = vsel %vm1609_vm5, %v12092_v19, -inf  ;;  %v12118_v48 = vadd.f32 %v4553_v23, %v13148_v4 }
0x1053   :  { %v12099_v29 = vadd.f32 %v8728_v24, %v13148_v4  ;;  %v4616_v25 = vpop.f32.mrb[109].mxu1 }
0x1054   :  { %v8729_v53 = vpop.f32.mrb[110].mxu1  ;;  %v12106_v38 = vadd.f32 %v4616_v25, %v13148_v4  ;;  %v5386_v28 = vsel %vm1609_vm5, %v12118_v48, -inf }
0x1055   :  { %v4619_v42 = vpop.f32.mrb[111].mxu1  ;;  %v5398_v35 = vsel %vm1609_vm5, %v12099_v29, -inf }
0x1056   :  { %5384 = vmax.xlane.f32.xlu1 %v5383_v22  ;;  %v12111_v55 = vadd.f32 %v4619_v42, %v13148_v4  ;;  %5399 = vmax.xlane.f32.xlu0 %v5398_v35  ;;  %v5392_v10 = vsel %vm1609_vm5, %v12106_v38, -inf  ;;  %v12150_v22 = vpop.permute.xlu0 %6152 }
0x1058   :  { %v5395_v30 = vsel %vm1609_vm5, %v12111_v55, -inf }
0x105a   :  { %5396 = vmax.xlane.f32.xlu1 %v5395_v30  ;;  %5393 = vmax.xlane.f32.xlu0 %v5392_v10  ;;  %v12157_v30 = vpop.permute.xlu1 %6586 }
0x105b   :  { %13160 = vst [vmem:[#allocation28_spill] sm:$0xff] %v12157_v30 }
0x105e   :  { %v8736_v59 = vpop.f32.mrb[108].mxu0  ;;  %5387 = vmax.xlane.f32.xlu0 %v5386_v28  ;;  %v12164_v28 = vpop.permute.xlu0 %6276 }
0x105f   :  { %v12129_v54 = vadd.f32 %v8736_v59, %v13148_v4  ;;  %v4682_v46 = vpop.f32.mrb[109].mxu0  ;;  %13161 = vst [vmem:[#allocation32_spill] sm:$0xff] %v12164_v28 }
0x1060   :  { %v8737_v6 = vpop.f32.mrb[110].mxu0  ;;  %v12132_v62 = vadd.f32 %v4682_v46, %v13148_v4 }
0x1061   :  { %v4685_v63 = vpop.f32.mrb[111].mxu0  ;;  %v5407_v15 = vsel %vm1609_vm5, %v12129_v54, -inf }
0x1062   :  { %5408 = vmax.xlane.f32.xlu1 %v5407_v15  ;;  %v5401_v23 = vsel %vm1609_vm5, %v12132_v62, -inf  ;;  %v12160_v10 = vadd.f32 %v4685_v63, %v13148_v4 }
0x1063   :  { %v8744_v31 = vpop.f32.mrb[112].mxu1 }
0x1064   :  { %v12141_v44 = vadd.f32 %v8744_v31, %v13148_v4  ;;  %v4748_v26 = vpop.f32.mrb[113].mxu1  ;;  %v5404_v6 = vsel %vm1609_vm5, %v12160_v10, -inf }
0x1065   :  { %v8745_v20 = vpop.f32.mrb[114].mxu1  ;;  %v12146_v24 = vadd.f32 %v4748_v26, %v13148_v4  ;;  %v12168_v26 = vpop.permute.xlu1 %6710 }
0x1066   :  { %5402 = vmax.xlane.f32.xlu1 %v5401_v23  ;;  %v4751_v25 = vpop.f32.mrb[115].mxu1  ;;  %v5416_v53 = vsel %vm1609_vm5, %v12141_v44, -inf  ;;  %13162 = vst [vmem:[#allocation27_spill] sm:$0xff] %v12168_v26  ;;  %v12170_v20 = vpop.permute.xlu0 %6400 }
0x1067   :  { %v12153_v42 = vadd.f32 %v4751_v25, %v13148_v4  ;;  %5417 = vmax.xlane.f32.xlu0 %v5416_v53  ;;  %v5410_v59 = vsel %vm1609_vm5, %v12146_v24, -inf  ;;  %13163 = vst [vmem:[#allocation39_spill] sm:$0xff] %v12170_v20 }
0x1069   :  { %v5413_v35 = vsel %vm1609_vm5, %v12153_v42, -inf  ;;  %v12172_v17 = vpop.permute.xlu1 %6832 }
0x106a   :  { %5414 = vmax.xlane.f32.xlu1 %v5413_v35  ;;  %13164 = vst [vmem:[#allocation34_spill] sm:$0xff] %v12172_v17 }
0x106b   :  { %5411 = vmax.xlane.f32.xlu0 %v5410_v59  ;;  %v12174_v59 = vpop.permute.xlu0 %6524 }
0x106c   :  { %13165 = vst [vmem:[#allocation30_spill] sm:$0xff] %v12174_v59 }
0x106d   :  { %v12176_v51 = vpop.permute.xlu1 %6834 }
0x106e   :  { %v8752_v46 = vpop.f32.mrb[112].mxu0  ;;  %13166 = vst [vmem:[#allocation36_spill] sm:$0xff] %v12176_v51 }
0x106f   :  { %v4814_v15 = vpop.f32.mrb[113].mxu0  ;;  %5405 = vmax.xlane.f32.xlu0 %v5404_v6  ;;  %v12182_v6 = vpop.permute.xlu0 %6648 }
0x1070   :  { %v8753_v31 = vpop.f32.mrb[114].mxu0  ;;  %13167 = vst [vmem:[#allocation38_spill] sm:$0xff] %v12182_v6 }
0x1071   :  { %v4817_v23 = vpop.f32.mrb[115].mxu0 }
0x1073   :  { %v8760_v63 = vpop.f32.mrb[116].mxu1 }
0x1074   :  { %v4880_v25 = vpop.f32.mrb[117].mxu1 }
0x1075   :  { %v8761_v53 = vpop.f32.mrb[118].mxu1 }
0x1076   :  { %v4883_v35 = vpop.f32.mrb[119].mxu1 }
0x1079   :  { %v5358_v7 = vpop.xlane.xlu1 %5357 }
0x107a   :  { %v5500_v45 = vsub.f32 %v11986_v40, %v5358_v7 }
0x107c   :  { %v5548_v17 = vmul.f32 1.442695, %v5500_v45 }
0x107d   :  { %v5373_v21 = vpop.xlane.xlu1 %5372 }
0x107e   :  { %v12178_v34 = vpop.f32.mrb[116].mxu0 }
0x107f   :  { %v12180_v33 = vpop.f32.mrb[117].mxu0 }
0x1080   :  { %v8769_v31 = vpop.f32.mrb[118].mxu0 }
0x1081   :  { %v12184_v41 = vpop.f32.mrb[119].mxu0  ;;  %v5505_v31 = vsub.f32 %v11990_v16, %v5373_v21  ;;  %v5367_v40 = vpop.xlane.xlu1 %5366  ;;  %v12204_v16 = vadd.f32 %v8760_v63, %v13148_v4 }
0x1085   :  { %v5364_v53 = vpop.xlane.xlu0 %5363 }
0x1086   :  { %v5502_v36 = vsub.f32 %v12003_v1, %v5364_v53  ;;  %v5558_v1 = vmul.f32 1.442695, %v5505_v31  ;;  %v12224_v53 = vadd.f32 %v4883_v35, %v13148_v4 }
0x1088   :  { %v5552_v27 = vmul.f32 1.442695, %v5502_v36 }
0x1089   :  { %v5361_v26 = vpop.xlane.xlu0 %5360 }
0x108a   :  { %9826 = vpow2.f32 %v5552_v27  ;;  %v5501_v51 = vsub.f32 %v12014_v5, %v5361_v26  ;;  %v5434_v26 = vsel %vm1609_vm5, %v12204_v16, -inf }
0x108b   :  { %9828 = vpow2.f32 %v5548_v17  ;;  %v5503_v17 = vsub.f32 %v11998_v32, %v5367_v40  ;;  %v12211_v32 = vadd.f32 %v4814_v15, %v13148_v4 }
0x108c   :  { %v5550_v47 = vmul.f32 1.442695, %v5501_v51 }
0x108d   :  { %v5370_v6 = vpop.xlane.xlu0 %5369  ;;  %v5554_v27 = vmul.f32 1.442695, %v5503_v17  ;;  %v12246_v17 = vadd.f32 %v12178_v34, %v13148_v4 }
0x108e   :  { %9830 = vpow2.f32 %v5550_v47  ;;  %v5504_v7 = vsub.f32 %v12022_v12, %v5370_v6  ;;  %v12201_v47 = vadd.f32 %v8752_v46, %v13148_v4  ;;  %v12214_v46 = vadd.f32 %v4880_v25, %v13148_v4 }
0x108f   :  { %9832 = vpow2.f32 %v5558_v1  ;;  %v12221_v6 = vadd.f32 %v4817_v23, %v13148_v4  ;;  %v5419_v25 = vsel %vm1609_vm5, %v12211_v32, -inf  ;;  %v5431_v23 = vsel %vm1609_vm5, %v12224_v53, -inf }
0x1090   :  { %v5556_v51 = vmul.f32 1.442695, %v5504_v7  ;;  %v5425_v63 = vsel %vm1609_vm5, %v12201_v47, -inf  ;;  %v5428_v15 = vsel %vm1609_vm5, %v12214_v46, -inf }
0x1091   :  { %v5422_v7 = vsel %vm1609_vm5, %v12221_v6, -inf }
0x1092   :  { %9834 = vpow2.f32 %v5556_v51 }
0x1093   :  { %9836 = vpow2.f32 %v5554_v27 }
0x1094   :  { %v12190_v30 = vpop.eup %9826 }
0x1095   :  { %v5650_v45 = vsel %vm1609_vm5, %v12190_v30, 0.0  ;;  %v12195_v36 = vpop.eup %9828 }
0x1096   :  { %5651 = vadd.xlane.f32.xlu1 %v5650_v45  ;;  %v5644_v21 = vsel %vm1609_vm5, %v12195_v36, 0.0 }
0x1098   :  { %v12197_v5 = vpop.eup %9830 }
0x1099   :  { %v5647_v12 = vsel %vm1609_vm5, %v12197_v5, 0.0  ;;  %v12230_v31 = vpop.eup %9832 }
0x109a   :  { %5648 = vadd.xlane.f32.xlu0 %v5647_v12  ;;  %5645 = vadd.xlane.f32.xlu1 %v5644_v21  ;;  %v5659_v45 = vsel %vm1609_vm5, %v12230_v31, 0.0  ;;  %v12252_v12 = vadd.f32 %v12180_v33, %v13148_v4  ;;  %v5443_v21 = vsel %vm1609_vm5, %v12246_v17, -inf }
0x109c   :  { %v12236_v40 = vpop.eup %9834  ;;  %v5437_v27 = vsel %vm1609_vm5, %v12252_v12, -inf }
0x109d   :  { %v5656_v35 = vsel %vm1609_vm5, %v12236_v40, 0.0  ;;  %v12242_v1 = vpop.eup %9836 }
0x109e   :  { %5435 = vmax.xlane.f32.xlu0 %v5434_v26  ;;  %5426 = vmax.xlane.f32.xlu1 %v5425_v63  ;;  %v5653_v51 = vsel %vm1609_vm5, %v12242_v1, 0.0 }
0x10a2   :  { %5429 = vmax.xlane.f32.xlu0 %v5428_v15  ;;  %5420 = vmax.xlane.f32.xlu1 %v5419_v25 }
0x10a6   :  { %5423 = vmax.xlane.f32.xlu0 %v5422_v7  ;;  %5432 = vmax.xlane.f32.xlu1 %v5431_v23 }
0x10aa   :  { %5657 = vadd.xlane.f32.xlu0 %v5656_v35  ;;  %5660 = vadd.xlane.f32.xlu1 %v5659_v45  ;;  %v12273_v45 = vadd.f32 %v12184_v41, %v13148_v4 }
0x10ae   :  { %5654 = vadd.xlane.f32.xlu1 %v5653_v51 }
0x10b2   :  { %5444 = vmax.xlane.f32.xlu1 %v5443_v21  ;;  %v5440_v21 = vsel %vm1609_vm5, %v12273_v45, -inf }
0x10b6   :  { %5438 = vmax.xlane.f32.xlu1 %v5437_v27 }
0x10b8   :  { %v8776_v26 = vpop.f32.mrb[120].mxu1 }
0x10b9   :  { %v12259_v34 = vadd.f32 %v8776_v26, %v13148_v4  ;;  %v5012_v63 = vpop.f32.mrb[121].mxu1 }
0x10ba   :  { %v8777_v15 = vpop.f32.mrb[122].mxu1  ;;  %v12262_v25 = vadd.f32 %v5012_v63, %v13148_v4 }
0x10bb   :  { %v5015_v7 = vpop.f32.mrb[123].mxu1  ;;  %v5452_v33 = vsel %vm1609_vm5, %v12259_v34, -inf }
0x10bc   :  { %v12267_v23 = vadd.f32 %v5015_v7, %v13148_v4  ;;  %5453 = vmax.xlane.f32.xlu0 %v5452_v33  ;;  %v5446_v51 = vsel %vm1609_vm5, %v12262_v25, -inf }
0x10be   :  { %v5449_v35 = vsel %vm1609_vm5, %v12267_v23, -inf }
0x10bf   :  { %5450 = vmax.xlane.f32.xlu1 %v5449_v35 }
0x10c0   :  { %5447 = vmax.xlane.f32.xlu0 %v5446_v51 }
0x10c4   :  { %5441 = vmax.xlane.f32.xlu0 %v5440_v21 }
0x10c8   :  { %v8784_v27 = vpop.f32.mrb[120].mxu0 }
0x10c9   :  { %v12280_v26 = vadd.f32 %v8784_v27, %v13148_v4  ;;  %v5078_v63 = vpop.f32.mrb[121].mxu0 }
0x10ca   :  { %v8785_v15 = vpop.f32.mrb[122].mxu0  ;;  %v12283_v7 = vadd.f32 %v5078_v63, %v13148_v4 }
0x10cb   :  { %v5081_v41 = vpop.f32.mrb[123].mxu0  ;;  %v5461_v33 = vsel %vm1609_vm5, %v12280_v26, -inf }
0x10cc   :  { %5462 = vmax.xlane.f32.xlu1 %v5461_v33  ;;  %v5455_v51 = vsel %vm1609_vm5, %v12283_v7, -inf }
0x10cf   :  { %v8792_v35 = vpop.f32.mrb[124].mxu1 }
0x10d0   :  { %v12290_v21 = vadd.f32 %v8792_v35, %v13148_v4  ;;  %v5144_v59 = vpop.f32.mrb[125].mxu1  ;;  %5456 = vmax.xlane.f32.xlu1 %v5455_v51  ;;  %v12303_v35 = vadd.f32 %v5081_v41, %v13148_v4 }
0x10d1   :  { %v8793_v27 = vpop.f32.mrb[126].mxu1  ;;  %v12293_v15 = vadd.f32 %v5144_v59, %v13148_v4 }
0x10d2   :  { %v5147_v63 = vpop.f32.mrb[127].mxu1  ;;  %v5470_v49 = vsel %vm1609_vm5, %v12290_v21, -inf  ;;  %v5382_v27 = vpop.xlane.xlu0 %5381 }
0x10d3   :  { %v12298_v52 = vadd.f32 %v5147_v63, %v13148_v4  ;;  %5471 = vmax.xlane.f32.xlu0 %v5470_v49  ;;  %v5464_v51 = vsel %vm1609_vm5, %v12293_v15, -inf  ;;  %v5379_v63 = vpop.xlane.xlu1 %5378  ;;  %v5458_v49 = vsel %vm1609_vm5, %v12303_v35, -inf  ;;  %v5508_v11 = vsub.f32 %v12066_v43, %v5382_v27 }
0x10d5   :  { %v5467_v33 = vsel %vm1609_vm5, %v12298_v52, -inf }
0x10d6   :  { %5468 = vmax.xlane.f32.xlu1 %v5467_v33 }
0x10d7   :  { %5465 = vmax.xlane.f32.xlu0 %v5464_v51  ;;  %v5507_v51 = vsub.f32 %v12074_v2, %v5379_v63 }
0x10d8   :  { %v8800_v59 = vpop.f32.mrb[124].mxu0 }
0x10d9   :  { %v12308_v37 = vadd.f32 %v8800_v59, %v13148_v4  ;;  %v5210_v20 = vpop.f32.mrb[125].mxu0  ;;  %v5376_v59 = vpop.xlane.xlu0 %5375 }
0x10da   :  { %v8801_v39 = vpop.f32.mrb[126].mxu0  ;;  %v12313_v41 = vadd.f32 %v5210_v20, %v13148_v4 }
0x10db   :  { %13168 = vst [vmem:[#allocation11_spill] sm:$0xff] %v12308_v37  ;;  %5459 = vmax.xlane.f32.xlu0 %v5458_v49  ;;  %v5213_v56 = vpop.f32.mrb[127].mxu0  ;;  %v5479_v33 = vsel %vm1609_vm5, %v12308_v37, -inf  ;;  %v5562_v49 = vmul.f32 1.442695, %v5507_v51 }
0x10dc   :  { %5480 = vmax.xlane.f32.xlu1 %v5479_v33  ;;  %v5473_v0 = vsel %vm1609_vm5, %v12313_v41, -inf  ;;  %v12338_v27 = vadd.f32 %v5213_v56, %v13148_v4 }
0x10dd   :  { %9838 = vpow2.f32 %v5562_v49 }
0x10de   :  { %v5476_v49 = vsel %vm1609_vm5, %v12338_v27, -inf }
0x10df   :  { %v5391_v3 = vpop.xlane.xlu1 %5390  ;;  %v8808_v28 = vpop.f32.mrb[128].mxu1 }
0x10e0   :  { %v12322_v39 = vadd.f32 %v8808_v28, %v13148_v4  ;;  %v5276_v20 = vpop.f32.mrb[129].mxu1  ;;  %5474 = vmax.xlane.f32.xlu1 %v5473_v0  ;;  %v5511_v14 = vsub.f32 %v12087_v8, %v5391_v3  ;;  %v5564_v28 = vmul.f32 1.442695, %v5508_v11  ;;  %v5506_v0 = vsub.f32 %v12069_v9, %v5376_v59 }
0x10e1   :  { %v8809_v60 = vpop.f32.mrb[130].mxu1  ;;  %v12326_v33 = vadd.f32 %v5276_v20, %v13148_v4 }
0x10e2   :  { %v5279_v2 = vpop.f32.mrb[131].mxu1  ;;  %v5488_v63 = vsel %vm1609_vm5, %v12322_v39, -inf  ;;  %v5570_v60 = vmul.f32 1.442695, %v5511_v14  ;;  %9840 = vpow2.f32 %v5564_v28  ;;  %v5560_v11 = vmul.f32 1.442695, %v5506_v0 }
0x10e3   :  { %v5385_v61 = vpop.xlane.xlu1 %5384  ;;  %v12331_v37 = vadd.f32 %v5279_v2, %v13148_v4  ;;  %5489 = vmax.xlane.f32.xlu0 %v5488_v63  ;;  %v5400_v43 = vpop.xlane.xlu0 %5399  ;;  %v5482_v51 = vsel %vm1609_vm5, %v12326_v33, -inf }
0x10e4   :  { %v5509_v8 = vsub.f32 %v12092_v19, %v5385_v61  ;;  %v5514_v9 = vsub.f32 %v12099_v29, %v5400_v43  ;;  %9842 = vpow2.f32 %v5570_v60 }
0x10e5   :  { %v5485_v3 = vsel %vm1609_vm5, %v12331_v37, -inf  ;;  %9844 = vpow2.f32 %v5560_v11 }
0x10e6   :  { %5486 = vmax.xlane.f32.xlu1 %v5485_v3  ;;  %v5566_v19 = vmul.f32 1.442695, %v5509_v8  ;;  %v5576_v28 = vmul.f32 1.442695, %v5514_v9 }
0x10e7   :  { %v5397_v20 = vpop.xlane.xlu1 %5396  ;;  %5483 = vmax.xlane.f32.xlu0 %v5482_v51  ;;  %v5394_v2 = vpop.xlane.xlu0 %5393 }
0x10e8   :  { %v8816_v14 = vpop.f32.mrb[128].mxu0  ;;  %v5513_v61 = vsub.f32 %v12111_v55, %v5397_v20  ;;  %9846 = vpow2.f32 %v5566_v19  ;;  %v5512_v55 = vsub.f32 %v12106_v38, %v5394_v2  ;;  %v12360_v11 = vpop.eup %9838 }
0x10e9   :  { %v12345_v59 = vadd.f32 %v8816_v14, %v13148_v4  ;;  %v5342_v56 = vpop.f32.mrb[129].mxu0  ;;  %9848 = vpow2.f32 %v5576_v28  ;;  %v5665_v2 = vsel %vm1609_vm5, %v12360_v11, 0.0 }
0x10ea   :  { %v8817_v63 = vpop.f32.mrb[130].mxu0  ;;  %v5574_v43 = vmul.f32 1.442695, %v5513_v61  ;;  %v12356_v8 = vadd.f32 %v5342_v56, %v13148_v4  ;;  %v5572_v14 = vmul.f32 1.442695, %v5512_v55 }
0x10eb   :  { %5477 = vmax.xlane.f32.xlu0 %v5476_v49  ;;  %v5345_v3 = vpop.f32.mrb[131].mxu0  ;;  %v5497_v29 = vsel %vm1609_vm5, %v12345_v59, -inf  ;;  %v5388_v60 = vpop.xlane.xlu0 %5387 }
0x10ec   :  { %v12350_v0 = vadd.f32 %v5345_v3, %v13148_v4  ;;  %v5510_v9 = vsub.f32 %v12118_v48, %v5388_v60  ;;  %9850 = vpow2.f32 %v5574_v43  ;;  %v12363_v19 = vpop.eup %9840  ;;  %v5491_v38 = vsel %vm1609_vm5, %v12356_v8, -inf }
0x10ed   :  { %9852 = vpow2.f32 %v5572_v14  ;;  %v5668_v28 = vsel %vm1609_vm5, %v12363_v19, 0.0 }
0x10ee   :  { %v5494_v20 = vsel %vm1609_vm5, %v12350_v0, -inf  ;;  %v12369_v61 = vpop.eup %9842  ;;  %v5568_v49 = vmul.f32 1.442695, %v5510_v9 }
0x10ef   :  { %v5409_v51 = vpop.xlane.xlu1 %5408  ;;  %5498 = vmax.xlane.f32.xlu0 %v5497_v29  ;;  %5495 = vmax.xlane.f32.xlu1 %v5494_v20  ;;  %v12373_v3 = vpop.eup %9844  ;;  %v5677_v29 = vsel %vm1609_vm5, %v12369_v61, 0.0 }
0x10f0   :  { %v5517_v56 = vsub.f32 %v12129_v54, %v5409_v51  ;;  %9854 = vpow2.f32 %v5568_v49  ;;  %v5662_v14 = vsel %vm1609_vm5, %v12373_v3, 0.0 }
0x10f2   :  { %v12379_v55 = vpop.eup %9846  ;;  %v5582_v43 = vmul.f32 1.442695, %v5517_v56 }
0x10f3   :  { %v5403_v4 = vpop.xlane.xlu1 %5402  ;;  %5492 = vmax.xlane.f32.xlu0 %v5491_v38  ;;  %5666 = vadd.xlane.f32.xlu1 %v5665_v2  ;;  %v12383_v9 = vpop.eup %9848  ;;  %v5671_v38 = vsel %vm1609_vm5, %v12379_v55, 0.0 }
0x10f4   :  { %v5418_v63 = vpop.xlane.xlu0 %5417  ;;  %v5515_v54 = vsub.f32 %v12132_v62, %v5403_v4 }
0x10f5   :  { %v5520_v48 = vsub.f32 %v12141_v44, %v5418_v63 }
0x10f6   :  { %v12389_v2 = vpop.eup %9850  ;;  %v5578_v62 = vmul.f32 1.442695, %v5515_v54 }
0x10f7   :  { %v5588_v60 = vmul.f32 1.442695, %v5520_v48  ;;  %5669 = vadd.xlane.f32.xlu0 %v5668_v28  ;;  %5678 = vadd.xlane.f32.xlu1 %v5677_v29  ;;  %v5415_v20 = vpop.xlane.xlu1 %5414  ;;  %v5683_v63 = vsel %vm1609_vm5, %v12389_v2, 0.0  ;;  %v12396_v48 = vpop.eup %9852 }
0x10f8   :  { %v5412_v51 = vpop.xlane.xlu0 %5411  ;;  %v5519_v56 = vsub.f32 %v12153_v42, %v5415_v20  ;;  %v5680_v42 = vsel %vm1609_vm5, %v12396_v48, 0.0 }
0x10f9   :  { %9856 = vpow2.f32 %v5588_v60  ;;  %v5518_v44 = vsub.f32 %v12146_v24, %v5412_v51  ;;  %v5686_v24 = vsel %vm1609_vm5, %v12383_v9, 0.0 }
0x10fa   :  { %9858 = vpow2.f32 %v5582_v43  ;;  %v5586_v28 = vmul.f32 1.442695, %v5519_v56  ;;  %v12399_v43 = vpop.eup %9854 }
0x10fb   :  { %v5584_v4 = vmul.f32 1.442695, %v5518_v44  ;;  %5663 = vadd.xlane.f32.xlu0 %v5662_v14  ;;  %5672 = vadd.xlane.f32.xlu1 %v5671_v38 }
0x10fc   :  { %v5406_v49 = vpop.xlane.xlu0 %5405 }
0x10fd   :  { %9860 = vpow2.f32 %v5584_v4  ;;  %v5516_v29 = vsub.f32 %v12160_v10, %v5406_v49  ;;  %v5674_v10 = vsel %vm1609_vm5, %v12399_v43, 0.0 }
0x10fe   :  { %9862 = vpow2.f32 %v5578_v62 }
0x10ff   :  { %5687 = vadd.xlane.f32.xlu0 %v5686_v24  ;;  %5684 = vadd.xlane.f32.xlu1 %v5683_v63  ;;  %9864 = vpow2.f32 %v5586_v28  ;;  %v5580_v54 = vmul.f32 1.442695, %v5516_v29 }
0x1101   :  { %9866 = vpow2.f32 %v5580_v54 }
0x1103   :  { %v12403_v60 = vpop.eup %9856  ;;  %5681 = vadd.xlane.f32.xlu0 %v5680_v42 }
0x1104   :  { %v5704_v51 = vsel %vm1609_vm5, %v12403_v60, 0.0  ;;  %v12407_v20 = vpop.eup %9858 }
0x1105   :  { %13169 = vst [vmem:[#allocation12_spill] sm:$0xff] %v12407_v20  ;;  %5705 = vadd.xlane.f32.xlu1 %v5704_v51  ;;  %v5695_v14 = vsel %vm1609_vm5, %v12407_v20, 0.0 }
0x1107   :  { %v12411_v44 = vpop.eup %9860  ;;  %5675 = vadd.xlane.f32.xlu0 %v5674_v10 }
0x1108   :  { %13170 = vst [vmem:[#allocation13_spill] sm:$0xff] %v12411_v44  ;;  %v5698_v38 = vsel %vm1609_vm5, %v12411_v44, 0.0  ;;  %v12417_v62 = vpop.eup %9862 }
0x1109   :  { %13171 = vst [vmem:[#allocation14_spill] sm:$0xff] %v12417_v62  ;;  %5696 = vadd.xlane.f32.xlu1 %v5695_v14  ;;  %v5689_v4 = vsel %vm1609_vm5, %v12417_v62, 0.0  ;;  %v12421_v56 = vpop.eup %9864 }
0x110a   :  { %13172 = vst [vmem:[#allocation15_spill] sm:$0xff] %v12421_v56  ;;  %v5701_v49 = vsel %vm1609_vm5, %v12421_v56, 0.0 }
0x110b   :  { %5699 = vadd.xlane.f32.xlu0 %v5698_v38  ;;  %v12425_v24 = vpop.eup %9866 }
0x110c   :  { %13173 = vst [vmem:[#allocation16_spill] sm:$0xff] %v12425_v24  ;;  %v5692_v63 = vsel %vm1609_vm5, %v12425_v24, 0.0 }
0x110d   :  { %5690 = vadd.xlane.f32.xlu1 %v5689_v4 }
0x1111   :  { %5702 = vadd.xlane.f32.xlu1 %v5701_v49 }
0x1115   :  { %5693 = vadd.xlane.f32.xlu1 %v5692_v63 }
0x1123   :  { %v5652_v28 = vpop.xlane.xlu1 %5651 }
0x1124   :  { %v5790_v29 = vmul.f32 5.656854, %v5652_v28 }
0x1126   :  { %9868 = vrcp.f32 %v5790_v29 }
0x1127   :  { %v5649_v42 = vpop.xlane.xlu0 %5648  ;;  %v5646_v54 = vpop.xlane.xlu1 %5645 }
0x1128   :  { %v5789_v51 = vmul.f32 5.656854, %v5649_v42  ;;  %v5788_v10 = vmul.f32 5.656854, %v5646_v54 }
0x112a   :  { %9870 = vrcp.f32 %v5789_v51 }
0x112b   :  { %9872 = vrcp.f32 %v5788_v10  ;;  %v5436_v14 = vpop.xlane.xlu0 %5435  ;;  %v5427_v38 = vpop.xlane.xlu1 %5426 }
0x112c   :  { %v5526_v4 = vsub.f32 %v12204_v16, %v5436_v14  ;;  %v5523_v62 = vsub.f32 %v12201_v47, %v5427_v38 }
0x112e   :  { %v5600_v49 = vmul.f32 1.442695, %v5526_v4  ;;  %v5594_v20 = vmul.f32 1.442695, %v5523_v62 }
0x112f   :  { %v5430_v56 = vpop.xlane.xlu0 %5429  ;;  %v5421_v24 = vpop.xlane.xlu1 %5420 }
0x1130   :  { %9874 = vpow2.f32 %v5600_v49  ;;  %v5524_v63 = vsub.f32 %v12214_v46, %v5430_v56  ;;  %v5521_v28 = vsub.f32 %v12211_v32, %v5421_v24  ;;  %v9869_v29 = vpop.eup %9868 }
0x1131   :  { %9876 = vpow2.f32 %v5594_v20  ;;  %v5886_v38 = vmul.f32 %v9869_v29, %v12190_v30  ;;  %v6100_v29 = vsel %vm2229_vm6, %v12050_v13, 0 }
0x1132   :  { %v5596_v42 = vmul.f32 1.442695, %v5524_v63  ;;  %v5590_v54 = vmul.f32 1.442695, %v5521_v28 }
0x1133   :  { %v5424_v51 = vpop.xlane.xlu0 %5423  ;;  %v5433_v10 = vpop.xlane.xlu1 %5432  ;;  %v5933_v28 = vpack.c.bf16 %v5886_v38, %v5886_v38 }
0x1134   :  { %v9871_v44 = vpop.eup %9870  ;;  %9878 = vpow2.f32 %v5596_v42  ;;  %v5522_v16 = vsub.f32 %v12221_v6, %v5424_v51  ;;  %v5525_v47 = vsub.f32 %v12224_v53, %v5433_v10 }
0x1135   :  { %v9873_v62 = vpop.eup %9872  ;;  %v5885_v14 = vmul.f32 %v9871_v44, %v12197_v5  ;;  %9880 = vpow2.f32 %v5590_v54 }
0x1136   :  { %v5592_v46 = vmul.f32 1.442695, %v5522_v16  ;;  %v5598_v56 = vmul.f32 1.442695, %v5525_v47  ;;  %v5884_v32 = vmul.f32 %v9873_v62, %v12195_v36 }
0x1137   :  { %v5658_v20 = vpop.xlane.xlu0 %5657  ;;  %v5661_v24 = vpop.xlane.xlu1 %5660 }
0x1138   :  { %9882 = vpow2.f32 %v5592_v46  ;;  %v5792_v4 = vmul.f32 5.656854, %v5658_v20  ;;  %v5793_v49 = vmul.f32 5.656854, %v5661_v24  ;;  %v5932_v63 = vpack.c.bf16 %v5885_v14, %v5884_v32 }
0x1139   :  { %9884 = vpow2.f32 %v5598_v56 }
0x113a   :  { %v12438_v6 = vpop.eup %9874  ;;  %8822 = vmatprep.mubr.msk.bf16.mxu1 %vm1609_vm5, %v5932_v63  ;;  %9886 = vrcp.f32 %v5793_v49 }
0x113b   :  { %8823 = vmatmul.mubr.msk.bf16.vlgmr.msra.gmra.mrb[132].mxu1 %vm1609_vm5, %v5933_v28  ;;  %v5655_v30 = vpop.xlane.xlu1 %5654  ;;  %v5722_v36 = vsel %vm1609_vm5, %v12438_v6, 0.0  ;;  %9888 = vrcp.f32 %v5792_v4  ;;  %v12445_v53 = vpop.eup %9876 }
0x113c   :  { %8835 = vmatpush3.bf16.msra.mxu1 %v12044_v50  ;;  %v5791_v5 = vmul.f32 5.656854, %v5655_v30  ;;  %5723 = vadd.xlane.f32.xlu1 %v5722_v36  ;;  %v5713_v50 = vsel %vm1609_vm5, %v12445_v53, 0.0 }
0x113d   :  { %9084 = vmatprep.subr.msk.bf16.mxu1 %vm2229_vm6, %v12050_v13 }
0x113e   :  { %v12449_v44 = vpop.eup %9878  ;;  %9890 = vrcp.f32 %v5791_v5 }
0x113f   :  { %v5445_v42 = vpop.xlane.xlu1 %5444  ;;  %v5716_v54 = vsel %vm1609_vm5, %v12449_v44, 0.0  ;;  %v12457_v51 = vpop.eup %9880 }
0x1140   :  { %8837 = vmatpush3.bf16.msra.mxu1 %v6100_v29  ;;  %5717 = vadd.xlane.f32.xlu0 %v5716_v54  ;;  %v5707_v14 = vsel %vm1609_vm5, %v12457_v51, 0.0  ;;  %v5529_v20 = vsub.f32 %v12246_v17, %v5445_v42 }
0x1141   :  { %8850 = vmatprep.subr.bf16.mxu1 %v12084_v57  ;;  %5714 = vadd.xlane.f32.xlu1 %v5713_v50 }
0x1142   :  { %v12460_v10 = vpop.eup %9882  ;;  %v5606_v36 = vmul.f32 1.442695, %v5529_v20 }
0x1143   :  { %v5439_v16 = vpop.xlane.xlu1 %5438  ;;  %v5710_v13 = vsel %vm1609_vm5, %v12460_v10, 0.0  ;;  %v12464_v47 = vpop.eup %9884 }
0x1144   :  { %v5527_v62 = vsub.f32 %v12252_v12, %v5439_v16  ;;  %5711 = vadd.xlane.f32.xlu0 %v5710_v13  ;;  %v9887_v38 = vpop.eup %9886  ;;  %v5719_v24 = vsel %vm1609_vm5, %v12464_v47, 0.0 }
0x1145   :  { %5708 = vadd.xlane.f32.xlu1 %v5707_v14  ;;  %v9889_v46 = vpop.eup %9888  ;;  %v5889_v4 = vmul.f32 %v9887_v38, %v12230_v31 }
0x1146   :  { %v5602_v56 = vmul.f32 1.442695, %v5527_v62  ;;  %v5888_v63 = vmul.f32 %v9889_v46, %v12236_v40 }
0x1147   :  { %v5935_v29 = vpack.c.bf16 %v5889_v4, %v5889_v4 }
0x1148   :  { %v9891_v32 = vpop.eup %9890  ;;  %9892 = vpow2.f32 %v5602_v56 }
0x1149   :  { %5720 = vadd.xlane.f32.xlu1 %v5719_v24  ;;  %v5454_v49 = vpop.xlane.xlu0 %5453  ;;  %v5887_v12 = vmul.f32 %v9891_v32, %v12242_v1 }
0x114a   :  { %v5532_v28 = vsub.f32 %v12259_v34, %v5454_v49 }
0x114b   :  { %v5934_v30 = vpack.c.bf16 %v5888_v63, %v5887_v12 }
0x114c   :  { %v5612_v5 = vmul.f32 1.442695, %v5532_v28  ;;  %v5451_v54 = vpop.xlane.xlu1 %5450 }
0x114d   :  { %8830 = vmatprep.mubr.msk.bf16.mxu0 %vm1609_vm5, %v5934_v30  ;;  %v5531_v17 = vsub.f32 %v12267_v23, %v5451_v54  ;;  %v5448_v42 = vpop.xlane.xlu0 %5447  ;;  %v6162_v23 = vsel %vm2229_vm6, %v12150_v22, 0 }
0x114e   :  { %9894 = vpow2.f32 %v5612_v5  ;;  %8831 = vmatmul.mubr.msk.bf16.vlgmr.msra.gmra.mrb[132].mxu0 %vm1609_vm5, %v5935_v29  ;;  %v5530_v31 = vsub.f32 %v12262_v25, %v5448_v42 }
0x114f   :  { %8843 = vmatpush3.bf16.msra.mxu0 %v12058_v18  ;;  %v5610_v40 = vmul.f32 1.442695, %v5531_v17  ;;  %9896 = vpow2.f32 %v5606_v36 }
0x1150   :  { %9085 = vmatprep.subr.msk.bf16.mxu0 %vm2229_vm6, %v12150_v22  ;;  %v5608_v1 = vmul.f32 1.442695, %v5530_v31 }
0x1151   :  { %9898 = vpow2.f32 %v5610_v40  ;;  %v5442_v34 = vpop.xlane.xlu0 %5441 }
0x1152   :  { %v12483_v50 = vpop.eup %9892  ;;  %v5528_v16 = vsub.f32 %v12273_v45, %v5442_v34  ;;  %9900 = vpow2.f32 %v5608_v1 }
0x1153   :  { %8845 = vmatpush3.bf16.msra.mxu0 %v6162_v23  ;;  %v5725_v25 = vsel %vm1609_vm5, %v12483_v50, 0.0 }
0x1154   :  { %8858 = vmatprep.subr.bf16.mxu0 %v12113_v58  ;;  %v5604_v18 = vmul.f32 1.442695, %v5528_v16  ;;  %5726 = vadd.xlane.f32.xlu0 %v5725_v25 }
0x1156   :  { %9902 = vpow2.f32 %v5604_v18 }
0x1158   :  { %v12491_v13 = vpop.eup %9894 }
0x1159   :  { %v5740_v62 = vsel %vm1609_vm5, %v12491_v13, 0.0  ;;  %v12495_v14 = vpop.eup %9896  ;;  %v5463_v22 = vpop.xlane.xlu1 %5462 }
0x115a   :  { %5741 = vadd.xlane.f32.xlu1 %v5740_v62  ;;  %v5731_v46 = vsel %vm1609_vm5, %v12495_v14, 0.0  ;;  %v5535_v24 = vsub.f32 %v12280_v26, %v5463_v22 }
0x115b   :  { %v12497_v45 = vpop.eup %9898 }
0x115c   :  { %v5737_v38 = vsel %vm1609_vm5, %v12497_v45, 0.0  ;;  %v12503_v56 = vpop.eup %9900  ;;  %v5618_v28 = vmul.f32 1.442695, %v5535_v24 }
0x115d   :  { %5738 = vadd.xlane.f32.xlu0 %v5737_v38  ;;  %v5457_v32 = vpop.xlane.xlu1 %5456  ;;  %v5734_v49 = vsel %vm1609_vm5, %v12503_v56, 0.0 }
0x115e   :  { %5732 = vadd.xlane.f32.xlu1 %v5731_v46  ;;  %v5533_v36 = vsub.f32 %v12283_v7, %v5457_v32 }
0x1160   :  { %v12505_v20 = vpop.eup %9902  ;;  %v5472_v4 = vpop.xlane.xlu0 %5471  ;;  %v5614_v54 = vmul.f32 1.442695, %v5533_v36 }
0x1161   :  { %v5728_v12 = vsel %vm1609_vm5, %v12505_v20, 0.0  ;;  %v5538_v63 = vsub.f32 %v12290_v21, %v5472_v4 }
0x1162   :  { %5735 = vadd.xlane.f32.xlu1 %v5734_v49  ;;  %5729 = vadd.xlane.f32.xlu0 %v5728_v12 }
0x1163   :  { %v5624_v30 = vmul.f32 1.442695, %v5538_v63  ;;  %v5469_v29 = vpop.xlane.xlu1 %5468 }
0x1164   :  { %v5466_v5 = vpop.xlane.xlu0 %5465  ;;  %v5537_v42 = vsub.f32 %v12298_v52, %v5469_v29 }
0x1165   :  { %9904 = vpow2.f32 %v5624_v30  ;;  %v5536_v26 = vsub.f32 %v12293_v15, %v5466_v5  ;;  %v13174_v15 = vld [vmem:[#allocation11_spill] sm:$0xff] }
0x1166   :  { %9906 = vpow2.f32 %v5618_v28  ;;  %v5622_v1 = vmul.f32 1.442695, %v5537_v42 }
0x1167   :  { %v5620_v17 = vmul.f32 1.442695, %v5536_v26 }
0x1168   :  { %v5460_v31 = vpop.xlane.xlu0 %5459 }
0x1169   :  { %9908 = vpow2.f32 %v5620_v17  ;;  %v5534_v21 = vsub.f32 %v12303_v35, %v5460_v31  ;;  %v5481_v40 = vpop.xlane.xlu1 %5480 }
0x116a   :  { %9910 = vpow2.f32 %v5614_v54  ;;  %v5541_v25 = vsub.f32 %v13174_v15, %v5481_v40 }
0x116b   :  { %v5616_v34 = vmul.f32 1.442695, %v5534_v21 }
0x116c   :  { %v5630_v46 = vmul.f32 1.442695, %v5541_v25 }
0x116d   :  { %9912 = vpow2.f32 %v5616_v34  ;;  %v5475_v7 = vpop.xlane.xlu1 %5474 }
0x116e   :  { %v5539_v23 = vsub.f32 %v12313_v41, %v5475_v7  ;;  %9914 = vpow2.f32 %v5622_v1 }
0x116f   :  { %v12518_v16 = vpop.eup %9904 }
0x1170   :  { %v5490_v18 = vpop.xlane.xlu0 %5489  ;;  %v5626_v62 = vmul.f32 1.442695, %v5539_v23  ;;  %v5758_v52 = vsel %vm1609_vm5, %v12518_v16, 0.0  ;;  %v12523_v22 = vpop.eup %9906 }
0x1171   :  { %v5544_v35 = vsub.f32 %v12322_v39, %v5490_v18  ;;  %5759 = vadd.xlane.f32.xlu1 %v5758_v52  ;;  %v5749_v12 = vsel %vm1609_vm5, %v12523_v22, 0.0 }
0x1172   :  { %9916 = vpow2.f32 %v5626_v62 }
0x1173   :  { %v12526_v38 = vpop.eup %9908  ;;  %v5636_v41 = vmul.f32 1.442695, %v5544_v35  ;;  %v5487_v32 = vpop.xlane.xlu1 %5486 }
0x1174   :  { %v5484_v24 = vpop.xlane.xlu0 %5483  ;;  %v5543_v4 = vsub.f32 %v12331_v37, %v5487_v32  ;;  %v5752_v49 = vsel %vm1609_vm5, %v12526_v38, 0.0  ;;  %v12533_v63 = vpop.eup %9910 }
0x1175   :  { %9918 = vpow2.f32 %v5636_v41  ;;  %v5542_v39 = vsub.f32 %v12326_v33, %v5484_v24  ;;  %5753 = vadd.xlane.f32.xlu0 %v5752_v49  ;;  %5750 = vadd.xlane.f32.xlu1 %v5749_v12  ;;  %v5743_v29 = vsel %vm1609_vm5, %v12533_v63, 0.0 }
0x1176   :  { %v5634_v28 = vmul.f32 1.442695, %v5543_v4  ;;  %9920 = vpow2.f32 %v5630_v46 }
0x1177   :  { %v12536_v30 = vpop.eup %9912  ;;  %v5632_v36 = vmul.f32 1.442695, %v5542_v39 }
0x1178   :  { %9922 = vpow2.f32 %v5634_v28  ;;  %v5478_v37 = vpop.xlane.xlu0 %5477  ;;  %v5746_v5 = vsel %vm1609_vm5, %v12536_v30, 0.0  ;;  %v12542_v26 = vpop.eup %9914 }
0x1179   :  { %v5540_v54 = vsub.f32 %v12338_v27, %v5478_v37  ;;  %5747 = vadd.xlane.f32.xlu0 %v5746_v5  ;;  %5744 = vadd.xlane.f32.xlu1 %v5743_v29  ;;  %9924 = vpow2.f32 %v5632_v36  ;;  %v5755_v31 = vsel %vm1609_vm5, %v12542_v26, 0.0 }
0x117b   :  { %v5628_v33 = vmul.f32 1.442695, %v5540_v54 }
0x117c   :  { %v12545_v17 = vpop.eup %9916  ;;  %v5499_v42 = vpop.xlane.xlu0 %5498 }
0x117d   :  { %v5496_v21 = vpop.xlane.xlu1 %5495  ;;  %9926 = vpow2.f32 %v5628_v33  ;;  %v5547_v40 = vsub.f32 %v12345_v59, %v5499_v42  ;;  %5756 = vadd.xlane.f32.xlu1 %v5755_v31  ;;  %v5761_v27 = vsel %vm1609_vm5, %v12545_v17, 0.0 }
0x117e   :  { %v5546_v1 = vsub.f32 %v12350_v0, %v5496_v21  ;;  %5762 = vadd.xlane.f32.xlu0 %v5761_v27 }
0x117f   :  { %v12553_v34 = vpop.eup %9918  ;;  %v5642_v7 = vmul.f32 1.442695, %v5547_v40 }
0x1180   :  { %v5640_v23 = vmul.f32 1.442695, %v5546_v1  ;;  %v12555_v15 = vpop.xlane.xlu0 %5492  ;;  %v5776_v25 = vsel %vm1609_vm5, %v12553_v34, 0.0  ;;  %v12559_v62 = vpop.eup %9920 }
0x1181   :  { %v5667_v18 = vpop.xlane.xlu1 %5666  ;;  %9928 = vpow2.f32 %v5642_v7  ;;  %5777 = vadd.xlane.f32.xlu1 %v5776_v25  ;;  %v5767_v35 = vsel %vm1609_vm5, %v12559_v62, 0.0 }
0x1182   :  { %v12561_v59 = vpop.eup %9922  ;;  %9930 = vpow2.f32 %v5640_v23  ;;  %v5795_v32 = vmul.f32 5.656854, %v5667_v18 }
0x1183   :  { %v5773_v0 = vsel %vm1609_vm5, %v12561_v59, 0.0  ;;  %v12567_v41 = vpop.eup %9924 }
0x1184   :  { %v5670_v52 = vpop.xlane.xlu0 %5669  ;;  %5774 = vadd.xlane.f32.xlu0 %v5773_v0  ;;  %v5770_v12 = vsel %vm1609_vm5, %v12567_v41, 0.0 }
0x1185   :  { %v5679_v46 = vpop.xlane.xlu1 %5678  ;;  %v5796_v24 = vmul.f32 5.656854, %v5670_v52  ;;  %5768 = vadd.xlane.f32.xlu1 %v5767_v35 }
0x1186   :  { %v5799_v40 = vmul.f32 5.656854, %v5679_v46 }
0x1187   :  { %v12569_v4 = vpop.eup %9926  ;;  %9932 = vrcp.f32 %v5796_v24 }
0x1188   :  { %v5664_v49 = vpop.xlane.xlu0 %5663  ;;  %v5764_v39 = vsel %vm1609_vm5, %v12569_v4, 0.0  ;;  %9934 = vrcp.f32 %v5795_v32 }
0x1189   :  { %v5673_v28 = vpop.xlane.xlu1 %5672  ;;  %v5794_v36 = vmul.f32 5.656854, %v5664_v49  ;;  %5771 = vadd.xlane.f32.xlu1 %v5770_v12  ;;  %5765 = vadd.xlane.f32.xlu0 %v5764_v39 }
0x118a   :  { %v5797_v27 = vmul.f32 5.656854, %v5673_v28 }
0x118b   :  { %v12575_v37 = vpop.eup %9928  ;;  %9936 = vrcp.f32 %v5794_v36 }
0x118c   :  { %v12577_v5 = vpop.eup %9930  ;;  %v5688_v29 = vpop.xlane.xlu0 %5687  ;;  %v5785_v54 = vsel %vm1609_vm5, %v12575_v37, 0.0 }
0x118d   :  { %v5685_v33 = vpop.xlane.xlu1 %5684  ;;  %v5802_v42 = vmul.f32 5.656854, %v5688_v29  ;;  %5786 = vadd.xlane.f32.xlu1 %v5785_v54  ;;  %v5782_v21 = vsel %vm1609_vm5, %v12577_v5, 0.0 }
0x118e   :  { %v5801_v31 = vmul.f32 5.656854, %v5685_v33 }
0x118f   :  { %9938 = vrcp.f32 %v5802_v42 }
0x1190   :  { %9940 = vrcp.f32 %v5801_v31  ;;  %v5682_v1 = vpop.xlane.xlu0 %5681  ;;  %v13175_v31 = vld [vmem:[#allocation35_spill] sm:$0xff] }
0x1191   :  { %v5800_v7 = vmul.f32 5.656854, %v5682_v1  ;;  %5783 = vadd.xlane.f32.xlu1 %v5782_v21  ;;  %v9933_v23 = vpop.eup %9932 }
0x1192   :  { %v5706_v25 = vpop.xlane.xlu1 %5705  ;;  %v9935_v18 = vpop.eup %9934  ;;  %v5892_v35 = vmul.f32 %v9933_v23, %v12363_v19 }
0x1193   :  { %9942 = vrcp.f32 %v5800_v7  ;;  %v5891_v46 = vmul.f32 %v9935_v18, %v12360_v11  ;;  %v5808_v54 = vmul.f32 5.656854, %v5706_v25  ;;  %v13176_v25 = vld [vmem:[#allocation33_spill] sm:$0xff] }
0x1194   :  { %9944 = vrcp.f32 %v5799_v40  ;;  %v5676_v0 = vpop.xlane.xlu0 %5675  ;;  %v5937_v36 = vpack.c.bf16 %v5892_v35, %v5892_v35 }
0x1195   :  { %v9937_v52 = vpop.eup %9936  ;;  %9946 = vrcp.f32 %v5797_v27  ;;  %v5798_v32 = vmul.f32 5.656854, %v5676_v0 }
0x1196   :  { %v5697_v24 = vpop.xlane.xlu1 %5696  ;;  %v5890_v49 = vmul.f32 %v9937_v52, %v12373_v3  ;;  %v13177_v52 = vld [vmem:[#allocation41_spill] sm:$0xff] }
0x1197   :  { %9948 = vrcp.f32 %v5798_v32  ;;  %v5805_v40 = vmul.f32 5.656854, %v5697_v24 }
0x1198   :  { %v5700_v12 = vpop.xlane.xlu0 %5699  ;;  %v5936_v39 = vpack.c.bf16 %v5891_v46, %v5890_v49  ;;  %9950 = vrcp.f32 %v5808_v54  ;;  %v13181_v54 = vld [vmem:[#allocation24_spill] sm:$0xff] }
0x1199   :  { %v9939_v28 = vpop.eup %9938  ;;  %v5806_v42 = vmul.f32 5.656854, %v5700_v12  ;;  %v13179_v12 = vld [vmem:[#allocation23_spill] sm:$0xff] }
0x119a   :  { %v9941_v29 = vpop.eup %9940  ;;  %8838 = vmatprep.mubr.msk.bf16.mxu1 %vm1609_vm5, %v5936_v39  ;;  %v5691_v33 = vpop.xlane.xlu1 %5690  ;;  %v5898_v11 = vmul.f32 %v9939_v28, %v12383_v9  ;;  %v5545_v28 = vsub.f32 %v12356_v8, %v12555_v15  ;;  %v13183_v15 = vld [vmem:[#allocation15_spill] sm:$0xff] }
0x119b   :  { %8839 = vmatmul.mubr.msk.bf16.vlgmr.msra.gmra.mrb[136].mxu1 %vm1609_vm5, %v5937_v36  ;;  %v5897_v19 = vmul.f32 %v9941_v29, %v12389_v2  ;;  %9952 = vrcp.f32 %v5806_v42  ;;  %v5803_v23 = vmul.f32 5.656854, %v5691_v33  ;;  %v13180_v29 = vld [vmem:[#allocation32_spill] sm:$0xff] }
0x119c   :  { %8851 = vmatpush3.bf16.msra.mxu1 %v12084_v57  ;;  %v6224_v57 = vsel %vm2229_vm6, %v13175_v31, 0  ;;  %v5941_v35 = vpack.c.bf16 %v5898_v11, %v5898_v11  ;;  %v5638_v11 = vmul.f32 1.442695, %v5545_v28 }
0x119d   :  { %v9943_v3 = vpop.eup %9942  ;;  %9086 = vmatprep.subr.msk.bf16.mxu1 %vm2229_vm6, %v13175_v31  ;;  %v13182_v31 = vld [vmem:[#allocation13_spill] sm:$0xff] }
0x119e   :  { %v9945_v21 = vpop.eup %9944  ;;  %v5703_v1 = vpop.xlane.xlu1 %5702  ;;  %v5896_v27 = vmul.f32 %v9943_v3, %v12396_v48  ;;  %v13178_v48 = vld [vmem:[#allocation44_spill] sm:$0xff] }
0x119f   :  { %v9947_v7 = vpop.eup %9946  ;;  %6772 = vrot.lane.b32.xlu0 %v13176_v25, %s10144_s6  ;;  %v5807_v2 = vmul.f32 5.656854, %v5703_v1  ;;  %v5895_v0 = vmul.f32 %v9945_v21, %v12369_v61 }
0x11a0   :  { %8853 = vmatpush3.bf16.msra.mxu1 %v6224_v57  ;;  %v5940_v9 = vpack.c.bf16 %v5897_v19, %v5896_v27  ;;  %v5893_v24 = vmul.f32 %v9947_v7, %v12379_v55  ;;  %v6348_v55 = vsel %vm2229_vm6, %v13179_v12, 0  ;;  %v6286_v19 = vsel %vm2229_vm6, %v13180_v29, 0  ;;  %v13185_v7 = vld [vmem:[#allocation12_spill] sm:$0xff] }
0x11a1   :  { %v9949_v18 = vpop.eup %9948  ;;  %9954 = vrcp.f32 %v5807_v2  ;;  %8866 = vmatprep.subr.bf16.mxu1 %v13177_v52  ;;  %v5939_v39 = vpack.c.bf16 %v5895_v0, %v5895_v0  ;;  %v13187_v2 = vld [vmem:[#allocation16_spill] sm:$0xff]  ;;  %v13188_v0 = vld [vmem:[#allocation37_spill] sm:$0xff] }
0x11a2   :  { %9956 = vrcp.f32 %v5805_v40  ;;  %6894 = vrot.lane.b32.xlu1 %v13178_v48, %s10144_s6  ;;  %8854 = vmatprep.mubr.msk.bf16.mxu1 %vm1609_vm5, %v5940_v9  ;;  %v5694_v32 = vpop.xlane.xlu1 %5693  ;;  %v5894_v49 = vmul.f32 %v9949_v18, %v12399_v43  ;;  %v9951_v43 = vpop.eup %9950  ;;  %v13184_v40 = vld [vmem:[#allocation42_spill] sm:$0xff]  ;;  %v13189_v48 = vld [vmem:[#allocation39_spill] sm:$0xff] }
0x11a3   :  { %9958 = vrcp.f32 %v5803_v23  ;;  %8855 = vmatmul.mubr.msk.bf16.vlgmr.msra.gmra.mrb[140].mxu1 %vm1609_vm5, %v5941_v35  ;;  %v5804_v46 = vmul.f32 5.656854, %v5694_v32  ;;  %v5904_v42 = vmul.f32 %v9951_v43, %v12403_v60  ;;  %v13186_v60 = vld [vmem:[#allocation14_spill] sm:$0xff]  ;;  %v6472_v35 = vsel %vm2229_vm6, %v13188_v0, 0  ;;  %v13190_v32 = vld [vmem:[#allocation43_spill] sm:$0xff] }
0x11a4   :  { %8867 = vmatpush3.bf16.msra.mxu1 %v13177_v52  ;;  %v5938_v61 = vpack.c.bf16 %v5894_v49, %v5893_v24  ;;  %v6410_v24 = vsel %vm2229_vm6, %v13189_v48, 0 }
0x11a5   :  { %9960 = vrcp.f32 %v5804_v46  ;;  %9088 = vmatprep.subr.msk.bf16.mxu1 %vm2229_vm6, %v13179_v12  ;;  %v9953_v36 = vpop.eup %9952  ;;  %v5945_v25 = vpack.c.bf16 %v5904_v42, %v5904_v42  ;;  %v13191_v46 = vld [vmem:[#allocation45_spill] sm:$0xff] }
0x11a6   :  { %8846 = vmatprep.mubr.msk.bf16.mxu0 %vm1609_vm5, %v5938_v61  ;;  %v5902_v8 = vmul.f32 %v9953_v36, %v13182_v31  ;;  %9962 = vpow2.f32 %v5638_v11 }
0x11a7   :  { %8847 = vmatmul.mubr.msk.bf16.vlgmr.msra.gmra.mrb[136].mxu0 %vm1609_vm5, %v5939_v39 }
0x11a8   :  { %8859 = vmatpush3.bf16.msra.mxu0 %v12113_v58  ;;  %8869 = vmatpush3.bf16.msra.mxu1 %v6348_v55 }
0x11a9   :  { %9087 = vmatprep.subr.msk.bf16.mxu0 %vm2229_vm6, %v13180_v29  ;;  %8882 = vmatprep.subr.bf16.mxu1 %v13181_v54 }
0x11ab   :  { %v9955_v33 = vpop.eup %9954 }
0x11ac   :  { %v9957_v3 = vpop.eup %9956  ;;  %8861 = vmatpush3.bf16.msra.mxu0 %v6286_v19  ;;  %v5903_v58 = vmul.f32 %v9955_v33, %v13183_v15  ;;  %v13192_v19 = vld [vmem:[#allocation29_spill] sm:$0xff] }
0x11ad   :  { %v9959_v21 = vpop.eup %9958  ;;  %8874 = vmatprep.subr.bf16.mxu0 %v13184_v40  ;;  %v5901_v23 = vmul.f32 %v9957_v3, %v13185_v7 }
0x11ae   :  { %v5944_v1 = vpack.c.bf16 %v5903_v58, %v5902_v8  ;;  %v5899_v57 = vmul.f32 %v9959_v21, %v13186_v60 }
0x11af   :  { %v9961_v27 = vpop.eup %9960  ;;  %v5943_v52 = vpack.c.bf16 %v5901_v23, %v5901_v23 }
0x11b0   :  { %8870 = vmatprep.mubr.msk.bf16.mxu1 %vm1609_vm5, %v5944_v1  ;;  %v5900_v9 = vmul.f32 %v9961_v27, %v13187_v2  ;;  %v12643_v49 = vpop.eup %9962 }
0x11b1   :  { %8871 = vmatmul.mubr.msk.bf16.vlgmr.msra.gmra.mrb[144].mxu1 %vm1609_vm5, %v5945_v25  ;;  %v5779_v61 = vsel %vm1609_vm5, %v12643_v49, 0.0 }
0x11b2   :  { %8883 = vmatpush3.bf16.msra.mxu1 %v13181_v54  ;;  %v5942_v18 = vpack.c.bf16 %v5900_v9, %v5899_v57  ;;  %v13193_v9 = vld [vmem:[#allocation30_spill] sm:$0xff] }
0x11b3   :  { %9090 = vmatprep.subr.msk.bf16.mxu1 %vm2229_vm6, %v13188_v0  ;;  %v13194_v0 = vld [vmem:[#allocation28_spill] sm:$0xff] }
0x11b4   :  { %8862 = vmatprep.mubr.msk.bf16.mxu0 %vm1609_vm5, %v5942_v18 }
0x11b5   :  { %8863 = vmatmul.mubr.msk.bf16.vlgmr.msra.gmra.mrb[140].mxu0 %vm1609_vm5, %v5943_v52  ;;  %v13195_v52 = vld [vmem:[#allocation25_spill] sm:$0xff] }
0x11b6   :  { %8875 = vmatpush3.bf16.msra.mxu0 %v13184_v40  ;;  %8885 = vmatpush3.bf16.msra.mxu1 %v6472_v35 }
0x11b7   :  { %9089 = vmatprep.subr.msk.bf16.mxu0 %vm2229_vm6, %v13189_v48  ;;  %8898 = vmatprep.subr.bf16.mxu1 %v13190_v32 }
0x11ba   :  { %8877 = vmatpush3.bf16.msra.mxu0 %v6410_v24 }
0x11bb   :  { %8890 = vmatprep.subr.bf16.mxu0 %v13191_v46 }
0x11be   :  { %5780 = vadd.xlane.f32.xlu0 %v5779_v61 }
0x11c9   :  { %v5724_v12 = vpop.xlane.xlu1 %5723 }
0x11ca   :  { %v5814_v36 = vmul.f32 5.656854, %v5724_v12  ;;  %v13196_v12 = vld [vmem:[#allocation31_spill] sm:$0xff] }
0x11cd   :  { %v5718_v39 = vpop.xlane.xlu0 %5717 }
0x11ce   :  { %v5715_v55 = vpop.xlane.xlu1 %5714  ;;  %v5812_v33 = vmul.f32 5.656854, %v5718_v39 }
0x11cf   :  { %v5811_v43 = vmul.f32 5.656854, %v5715_v55 }
0x11d1   :  { %v5712_v28 = vpop.xlane.xlu0 %5711  ;;  %9964 = vrcp.f32 %v5811_v43 }
0x11d2   :  { %v5810_v29 = vmul.f32 5.656854, %v5712_v28  ;;  %v5709_v54 = vpop.xlane.xlu1 %5708 }
0x11d3   :  { %v5809_v42 = vmul.f32 5.656854, %v5709_v54 }
0x11d4   :  { %9966 = vrcp.f32 %v5810_v29  ;;  %6896 = vrot.lane.b32.xlu0 %v13192_v19, %s10144_s6 }
0x11d5   :  { %9968 = vrcp.f32 %v5809_v42 }
0x11d6   :  { %9970 = vrcp.f32 %v5814_v36  ;;  %v5721_v3 = vpop.xlane.xlu1 %5720 }
0x11d7   :  { %9972 = vrcp.f32 %v5812_v33  ;;  %v5813_v11 = vmul.f32 5.656854, %v5721_v3 }
0x11d9   :  { %9974 = vrcp.f32 %v5813_v11 }
0x11db   :  { %v9965_v31 = vpop.eup %9964 }
0x11dc   :  { %v5907_v58 = vmul.f32 %v9965_v31, %v12445_v53 }
0x11de   :  { %v9967_v8 = vpop.eup %9966  ;;  %v5947_v60 = vpack.c.bf16 %v5907_v58, %v5907_v58 }
0x11df   :  { %v9969_v15 = vpop.eup %9968  ;;  %v5906_v21 = vmul.f32 %v9967_v8, %v12460_v10 }
0x11e0   :  { %v9971_v40 = vpop.eup %9970  ;;  %v5905_v1 = vmul.f32 %v9969_v15, %v12457_v51 }
0x11e1   :  { %v9973_v27 = vpop.eup %9972  ;;  %v5910_v25 = vmul.f32 %v9971_v40, %v12438_v6  ;;  %v5727_v53 = vpop.xlane.xlu0 %5726  ;;  %v6534_v6 = vsel %vm2229_vm6, %v13193_v9, 0 }
0x11e2   :  { %v5946_v7 = vpack.c.bf16 %v5906_v21, %v5905_v1  ;;  %v5908_v57 = vmul.f32 %v9973_v27, %v12449_v44  ;;  %v5815_v44 = vmul.f32 5.656854, %v5727_v53 }
0x11e3   :  { %v9975_v23 = vpop.eup %9974  ;;  %v5949_v51 = vpack.c.bf16 %v5910_v25, %v5910_v25 }
0x11e4   :  { %8878 = vmatprep.mubr.msk.bf16.mxu0 %vm1609_vm5, %v5946_v7  ;;  %v5909_v2 = vmul.f32 %v9975_v23, %v12464_v47  ;;  %9976 = vrcp.f32 %v5815_v44 }
0x11e5   :  { %8879 = vmatmul.mubr.msk.bf16.vlgmr.msra.gmra.mrb[144].mxu0 %vm1609_vm5, %v5947_v60 }
0x11e6   :  { %8891 = vmatpush3.bf16.msra.mxu0 %v13191_v46  ;;  %v5948_v10 = vpack.c.bf16 %v5909_v2, %v5908_v57  ;;  %v6596_v46 = vsel %vm2229_vm6, %v13194_v0, 0 }
0x11e7   :  { %9091 = vmatprep.subr.msk.bf16.mxu0 %vm2229_vm6, %v13193_v9  ;;  %v5742_v18 = vpop.xlane.xlu1 %5741  ;;  %v13200_v9 = vld [vmem:[#allocation34_spill] sm:$0xff] }
0x11e8   :  { %8886 = vmatprep.mubr.msk.bf16.mxu1 %vm1609_vm5, %v5948_v10  ;;  %v5820_v48 = vmul.f32 5.656854, %v5742_v18  ;;  %v13199_v10 = vld [vmem:[#allocation19_spill] sm:$0xff] }
0x11e9   :  { %8887 = vmatmul.mubr.msk.bf16.vlgmr.msra.gmra.mrb[148].mxu1 %vm1609_vm5, %v5949_v51 }
0x11ea   :  { %8893 = vmatpush3.bf16.msra.mxu0 %v6534_v6  ;;  %8899 = vmatpush3.bf16.msra.mxu1 %v13190_v32  ;;  %v5739_v47 = vpop.xlane.xlu0 %5738 }
0x11eb   :  { %9092 = vmatprep.subr.msk.bf16.mxu1 %vm2229_vm6, %v13194_v0  ;;  %8906 = vmatprep.subr.bf16.mxu0 %v13195_v52  ;;  %v5733_v35 = vpop.xlane.xlu1 %5732  ;;  %v5819_v61 = vmul.f32 5.656854, %v5739_v47 }
0x11ec   :  { %v5817_v24 = vmul.f32 5.656854, %v5733_v35 }
0x11ee   :  { %8901 = vmatpush3.bf16.msra.mxu1 %v6596_v46  ;;  %9978 = vrcp.f32 %v5817_v24  ;;  %v9977_v28 = vpop.eup %9976 }
0x11ef   :  { %8914 = vmatprep.subr.bf16.mxu1 %v13196_v12  ;;  %v5730_v39 = vpop.xlane.xlu0 %5729  ;;  %v5736_v32 = vpop.xlane.xlu1 %5735  ;;  %9980 = vrcp.f32 %v5820_v48  ;;  %v5911_v11 = vmul.f32 %v9977_v28, %v12483_v50 }
0x11f0   :  { %v5816_v55 = vmul.f32 5.656854, %v5730_v39  ;;  %v5818_v43 = vmul.f32 5.656854, %v5736_v32  ;;  %9982 = vrcp.f32 %v5819_v61 }
0x11f2   :  { %9984 = vrcp.f32 %v5816_v55 }
0x11f3   :  { %9986 = vrcp.f32 %v5818_v43 }
0x11f8   :  { %v9979_v36 = vpop.eup %9978 }
0x11f9   :  { %v9981_v29 = vpop.eup %9980  ;;  %v5913_v42 = vmul.f32 %v9979_v36, %v12495_v14 }
0x11fa   :  { %v9983_v54 = vpop.eup %9982  ;;  %v5916_v3 = vmul.f32 %v9981_v29, %v12491_v13 }
0x11fb   :  { %v5915_v15 = vmul.f32 %v9983_v54, %v12497_v45  ;;  %v5951_v1 = vpack.c.bf16 %v5913_v42, %v5913_v42  ;;  %v13197_v45 = vld [vmem:[#allocation38_spill] sm:$0xff] }
0x11fc   :  { %v9985_v33 = vpop.eup %9984  ;;  %v5953_v27 = vpack.c.bf16 %v5916_v3, %v5916_v3  ;;  %v6658_v7 = vsel %vm2229_vm6, %v13197_v45, 0 }
0x11fd   :  { %v9987_v19 = vpop.eup %9986  ;;  %v5912_v31 = vmul.f32 %v9985_v33, %v12505_v20  ;;  %v13198_v20 = vld [vmem:[#allocation27_spill] sm:$0xff] }
0x11fe   :  { %v5914_v8 = vmul.f32 %v9987_v19, %v12503_v56  ;;  %v5760_v58 = vpop.xlane.xlu1 %5759  ;;  %v6720_v60 = vsel %vm2229_vm6, %v13198_v20, 0 }
0x11ff   :  { %v5950_v21 = vpack.c.bf16 %v5912_v31, %v5911_v11  ;;  %v5826_v56 = vmul.f32 5.656854, %v5760_v58 }
0x1200   :  { %v5952_v40 = vpack.c.bf16 %v5915_v15, %v5914_v8 }
0x1201   :  { %8894 = vmatprep.mubr.msk.bf16.mxu0 %vm1609_vm5, %v5950_v21 }
0x1202   :  { %8902 = vmatprep.mubr.msk.bf16.mxu1 %vm1609_vm5, %v5952_v40  ;;  %8895 = vmatmul.mubr.msk.bf16.vlgmr.msra.gmra.mrb[148].mxu0 %vm1609_vm5, %v5951_v1  ;;  %v5754_v13 = vpop.xlane.xlu0 %5753  ;;  %v5751_v14 = vpop.xlane.xlu1 %5750 }
0x1203   :  { %8903 = vmatmul.mubr.msk.bf16.vlgmr.msra.gmra.mrb[152].mxu1 %vm1609_vm5, %v5953_v27  ;;  %8907 = vmatpush3.bf16.msra.mxu0 %v13195_v52  ;;  %v5823_v50 = vmul.f32 5.656854, %v5751_v14  ;;  %v5824_v57 = vmul.f32 5.656854, %v5754_v13  ;;  %v13201_v27 = vld [vmem:[#allocation36_spill] sm:$0xff] }
0x1204   :  { %8915 = vmatpush3.bf16.msra.mxu1 %v13196_v12  ;;  %9093 = vmatprep.subr.msk.bf16.mxu0 %vm2229_vm6, %v13197_v45  ;;  %v6844_v45 = vsel %vm2229_vm6, %v13201_v27, 0 }
0x1205   :  { %9094 = vmatprep.subr.msk.bf16.mxu1 %vm2229_vm6, %v13198_v20  ;;  %9988 = vrcp.f32 %v5823_v50 }
0x1206   :  { %v5748_v23 = vpop.xlane.xlu0 %5747  ;;  %v5745_v25 = vpop.xlane.xlu1 %5744  ;;  %9990 = vrcp.f32 %v5826_v56 }
0x1207   :  { %8909 = vmatpush3.bf16.msra.mxu0 %v6658_v7  ;;  %v5822_v2 = vmul.f32 5.656854, %v5748_v23  ;;  %v5821_v53 = vmul.f32 5.656854, %v5745_v25 }
0x1208   :  { %8917 = vmatpush3.bf16.msra.mxu1 %v6720_v60  ;;  %8922 = vmatprep.subr.bf16.mxu0 %v13199_v10 }
0x1209   :  { %8930 = vmatprep.subr.bf16.mxu1 %v13200_v9  ;;  %9992 = vrcp.f32 %v5822_v2  ;;  %v13202_v2 = vmov 0.0  }
0x120a   :  { %9994 = vrcp.f32 %v5821_v53  ;;  %v5757_v51 = vpop.xlane.xlu1 %5756 }
0x120b   :  { %9996 = vrcp.f32 %v5824_v57  ;;  %v5825_v18 = vmul.f32 5.656854, %v5757_v51  ;;  %v5763_v6 = vpop.xlane.xlu0 %5762 }
0x120c   :  { %v5827_v24 = vmul.f32 5.656854, %v5763_v6 }
0x120d   :  { %9998 = vrcp.f32 %v5825_v18 }
0x120e   :  { %v12694_v44 = vpop.f32.mrb[132].mxu1  ;;  %v5778_v0 = vpop.xlane.xlu1 %5777  ;;  %10000 = vrcp.f32 %v5827_v24 }
0x120f   :  { %v12696_v47 = vpop.f32.mrb[133].mxu1  ;;  %v9989_v48 = vpop.eup %9988  ;;  %v5832_v32 = vmul.f32 5.656854, %v5778_v0 }
0x1210   :  { %v8825_v52 = vpop.f32.mrb[134].mxu1  ;;  %v9991_v61 = vpop.eup %9990  ;;  %v5919_v28 = vmul.f32 %v9989_v48, %v12523_v22 }
0x1211   :  { %v12698_v35 = vpop.f32.mrb[135].mxu1  ;;  %v5775_v46 = vpop.xlane.xlu0 %5774  ;;  %v5922_v42 = vmul.f32 %v9991_v61, %v12518_v16 }
0x1212   :  { %v5769_v12 = vpop.xlane.xlu1 %5768  ;;  %v5831_v36 = vmul.f32 5.656854, %v5775_v46  ;;  %v5955_v58 = vpack.c.bf16 %v5919_v28, %v5919_v28 }
0x1213   :  { %v9993_v39 = vpop.eup %9992  ;;  %v5829_v55 = vmul.f32 5.656854, %v5769_v12  ;;  %v5957_v40 = vpack.c.bf16 %v5922_v42, %v5922_v42 }
0x1214   :  { %v9995_v43 = vpop.eup %9994  ;;  %v5918_v29 = vmul.f32 %v9993_v39, %v12536_v30 }
0x1215   :  { %v9997_v54 = vpop.eup %9996  ;;  %v5917_v33 = vmul.f32 %v9995_v43, %v12533_v63  ;;  %10002 = vrcp.f32 %v5829_v55 }
0x1216   :  { %v5766_v19 = vpop.xlane.xlu0 %5765  ;;  %v5772_v3 = vpop.xlane.xlu1 %5771  ;;  %10004 = vrcp.f32 %v5832_v32  ;;  %v5920_v22 = vmul.f32 %v9997_v54, %v12526_v38 }
0x1217   :  { %v9999_v11 = vpop.eup %9998  ;;  %v5828_v31 = vmul.f32 5.656854, %v5766_v19  ;;  %v5830_v8 = vmul.f32 5.656854, %v5772_v3  ;;  %v5954_v15 = vpack.c.bf16 %v5918_v29, %v5917_v33  ;;  %10006 = vrcp.f32 %v5831_v36 }
0x1218   :  { %v5921_v30 = vmul.f32 %v9999_v11, %v12542_v26  ;;  %v10001_v26 = vpop.eup %10000 }
0x1219   :  { %10008 = vrcp.f32 %v5828_v31  ;;  %8910 = vmatprep.mubr.msk.bf16.mxu0 %vm1609_vm5, %v5954_v15 }
0x121a   :  { %10010 = vrcp.f32 %v5830_v8  ;;  %8911 = vmatmul.mubr.msk.bf16.vlgmr.msra.gmra.mrb[152].mxu0 %vm1609_vm5, %v5955_v58  ;;  %v6773_v16 = vpop.permute.xlu0 %6772  ;;  %v5787_v63 = vpop.xlane.xlu1 %5786  ;;  %v5956_v21 = vpack.c.bf16 %v5921_v30, %v5920_v22 }
0x121b   :  { %8923 = vmatpush3.bf16.msra.mxu0 %v13199_v10  ;;  %v6782_v1 = vsel %vm2229_vm6, %v6773_v16, 0 }
0x121c   :  { %9095 = vmatprep.subr.msk.bf16.mxu0 %vm2229_vm6, %v6773_v16  ;;  %8918 = vmatprep.mubr.msk.bf16.mxu1 %vm1609_vm5, %v5956_v21 }
0x121d   :  { %8919 = vmatmul.mubr.msk.bf16.vlgmr.msra.gmra.mrb[156].mxu1 %vm1609_vm5, %v5957_v40 }
0x121e   :  { %8931 = vmatpush3.bf16.msra.mxu1 %v13200_v9  ;;  %v5784_v38 = vpop.xlane.xlu1 %5783  ;;  %v5923_v9 = vmul.f32 %v10001_v26, %v12545_v17  ;;  %v5835_v17 = vmul.f32 5.656854, %v5787_v63 }
0x121f   :  { %8925 = vmatpush3.bf16.msra.mxu0 %v6782_v1  ;;  %9096 = vmatprep.subr.msk.bf16.mxu1 %vm2229_vm6, %v13201_v27  ;;  %v10003_v13 = vpop.eup %10002 }
0x1220   :  { %v10005_v50 = vpop.eup %10004  ;;  %v5925_v60 = vmul.f32 %v10003_v13, %v12559_v62  ;;  %10012 = vrcp.f32 %v5835_v17 }
0x1221   :  { %v12716_v14 = vpop.f32.mrb[132].mxu0  ;;  %v10007_v20 = vpop.eup %10006  ;;  %v5928_v10 = vmul.f32 %v10005_v50, %v12553_v34  ;;  %v5834_v34 = vmul.f32 5.656854, %v5784_v38 }
0x1222   :  { %v12720_v56 = vpop.f32.mrb[133].mxu0  ;;  %8933 = vmatpush3.bf16.msra.mxu1 %v6844_v45  ;;  %v6895_v7 = vpop.permute.xlu1 %6894  ;;  %v5927_v6 = vmul.f32 %v10007_v20, %v12561_v59  ;;  %v5959_v48 = vpack.c.bf16 %v5925_v60, %v5925_v60 }
0x1223   :  { %v8833_v23 = vpop.f32.mrb[134].mxu0  ;;  %v10009_v25 = vpop.eup %10008  ;;  %8938 = vmatprep.subr.bf16.mxu0 %v6895_v7  ;;  %8946 = vmatprep.subr.bf16.mxu1 %v13202_v2  ;;  %v5961_v62 = vpack.c.bf16 %v5928_v10, %v5928_v10  ;;  %10014 = vrcp.f32 %v5834_v34 }
0x1224   :  { %v12723_v57 = vpop.f32.mrb[135].mxu0  ;;  %v10011_v53 = vpop.eup %10010  ;;  %v5924_v51 = vmul.f32 %v10009_v25, %v12569_v4 }
0x1225   :  { %v5926_v18 = vmul.f32 %v10011_v53, %v12567_v41 }
0x1226   :  { %v5958_v0 = vpack.c.bf16 %v5924_v51, %v5923_v9 }
0x1227   :  { %v5960_v52 = vpack.c.bf16 %v5927_v6, %v5926_v18 }
0x1228   :  { %8926 = vmatprep.mubr.msk.bf16.mxu0 %vm1609_vm5, %v5958_v0 }
0x1229   :  { %8934 = vmatprep.mubr.msk.bf16.mxu1 %vm1609_vm5, %v5960_v52  ;;  %8927 = vmatmul.mubr.msk.bf16.vlgmr.msra.gmra.mrb[156].mxu0 %vm1609_vm5, %v5959_v48 }
0x122a   :  { %8935 = vmatmul.mubr.msk.bf16.vlgmr.msra.gmra.mrb[160].mxu1 %vm1609_vm5, %v5961_v62  ;;  %8939 = vmatpush3.bf16.msra.mxu0 %v6895_v7  ;;  %v10013_v46 = vpop.eup %10012 }
0x122b   :  { %8950 = vmatprep.mubr.msk.bf16.mxu1 %vm10135_vm0, %v13202_v2  ;;  %v5931_v39 = vmul.f32 %v10013_v46, %v12575_v37 }
0x122d   :  { %v10015_v61 = vpop.eup %10014  ;;  %v5963_v28 = vpack.c.bf16 %v5931_v39, %v5931_v39 }
0x122e   :  { %v5930_v55 = vmul.f32 %v10015_v61, %v12577_v5 }
0x124b   :  { %v5781_v59 = vpop.xlane.xlu0 %5780 }
0x124c   :  { %v5833_v41 = vmul.f32 5.656854, %v5781_v59 }
0x124e   :  { %10016 = vrcp.f32 %v5833_v41 }
0x124f   :  { %v6897_v4 = vpop.permute.xlu0 %6896 }
0x1250   :  { %v6906_v24 = vsel %vm2229_vm6, %v6897_v4, 0  ;;  %9097 = vmatprep.subr.msk.bf16.mxu0 %vm2229_vm6, %v6897_v4 }
0x1251   :  { %8941 = vmatpush3.bf16.msra.mxu0 %v6906_v24 }
0x1252   :  { %8962 = vmatprep.subr.bf16.mxu0 %v13202_v2 }
0x1258   :  { %v10017_v12 = vpop.eup %10016 }
0x1259   :  { %v5929_v32 = vmul.f32 %v10017_v12, %v12643_v49 }
0x125b   :  { %v5962_v43 = vpack.c.bf16 %v5930_v55, %v5929_v32 }
0x125d   :  { %8942 = vmatprep.mubr.msk.bf16.mxu0 %vm1609_vm5, %v5962_v43 }
0x125e   :  { %8943 = vmatmul.mubr.msk.bf16.vlgmr.msra.gmra.mrb[160].mxu0 %vm1609_vm5, %v5963_v28 }
0x125f   :  { %8966 = vmatprep.mubr.msk.bf16.mxu0 %vm10135_vm0, %v13202_v2 }
0x126e   :  { %v8840_v36 = vpop.f32.mrb[136].mxu1 }
0x126f   :  { %v6136_v29 = vpop.f32.mrb[137].mxu1 }
0x1270   :  { %v8841_v54 = vpop.f32.mrb[138].mxu1 }
0x1271   :  { %v6139_v33 = vpop.f32.mrb[139].mxu1 }
0x1272   :  { %v9438_v42 = vpack.i.bf16 %v6139_v33, %v6136_v29 }
0x1274   :  { %9439 = vrot.lane.b32.xlu1 %v9438_v42, %s10146_s7 }
0x1276   :  { %v8856_v37 = vpop.f32.mrb[140].mxu1 }
0x1277   :  { %v6260_v49 = vpop.f32.mrb[141].mxu1 }
0x1278   :  { %v8857_v19 = vpop.f32.mrb[142].mxu1 }
0x1279   :  { %v6263_v5 = vpop.f32.mrb[143].mxu1 }
0x127a   :  { %v9448_v3 = vpack.i.bf16 %v6263_v5, %v6260_v49  ;;  %v12748_v11 = vpop.f32.mrb[136].mxu0  ;;  %v9566_v5 = vld [vmem:[#allocation2 + $0x4c] ss:$16 sps:$4 sm:$0xff]  }
0x127b   :  { %v6198_v31 = vpop.f32.mrb[137].mxu0  ;;  %8947 = vmatpush3.bf16.msra.mxu1 %v9566_v5 }
0x127c   :  { %v9443_v8 = vpack.i.bf16 %v6198_v31, %v8840_v36  ;;  %v8849_v15 = vpop.f32.mrb[138].mxu0  ;;  %8948 = vmatprep.subr.bf16.mxu1 %v13202_v2 }
0x127d   :  { %v12750_v58 = vpop.f32.mrb[139].mxu0 }
0x127e   :  { %v9503_v22 = vpack.i.bf16 %v12748_v11, %v12750_v58  ;;  %9444 = vrot.lane.b32.xlu0 %v9443_v8, %s10146_s7 }
0x1282   :  { %9449 = vrot.lane.b32.xlu0 %v9448_v3, %s10133_s9  ;;  %v9568_v3 = vld [vmem:[#allocation2 + $0x6c] ss:$16 sps:$4 sm:$0xff]  }
0x1283   :  { %8949 = vmatpush3.bf16.msra.mxu1 %v9568_v3 }
0x1284   :  { %v8872_v30 = vpop.f32.mrb[144].mxu1  ;;  %8978 = vmatprep.subr.bf16.mxu1 %v13202_v2 }
0x1285   :  { %v6384_v16 = vpop.f32.mrb[145].mxu1 }
0x1286   :  { %v8873_v63 = vpop.f32.mrb[146].mxu1 }
0x1287   :  { %v6387_v21 = vpop.f32.mrb[147].mxu1 }
0x1288   :  { %v9458_v40 = vpack.i.bf16 %v6387_v21, %v6384_v16  ;;  %v8864_v1 = vpop.f32.mrb[140].mxu0 }
0x1289   :  { %v6322_v38 = vpop.f32.mrb[141].mxu0 }
0x128a   :  { %v9453_v26 = vpack.i.bf16 %v6322_v38, %v8856_v37  ;;  %v8865_v27 = vpop.f32.mrb[142].mxu0 }
0x128b   :  { %v6325_v13 = vpop.f32.mrb[143].mxu0 }
0x128c   :  { %v9508_v50 = vpack.i.bf16 %v8864_v1, %v6325_v13  ;;  %9454 = vrot.lane.b32.xlu1 %v9453_v26, %s10133_s9 }
0x1290   :  { %9459 = vrot.lane.b32.xlu1 %v9458_v40, %s10147_s8 }
0x12b8   :  { %v12758_v45 = vpop.f32.mrb[144].mxu0 }
0x12b9   :  { %v6446_v20 = vpop.f32.mrb[145].mxu0 }
0x12ba   :  { %v9463_v7 = vpack.i.bf16 %v6446_v20, %v8872_v30  ;;  %v8881_v23 = vpop.f32.mrb[146].mxu0 }
0x12bb   :  { %v12760_v25 = vpop.f32.mrb[147].mxu0 }
0x12bc   :  { %v9513_v60 = vpack.i.bf16 %v12758_v45, %v12760_v25  ;;  %9464 = vrot.lane.b32.xlu0 %v9463_v7, %s10147_s8  ;;  %v8888_v53 = vpop.f32.mrb[148].mxu1 }
0x12bd   :  { %v6508_v10 = vpop.f32.mrb[149].mxu1 }
0x12be   :  { %v8889_v9 = vpop.f32.mrb[150].mxu1 }
0x12bf   :  { %v6511_v51 = vpop.f32.mrb[151].mxu1 }
0x12c0   :  { %v9468_v18 = vpack.i.bf16 %v6511_v51, %v6508_v10 }
0x12c2   :  { %9469 = vrot.lane.b32.xlu0 %v9468_v18, %s10130_s23 }
0x12d5   :  { %v12766_v6 = vpop.f32.mrb[148].mxu0 }
0x12d6   :  { %v8904_v0 = vpop.f32.mrb[152].mxu1  ;;  %v6570_v52 = vpop.f32.mrb[149].mxu0 }
0x12d7   :  { %v9473_v48 = vpack.i.bf16 %v6570_v52, %v8888_v53  ;;  %v6632_v62 = vpop.f32.mrb[153].mxu1  ;;  %v8897_v17 = vpop.f32.mrb[150].mxu0 }
0x12d8   :  { %v8905_v34 = vpop.f32.mrb[154].mxu1  ;;  %v6573_v59 = vpop.f32.mrb[151].mxu0 }
0x12d9   :  { %v9523_v41 = vpack.i.bf16 %v12766_v6, %v6573_v59  ;;  %v6635_v4 = vpop.f32.mrb[155].mxu1  ;;  %9474 = vrot.lane.b32.xlu1 %v9473_v48, %s10130_s23 }
0x12da   :  { %v9478_v24 = vpack.i.bf16 %v6635_v4, %v6632_v62 }
0x12dd   :  { %9479 = vrot.lane.b32.xlu1 %v9478_v24, %s10148_s1 }
0x12e6   :  { %v9440_v31 = vpop.permute.xlu1 %9439 }
0x12e7   :  { %v9442_v6 = vunpack.i.h.bf16 %v9440_v31 }
0x12ed   :  { %v8912_v46 = vpop.f32.mrb[152].mxu0 }
0x12ee   :  { %v6694_v61 = vpop.f32.mrb[153].mxu0 }
0x12ef   :  { %v9483_v12 = vpack.i.bf16 %v6694_v61, %v8904_v0  ;;  %v8913_v39 = vpop.f32.mrb[154].mxu0  ;;  %v9441_v0 = vunpack.i.l.bf16 %v9440_v31 }
0x12f0   :  { %v6697_v32 = vpop.f32.mrb[155].mxu0  ;;  %v9445_v55 = vpop.permute.xlu0 %9444 }
0x12f1   :  { %v9528_v43 = vpack.i.bf16 %v8912_v46, %v6697_v32  ;;  %v9447_v28 = vunpack.i.h.bf16 %v9445_v55  ;;  %v9446_v36 = vunpack.i.l.bf16 %v9445_v55  ;;  %9484 = vrot.lane.b32.xlu0 %v9483_v12, %s10148_s1  ;;  %v8920_v29 = vpop.f32.mrb[156].mxu1  ;;  %v7124_v46 = vsel %vm558_vm3, %v12696_v47, %v9441_v0 }
0x12f2   :  { %v6756_v54 = vpop.f32.mrb[157].mxu1 }
0x12f3   :  { %v7127_v33 = vsel %vm558_vm3, %v12720_v56, %v9447_v28  ;;  %v7126_v42 = vsel %vm558_vm3, %v12694_v44, %v9446_v36  ;;  %v8921_v37 = vpop.f32.mrb[158].mxu1 }
0x12f4   :  { %v6759_v49 = vpop.f32.mrb[159].mxu1  ;;  %v9450_v11 = vpop.permute.xlu0 %9449 }
0x12f5   :  { %v9488_v19 = vpack.i.bf16 %v6759_v49, %v6756_v54  ;;  %v9452_v52 = vunpack.i.h.bf16 %v9450_v11  ;;  %v9451_v48 = vunpack.i.l.bf16 %v9450_v11 }
0x12f7   :  { %9489 = vrot.lane.b32.xlu0 %v9488_v19, %s10149_s10  ;;  %v7130_v39 = vsel %vm3385_vm7, %v7124_v46, %v9451_v48 }
0x12fb   :  { %9509 = vrot.lane.b32.xlu0 %v9508_v50, %s10133_s9 }
0x12fc   :  { %v8928_v8 = vpop.f32.mrb[156].mxu0 }
0x12fd   :  { %v8936_v56 = vpop.f32.mrb[160].mxu1  ;;  %v6818_v15 = vpop.f32.mrb[157].mxu0 }
0x12fe   :  { %v9493_v44 = vpack.i.bf16 %v6818_v15, %v8920_v29  ;;  %v6880_v30 = vpop.f32.mrb[161].mxu1  ;;  %v8929_v16 = vpop.f32.mrb[158].mxu0 }
0x12ff   :  { %v8937_v63 = vpop.f32.mrb[162].mxu1  ;;  %v6821_v21 = vpop.f32.mrb[159].mxu0 }
0x1300   :  { %v9533_v40 = vpack.i.bf16 %v8928_v8, %v6821_v21  ;;  %v6883_v1 = vpop.f32.mrb[163].mxu1  ;;  %v9455_v38 = vpop.permute.xlu1 %9454  ;;  %9494 = vrot.lane.b32.xlu1 %v9493_v44, %s10149_s10 }
0x1301   :  { %v9498_v26 = vpack.i.bf16 %v6883_v1, %v6880_v30  ;;  %v9457_v27 = vunpack.i.h.bf16 %v9455_v38  ;;  %v9456_v13 = vunpack.i.l.bf16 %v9455_v38 }
0x1303   :  { %v12782_v50 = vsel %vm3385_vm7, %v7127_v33, %v9457_v27  ;;  %v12785_v20 = vsel %vm3385_vm7, %v7126_v42, %v9456_v13 }
0x1304   :  { %9499 = vrot.lane.b32.xlu1 %v9498_v26, %s10150_s11  ;;  %v9460_v58 = vpop.permute.xlu1 %9459 }
0x1305   :  { %v9462_v62 = vunpack.i.h.bf16 %v9460_v58  ;;  %v9461_v17 = vunpack.i.l.bf16 %v9460_v58 }
0x1307   :  { %v7136_v28 = vsel %vm3392_vm8, %v7130_v39, %v9461_v17 }
0x1308   :  { %9504 = vrot.lane.b32.xlu1 %v9503_v22, %s10146_s7 }
0x130c   :  { %9514 = vrot.lane.b32.xlu1 %v9513_v60, %s10147_s8 }
0x1310   :  { %9529 = vrot.lane.b32.xlu1 %v9528_v43, %s10148_s1 }
0x132e   :  { %v9465_v22 = vpop.permute.xlu0 %9464 }
0x132f   :  { %v9466_v15 = vunpack.i.l.bf16 %v9465_v22 }
0x1331   :  { %v8944_v7 = vpop.f32.mrb[160].mxu0  ;;  %v7138_v26 = vsel %vm3392_vm8, %v12785_v20, %v9466_v15  ;;  %v13204_v15 = vld [vmem:[#allocation26_spill] sm:$0xff] }
0x1332   :  { %v6942_v23 = vpop.f32.mrb[161].mxu0 }
0x1333   :  { %v9518_v53 = vpack.i.bf16 %v6942_v23, %v8936_v56  ;;  %v8945_v10 = vpop.f32.mrb[162].mxu0  ;;  %v9467_v56 = vunpack.i.h.bf16 %v9465_v22 }
0x1334   :  { %v6945_v9 = vpop.f32.mrb[163].mxu0  ;;  %v9470_v25 = vpop.permute.xlu0 %9469 }
0x1335   :  { %v9538_v51 = vpack.i.bf16 %v8944_v7, %v6945_v9  ;;  %9519 = vrot.lane.b32.xlu0 %v9518_v53, %s10150_s11  ;;  %v9472_v59 = vunpack.i.h.bf16 %v9470_v25  ;;  %v9471_v4 = vunpack.i.l.bf16 %v9470_v25  ;;  %v7139_v27 = vsel %vm3392_vm8, %v12782_v50, %v9467_v56 }
0x1337   :  { %9539 = vrot.lane.b32.xlu1 %v9538_v51, %s10150_s11  ;;  %v7142_v29 = vsel %vm3399_vm9, %v7136_v28, %v9471_v4 }
0x1339   :  { %9524 = vrot.lane.b32.xlu0 %v9523_v41, %s10130_s23  ;;  %v7125_v41 = vsel %vm558_vm3, %v12698_v35, %v9442_v6  ;;  %s10152_s23 = smov [#allocation7]  }
0x133a   :  { %v7131_v32 = vsel %vm3385_vm7, %v7125_v41, %v9452_v52  ;;  %s7825_s9 = sshll.u32 %s10152_s23, 4  ;;  %s7826_s9 = int_to_ptr.vmem [resolvable:$true] %s7825_s9 }
0x133b   :  { %v7137_v36 = vsel %vm3392_vm8, %v7131_v32, %v9462_v62  ;;  %s10100_s12 = scalar_lea.vmem %s7826_s9, 32  ;;  %p10105_p3 = scmp.lt.s32.totalorder %s7826_s9, %s7826_s9 }
0x133c   :  { %v7143_v54 = vsel %vm3399_vm9, %v7137_v36, %v9472_v59  ;;  %p10101_p2 = scmp.ne.s32.totalorder %s7826_s9, %s10100_s12  ;;  %p10106_p4 = scmp.lt.s32.totalorder %s10100_s12, %s10100_s12 }
0x133d   :  { %9534 = vrot.lane.b32.xlu0 %v9533_v40, %s10149_s10 }
0x133e   :  { %p10107_p5 = por %p10106_p4, %p10105_p3 }
0x1340   :  { %p10108_p6 = pnand %p10107_p5, %p10101_p2 }
0x134b   :  { %v9475_v45 = vpop.permute.xlu1 %9474 }
0x134c   :  { %v9477_v44 = vunpack.i.h.bf16 %v9475_v45  ;;  %v9476_v30 = vunpack.i.l.bf16 %v9475_v45 }
0x134e   :  { %v7144_v23 = vsel %vm3399_vm9, %v7138_v26, %v9476_v30  ;;  %v7145_v53 = vsel %vm3399_vm9, %v7139_v27, %v9477_v44 }
0x134f   :  { %v9480_v18 = vpop.permute.xlu1 %9479 }
0x1350   :  { %v9482_v61 = vunpack.i.h.bf16 %v9480_v18  ;;  %v9481_v12 = vunpack.i.l.bf16 %v9480_v18 }
0x1352   :  { %v7148_v33 = vsel %vm3406_vm10, %v7142_v29, %v9481_v12  ;;  %v7149_v47 = vsel %vm3406_vm10, %v7143_v54, %v9482_v61 }
0x1363   :  { %v9485_v60 = vpop.permute.xlu0 %9484 }
0x1364   :  { %v9487_v16 = vunpack.i.h.bf16 %v9485_v60  ;;  %v9486_v63 = vunpack.i.l.bf16 %v9485_v60 }
0x1366   :  { %v7150_v10 = vsel %vm3406_vm10, %v7144_v23, %v9486_v63  ;;  %v7151_v9 = vsel %vm3406_vm10, %v7145_v53, %v9487_v16 }
0x1369   :  { %v9490_v34 = vpop.permute.xlu0 %9489 }
0x136a   :  { %v9492_v55 = vunpack.i.h.bf16 %v9490_v34  ;;  %v9491_v43 = vunpack.i.l.bf16 %v9490_v34 }
0x136c   :  { %v7154_v49 = vsel %vm1609_vm5, %v7148_v33, %v9491_v43  ;;  %v7155_v19 = vsel %vm1609_vm5, %v7149_v47, %v9492_v55 }
0x136d   :  { %v9510_v21 = vpop.permute.xlu0 %9509 }
0x136e   :  { %v9512_v18 = vunpack.i.h.bf16 %v9510_v21  ;;  %v9511_v6 = vunpack.i.l.bf16 %v9510_v21 }
0x1372   :  { %v9495_v24 = vpop.permute.xlu1 %9494 }
0x1373   :  { %v9497_v40 = vunpack.i.h.bf16 %v9495_v24  ;;  %v9496_v1 = vunpack.i.l.bf16 %v9495_v24 }
0x1375   :  { %v7156_v11 = vsel %vm1609_vm5, %v7150_v10, %v9496_v1  ;;  %v7157_v58 = vsel %vm1609_vm5, %v7151_v9, %v9497_v40  ;;  %v13205_v1 = vld [vmem:[#allocation21_spill] sm:$0xff] }
0x1376   :  { %v9500_v35 = vpop.permute.xlu1 %9499 }
0x1377   :  { %v9502_v42 = vunpack.i.h.bf16 %v9500_v35  ;;  %v9501_v37 = vunpack.i.l.bf16 %v9500_v35 }
0x1379   :  { %v7160_v5 = vsel %vm3419_vm11, %v7154_v49, %v9501_v37  ;;  %v7161_v3 = vsel %vm3419_vm11, %v7155_v19, %v9502_v42  ;;  %v8012_v49 = vld [vmem:[#allocation5 + $0xb] ss:$0 sm:$0xff] }
0x137a   :  { %v7166_v31 = vpack.c.bf16 %v7161_v3, %v7160_v5  ;;  %v9505_v8 = vpop.permute.xlu1 %9504  ;;  %v13203_v5 = vld [vmem:[#allocation40_spill] sm:$0xff] }
0x137b   :  { %v9507_v13 = vunpack.i.h.bf16 %v9505_v8  ;;  %v9506_v7 = vunpack.i.l.bf16 %v9505_v8 }
0x137c   :  { %8951 = vmatmul.mubr.msk.bf16.vlgmr.msra.gmra.mrb[164].mxu1 %vm203_vm2, %v7166_v31 }
0x137d   :  { %8954 = vmatprep.mubr.msk.bf16.mxu1 %vm10135_vm0, %v13202_v2  ;;  %v7129_v50 = vsel %vm558_vm3, %v12716_v14, %v9507_v13  ;;  %v7128_v45 = vsel %vm558_vm3, %v12723_v57, %v9506_v7  ;;  %v13206_v7 = vld [vmem:[#allocation18_spill] sm:$0xff] }
0x137e   :  { %v9515_v38 = vpop.permute.xlu1 %9514  ;;  %v7134_v34 = vsel %vm3385_vm7, %v7128_v45, %v9511_v6  ;;  %v7135_v59 = vsel %vm3385_vm7, %v7129_v50, %v9512_v18 }
0x137f   :  { %v9517_v25 = vunpack.i.h.bf16 %v9515_v38  ;;  %v9516_v60 = vunpack.i.l.bf16 %v9515_v38 }
0x1381   :  { %v7140_v24 = vsel %vm3392_vm8, %v7134_v34, %v9516_v60  ;;  %v7141_v57 = vsel %vm3392_vm8, %v7135_v59, %v9517_v25  ;;  %v13208_v25 = vld [vmem:[#allocation22_spill] sm:$0xff] }
0x1382   :  { %v9530_v0 = vpop.permute.xlu1 %9529 }
0x1383   :  { %v9532_v12 = vunpack.i.h.bf16 %v9530_v0  ;;  %v9531_v39 = vunpack.i.l.bf16 %v9530_v0 }
0x13a7   :  { %v9520_v51 = vpop.permute.xlu0 %9519 }
0x13a8   :  { %v9522_v22 = vunpack.i.h.bf16 %v9520_v51  ;;  %v9521_v20 = vunpack.i.l.bf16 %v9520_v51 }
0x13a9   :  { %v9540_v41 = vpop.permute.xlu1 %9539 }
0x13aa   :  { %v7162_v52 = vsel %vm3419_vm11, %v7156_v11, %v9521_v20  ;;  %v7163_v48 = vsel %vm3419_vm11, %v7157_v58, %v9522_v22  ;;  %v9542_v28 = vunpack.i.h.bf16 %v9540_v41  ;;  %v9541_v36 = vunpack.i.l.bf16 %v9540_v41  ;;  %v13207_v58 = vld [vmem:[#allocation17_spill] sm:$0xff] }
0x13ab   :  { %v7167_v62 = vpack.c.bf16 %v7163_v48, %v7162_v52  ;;  %v9525_v17 = vpop.permute.xlu0 %9524 }
0x13ac   :  { %v9527_v4 = vunpack.i.h.bf16 %v9525_v17  ;;  %v9526_v14 = vunpack.i.l.bf16 %v9525_v17 }
0x13ad   :  { %8955 = vmatmul.mubr.msk.bf16.gmra.mrb[168].mxu1 %vm203_vm2, %v7167_v62 }
0x13ae   :  { %v7146_v46 = vsel %vm3399_vm9, %v7140_v24, %v9526_v14  ;;  %v7147_v61 = vsel %vm3399_vm9, %v7141_v57, %v9527_v4  ;;  %8958 = vmatprep.mubr.msk.bf16.mxu1 %vm10135_vm0, %v13202_v2 }
0x13af   :  { %v9535_v32 = vpop.permute.xlu0 %9534  ;;  %v7152_v29 = vsel %vm3406_vm10, %v7146_v46, %v9531_v39  ;;  %v7153_v54 = vsel %vm3406_vm10, %v7147_v61, %v9532_v12  ;;  %v9570_v46 = vld [vmem:[#allocation2 + $0x44] ss:$16 sps:$4 sm:$0xff]   ;;  %vm7717_vm10 = vcmask 1041409  }
0x13b0   :  { %v9537_v55 = vunpack.i.h.bf16 %v9535_v32  ;;  %v9536_v43 = vunpack.i.l.bf16 %v9535_v32  ;;  %8963 = vmatpush3.bf16.msra.mxu0 %v9570_v46  ;;  %v9571_v61 = vld [vmem:[#allocation2 + $0x64] ss:$16 sps:$4 sm:$0xff]  }
0x13b1   :  { %8964 = vmatprep.subr.bf16.mxu0 %v13202_v2 }
0x13b2   :  { %v7158_v35 = vsel %vm1609_vm5, %v7152_v29, %v9536_v43  ;;  %v7159_v33 = vsel %vm1609_vm5, %v7153_v54, %v9537_v55 }
0x13b3   :  { %v7164_v47 = vsel %vm3419_vm11, %v7158_v35, %v9541_v36  ;;  %v7165_v42 = vsel %vm3419_vm11, %v7159_v33, %v9542_v28  ;;  %vm7720_vm11 = vcmask 254976  }
0x13b4   :  { %v7168_v37 = vpack.c.bf16 %v7165_v42, %v7164_v47  ;;  %8965 = vmatpush3.bf16.msra.mxu0 %v9571_v61 }
0x13b5   :  { %8994 = vmatprep.subr.bf16.mxu0 %v13202_v2 }
0x13b6   :  { %8959 = vmatmul.mubr.msk.bf16.gmra.mrb[172].mxu1 %vm203_vm2, %v7168_v37 }
0x13b7   :  { %8982 = vmatprep.mubr.msk.bf16.mxu1 %vm10135_vm0, %v13202_v2 }
0x144f   :  { %v7224_v19 = vpop.f32.mrb[164].mxu1 }
0x1450   :  { %v7247_v3 = vadd.f32 %v7224_v19, %v13203_v5  ;;  %v8952_v31 = vpop.f32.mrb[165].mxu1 }
0x1451   :  { %v7227_v8 = vpop.f32.mrb[166].mxu1 }
0x1452   :  { %v12855_v56 = vadd.f32 %v8012_v49, %v7247_v3  ;;  %v7248_v44 = vadd.f32 %v7227_v8, %v13204_v15  ;;  %v8953_v30 = vpop.f32.mrb[167].mxu1 }
0x1454   :  { %v12858_v16 = vadd.f32 %v8012_v49, %v7248_v44  ;;  %v7263_v63 = vsel %vm203_vm2, %v12855_v56, 0.0 }
0x1455   :  { %7264 = vadd.xlane.f32.xlu0 %v7263_v63 }
0x1456   :  { %v7266_v21 = vsel %vm203_vm2, %v12858_v16, 0.0 }
0x1457   :  { %7267 = vadd.xlane.f32.xlu1 %v7266_v21 }
0x1480   :  { %v7232_v40 = vpop.f32.mrb[168].mxu1 }
0x1481   :  { %v7249_v38 = vadd.f32 %v7232_v40, %v13205_v1  ;;  %v8956_v26 = vpop.f32.mrb[169].mxu1 }
0x1482   :  { %v7235_v27 = vpop.f32.mrb[170].mxu1 }
0x1483   :  { %v12865_v13 = vadd.f32 %v8012_v49, %v7249_v38  ;;  %v7250_v23 = vadd.f32 %v7235_v27, %v13206_v7  ;;  %v8957_v53 = vpop.f32.mrb[171].mxu1  ;;  %v8013_v38 = vld [vmem:[#allocation5 + $0xc] ss:$0 sm:$0xff] }
0x1484   :  { %v8014_v53 = vld [vmem:[#allocation5 + $0xd] ss:$0 sm:$0xff] }
0x1485   :  { %v12868_v10 = vadd.f32 %v8012_v49, %v7250_v23  ;;  %v7269_v9 = vsel %vm203_vm2, %v12865_v13, 0.0 }
0x1486   :  { %7270 = vadd.xlane.f32.xlu0 %v7269_v9 }
0x1487   :  { %v7272_v11 = vsel %vm203_vm2, %v12868_v10, 0.0 }
0x1489   :  { %v7240_v51 = vpop.f32.mrb[172].mxu1 }
0x148a   :  { %v7251_v22 = vadd.f32 %v7240_v51, %v13207_v58  ;;  %7273 = vadd.xlane.f32.xlu0 %v7272_v11  ;;  %v8960_v20 = vpop.f32.mrb[173].mxu1 }
0x148b   :  { %v7243_v50 = vpop.f32.mrb[174].mxu1 }
0x148c   :  { %v12875_v45 = vadd.f32 %v8012_v49, %v7251_v22  ;;  %v7252_v60 = vadd.f32 %v7243_v50, %v13208_v25  ;;  %v8961_v18 = vpop.f32.mrb[175].mxu1 }
0x148e   :  { %v12878_v6 = vadd.f32 %v8012_v49, %v7252_v60  ;;  %v7275_v0 = vsel %vm203_vm2, %v12875_v45, 0.0 }
0x148f   :  { %7276 = vadd.xlane.f32.xlu0 %v7275_v0 }
0x1490   :  { %v7278_v52 = vsel %vm203_vm2, %v12878_v6, 0.0 }
0x1491   :  { %7279 = vadd.xlane.f32.xlu1 %v7278_v52 }
0x14e2   :  { %v7265_v48 = vpop.xlane.xlu0 %7264 }
0x14e3   :  { %v7281_v62 = vmul.f32 0.03125, %v7265_v48 }
0x14e4   :  { %v7268_v17 = vpop.xlane.xlu1 %7267 }
0x14e5   :  { %v7287_v34 = vsub.f32 %v12855_v56, %v7281_v62  ;;  %v7282_v59 = vmul.f32 0.03125, %v7268_v17 }
0x14e7   :  { %v7288_v4 = vsub.f32 %v12858_v16, %v7282_v59  ;;  %v7293_v14 = vmul.f32 %v7287_v34, %v7287_v34 }
0x14e9   :  { %v7299_v24 = vsel %vm203_vm2, %v7293_v14, 0.0  ;;  %v7294_v57 = vmul.f32 %v7288_v4, %v7288_v4 }
0x14ea   :  { %7300 = vadd.xlane.f32.xlu0 %v7299_v24 }
0x14eb   :  { %v7302_v41 = vsel %vm203_vm2, %v7294_v57, 0.0 }
0x14ec   :  { %7303 = vadd.xlane.f32.xlu1 %v7302_v41 }
0x1513   :  { %v7271_v12 = vpop.xlane.xlu0 %7270 }
0x1514   :  { %v7283_v39 = vmul.f32 0.03125, %v7271_v12 }
0x1516   :  { %v7289_v32 = vsub.f32 %v12865_v13, %v7283_v39 }
0x1517   :  { %v7274_v55 = vpop.xlane.xlu0 %7273 }
0x1518   :  { %v7284_v43 = vmul.f32 0.03125, %v7274_v55  ;;  %v7295_v28 = vmul.f32 %v7289_v32, %v7289_v32 }
0x151a   :  { %v7290_v36 = vsub.f32 %v12868_v10, %v7284_v43  ;;  %v7305_v29 = vsel %vm203_vm2, %v7295_v28, 0.0 }
0x151b   :  { %7306 = vadd.xlane.f32.xlu0 %v7305_v29 }
0x151c   :  { %v7277_v54 = vpop.xlane.xlu0 %7276  ;;  %v7296_v35 = vmul.f32 %v7290_v36, %v7290_v36 }
0x151d   :  { %v7285_v33 = vmul.f32 0.03125, %v7277_v54 }
0x151e   :  { %v7280_v47 = vpop.xlane.xlu1 %7279  ;;  %v7308_v42 = vsel %vm203_vm2, %v7296_v35, 0.0 }
0x151f   :  { %v7291_v37 = vsub.f32 %v12875_v45, %v7285_v33  ;;  %v7286_v49 = vmul.f32 0.03125, %v7280_v47  ;;  %7309 = vadd.xlane.f32.xlu1 %v7308_v42  ;;  %v9573_v47 = vld [vmem:[#allocation2 + $0x68] ss:$16 sps:$4 sm:$0xff]   ;;  %v12908_v42 = vld [vmem:[#allocation5 + $0xe] ss:$0 sm:$0xff] }
0x1521   :  { %v7292_v19 = vsub.f32 %v12878_v6, %v7286_v49  ;;  %v7297_v5 = vmul.f32 %v7291_v37, %v7291_v37 }
0x1523   :  { %v7311_v3 = vsel %vm203_vm2, %v7297_v5, 0.0  ;;  %v7298_v31 = vmul.f32 %v7292_v19, %v7292_v19 }
0x1524   :  { %7312 = vadd.xlane.f32.xlu0 %v7311_v3 }
0x1525   :  { %v7314_v8 = vsel %vm203_vm2, %v7298_v31, 0.0 }
0x1526   :  { %7315 = vadd.xlane.f32.xlu1 %v7314_v8 }
0x1577   :  { %v7301_v15 = vpop.xlane.xlu0 %7300 }
0x1578   :  { %v7317_v44 = vmul.f32 0.03125, %v7301_v15 }
0x1579   :  { %v7304_v30 = vpop.xlane.xlu1 %7303 }
0x157a   :  { %v7323_v63 = vadd.f32 1e-05, %v7317_v44  ;;  %v7318_v21 = vmul.f32 0.03125, %v7304_v30 }
0x157c   :  { %10018 = vrsqrt.f32 %v7323_v63  ;;  %v7324_v40 = vadd.f32 1e-05, %v7318_v21 }
0x157e   :  { %10020 = vrsqrt.f32 %v7324_v40 }
0x1586   :  { %v10019_v1 = vpop.eup %10018 }
0x1587   :  { %v7335_v26 = vmul.f32 %v10019_v1, %v7287_v34 }
0x1588   :  { %v10021_v27 = vpop.eup %10020 }
0x1589   :  { %v7345_v7 = vmul.f32 %v8013_v38, %v7335_v26  ;;  %v7336_v23 = vmul.f32 %v10021_v27, %v7288_v4 }
0x158b   :  { %v7346_v9 = vmul.f32 %v8013_v38, %v7336_v23  ;;  %v7355_v51 = vadd.f32 %v8014_v53, %v7345_v7 }
0x158d   :  { %v7356_v11 = vadd.f32 %v8014_v53, %v7346_v9 }
0x158f   :  { %v7361_v58 = vpack.c.bf16 %v7356_v11, %v7355_v51 }
0x1591   :  { %8967 = vmatmul.mubr.msk.bf16.vlgmr.msra.gmra.mrb[164].mxu0 %vm203_vm2, %v7361_v58 }
0x1592   :  { %8970 = vmatprep.mubr.msk.bf16.mxu0 %vm10135_vm0, %v13202_v2 }
0x15a8   :  { %v7307_v22 = vpop.xlane.xlu0 %7306 }
0x15a9   :  { %v7319_v20 = vmul.f32 0.03125, %v7307_v22 }
0x15ab   :  { %v7325_v50 = vadd.f32 1e-05, %v7319_v20 }
0x15ac   :  { %v7310_v25 = vpop.xlane.xlu1 %7309 }
0x15ad   :  { %10022 = vrsqrt.f32 %v7325_v50  ;;  %v7320_v60 = vmul.f32 0.03125, %v7310_v25 }
0x15af   :  { %v7326_v18 = vadd.f32 1e-05, %v7320_v60 }
0x15b1   :  { %10024 = vrsqrt.f32 %v7326_v18  ;;  %v7313_v0 = vpop.xlane.xlu0 %7312 }
0x15b2   :  { %v7321_v52 = vmul.f32 0.03125, %v7313_v0 }
0x15b3   :  { %v7316_v48 = vpop.xlane.xlu1 %7315 }
0x15b4   :  { %v7327_v62 = vadd.f32 1e-05, %v7321_v52  ;;  %v7322_v17 = vmul.f32 0.03125, %v7316_v48 }
0x15b6   :  { %10026 = vrsqrt.f32 %v7327_v62  ;;  %v7328_v34 = vadd.f32 1e-05, %v7322_v17 }
0x15b7   :  { %v10023_v59 = vpop.eup %10022 }
0x15b8   :  { %v7337_v4 = vmul.f32 %v10023_v59, %v7289_v32  ;;  %10028 = vrsqrt.f32 %v7328_v34 }
0x15ba   :  { %v7347_v57 = vmul.f32 %v8013_v38, %v7337_v4 }
0x15bb   :  { %v10025_v14 = vpop.eup %10024 }
0x15bc   :  { %v7338_v24 = vmul.f32 %v10025_v14, %v7290_v36  ;;  %v7357_v61 = vadd.f32 %v8014_v53, %v7347_v57  ;;  %v9572_v36 = vld [vmem:[#allocation2 + $0x48] ss:$16 sps:$4 sm:$0xff]  }
0x15bd   :  { %8979 = vmatpush3.bf16.xpose.msra.mxu1 %v9572_v36 }
0x15be   :  { %v7348_v41 = vmul.f32 %v8013_v38, %v7338_v24  ;;  %8980 = vmatprep.subr.bf16.mxu1 %v13202_v2 }
0x15c0   :  { %v10027_v46 = vpop.eup %10026  ;;  %v7358_v12 = vadd.f32 %v8014_v53, %v7348_v41 }
0x15c1   :  { %v7339_v39 = vmul.f32 %v10027_v46, %v7291_v37 }
0x15c2   :  { %v10029_v55 = vpop.eup %10028  ;;  %v7362_v43 = vpack.c.bf16 %v7358_v12, %v7357_v61  ;;  %v13209_v12 = vmov -1.0  }
0x15c3   :  { %v7340_v28 = vmul.f32 %v10029_v55, %v7292_v19  ;;  %v7349_v29 = vmul.f32 %v8013_v38, %v7339_v39 }
0x15c4   :  { %8971 = vmatmul.mubr.msk.bf16.gmra.mrb[168].mxu0 %vm203_vm2, %v7362_v43 }
0x15c5   :  { %8974 = vmatprep.mubr.msk.bf16.mxu0 %vm10135_vm0, %v13202_v2  ;;  %v7350_v54 = vmul.f32 %v8013_v38, %v7340_v28  ;;  %v7359_v32 = vadd.f32 %v8014_v53, %v7349_v29  ;;  %8981 = vmatpush3.bf16.xpose.msra.mxu1 %v9573_v47 }
0x15c7   :  { %v7360_v35 = vadd.f32 %v8014_v53, %v7350_v54 }
0x15c9   :  { %v7363_v33 = vpack.c.bf16 %v7360_v35, %v7359_v32 }
0x15cc   :  { %8975 = vmatmul.mubr.msk.bf16.gmra.mrb[172].mxu0 %vm203_vm2, %v7363_v33 }
0x15cd   :  { %8998 = vmatprep.mubr.msk.bf16.mxu0 %vm10135_vm0, %v13202_v2 }
0x1664   :  { %v7419_v37 = vpop.f32.mrb[164].mxu0 }
0x1665   :  { %v7420_v49 = vadd.f32 %v12908_v42, %v7419_v37  ;;  %v8968_v19 = vpop.f32.mrb[165].mxu0 }
0x1666   :  { %v7422_v5 = vpop.f32.mrb[166].mxu0 }
0x1667   :  { %v7448_v3 = vmul.f32 0.70710677, %v7420_v49  ;;  %v7423_v31 = vadd.f32 %v12908_v42, %v7422_v5  ;;  %v8969_v8 = vpop.f32.mrb[167].mxu0  ;;  %v7442_v35 = vmul.f32 0.5, %v7420_v49 }
0x1669   :  { %v7466_v15 = vand.u32 2147483647, %v7448_v3  ;;  %v7449_v44 = vmul.f32 0.70710677, %v7423_v31  ;;  %vm7454_vm3 = vcmp.ge.f32.partialorder %v7448_v3, 0.0  ;;  %v7443_v33 = vmul.f32 0.5, %v7423_v31 }
0x166a   :  { %v7460_v39 = vsel %vm7454_vm3, 1.0, %v13209_v12 }
0x166b   :  { %v7472_v30 = vmul.f32 0.3275911, %v7466_v15  ;;  %v7467_v63 = vand.u32 2147483647, %v7449_v44  ;;  %v7544_v38 = vsub.f32 0.0, %v7466_v15  ;;  %vm7455_vm5 = vcmp.ge.f32.partialorder %v7449_v44, 0.0 }
0x166c   :  { %v7461_v29 = vsel %vm7455_vm5, 1.0, %v13209_v12 }
0x166d   :  { %v7478_v21 = vadd.f32 1.0, %v7472_v30  ;;  %v7473_v40 = vmul.f32 0.3275911, %v7467_v63  ;;  %v7545_v26 = vsub.f32 0.0, %v7467_v63  ;;  %v7550_v7 = vmul.f32 %v7544_v38, %v7466_v15 }
0x166f   :  { %10030 = vrcp.f32 %v7478_v21  ;;  %v7479_v1 = vadd.f32 1.0, %v7473_v40  ;;  %v7551_v51 = vmul.f32 %v7545_v26, %v7467_v63  ;;  %v7556_v11 = vmul.f32 1.442695, %v7550_v7 }
0x1671   :  { %10032 = vrcp.f32 %v7479_v1  ;;  %v7558_v25 = vmul.f32 1.442695, %v7551_v51 }
0x1672   :  { %10034 = vpow2.f32 %v7556_v11 }
0x1673   :  { %10036 = vpow2.f32 %v7558_v25 }
0x1679   :  { %v10031_v27 = vpop.eup %10030 }
0x167a   :  { %v7490_v23 = vmul.f32 1.0614054, %v10031_v27 }
0x167b   :  { %v10033_v53 = vpop.eup %10032 }
0x167c   :  { %v7496_v9 = vadd.f32 -1.4531521, %v7490_v23  ;;  %v7491_v58 = vmul.f32 1.0614054, %v10033_v53  ;;  %v10035_v14 = vpop.eup %10034 }
0x167d   :  { %v10037_v46 = vpop.eup %10036 }
0x167e   :  { %v7502_v22 = vmul.f32 %v10031_v27, %v7496_v9  ;;  %v7497_v20 = vadd.f32 -1.4531521, %v7491_v58 }
0x1680   :  { %v7508_v50 = vadd.f32 1.4214138, %v7502_v22  ;;  %v7503_v60 = vmul.f32 %v10033_v53, %v7497_v20 }
0x1682   :  { %v7514_v18 = vmul.f32 %v10031_v27, %v7508_v50  ;;  %v7509_v0 = vadd.f32 1.4214138, %v7503_v60 }
0x1684   :  { %v7520_v52 = vadd.f32 -0.28449672, %v7514_v18  ;;  %v7515_v48 = vmul.f32 %v10033_v53, %v7509_v0 }
0x1686   :  { %v7526_v62 = vmul.f32 %v10031_v27, %v7520_v52  ;;  %v7521_v17 = vadd.f32 -0.28449672, %v7515_v48 }
0x1688   :  { %v7532_v34 = vadd.f32 0.2548296, %v7526_v62  ;;  %v7527_v59 = vmul.f32 %v10033_v53, %v7521_v17 }
0x168a   :  { %v7538_v4 = vmul.f32 %v10031_v27, %v7532_v34  ;;  %v7533_v24 = vadd.f32 0.2548296, %v7527_v59 }
0x168c   :  { %v7568_v57 = vmul.f32 %v10035_v14, %v7538_v4  ;;  %v7539_v41 = vmul.f32 %v10033_v53, %v7533_v24 }
0x168e   :  { %v7574_v61 = vsub.f32 1.0, %v7568_v57  ;;  %v7569_v55 = vmul.f32 %v10037_v46, %v7539_v41 }
0x1690   :  { %v7580_v43 = vmul.f32 %v7574_v61, %v7460_v39  ;;  %v7575_v28 = vsub.f32 1.0, %v7569_v55 }
0x1692   :  { %v7586_v54 = vadd.f32 1.0, %v7580_v43  ;;  %v7581_v32 = vmul.f32 %v7575_v28, %v7461_v29 }
0x1694   :  { %v7587_v36 = vadd.f32 1.0, %v7581_v32  ;;  %v7592_v47 = vmul.f32 %v7586_v54, %v7442_v35 }
0x1696   :  { %v7593_v37 = vmul.f32 %v7587_v36, %v7443_v33 }
0x1697   :  { %v7427_v19 = vpop.f32.mrb[168].mxu0 }
0x1698   :  { %v12915_v5 = vadd.f32 %v12908_v42, %v7427_v19  ;;  %v8972_v3 = vpop.f32.mrb[169].mxu0  ;;  %v7598_v8 = vpack.c.bf16 %v7593_v37, %v7592_v47 }
0x1699   :  { %v7430_v15 = vpop.f32.mrb[170].mxu0 }
0x169a   :  { %v12918_v44 = vmul.f32 0.70710677, %v12915_v5  ;;  %v12921_v30 = vadd.f32 %v12908_v42, %v7430_v15  ;;  %v8973_v63 = vpop.f32.mrb[171].mxu0  ;;  %8983 = vmatmul.mubr.bf16.vlgmr.msra.gmra.mrb[176].mxu1 %v7598_v8 }
0x169b   :  { %8986 = vmatprep.mubr.msk.bf16.mxu1 %vm10135_vm0, %v13202_v2 }
0x169c   :  { %v7468_v49 = vand.u32 2147483647, %v12918_v44  ;;  %v12925_v31 = vmul.f32 0.70710677, %v12921_v30  ;;  %vm7456_vm6 = vcmp.ge.f32.partialorder %v12918_v44, 0.0 }
0x169e   :  { %v7474_v21 = vmul.f32 0.3275911, %v7468_v49  ;;  %v7469_v40 = vand.u32 2147483647, %v12925_v31  ;;  %v7546_v50 = vsub.f32 0.0, %v7468_v49  ;;  %vm7457_vm7 = vcmp.ge.f32.partialorder %v12925_v31, 0.0 }
0x169f   :  { %v7435_v1 = vpop.f32.mrb[172].mxu0  ;;  %v7463_v44 = vsel %vm7457_vm7, 1.0, %v13209_v12 }
0x16a0   :  { %v7480_v38 = vadd.f32 1.0, %v7474_v21  ;;  %v7475_v26 = vmul.f32 0.3275911, %v7469_v40  ;;  %v8976_v27 = vpop.f32.mrb[173].mxu0  ;;  %v12931_v7 = vadd.f32 %v12908_v42, %v7435_v1  ;;  %v7547_v0 = vsub.f32 0.0, %v7469_v40 }
0x16a1   :  { %v7438_v23 = vpop.f32.mrb[174].mxu0  ;;  %v7552_v48 = vmul.f32 %v7546_v50, %v7468_v49 }
0x16a2   :  { %10038 = vrcp.f32 %v7480_v38  ;;  %v7481_v53 = vadd.f32 1.0, %v7475_v26  ;;  %v8977_v9 = vpop.f32.mrb[175].mxu0  ;;  %v12934_v51 = vmul.f32 0.70710677, %v12931_v7  ;;  %v12937_v11 = vadd.f32 %v12908_v42, %v7438_v23 }
0x16a3   :  { %v7553_v59 = vmul.f32 %v7547_v0, %v7469_v40  ;;  %v7560_v4 = vmul.f32 1.442695, %v7552_v48  ;;  %v7462_v48 = vsel %vm7456_vm6, 1.0, %v13209_v12 }
0x16a4   :  { %10040 = vrcp.f32 %v7481_v53  ;;  %v7470_v58 = vand.u32 2147483647, %v12934_v51  ;;  %v12941_v22 = vmul.f32 0.70710677, %v12937_v11  ;;  %vm7458_vm8 = vcmp.ge.f32.partialorder %v12934_v51, 0.0 }
0x16a5   :  { %v7562_v61 = vmul.f32 1.442695, %v7553_v59  ;;  %v7446_v51 = vmul.f32 0.5, %v12931_v7 }
0x16a6   :  { %v7476_v20 = vmul.f32 0.3275911, %v7470_v58  ;;  %v7471_v25 = vand.u32 2147483647, %v12941_v22  ;;  %v7548_v57 = vsub.f32 0.0, %v7470_v58  ;;  %vm7459_vm9 = vcmp.ge.f32.partialorder %v12941_v22, 0.0 }
0x16a8   :  { %v7482_v60 = vadd.f32 1.0, %v7476_v20  ;;  %v7477_v18 = vmul.f32 0.3275911, %v7471_v25  ;;  %v7549_v55 = vsub.f32 0.0, %v7471_v25  ;;  %v7554_v29 = vmul.f32 %v7548_v57, %v7470_v58 }
0x16aa   :  { %10042 = vrcp.f32 %v7482_v60  ;;  %v7483_v62 = vadd.f32 1.0, %v7477_v18  ;;  %v7555_v37 = vmul.f32 %v7549_v55, %v7471_v25  ;;  %v7564_v3 = vmul.f32 1.442695, %v7554_v29 }
0x16ac   :  { %v10039_v52 = vpop.eup %10038  ;;  %10044 = vrcp.f32 %v7483_v62  ;;  %v7566_v38 = vmul.f32 1.442695, %v7555_v37 }
0x16ad   :  { %v7492_v17 = vmul.f32 1.0614054, %v10039_v52  ;;  %10046 = vpow2.f32 %v7560_v4 }
0x16ae   :  { %v10041_v42 = vpop.eup %10040  ;;  %10048 = vpow2.f32 %v7562_v61 }
0x16af   :  { %v7498_v34 = vadd.f32 -1.4531521, %v7492_v17  ;;  %v7493_v14 = vmul.f32 1.0614054, %v10041_v42  ;;  %10050 = vpow2.f32 %v7564_v3 }
0x16b0   :  { %10052 = vpow2.f32 %v7566_v38 }
0x16b1   :  { %v7504_v24 = vmul.f32 %v10039_v52, %v7498_v34  ;;  %v7499_v41 = vadd.f32 -1.4531521, %v7493_v14 }
0x16b3   :  { %v7510_v46 = vadd.f32 1.4214138, %v7504_v24  ;;  %v7505_v39 = vmul.f32 %v10041_v42, %v7499_v41 }
0x16b4   :  { %v10043_v43 = vpop.eup %10042 }
0x16b5   :  { %v7516_v28 = vmul.f32 %v10039_v52, %v7510_v46  ;;  %v7511_v54 = vadd.f32 1.4214138, %v7505_v39  ;;  %v7494_v32 = vmul.f32 1.0614054, %v10043_v43  ;;  %v7444_v46 = vmul.f32 0.5, %v12915_v5 }
0x16b6   :  { %v10045_v33 = vpop.eup %10044  ;;  %v7445_v39 = vmul.f32 0.5, %v12921_v30 }
0x16b7   :  { %v7522_v35 = vadd.f32 -0.28449672, %v7516_v28  ;;  %v7517_v36 = vmul.f32 %v10041_v42, %v7511_v54  ;;  %v7500_v47 = vadd.f32 -1.4531521, %v7494_v32  ;;  %v7495_v8 = vmul.f32 1.0614054, %v10045_v33  ;;  %v10047_v23 = vpop.eup %10046 }
0x16b8   :  { %v10049_v60 = vpop.eup %10048 }
0x16b9   :  { %v7528_v19 = vmul.f32 %v10039_v52, %v7522_v35  ;;  %v7523_v15 = vadd.f32 -0.28449672, %v7517_v36  ;;  %v7506_v63 = vmul.f32 %v10043_v43, %v7500_v47  ;;  %v7501_v21 = vadd.f32 -1.4531521, %v7495_v8  ;;  %v10051_v41 = vpop.eup %10050 }
0x16ba   :  { %v10053_v29 = vpop.eup %10052  ;;  %v7464_v36 = vsel %vm7458_vm8, 1.0, %v13209_v12 }
0x16bb   :  { %v7534_v49 = vadd.f32 0.2548296, %v7528_v19  ;;  %v7529_v40 = vmul.f32 %v10041_v42, %v7523_v15  ;;  %v7512_v1 = vadd.f32 1.4214138, %v7506_v63  ;;  %v7507_v27 = vmul.f32 %v10045_v33, %v7501_v21 }
0x16bc   :  { %v7465_v19 = vsel %vm7459_vm9, 1.0, %v13209_v12 }
0x16bd   :  { %v7540_v26 = vmul.f32 %v10039_v52, %v7534_v49  ;;  %v7535_v53 = vadd.f32 0.2548296, %v7529_v40  ;;  %v7518_v9 = vmul.f32 %v10043_v43, %v7512_v1  ;;  %v7513_v20 = vadd.f32 1.4214138, %v7507_v27  ;;  %v8021_v49 = vld [vmem:[#allocation5 + $0xf] ss:$0 sm:$0xff] }
0x16bf   :  { %v7570_v58 = vmul.f32 %v10047_v23, %v7540_v26  ;;  %v7541_v50 = vmul.f32 %v10041_v42, %v7535_v53  ;;  %v7524_v25 = vadd.f32 -0.28449672, %v7518_v9  ;;  %v7519_v0 = vmul.f32 %v10045_v33, %v7513_v20 }
0x16c0   :  { %v13210_v9 = vlaneseq }
0x16c1   :  { %v7576_v18 = vsub.f32 1.0, %v7570_v58  ;;  %v7571_v52 = vmul.f32 %v10049_v60, %v7541_v50  ;;  %v7530_v62 = vmul.f32 %v10043_v43, %v7524_v25  ;;  %v7525_v34 = vadd.f32 -0.28449672, %v7519_v0 }
0x16c2   :  { %v49_v58 = vshrl.u32 %v13210_v9, 7 }
0x16c3   :  { %v7582_v17 = vmul.f32 %v7576_v18, %v7462_v48  ;;  %v7577_v59 = vsub.f32 1.0, %v7571_v52  ;;  %v7536_v4 = vadd.f32 0.2548296, %v7530_v62  ;;  %v7531_v14 = vmul.f32 %v10045_v33, %v7525_v34 }
0x16c4   :  { %v51_v20 = vadd.s32 16, %v49_v58 }
0x16c5   :  { %v7588_v24 = vadd.f32 1.0, %v7582_v17  ;;  %v7583_v42 = vmul.f32 %v7577_v59, %v7463_v44  ;;  %v7542_v57 = vmul.f32 %v10043_v43, %v7536_v4  ;;  %v7537_v61 = vadd.f32 0.2548296, %v7531_v14 }
0x16c7   :  { %v7589_v55 = vadd.f32 1.0, %v7583_v42  ;;  %v7572_v31 = vmul.f32 %v10051_v41, %v7542_v57  ;;  %v7543_v28 = vmul.f32 %v10045_v33, %v7537_v61  ;;  %v7594_v54 = vmul.f32 %v7588_v24, %v7444_v46 }
0x16c8   :  { %v7447_v33 = vmul.f32 0.5, %v12937_v11 }
0x16c9   :  { %v7595_v32 = vmul.f32 %v7589_v55, %v7445_v39  ;;  %v7578_v35 = vsub.f32 1.0, %v7572_v31  ;;  %v7573_v43 = vmul.f32 %v10053_v29, %v7543_v28 }
0x16cb   :  { %v7584_v47 = vmul.f32 %v7578_v35, %v7464_v36  ;;  %v7599_v37 = vpack.c.bf16 %v7595_v32, %v7594_v54  ;;  %v7579_v5 = vsub.f32 1.0, %v7573_v43 }
0x16cd   :  { %8987 = vmatmul.mubr.bf16.gmra.mrb[180].mxu1 %v7599_v37  ;;  %v7590_v30 = vadd.f32 1.0, %v7584_v47  ;;  %v7585_v3 = vmul.f32 %v7579_v5, %v7465_v19 }
0x16ce   :  { %8990 = vmatprep.mubr.msk.bf16.mxu1 %vm10135_vm0, %v13202_v2  ;;  %vm54_vm0 = vcmp.lt.s32.totalorder %v51_v20, 17  ;;  %v8024_v20 = vld [vmem:[#allocation5 + $0x60] ss:$0 sm:$0xff] }
0x16cf   :  { %v7591_v8 = vadd.f32 1.0, %v7585_v3  ;;  %v7596_v15 = vmul.f32 %v7590_v30, %v7446_v51  ;;  %v7835_v18 = vsel %vm54_vm0, 1.0, %v13202_v2 }
0x16d1   :  { %v7597_v63 = vmul.f32 %v7591_v8, %v7447_v33 }
0x16d3   :  { %v7600_v22 = vpack.c.bf16 %v7597_v63, %v7596_v15 }
0x16d5   :  { %8991 = vmatmul.mubr.bf16.gmra.mrb[184].mxu1 %v7600_v22 }
0x176d   :  { %v7647_v21 = vpop.f32.mrb[176].mxu1 }
0x176e   :  { %v7648_v40 = vadd.f32 %v8021_v49, %v7647_v21  ;;  %v8984_v1 = vpop.f32.mrb[177].mxu1 }
0x176f   :  { %v7650_v12 = vpop.f32.mrb[178].mxu1 }
0x1770   :  { %v7670_v38 = vadd.f32 %v7648_v40, %v12855_v56  ;;  %v7651_v26 = vadd.f32 %v8021_v49, %v7650_v12  ;;  %v8985_v27 = vpop.f32.mrb[179].mxu1  ;;  %v7706_v12 = vld [vmem:[#allocation5 + $0x40] sm:$0xff] }
0x1771   :  { %v7708_v27 = vld [vmem:[#allocation5 + $0x50] sm:$0xff] }
0x1772   :  { %v7671_v23 = vadd.f32 %v7651_v26, %v12858_v16  ;;  %v7682_v7 = vsel %vm203_vm2, %v7670_v38, 0.0  ;;  %v7707_v38 = vld [vmem:[#allocation5 + $0x48] sm:$0xff] }
0x1773   :  { %v7710_v26 = vpack.c.bf16 %v7707_v38, %v7706_v12 }
0x1774   :  { %v7683_v11 = vsel %vm203_vm2, %v7671_v23, 0.0  ;;  %v7709_v23 = vld [vmem:[#allocation5 + $0x58] sm:$0xff] }
0x1775   :  { %v7684_v53 = vadd.f32 %v7683_v11, %v7682_v7  ;;  %8995 = vmatpush3.bf16.msra.mxu0 %v7710_v26  ;;  %v7711_v7 = vpack.c.bf16 %v7709_v23, %v7708_v27 }
0x1776   :  { %8996 = vmatprep.subr.bf16.mxu0 %v13202_v2 }
0x1779   :  { %8997 = vmatpush3.bf16.msra.mxu0 %v7711_v7 }
0x17a0   :  { %v7655_v50 = vpop.f32.mrb[180].mxu1 }
0x17a1   :  { %v7656_v25 = vadd.f32 %v8021_v49, %v7655_v50  ;;  %v8988_v60 = vpop.f32.mrb[181].mxu1 }
0x17a2   :  { %v7658_v0 = vpop.f32.mrb[182].mxu1  ;;  %v8025_v60 = vld [vmem:[#allocation5 + $0x61] ss:$0 sm:$0xff] }
0x17a3   :  { %v7672_v56 = vadd.f32 %v7656_v25, %v12865_v13  ;;  %v8989_v48 = vpop.f32.mrb[183].mxu1  ;;  %v7659_v16 = vadd.f32 %v8021_v49, %v7658_v0 }
0x17a5   :  { %v7678_v52 = vmul.f32 %v7835_v18, %v7672_v56  ;;  %v7673_v4 = vadd.f32 %v7659_v16, %v12868_v10 }
0x17a7   :  { %v7685_v62 = vsel %vm203_vm2, %v7678_v52, 0.0  ;;  %v7693_v13 = vsel %vm203_vm2, %v7673_v4, 0.0 }
0x17a8   :  { %v7686_v17 = vadd.f32 %v7685_v62, %v7684_v53  ;;  %v7663_v34 = vpop.f32.mrb[184].mxu1 }
0x17a9   :  { %v7664_v44 = vadd.f32 %v8021_v49, %v7663_v34  ;;  %v8992_v14 = vpop.f32.mrb[185].mxu1 }
0x17aa   :  { %v7687_v59 = vrot.slane %v7686_v17, 4  ;;  %v7666_v24 = vpop.f32.mrb[186].mxu1 }
0x17ab   :  { %v7674_v42 = vadd.f32 %v7664_v44, %v12875_v45  ;;  %v7667_v57 = vadd.f32 %v8021_v49, %v7666_v24  ;;  %v8993_v41 = vpop.f32.mrb[187].mxu1  ;;  %v8026_v44 = vld [vmem:[#allocation5 + $0x62] ss:$0 sm:$0xff] }
0x17ac   :  { %v7688_v46 = vadd.f32 %v7687_v59, %v7686_v17 }
0x17ad   :  { %v7694_v61 = vsel %vm203_vm2, %v7674_v42, 0.0  ;;  %v7675_v39 = vadd.f32 %v7667_v57, %v12878_v6 }
0x17ae   :  { %v7695_v55 = vadd.f32 %v7694_v61, %v7693_v13  ;;  %v7689_v28 = vrot.slane %v7688_v46, 2 }
0x17af   :  { %v7681_v31 = vmul.f32 %v7835_v18, %v7675_v39 }
0x17b0   :  { %v7690_v32 = vadd.f32 %v7689_v28, %v7688_v46 }
0x17b1   :  { %v7696_v29 = vsel %vm203_vm2, %v7681_v31, 0.0 }
0x17b2   :  { %v7697_v10 = vadd.f32 %v7696_v29, %v7695_v55  ;;  %v7691_v45 = vrot.slane %v7690_v32, 1 }
0x17b4   :  { %v7698_v54 = vrot.slane %v7697_v10, 4  ;;  %v7692_v47 = vadd.f32 %v7691_v45, %v7690_v32 }
0x17b6   :  { %v7699_v35 = vadd.f32 %v7698_v54, %v7697_v10  ;;  %v7704_v19 = vmul.f32 0.05882353, %v7692_v47 }
0x17b8   :  { %v7700_v36 = vrot.slane %v7699_v35, 2 }
0x17ba   :  { %v7701_v43 = vadd.f32 %v7700_v36, %v7699_v35 }
0x17bc   :  { %v7702_v37 = vrot.slane %v7701_v43, 1 }
0x17be   :  { %v7703_v5 = vadd.f32 %v7702_v37, %v7701_v43 }
0x17c0   :  { %v7705_v30 = vmul.f32 0.05882353, %v7703_v5 }
0x17c2   :  { %v7718_v6 = vsel %vm7717_vm10, %v7705_v30, %v7704_v19 }
0x17c3   :  { %v7721_v3 = vsel %vm7720_vm11, %v7718_v6, 0.0 }
0x17c4   :  { %7722 = vadd.xlane.f32.xlu0 %v7721_v3 }
0x1851   :  { %v7723_v51 = vpop.xlane.xlu0 %7722 }
0x1852   :  { %v7724_v33 = vmul.f32 0.03125, %v7723_v51 }
0x1854   :  { %v7726_v8 = vrot.slane %v7724_v33, 1  ;;  %v7729_v15 = vsub.f32 %v7704_v19, %v7724_v33 }
0x1856   :  { %v7730_v63 = vsub.f32 %v7705_v30, %v7726_v8  ;;  %v7731_v49 = vmul.f32 %v7729_v15, %v7729_v15 }
0x1858   :  { %v7732_v22 = vmul.f32 %v7730_v63, %v7730_v63 }
0x185a   :  { %v7735_v21 = vrot.slane %v7732_v22, 7 }
0x185c   :  { %v7736_v40 = vsel %vm7717_vm10, %v7735_v21, %v7731_v49 }
0x185d   :  { %v7738_v1 = vsel %vm7720_vm11, %v7736_v40, 0.0 }
0x185e   :  { %7739 = vadd.xlane.f32.xlu1 %v7738_v1 }
0x18eb   :  { %v7740_v11 = vpop.xlane.xlu1 %7739 }
0x18ec   :  { %v7741_v53 = vmul.f32 0.03125, %v7740_v11 }
0x18ee   :  { %v7742_v9 = vadd.f32 1e-05, %v7741_v53 }
0x18f0   :  { %10054 = vrsqrt.f32 %v7742_v9 }
0x18fa   :  { %v10055_v58 = vpop.eup %10054 }
0x18fb   :  { %v7745_v50 = vrot.slane %v10055_v58, 1  ;;  %v7748_v25 = vmul.f32 %v10055_v58, %v7729_v15 }
0x18fd   :  { %v7749_v18 = vmul.f32 %v7745_v50, %v7730_v63  ;;  %v7754_v0 = vmul.f32 %v8024_v20, %v7748_v25 }
0x18ff   :  { %v7755_v56 = vmul.f32 %v8024_v20, %v7749_v18  ;;  %v7760_v48 = vadd.f32 %v8025_v60, %v7754_v0 }
0x1901   :  { %v7761_v52 = vadd.f32 %v8025_v60, %v7755_v56  ;;  %v7762_v16 = vpack.c.bf16 %v7760_v48, %v7760_v48 }
0x1903   :  { %v7763_v2 = vpack.c.bf16 %v7761_v52, %v7761_v52  ;;  %v7770_v17 = vunpack.c.l.b16 %v7762_v16 }
0x1905   :  { %v7771_v62 = vunpack.c.l.b16 %v7763_v2 }
0x1907   :  { %v7772_v34 = vrot.slane %v7771_v62, 7 }
0x1909   :  { %v7773_v59 = vsel %vm7717_vm10, %v7772_v34, %v7770_v17 }
0x190a   :  { %v7774_v4 = vpack.c.b16 %v7773_v59, %v7773_v59 }
0x190c   :  { %8999 = vmatmul.mubr.msk.bf16.vlgmr.msra.gmra.mrb[176].mxu0 %vm203_vm2, %v7774_v4 }
0x19df   :  { %v7812_v14 = vpop.f32.mrb[176].mxu0 }
0x19e0   :  { %v7813_v24 = vadd.f32 %v8026_v44, %v7812_v14  ;;  %v9000_v42 = vpop.f32.mrb[177].mxu0 }
0x19e1   :  { %v7815_v57 = vpop.f32.mrb[178].mxu0 }
0x19e2   :  { %7818 = vst [vmem:[#allocation7] sm:$0x3] %v7813_v24  ;;  %v9001_v41 = vpop.f32.mrb[179].mxu0 }
0x19e3   :  { %10111 = shalt.err (!%p10108_p6)
}
0x19e4   :  { %s10112_s14 = scalar_lea.hbm %s12992_s3, 32 }
0x19e5   :  { %p10113_p7 = scmp.ne.s32.totalorder %s12992_s3, %s10112_s14  ;;  %p10116_p8 = scmp.lt.u32.totalorder %s10112_s14, %s12992_s3 }
0x19e7   :  { %p10118_p9 = pnand %p10116_p8, %p10113_p7 }
0x19e9   :  { %10121 = shalt.err (!%p10118_p9)
}
0x19ea   :  { %7828 = dma.vmem_to_hbm [thread:$0]  %s7826_s9, 32, %s12992_s3, [#allocation4]  }
0x19eb   :  { %10126 = dma.done.wait [#allocation4], 32  }
0x19ec   :  { %10127 = vsyncadd [#allocation4], 4294967264 }
0x19ed   :  { %7832 = vsyncpa [#allocation3], 1 }
0x19ee   :  { %7833 = vsyncpa [#allocation6], 1 }
0x19ef   :  { %7834 = vsyncpa [#allocation4], 1 }

</bundles_post_ra>
